<compile_context>
chip_gen: v7x
topology: tpu7x:2x2x1
jax: 0.10.0
libtpu: 0.0.40
codegen_flags: <defaults>
</compile_context>

<pallas_src>
import jax
import jax.numpy as jnp
from jax.experimental import pallas as pl
from jax.experimental.pallas import tpu as pltpu


def _round_up(x, m):
    return ((x + m - 1) // m) * m


def _sigmoid(x):
    # Guaranteed single EUP (tanh) push instead of a possible exp+recip pair.
    return 0.5 * jnp.tanh(0.5 * x) + 0.5


def lstm_kernel(tok_ref,                                    # SMEM (B, T) int32
                emb_ref, w_ih_ref, b_ref,                   # VMEM (bf16/bf16/f32)
                w_hh_hbm, w_out_hbm,                        # HBM (pl.ANY)
                b_out_ref, h0_ref, c0_ref,                  # VMEM (f32)
                logits_ref, h_out_ref, c_out_ref,           # outputs (f32)
                onehot_ref, gx_ref, w_hh_vmem, w_out_vmem, dma_sem):
    B, T = tok_ref.shape
    Bp, H = h0_ref.shape
    VP = onehot_ref.shape[1]

    # Kick off the big weight DMAs first; the prologue below runs under them.
    w_hh_cp = pltpu.make_async_copy(w_hh_hbm, w_hh_vmem, dma_sem.at[0])
    w_out_cp = pltpu.make_async_copy(w_out_hbm, w_out_vmem, dma_sem.at[1])
    w_hh_cp.start()
    w_out_cp.start()

    # ---- Prologue (off the serial h-chain) --------------------------------
    # Embedding gather fused as a one-hot matmul: tokens are SMEM scalars,
    # one-hot rows are built via lane-iota compares + static single-row stores.
    lane_iota = jax.lax.broadcasted_iota(jnp.int32, (1, VP), 1)
    for t in range(T):
        for bb in range(Bp):
            src = min(bb, B - 1)            # padded batch rows reuse last row
            tok = tok_ref[src, t]
            onehot_ref[pl.ds(t * Bp + bb, 1), :] = (
                lane_iota == tok).astype(jnp.float32)

    # x = onehot @ emb (exact: one nonzero per row), then the hoisted input
    # projection (+ combined bias) for ALL timesteps, written to VMEM scratch
    # so no 256 KiB value stays live across the unrolled recurrence.
    x = jnp.dot(onehot_ref[...].astype(jnp.bfloat16), emb_ref[...],
                preferred_element_type=jnp.float32)
    gx_ref[...] = jnp.dot(x.astype(jnp.bfloat16), w_ih_ref[...],
                          preferred_element_type=jnp.float32) + b_ref[...]

    # ---- Recurrence (serial over T, fully unrolled) ------------------------
    w_hh_cp.wait()
    h = h0_ref[...]                          # (Bp, H) f32
    c = c0_ref[...]
    for t in range(T):
        # Only this (Bp, H) @ (H, 4H) bf16 matmul sits on the serial chain.
        # W_hh is read from its VMEM ref at every dot (no hoisted copy); gx is
        # re-loaded one 8-sublane slice per step.
        gates = gx_ref[pl.ds(t * Bp, Bp), :] + jnp.dot(
            h.astype(jnp.bfloat16), w_hh_vmem[...],
            preferred_element_type=jnp.float32)                # (Bp, 4H) f32
        i_g = _sigmoid(gates[:, 0 * H:1 * H])
        f_g = _sigmoid(gates[:, 1 * H:2 * H])
        g_g = jnp.tanh(gates[:, 2 * H:3 * H])
        o_g = _sigmoid(gates[:, 3 * H:4 * H])
        c = f_g * c + i_g * g_g
        h = o_g * jnp.tanh(c)

    # ---- Output projection on the last hidden state ------------------------
    w_out_cp.wait()
    logits_ref[...] = (jnp.dot(h.astype(jnp.bfloat16), w_out_vmem[...],
                               preferred_element_type=jnp.float32)
                       + b_out_ref[...])
    h_out_ref[...] = h
    c_out_ref[...] = c


def pack_params(params):
    """One-time packing: pad to TPU tiles and pre-cast matmul weights to bf16
    (f32 accumulation and f32 gate math stay inside the kernel)."""
    emb, w_ih, w_hh = params["emb"], params["w_ih"], params["w_hh"]
    b, w_out, b_out = params["b"], params["w_out"], params["b_out"]
    V, E = emb.shape
    H = w_hh.shape[0]
    VP = _round_up(max(V, 128), 128)
    emb_p = jnp.zeros((VP, E), jnp.bfloat16).at[:V].set(emb.astype(jnp.bfloat16))
    w_out_p = jnp.zeros((H, VP), jnp.bfloat16).at[:, :V].set(
        w_out.astype(jnp.bfloat16))
    return {
        "emb": emb_p,                           # (VP, E)  bf16, zero-padded rows
        "w_ih": w_ih.astype(jnp.bfloat16),      # (E, 4H)  bf16
        "w_hh": w_hh.astype(jnp.bfloat16),      # (H, 4H)  bf16
        "b": b.astype(jnp.float32),             # (1, 4H)  f32  (b_ih + b_hh)
        "w_out": w_out_p,                       # (H, VP)  bf16, zero-padded cols
        "b_out": b_out.astype(jnp.float32),     # (1, V)   f32  (unpadded; V from shape)
    }


def lstm_shakespeare_forward(seq_in, packed, state=None):
    """seq_in: (B, T) int token ids. Returns (logits (B, V), {'h1': (h, c)})."""
    emb_p, w_ih, w_hh = packed["emb"], packed["w_ih"], packed["w_hh"]
    b, w_out_p, b_out = packed["b"], packed["w_out"], packed["b_out"]

    B, T = seq_in.shape
    VP, E = emb_p.shape
    H, H4 = w_hh.shape
    V = b_out.shape[1]
    Bp = max(_round_up(B, 8), 8)

    tok = seq_in.astype(jnp.int32)
    b_out_pad = jnp.zeros((1, VP), jnp.float32).at[:, :V].set(b_out)

    if state is not None:
        h0 = state["h1"][0].reshape(B, H).astype(jnp.float32)
        c0 = state["h1"][1].reshape(B, H).astype(jnp.float32)
        h0p = jnp.zeros((Bp, H), jnp.float32).at[:B].set(h0)
        c0p = jnp.zeros((Bp, H), jnp.float32).at[:B].set(c0)
    else:
        h0p = jnp.zeros((Bp, H), jnp.float32)
        c0p = jnp.zeros((Bp, H), jnp.float32)

    grid_spec = pltpu.PrefetchScalarGridSpec(
        num_scalar_prefetch=1,           # token ids -> SMEM, read as scalars
        grid=(1,),
        in_specs=[
            pl.BlockSpec((VP, E), lambda i, *_: (0, 0)),    # emb (bf16)
            pl.BlockSpec((E, H4), lambda i, *_: (0, 0)),    # w_ih (bf16)
            pl.BlockSpec((1, H4), lambda i, *_: (0, 0)),    # combined bias (f32)
            pl.BlockSpec(memory_space=pl.ANY),              # w_hh -> manual DMA
            pl.BlockSpec(memory_space=pl.ANY),              # w_out -> manual DMA
            pl.BlockSpec((1, VP), lambda i, *_: (0, 0)),    # b_out (padded, f32)
            pl.BlockSpec((Bp, H), lambda i, *_: (0, 0)),    # h0
            pl.BlockSpec((Bp, H), lambda i, *_: (0, 0)),    # c0
        ],
        out_specs=[
            pl.BlockSpec((Bp, VP), lambda i, *_: (0, 0)),   # logits (padded)
            pl.BlockSpec((Bp, H), lambda i, *_: (0, 0)),    # h_T
            pl.BlockSpec((Bp, H), lambda i, *_: (0, 0)),    # c_T
        ],
        scratch_shapes=[
            pltpu.VMEM((T * Bp, VP), jnp.float32),          # one-hot tokens
            pltpu.VMEM((T * Bp, H4), jnp.float32),          # gx = x@W_ih + b
            pltpu.VMEM((H, H4), jnp.bfloat16),              # W_hh staged in VMEM
            pltpu.VMEM((H, VP), jnp.bfloat16),              # W_out staged in VMEM
            pltpu.SemaphoreType.DMA((2,)),
        ],
    )

    logits_p, h_fin, c_fin = pl.pallas_call(
        lstm_kernel,
        grid_spec=grid_spec,
        out_shape=(
            jax.ShapeDtypeStruct((Bp, VP), jnp.float32),
            jax.ShapeDtypeStruct((Bp, H), jnp.float32),
            jax.ShapeDtypeStruct((Bp, H), jnp.float32),
        ),
        compiler_params=pltpu.CompilerParams(
            dimension_semantics=("arbitrary",)),
    )(tok, emb_p, w_ih, b, w_hh, w_out_p, b_out_pad, h0p, c0p)

    # Padded batch rows (B..Bp) carry replicated-last-row dynamics; they are
    # sliced off here and must never be aliased or reduced over (review note).
    logits = logits_p[:B, :V]
    new_state = {"h1": (h_fin[:B].reshape(1, B, H),
                        c_fin[:B].reshape(1, B, H))}
    return logits, new_state


def make_params(key, n_vocab=80, embedding_dim=64, hidden_dim=256):
    """Deterministic synthetic params (PyTorch-style uniform init ranges)."""
    ks = jax.random.split(key, 7)
    bound = 1.0 / jnp.sqrt(hidden_dim)
    u = lambda k, shape, bnd: jax.random.uniform(k, shape, jnp.float32, -bnd, bnd)
    return {
        "emb":   jax.random.normal(ks[0], (n_vocab, embedding_dim), jnp.float32),
        "w_ih":  u(ks[1], (embedding_dim, 4 * hidden_dim), bound),
        "w_hh":  u(ks[2], (hidden_dim, 4 * hidden_dim), bound),
        "b":     u(ks[3], (1, 4 * hidden_dim), bound)
                 + u(ks[4], (1, 4 * hidden_dim), bound),   # b_ih + b_hh
        "w_out": u(ks[5], (hidden_dim, n_vocab), bound),
        "b_out": u(ks[6], (1, n_vocab), bound),
    }


def reference_forward(seq_in, params, state=None):
    """Pure-JAX f32 reference matching torch.nn.LSTM semantics."""
    emb = params["emb"][seq_in.T]                 # (T, B, E)
    B = seq_in.shape[0]
    H = params["w_hh"].shape[0]
    if state is not None:
        h = state["h1"][0].reshape(B, H)
        c = state["h1"][1].reshape(B, H)
    else:
        h = jnp.zeros((B, H), jnp.float32)
        c = jnp.zeros((B, H), jnp.float32)
    for t in range(emb.shape[0]):
        gates = emb[t] @ params["w_ih"] + h @ params["w_hh"] + params["b"]
        i = jax.nn.sigmoid(gates[:, 0 * H:1 * H])
        f = jax.nn.sigmoid(gates[:, 1 * H:2 * H])
        g = jnp.tanh(gates[:, 2 * H:3 * H])
        o = jax.nn.sigmoid(gates[:, 3 * H:4 * H])
        c = f * c + i * g
        h = o * jnp.tanh(c)
    logits = h @ params["w_out"] + params["b_out"]
    return logits, h, c


if __name__ == "__main__":
    key = jax.random.PRNGKey(0)
    k_param, k_tok = jax.random.split(key)

    n_vocab, embedding_dim, hidden_dim = 80, 64, 256
    batch, seq_len = 4, 8

    params = make_params(k_param, n_vocab, embedding_dim, hidden_dim)
    packed = pack_params(params)
    seq_in = jax.random.randint(k_tok, (batch, seq_len), 0, n_vocab, jnp.int32)

    forward = jax.jit(lstm_shakespeare_forward)

    # bf16 matmul inputs (f32 accumulate) -> compare against the f32 reference
    # with a loosened tolerance, per the review's correctness note.
    TOL = dict(atol=2e-2, rtol=2e-2)

    logits, new_state = forward(seq_in, packed)
    logits = jax.block_until_ready(logits)
    jax.block_until_ready(new_state)

    ref_logits, ref_h, ref_c = reference_forward(seq_in, params, state=None)
    assert jnp.allclose(logits, ref_logits, **TOL)
    assert jnp.allclose(new_state["h1"][0].reshape(batch, hidden_dim), ref_h, **TOL)
    assert jnp.allclose(new_state["h1"][1].reshape(batch, hidden_dim), ref_c, **TOL)

    # Explicit-state path (like passing `state` in PyTorch).
    logits2, state2 = forward(seq_in, packed, new_state)
    logits2 = jax.block_until_ready(logits2)
    jax.block_until_ready(state2)
    ref_logits2, ref_h2, ref_c2 = reference_forward(seq_in, params, state=new_state)
    assert jnp.allclose(logits2, ref_logits2, **TOL)
    assert jnp.allclose(state2["h1"][0].reshape(batch, hidden_dim), ref_h2, **TOL)
    assert jnp.allclose(state2["h1"][1].reshape(batch, hidden_dim), ref_c2, **TOL)

    print("KERNEL_OK")
</pallas_src>

<mosaic_0001>
module attributes {stable_mosaic.version = 11 : i64} {
  func.func @lstm_kernel(%arg0: i32, %arg1: memref<4x8xi32, #tpu.memory_space<smem>>, %arg2: memref<128x64xbf16, #tpu.memory_space<vmem>>, %arg3: memref<64x1024xbf16, #tpu.memory_space<vmem>>, %arg4: memref<1x1024xf32, #tpu.memory_space<vmem>>, %arg5: memref<256x1024xbf16, #tpu.memory_space<any>>, %arg6: memref<256x128xbf16, #tpu.memory_space<any>>, %arg7: memref<1x128xf32, #tpu.memory_space<vmem>>, %arg8: memref<8x256xf32, #tpu.memory_space<vmem>>, %arg9: memref<8x256xf32, #tpu.memory_space<vmem>>, %arg10: memref<8x128xf32, #tpu.memory_space<vmem>>, %arg11: memref<8x256xf32, #tpu.memory_space<vmem>>, %arg12: memref<8x256xf32, #tpu.memory_space<vmem>>, %arg13: memref<64x128xf32, #tpu.memory_space<vmem>>, %arg14: memref<64x1024xf32, #tpu.memory_space<vmem>>, %arg15: memref<256x1024xbf16, #tpu.memory_space<vmem>>, %arg16: memref<256x128xbf16, #tpu.memory_space<vmem>>, %arg17: memref<2x!tpu.dma_semaphore, #tpu.memory_space<semaphore_mem>>) attributes {dimension_semantics = [#tpu.dimension_semantics<arbitrary>], iteration_bounds = array<i64: 1>, scalar_prefetch = 1 : i64, scratch_operands = 5 : i64, tpu.core_type = #tpu.core_type<tc>, window_params = [{pipeline_mode = #tpu.pipeline_mode<synchronous>, transform_indices = @transform_0, window_bounds = array<i64: 128, 64>}, {pipeline_mode = #tpu.pipeline_mode<synchronous>, transform_indices = @transform_1, window_bounds = array<i64: 64, 1024>}, {pipeline_mode = #tpu.pipeline_mode<synchronous>, transform_indices = @transform_2, window_bounds = array<i64: 1, 1024>}, {}, {}, {pipeline_mode = #tpu.pipeline_mode<synchronous>, transform_indices = @transform_5, window_bounds = array<i64: 1, 128>}, {pipeline_mode = #tpu.pipeline_mode<synchronous>, transform_indices = @transform_6, window_bounds = array<i64: 8, 256>}, {pipeline_mode = #tpu.pipeline_mode<synchronous>, transform_indices = @transform_7, window_bounds = array<i64: 8, 256>}, {pipeline_mode = #tpu.pipeline_mode<synchronous>, transform_indices = @transform_8, window_bounds = array<i64: 8, 128>}, {pipeline_mode = #tpu.pipeline_mode<synchronous>, transform_indices = @transform_9, window_bounds = array<i64: 8, 256>}, {pipeline_mode = #tpu.pipeline_mode<synchronous>, transform_indices = @transform_10, window_bounds = array<i64: 8, 256>}]} {
    %c0_i32 = arith.constant 0 : i32
    %0 = tpu.memref_slice %arg17[%c0_i32] : memref<2x!tpu.dma_semaphore, #tpu.memory_space<semaphore_mem>> -> memref<1x!tpu.dma_semaphore, #tpu.memory_space<semaphore_mem>>
    %1 = tpu.memref_squeeze %0 : memref<1x!tpu.dma_semaphore, #tpu.memory_space<semaphore_mem>> -> memref<!tpu.dma_semaphore, #tpu.memory_space<semaphore_mem>>
    tpu.enqueue_dma source(%arg5 : memref<256x1024xbf16, #tpu.memory_space<any>>) target(%arg15 : memref<256x1024xbf16, #tpu.memory_space<vmem>>) target_semaphore(%1 : memref<!tpu.dma_semaphore, #tpu.memory_space<semaphore_mem>>)
    %c1_i32 = arith.constant 1 : i32
    %2 = tpu.memref_slice %arg17[%c1_i32] : memref<2x!tpu.dma_semaphore, #tpu.memory_space<semaphore_mem>> -> memref<1x!tpu.dma_semaphore, #tpu.memory_space<semaphore_mem>>
    %3 = tpu.memref_squeeze %2 : memref<1x!tpu.dma_semaphore, #tpu.memory_space<semaphore_mem>> -> memref<!tpu.dma_semaphore, #tpu.memory_space<semaphore_mem>>
    tpu.enqueue_dma source(%arg6 : memref<256x128xbf16, #tpu.memory_space<any>>) target(%arg16 : memref<256x128xbf16, #tpu.memory_space<vmem>>) target_semaphore(%3 : memref<!tpu.dma_semaphore, #tpu.memory_space<semaphore_mem>>)
    %4 = tpu.iota {dimensions = array<i32: 1>} : vector<1x128xi32>
    %c0 = arith.constant 0 : index
    %c0_0 = arith.constant 0 : index
    %5 = memref.load %arg1[%c0, %c0_0] : memref<4x8xi32, #tpu.memory_space<smem>>
    %6 = vector.broadcast %5 : i32 to vector<1x128xi32>
    %7 = arith.cmpi eq, %4, %6 : vector<1x128xi32>
    %8 = arith.extui %7 : vector<1x128xi1> to vector<1x128xi32>
    %9 = arith.sitofp %8 : vector<1x128xi32> to vector<1x128xf32>
    %c0_1 = arith.constant 0 : index
    %c0_2 = arith.constant 0 : index
    %10 = vector.load %arg13[%c0_1, %c0_2] : memref<64x128xf32, #tpu.memory_space<vmem>>, vector<1x128xf32>
    tpu.vector_store %arg13[%c0_1, %c0_2], %9 {strides = array<i32>} : memref<64x128xf32, #tpu.memory_space<vmem>>, vector<1x128xf32>,
    %c1 = arith.constant 1 : index
    %c0_3 = arith.constant 0 : index
    %11 = memref.load %arg1[%c1, %c0_3] : memref<4x8xi32, #tpu.memory_space<smem>>
    %12 = vector.broadcast %11 : i32 to vector<1x128xi32>
    %13 = arith.cmpi eq, %4, %12 : vector<1x128xi32>
    %14 = arith.extui %13 : vector<1x128xi1> to vector<1x128xi32>
    %15 = arith.sitofp %14 : vector<1x128xi32> to vector<1x128xf32>
    %c1_4 = arith.constant 1 : index
    %c0_5 = arith.constant 0 : index
    %16 = vector.load %arg13[%c1_4, %c0_5] : memref<64x128xf32, #tpu.memory_space<vmem>>, vector<1x128xf32>
    tpu.vector_store %arg13[%c1_4, %c0_5], %15 {strides = array<i32>} : memref<64x128xf32, #tpu.memory_space<vmem>>, vector<1x128xf32>,
    %c2 = arith.constant 2 : index
    %c0_6 = arith.constant 0 : index
    %17 = memref.load %arg1[%c2, %c0_6] : memref<4x8xi32, #tpu.memory_space<smem>>
    %18 = vector.broadcast %17 : i32 to vector<1x128xi32>
    %19 = arith.cmpi eq, %4, %18 : vector<1x128xi32>
    %20 = arith.extui %19 : vector<1x128xi1> to vector<1x128xi32>
    %21 = arith.sitofp %20 : vector<1x128xi32> to vector<1x128xf32>
    %c2_7 = arith.constant 2 : index
    %c0_8 = arith.constant 0 : index
    %22 = vector.load %arg13[%c2_7, %c0_8] : memref<64x128xf32, #tpu.memory_space<vmem>>, vector<1x128xf32>
    tpu.vector_store %arg13[%c2_7, %c0_8], %21 {strides = array<i32>} : memref<64x128xf32, #tpu.memory_space<vmem>>, vector<1x128xf32>,
    %c3 = arith.constant 3 : index
    %c0_9 = arith.constant 0 : index
    %23 = memref.load %arg1[%c3, %c0_9] : memref<4x8xi32, #tpu.memory_space<smem>>
    %24 = vector.broadcast %23 : i32 to vector<1x128xi32>
    %25 = arith.cmpi eq, %4, %24 : vector<1x128xi32>
    %26 = arith.extui %25 : vector<1x128xi1> to vector<1x128xi32>
    %27 = arith.sitofp %26 : vector<1x128xi32> to vector<1x128xf32>
    %c3_10 = arith.constant 3 : index
    %c0_11 = arith.constant 0 : index
    %28 = vector.load %arg13[%c3_10, %c0_11] : memref<64x128xf32, #tpu.memory_space<vmem>>, vector<1x128xf32>
    tpu.vector_store %arg13[%c3_10, %c0_11], %27 {strides = array<i32>} : memref<64x128xf32, #tpu.memory_space<vmem>>, vector<1x128xf32>,
    %c3_12 = arith.constant 3 : index
    %c0_13 = arith.constant 0 : index
    %29 = memref.load %arg1[%c3_12, %c0_13] : memref<4x8xi32, #tpu.memory_space<smem>>
    %30 = vector.broadcast %29 : i32 to vector<1x128xi32>
    %31 = arith.cmpi eq, %4, %30 : vector<1x128xi32>
    %32 = arith.extui %31 : vector<1x128xi1> to vector<1x128xi32>
    %33 = arith.sitofp %32 : vector<1x128xi32> to vector<1x128xf32>
    %c4 = arith.constant 4 : index
    %c0_14 = arith.constant 0 : index
    %34 = vector.load %arg13[%c4, %c0_14] : memref<64x128xf32, #tpu.memory_space<vmem>>, vector<1x128xf32>
    tpu.vector_store %arg13[%c4, %c0_14], %33 {strides = array<i32>} : memref<64x128xf32, #tpu.memory_space<vmem>>, vector<1x128xf32>,
    %c3_15 = arith.constant 3 : index
    %c0_16 = arith.constant 0 : index
    %35 = memref.load %arg1[%c3_15, %c0_16] : memref<4x8xi32, #tpu.memory_space<smem>>
    %36 = vector.broadcast %35 : i32 to vector<1x128xi32>
    %37 = arith.cmpi eq, %4, %36 : vector<1x128xi32>
    %38 = arith.extui %37 : vector<1x128xi1> to vector<1x128xi32>
    %39 = arith.sitofp %38 : vector<1x128xi32> to vector<1x128xf32>
    %c5 = arith.constant 5 : index
    %c0_17 = arith.constant 0 : index
    %40 = vector.load %arg13[%c5, %c0_17] : memref<64x128xf32, #tpu.memory_space<vmem>>, vector<1x128xf32>
    tpu.vector_store %arg13[%c5, %c0_17], %39 {strides = array<i32>} : memref<64x128xf32, #tpu.memory_space<vmem>>, vector<1x128xf32>,
    %c3_18 = arith.constant 3 : index
    %c0_19 = arith.constant 0 : index
    %41 = memref.load %arg1[%c3_18, %c0_19] : memref<4x8xi32, #tpu.memory_space<smem>>
    %42 = vector.broadcast %41 : i32 to vector<1x128xi32>
    %43 = arith.cmpi eq, %4, %42 : vector<1x128xi32>
    %44 = arith.extui %43 : vector<1x128xi1> to vector<1x128xi32>
    %45 = arith.sitofp %44 : vector<1x128xi32> to vector<1x128xf32>
    %c6 = arith.constant 6 : index
    %c0_20 = arith.constant 0 : index
    %46 = vector.load %arg13[%c6, %c0_20] : memref<64x128xf32, #tpu.memory_space<vmem>>, vector<1x128xf32>
    tpu.vector_store %arg13[%c6, %c0_20], %45 {strides = array<i32>} : memref<64x128xf32, #tpu.memory_space<vmem>>, vector<1x128xf32>,
    %c3_21 = arith.constant 3 : index
    %c0_22 = arith.constant 0 : index
    %47 = memref.load %arg1[%c3_21, %c0_22] : memref<4x8xi32, #tpu.memory_space<smem>>
    %48 = vector.broadcast %47 : i32 to vector<1x128xi32>
    %49 = arith.cmpi eq, %4, %48 : vector<1x128xi32>
    %50 = arith.extui %49 : vector<1x128xi1> to vector<1x128xi32>
    %51 = arith.sitofp %50 : vector<1x128xi32> to vector<1x128xf32>
    %c7 = arith.constant 7 : index
    %c0_23 = arith.constant 0 : index
    %52 = vector.load %arg13[%c7, %c0_23] : memref<64x128xf32, #tpu.memory_space<vmem>>, vector<1x128xf32>
    tpu.vector_store %arg13[%c7, %c0_23], %51 {strides = array<i32>} : memref<64x128xf32, #tpu.memory_space<vmem>>, vector<1x128xf32>,
    %c0_24 = arith.constant 0 : index
    %c1_25 = arith.constant 1 : index
    %53 = memref.load %arg1[%c0_24, %c1_25] : memref<4x8xi32, #tpu.memory_space<smem>>
    %54 = vector.broadcast %53 : i32 to vector<1x128xi32>
    %55 = arith.cmpi eq, %4, %54 : vector<1x128xi32>
    %56 = arith.extui %55 : vector<1x128xi1> to vector<1x128xi32>
    %57 = arith.sitofp %56 : vector<1x128xi32> to vector<1x128xf32>
    %c8 = arith.constant 8 : index
    %c0_26 = arith.constant 0 : index
    %58 = vector.load %arg13[%c8, %c0_26] : memref<64x128xf32, #tpu.memory_space<vmem>>, vector<1x128xf32>
    tpu.vector_store %arg13[%c8, %c0_26], %57 {strides = array<i32>} : memref<64x128xf32, #tpu.memory_space<vmem>>, vector<1x128xf32>,
    %c1_27 = arith.constant 1 : index
    %c1_28 = arith.constant 1 : index
    %59 = memref.load %arg1[%c1_27, %c1_28] : memref<4x8xi32, #tpu.memory_space<smem>>
    %60 = vector.broadcast %59 : i32 to vector<1x128xi32>
    %61 = arith.cmpi eq, %4, %60 : vector<1x128xi32>
    %62 = arith.extui %61 : vector<1x128xi1> to vector<1x128xi32>
    %63 = arith.sitofp %62 : vector<1x128xi32> to vector<1x128xf32>
    %c9 = arith.constant 9 : index
    %c0_29 = arith.constant 0 : index
    %64 = vector.load %arg13[%c9, %c0_29] : memref<64x128xf32, #tpu.memory_space<vmem>>, vector<1x128xf32>
    tpu.vector_store %arg13[%c9, %c0_29], %63 {strides = array<i32>} : memref<64x128xf32, #tpu.memory_space<vmem>>, vector<1x128xf32>,
    %c2_30 = arith.constant 2 : index
    %c1_31 = arith.constant 1 : index
    %65 = memref.load %arg1[%c2_30, %c1_31] : memref<4x8xi32, #tpu.memory_space<smem>>
    %66 = vector.broadcast %65 : i32 to vector<1x128xi32>
    %67 = arith.cmpi eq, %4, %66 : vector<1x128xi32>
    %68 = arith.extui %67 : vector<1x128xi1> to vector<1x128xi32>
    %69 = arith.sitofp %68 : vector<1x128xi32> to vector<1x128xf32>
    %c10 = arith.constant 10 : index
    %c0_32 = arith.constant 0 : index
    %70 = vector.load %arg13[%c10, %c0_32] : memref<64x128xf32, #tpu.memory_space<vmem>>, vector<1x128xf32>
    tpu.vector_store %arg13[%c10, %c0_32], %69 {strides = array<i32>} : memref<64x128xf32, #tpu.memory_space<vmem>>, vector<1x128xf32>,
    %c3_33 = arith.constant 3 : index
    %c1_34 = arith.constant 1 : index
    %71 = memref.load %arg1[%c3_33, %c1_34] : memref<4x8xi32, #tpu.memory_space<smem>>
    %72 = vector.broadcast %71 : i32 to vector<1x128xi32>
    %73 = arith.cmpi eq, %4, %72 : vector<1x128xi32>
    %74 = arith.extui %73 : vector<1x128xi1> to vector<1x128xi32>
    %75 = arith.sitofp %74 : vector<1x128xi32> to vector<1x128xf32>
    %c11 = arith.constant 11 : index
    %c0_35 = arith.constant 0 : index
    %76 = vector.load %arg13[%c11, %c0_35] : memref<64x128xf32, #tpu.memory_space<vmem>>, vector<1x128xf32>
    tpu.vector_store %arg13[%c11, %c0_35], %75 {strides = array<i32>} : memref<64x128xf32, #tpu.memory_space<vmem>>, vector<1x128xf32>,
    %c3_36 = arith.constant 3 : index
    %c1_37 = arith.constant 1 : index
    %77 = memref.load %arg1[%c3_36, %c1_37] : memref<4x8xi32, #tpu.memory_space<smem>>
    %78 = vector.broadcast %77 : i32 to vector<1x128xi32>
    %79 = arith.cmpi eq, %4, %78 : vector<1x128xi32>
    %80 = arith.extui %79 : vector<1x128xi1> to vector<1x128xi32>
    %81 = arith.sitofp %80 : vector<1x128xi32> to vector<1x128xf32>
    %c12 = arith.constant 12 : index
    %c0_38 = arith.constant 0 : index
    %82 = vector.load %arg13[%c12, %c0_38] : memref<64x128xf32, #tpu.memory_space<vmem>>, vector<1x128xf32>
    tpu.vector_store %arg13[%c12, %c0_38], %81 {strides = array<i32>} : memref<64x128xf32, #tpu.memory_space<vmem>>, vector<1x128xf32>,
    %c3_39 = arith.constant 3 : index
    %c1_40 = arith.constant 1 : index
    %83 = memref.load %arg1[%c3_39, %c1_40] : memref<4x8xi32, #tpu.memory_space<smem>>
    %84 = vector.broadcast %83 : i32 to vector<1x128xi32>
    %85 = arith.cmpi eq, %4, %84 : vector<1x128xi32>
    %86 = arith.extui %85 : vector<1x128xi1> to vector<1x128xi32>
    %87 = arith.sitofp %86 : vector<1x128xi32> to vector<1x128xf32>
    %c13 = arith.constant 13 : index
    %c0_41 = arith.constant 0 : index
    %88 = vector.load %arg13[%c13, %c0_41] : memref<64x128xf32, #tpu.memory_space<vmem>>, vector<1x128xf32>
    tpu.vector_store %arg13[%c13, %c0_41], %87 {strides = array<i32>} : memref<64x128xf32, #tpu.memory_space<vmem>>, vector<1x128xf32>,
    %c3_42 = arith.constant 3 : index
    %c1_43 = arith.constant 1 : index
    %89 = memref.load %arg1[%c3_42, %c1_43] : memref<4x8xi32, #tpu.memory_space<smem>>
    %90 = vector.broadcast %89 : i32 to vector<1x128xi32>
    %91 = arith.cmpi eq, %4, %90 : vector<1x128xi32>
    %92 = arith.extui %91 : vector<1x128xi1> to vector<1x128xi32>
    %93 = arith.sitofp %92 : vector<1x128xi32> to vector<1x128xf32>
    %c14 = arith.constant 14 : index
    %c0_44 = arith.constant 0 : index
    %94 = vector.load %arg13[%c14, %c0_44] : memref<64x128xf32, #tpu.memory_space<vmem>>, vector<1x128xf32>
    tpu.vector_store %arg13[%c14, %c0_44], %93 {strides = array<i32>} : memref<64x128xf32, #tpu.memory_space<vmem>>, vector<1x128xf32>,
    %c3_45 = arith.constant 3 : index
    %c1_46 = arith.constant 1 : index
    %95 = memref.load %arg1[%c3_45, %c1_46] : memref<4x8xi32, #tpu.memory_space<smem>>
    %96 = vector.broadcast %95 : i32 to vector<1x128xi32>
    %97 = arith.cmpi eq, %4, %96 : vector<1x128xi32>
    %98 = arith.extui %97 : vector<1x128xi1> to vector<1x128xi32>
    %99 = arith.sitofp %98 : vector<1x128xi32> to vector<1x128xf32>
    %c15 = arith.constant 15 : index
    %c0_47 = arith.constant 0 : index
    %100 = vector.load %arg13[%c15, %c0_47] : memref<64x128xf32, #tpu.memory_space<vmem>>, vector<1x128xf32>
    tpu.vector_store %arg13[%c15, %c0_47], %99 {strides = array<i32>} : memref<64x128xf32, #tpu.memory_space<vmem>>, vector<1x128xf32>,
    %c0_48 = arith.constant 0 : index
    %c2_49 = arith.constant 2 : index
    %101 = memref.load %arg1[%c0_48, %c2_49] : memref<4x8xi32, #tpu.memory_space<smem>>
    %102 = vector.broadcast %101 : i32 to vector<1x128xi32>
    %103 = arith.cmpi eq, %4, %102 : vector<1x128xi32>
    %104 = arith.extui %103 : vector<1x128xi1> to vector<1x128xi32>
    %105 = arith.sitofp %104 : vector<1x128xi32> to vector<1x128xf32>
    %c16 = arith.constant 16 : index
    %c0_50 = arith.constant 0 : index
    %106 = vector.load %arg13[%c16, %c0_50] : memref<64x128xf32, #tpu.memory_space<vmem>>, vector<1x128xf32>
    tpu.vector_store %arg13[%c16, %c0_50], %105 {strides = array<i32>} : memref<64x128xf32, #tpu.memory_space<vmem>>, vector<1x128xf32>,
    %c1_51 = arith.constant 1 : index
    %c2_52 = arith.constant 2 : index
    %107 = memref.load %arg1[%c1_51, %c2_52] : memref<4x8xi32, #tpu.memory_space<smem>>
    %108 = vector.broadcast %107 : i32 to vector<1x128xi32>
    %109 = arith.cmpi eq, %4, %108 : vector<1x128xi32>
    %110 = arith.extui %109 : vector<1x128xi1> to vector<1x128xi32>
    %111 = arith.sitofp %110 : vector<1x128xi32> to vector<1x128xf32>
    %c17 = arith.constant 17 : index
    %c0_53 = arith.constant 0 : index
    %112 = vector.load %arg13[%c17, %c0_53] : memref<64x128xf32, #tpu.memory_space<vmem>>, vector<1x128xf32>
    tpu.vector_store %arg13[%c17, %c0_53], %111 {strides = array<i32>} : memref<64x128xf32, #tpu.memory_space<vmem>>, vector<1x128xf32>,
    %c2_54 = arith.constant 2 : index
    %c2_55 = arith.constant 2 : index
    %113 = memref.load %arg1[%c2_54, %c2_55] : memref<4x8xi32, #tpu.memory_space<smem>>
    %114 = vector.broadcast %113 : i32 to vector<1x128xi32>
    %115 = arith.cmpi eq, %4, %114 : vector<1x128xi32>
    %116 = arith.extui %115 : vector<1x128xi1> to vector<1x128xi32>
    %117 = arith.sitofp %116 : vector<1x128xi32> to vector<1x128xf32>
    %c18 = arith.constant 18 : index
    %c0_56 = arith.constant 0 : index
    %118 = vector.load %arg13[%c18, %c0_56] : memref<64x128xf32, #tpu.memory_space<vmem>>, vector<1x128xf32>
    tpu.vector_store %arg13[%c18, %c0_56], %117 {strides = array<i32>} : memref<64x128xf32, #tpu.memory_space<vmem>>, vector<1x128xf32>,
    %c3_57 = arith.constant 3 : index
    %c2_58 = arith.constant 2 : index
    %119 = memref.load %arg1[%c3_57, %c2_58] : memref<4x8xi32, #tpu.memory_space<smem>>
    %120 = vector.broadcast %119 : i32 to vector<1x128xi32>
    %121 = arith.cmpi eq, %4, %120 : vector<1x128xi32>
    %122 = arith.extui %121 : vector<1x128xi1> to vector<1x128xi32>
    %123 = arith.sitofp %122 : vector<1x128xi32> to vector<1x128xf32>
    %c19 = arith.constant 19 : index
    %c0_59 = arith.constant 0 : index
    %124 = vector.load %arg13[%c19, %c0_59] : memref<64x128xf32, #tpu.memory_space<vmem>>, vector<1x128xf32>
    tpu.vector_store %arg13[%c19, %c0_59], %123 {strides = array<i32>} : memref<64x128xf32, #tpu.memory_space<vmem>>, vector<1x128xf32>,
    %c3_60 = arith.constant 3 : index
    %c2_61 = arith.constant 2 : index
    %125 = memref.load %arg1[%c3_60, %c2_61] : memref<4x8xi32, #tpu.memory_space<smem>>
    %126 = vector.broadcast %125 : i32 to vector<1x128xi32>
    %127 = arith.cmpi eq, %4, %126 : vector<1x128xi32>
    %128 = arith.extui %127 : vector<1x128xi1> to vector<1x128xi32>
    %129 = arith.sitofp %128 : vector<1x128xi32> to vector<1x128xf32>
    %c20 = arith.constant 20 : index
    %c0_62 = arith.constant 0 : index
    %130 = vector.load %arg13[%c20, %c0_62] : memref<64x128xf32, #tpu.memory_space<vmem>>, vector<1x128xf32>
    tpu.vector_store %arg13[%c20, %c0_62], %129 {strides = array<i32>} : memref<64x128xf32, #tpu.memory_space<vmem>>, vector<1x128xf32>,
    %c3_63 = arith.constant 3 : index
    %c2_64 = arith.constant 2 : index
    %131 = memref.load %arg1[%c3_63, %c2_64] : memref<4x8xi32, #tpu.memory_space<smem>>
    %132 = vector.broadcast %131 : i32 to vector<1x128xi32>
    %133 = arith.cmpi eq, %4, %132 : vector<1x128xi32>
    %134 = arith.extui %133 : vector<1x128xi1> to vector<1x128xi32>
    %135 = arith.sitofp %134 : vector<1x128xi32> to vector<1x128xf32>
    %c21 = arith.constant 21 : index
    %c0_65 = arith.constant 0 : index
    %136 = vector.load %arg13[%c21, %c0_65] : memref<64x128xf32, #tpu.memory_space<vmem>>, vector<1x128xf32>
    tpu.vector_store %arg13[%c21, %c0_65], %135 {strides = array<i32>} : memref<64x128xf32, #tpu.memory_space<vmem>>, vector<1x128xf32>,
    %c3_66 = arith.constant 3 : index
    %c2_67 = arith.constant 2 : index
    %137 = memref.load %arg1[%c3_66, %c2_67] : memref<4x8xi32, #tpu.memory_space<smem>>
    %138 = vector.broadcast %137 : i32 to vector<1x128xi32>
    %139 = arith.cmpi eq, %4, %138 : vector<1x128xi32>
    %140 = arith.extui %139 : vector<1x128xi1> to vector<1x128xi32>
    %141 = arith.sitofp %140 : vector<1x128xi32> to vector<1x128xf32>
    %c22 = arith.constant 22 : index
    %c0_68 = arith.constant 0 : index
    %142 = vector.load %arg13[%c22, %c0_68] : memref<64x128xf32, #tpu.memory_space<vmem>>, vector<1x128xf32>
    tpu.vector_store %arg13[%c22, %c0_68], %141 {strides = array<i32>} : memref<64x128xf32, #tpu.memory_space<vmem>>, vector<1x128xf32>,
    %c3_69 = arith.constant 3 : index
    %c2_70 = arith.constant 2 : index
    %143 = memref.load %arg1[%c3_69, %c2_70] : memref<4x8xi32, #tpu.memory_space<smem>>
    %144 = vector.broadcast %143 : i32 to vector<1x128xi32>
    %145 = arith.cmpi eq, %4, %144 : vector<1x128xi32>
    %146 = arith.extui %145 : vector<1x128xi1> to vector<1x128xi32>
    %147 = arith.sitofp %146 : vector<1x128xi32> to vector<1x128xf32>
    %c23 = arith.constant 23 : index
    %c0_71 = arith.constant 0 : index
    %148 = vector.load %arg13[%c23, %c0_71] : memref<64x128xf32, #tpu.memory_space<vmem>>, vector<1x128xf32>
    tpu.vector_store %arg13[%c23, %c0_71], %147 {strides = array<i32>} : memref<64x128xf32, #tpu.memory_space<vmem>>, vector<1x128xf32>,
    %c0_72 = arith.constant 0 : index
    %c3_73 = arith.constant 3 : index
    %149 = memref.load %arg1[%c0_72, %c3_73] : memref<4x8xi32, #tpu.memory_space<smem>>
    %150 = vector.broadcast %149 : i32 to vector<1x128xi32>
    %151 = arith.cmpi eq, %4, %150 : vector<1x128xi32>
    %152 = arith.extui %151 : vector<1x128xi1> to vector<1x128xi32>
    %153 = arith.sitofp %152 : vector<1x128xi32> to vector<1x128xf32>
    %c24 = arith.constant 24 : index
    %c0_74 = arith.constant 0 : index
    %154 = vector.load %arg13[%c24, %c0_74] : memref<64x128xf32, #tpu.memory_space<vmem>>, vector<1x128xf32>
    tpu.vector_store %arg13[%c24, %c0_74], %153 {strides = array<i32>} : memref<64x128xf32, #tpu.memory_space<vmem>>, vector<1x128xf32>,
    %c1_75 = arith.constant 1 : index
    %c3_76 = arith.constant 3 : index
    %155 = memref.load %arg1[%c1_75, %c3_76] : memref<4x8xi32, #tpu.memory_space<smem>>
    %156 = vector.broadcast %155 : i32 to vector<1x128xi32>
    %157 = arith.cmpi eq, %4, %156 : vector<1x128xi32>
    %158 = arith.extui %157 : vector<1x128xi1> to vector<1x128xi32>
    %159 = arith.sitofp %158 : vector<1x128xi32> to vector<1x128xf32>
    %c25 = arith.constant 25 : index
    %c0_77 = arith.constant 0 : index
    %160 = vector.load %arg13[%c25, %c0_77] : memref<64x128xf32, #tpu.memory_space<vmem>>, vector<1x128xf32>
    tpu.vector_store %arg13[%c25, %c0_77], %159 {strides = array<i32>} : memref<64x128xf32, #tpu.memory_space<vmem>>, vector<1x128xf32>,
    %c2_78 = arith.constant 2 : index
    %c3_79 = arith.constant 3 : index
    %161 = memref.load %arg1[%c2_78, %c3_79] : memref<4x8xi32, #tpu.memory_space<smem>>
    %162 = vector.broadcast %161 : i32 to vector<1x128xi32>
    %163 = arith.cmpi eq, %4, %162 : vector<1x128xi32>
    %164 = arith.extui %163 : vector<1x128xi1> to vector<1x128xi32>
    %165 = arith.sitofp %164 : vector<1x128xi32> to vector<1x128xf32>
    %c26 = arith.constant 26 : index
    %c0_80 = arith.constant 0 : index
    %166 = vector.load %arg13[%c26, %c0_80] : memref<64x128xf32, #tpu.memory_space<vmem>>, vector<1x128xf32>
    tpu.vector_store %arg13[%c26, %c0_80], %165 {strides = array<i32>} : memref<64x128xf32, #tpu.memory_space<vmem>>, vector<1x128xf32>,
    %c3_81 = arith.constant 3 : index
    %c3_82 = arith.constant 3 : index
    %167 = memref.load %arg1[%c3_81, %c3_82] : memref<4x8xi32, #tpu.memory_space<smem>>
    %168 = vector.broadcast %167 : i32 to vector<1x128xi32>
    %169 = arith.cmpi eq, %4, %168 : vector<1x128xi32>
    %170 = arith.extui %169 : vector<1x128xi1> to vector<1x128xi32>
    %171 = arith.sitofp %170 : vector<1x128xi32> to vector<1x128xf32>
    %c27 = arith.constant 27 : index
    %c0_83 = arith.constant 0 : index
    %172 = vector.load %arg13[%c27, %c0_83] : memref<64x128xf32, #tpu.memory_space<vmem>>, vector<1x128xf32>
    tpu.vector_store %arg13[%c27, %c0_83], %171 {strides = array<i32>} : memref<64x128xf32, #tpu.memory_space<vmem>>, vector<1x128xf32>,
    %c3_84 = arith.constant 3 : index
    %c3_85 = arith.constant 3 : index
    %173 = memref.load %arg1[%c3_84, %c3_85] : memref<4x8xi32, #tpu.memory_space<smem>>
    %174 = vector.broadcast %173 : i32 to vector<1x128xi32>
    %175 = arith.cmpi eq, %4, %174 : vector<1x128xi32>
    %176 = arith.extui %175 : vector<1x128xi1> to vector<1x128xi32>
    %177 = arith.sitofp %176 : vector<1x128xi32> to vector<1x128xf32>
    %c28 = arith.constant 28 : index
    %c0_86 = arith.constant 0 : index
    %178 = vector.load %arg13[%c28, %c0_86] : memref<64x128xf32, #tpu.memory_space<vmem>>, vector<1x128xf32>
    tpu.vector_store %arg13[%c28, %c0_86], %177 {strides = array<i32>} : memref<64x128xf32, #tpu.memory_space<vmem>>, vector<1x128xf32>,
    %c3_87 = arith.constant 3 : index
    %c3_88 = arith.constant 3 : index
    %179 = memref.load %arg1[%c3_87, %c3_88] : memref<4x8xi32, #tpu.memory_space<smem>>
    %180 = vector.broadcast %179 : i32 to vector<1x128xi32>
    %181 = arith.cmpi eq, %4, %180 : vector<1x128xi32>
    %182 = arith.extui %181 : vector<1x128xi1> to vector<1x128xi32>
    %183 = arith.sitofp %182 : vector<1x128xi32> to vector<1x128xf32>
    %c29 = arith.constant 29 : index
    %c0_89 = arith.constant 0 : index
    %184 = vector.load %arg13[%c29, %c0_89] : memref<64x128xf32, #tpu.memory_space<vmem>>, vector<1x128xf32>
    tpu.vector_store %arg13[%c29, %c0_89], %183 {strides = array<i32>} : memref<64x128xf32, #tpu.memory_space<vmem>>, vector<1x128xf32>,
    %c3_90 = arith.constant 3 : index
    %c3_91 = arith.constant 3 : index
    %185 = memref.load %arg1[%c3_90, %c3_91] : memref<4x8xi32, #tpu.memory_space<smem>>
    %186 = vector.broadcast %185 : i32 to vector<1x128xi32>
    %187 = arith.cmpi eq, %4, %186 : vector<1x128xi32>
    %188 = arith.extui %187 : vector<1x128xi1> to vector<1x128xi32>
    %189 = arith.sitofp %188 : vector<1x128xi32> to vector<1x128xf32>
    %c30 = arith.constant 30 : index
    %c0_92 = arith.constant 0 : index
    %190 = vector.load %arg13[%c30, %c0_92] : memref<64x128xf32, #tpu.memory_space<vmem>>, vector<1x128xf32>
    tpu.vector_store %arg13[%c30, %c0_92], %189 {strides = array<i32>} : memref<64x128xf32, #tpu.memory_space<vmem>>, vector<1x128xf32>,
    %c3_93 = arith.constant 3 : index
    %c3_94 = arith.constant 3 : index
    %191 = memref.load %arg1[%c3_93, %c3_94] : memref<4x8xi32, #tpu.memory_space<smem>>
    %192 = vector.broadcast %191 : i32 to vector<1x128xi32>
    %193 = arith.cmpi eq, %4, %192 : vector<1x128xi32>
    %194 = arith.extui %193 : vector<1x128xi1> to vector<1x128xi32>
    %195 = arith.sitofp %194 : vector<1x128xi32> to vector<1x128xf32>
    %c31 = arith.constant 31 : index
    %c0_95 = arith.constant 0 : index
    %196 = vector.load %arg13[%c31, %c0_95] : memref<64x128xf32, #tpu.memory_space<vmem>>, vector<1x128xf32>
    tpu.vector_store %arg13[%c31, %c0_95], %195 {strides = array<i32>} : memref<64x128xf32, #tpu.memory_space<vmem>>, vector<1x128xf32>,
    %c0_96 = arith.constant 0 : index
    %c4_97 = arith.constant 4 : index
    %197 = memref.load %arg1[%c0_96, %c4_97] : memref<4x8xi32, #tpu.memory_space<smem>>
    %198 = vector.broadcast %197 : i32 to vector<1x128xi32>
    %199 = arith.cmpi eq, %4, %198 : vector<1x128xi32>
    %200 = arith.extui %199 : vector<1x128xi1> to vector<1x128xi32>
    %201 = arith.sitofp %200 : vector<1x128xi32> to vector<1x128xf32>
    %c32 = arith.constant 32 : index
    %c0_98 = arith.constant 0 : index
    %202 = vector.load %arg13[%c32, %c0_98] : memref<64x128xf32, #tpu.memory_space<vmem>>, vector<1x128xf32>
    tpu.vector_store %arg13[%c32, %c0_98], %201 {strides = array<i32>} : memref<64x128xf32, #tpu.memory_space<vmem>>, vector<1x128xf32>,
    %c1_99 = arith.constant 1 : index
    %c4_100 = arith.constant 4 : index
    %203 = memref.load %arg1[%c1_99, %c4_100] : memref<4x8xi32, #tpu.memory_space<smem>>
    %204 = vector.broadcast %203 : i32 to vector<1x128xi32>
    %205 = arith.cmpi eq, %4, %204 : vector<1x128xi32>
    %206 = arith.extui %205 : vector<1x128xi1> to vector<1x128xi32>
    %207 = arith.sitofp %206 : vector<1x128xi32> to vector<1x128xf32>
    %c33 = arith.constant 33 : index
    %c0_101 = arith.constant 0 : index
    %208 = vector.load %arg13[%c33, %c0_101] : memref<64x128xf32, #tpu.memory_space<vmem>>, vector<1x128xf32>
    tpu.vector_store %arg13[%c33, %c0_101], %207 {strides = array<i32>} : memref<64x128xf32, #tpu.memory_space<vmem>>, vector<1x128xf32>,
    %c2_102 = arith.constant 2 : index
    %c4_103 = arith.constant 4 : index
    %209 = memref.load %arg1[%c2_102, %c4_103] : memref<4x8xi32, #tpu.memory_space<smem>>
    %210 = vector.broadcast %209 : i32 to vector<1x128xi32>
    %211 = arith.cmpi eq, %4, %210 : vector<1x128xi32>
    %212 = arith.extui %211 : vector<1x128xi1> to vector<1x128xi32>
    %213 = arith.sitofp %212 : vector<1x128xi32> to vector<1x128xf32>
    %c34 = arith.constant 34 : index
    %c0_104 = arith.constant 0 : index
    %214 = vector.load %arg13[%c34, %c0_104] : memref<64x128xf32, #tpu.memory_space<vmem>>, vector<1x128xf32>
    tpu.vector_store %arg13[%c34, %c0_104], %213 {strides = array<i32>} : memref<64x128xf32, #tpu.memory_space<vmem>>, vector<1x128xf32>,
    %c3_105 = arith.constant 3 : index
    %c4_106 = arith.constant 4 : index
    %215 = memref.load %arg1[%c3_105, %c4_106] : memref<4x8xi32, #tpu.memory_space<smem>>
    %216 = vector.broadcast %215 : i32 to vector<1x128xi32>
    %217 = arith.cmpi eq, %4, %216 : vector<1x128xi32>
    %218 = arith.extui %217 : vector<1x128xi1> to vector<1x128xi32>
    %219 = arith.sitofp %218 : vector<1x128xi32> to vector<1x128xf32>
    %c35 = arith.constant 35 : index
    %c0_107 = arith.constant 0 : index
    %220 = vector.load %arg13[%c35, %c0_107] : memref<64x128xf32, #tpu.memory_space<vmem>>, vector<1x128xf32>
    tpu.vector_store %arg13[%c35, %c0_107], %219 {strides = array<i32>} : memref<64x128xf32, #tpu.memory_space<vmem>>, vector<1x128xf32>,
    %c3_108 = arith.constant 3 : index
    %c4_109 = arith.constant 4 : index
    %221 = memref.load %arg1[%c3_108, %c4_109] : memref<4x8xi32, #tpu.memory_space<smem>>
    %222 = vector.broadcast %221 : i32 to vector<1x128xi32>
    %223 = arith.cmpi eq, %4, %222 : vector<1x128xi32>
    %224 = arith.extui %223 : vector<1x128xi1> to vector<1x128xi32>
    %225 = arith.sitofp %224 : vector<1x128xi32> to vector<1x128xf32>
    %c36 = arith.constant 36 : index
    %c0_110 = arith.constant 0 : index
    %226 = vector.load %arg13[%c36, %c0_110] : memref<64x128xf32, #tpu.memory_space<vmem>>, vector<1x128xf32>
    tpu.vector_store %arg13[%c36, %c0_110], %225 {strides = array<i32>} : memref<64x128xf32, #tpu.memory_space<vmem>>, vector<1x128xf32>,
    %c3_111 = arith.constant 3 : index
    %c4_112 = arith.constant 4 : index
    %227 = memref.load %arg1[%c3_111, %c4_112] : memref<4x8xi32, #tpu.memory_space<smem>>
    %228 = vector.broadcast %227 : i32 to vector<1x128xi32>
    %229 = arith.cmpi eq, %4, %228 : vector<1x128xi32>
    %230 = arith.extui %229 : vector<1x128xi1> to vector<1x128xi32>
    %231 = arith.sitofp %230 : vector<1x128xi32> to vector<1x128xf32>
    %c37 = arith.constant 37 : index
    %c0_113 = arith.constant 0 : index
    %232 = vector.load %arg13[%c37, %c0_113] : memref<64x128xf32, #tpu.memory_space<vmem>>, vector<1x128xf32>
    tpu.vector_store %arg13[%c37, %c0_113], %231 {strides = array<i32>} : memref<64x128xf32, #tpu.memory_space<vmem>>, vector<1x128xf32>,
    %c3_114 = arith.constant 3 : index
    %c4_115 = arith.constant 4 : index
    %233 = memref.load %arg1[%c3_114, %c4_115] : memref<4x8xi32, #tpu.memory_space<smem>>
    %234 = vector.broadcast %233 : i32 to vector<1x128xi32>
    %235 = arith.cmpi eq, %4, %234 : vector<1x128xi32>
    %236 = arith.extui %235 : vector<1x128xi1> to vector<1x128xi32>
    %237 = arith.sitofp %236 : vector<1x128xi32> to vector<1x128xf32>
    %c38 = arith.constant 38 : index
    %c0_116 = arith.constant 0 : index
    %238 = vector.load %arg13[%c38, %c0_116] : memref<64x128xf32, #tpu.memory_space<vmem>>, vector<1x128xf32>
    tpu.vector_store %arg13[%c38, %c0_116], %237 {strides = array<i32>} : memref<64x128xf32, #tpu.memory_space<vmem>>, vector<1x128xf32>,
    %c3_117 = arith.constant 3 : index
    %c4_118 = arith.constant 4 : index
    %239 = memref.load %arg1[%c3_117, %c4_118] : memref<4x8xi32, #tpu.memory_space<smem>>
    %240 = vector.broadcast %239 : i32 to vector<1x128xi32>
    %241 = arith.cmpi eq, %4, %240 : vector<1x128xi32>
    %242 = arith.extui %241 : vector<1x128xi1> to vector<1x128xi32>
    %243 = arith.sitofp %242 : vector<1x128xi32> to vector<1x128xf32>
    %c39 = arith.constant 39 : index
    %c0_119 = arith.constant 0 : index
    %244 = vector.load %arg13[%c39, %c0_119] : memref<64x128xf32, #tpu.memory_space<vmem>>, vector<1x128xf32>
    tpu.vector_store %arg13[%c39, %c0_119], %243 {strides = array<i32>} : memref<64x128xf32, #tpu.memory_space<vmem>>, vector<1x128xf32>,
    %c0_120 = arith.constant 0 : index
    %c5_121 = arith.constant 5 : index
    %245 = memref.load %arg1[%c0_120, %c5_121] : memref<4x8xi32, #tpu.memory_space<smem>>
    %246 = vector.broadcast %245 : i32 to vector<1x128xi32>
    %247 = arith.cmpi eq, %4, %246 : vector<1x128xi32>
    %248 = arith.extui %247 : vector<1x128xi1> to vector<1x128xi32>
    %249 = arith.sitofp %248 : vector<1x128xi32> to vector<1x128xf32>
    %c40 = arith.constant 40 : index
    %c0_122 = arith.constant 0 : index
    %250 = vector.load %arg13[%c40, %c0_122] : memref<64x128xf32, #tpu.memory_space<vmem>>, vector<1x128xf32>
    tpu.vector_store %arg13[%c40, %c0_122], %249 {strides = array<i32>} : memref<64x128xf32, #tpu.memory_space<vmem>>, vector<1x128xf32>,
    %c1_123 = arith.constant 1 : index
    %c5_124 = arith.constant 5 : index
    %251 = memref.load %arg1[%c1_123, %c5_124] : memref<4x8xi32, #tpu.memory_space<smem>>
    %252 = vector.broadcast %251 : i32 to vector<1x128xi32>
    %253 = arith.cmpi eq, %4, %252 : vector<1x128xi32>
    %254 = arith.extui %253 : vector<1x128xi1> to vector<1x128xi32>
    %255 = arith.sitofp %254 : vector<1x128xi32> to vector<1x128xf32>
    %c41 = arith.constant 41 : index
    %c0_125 = arith.constant 0 : index
    %256 = vector.load %arg13[%c41, %c0_125] : memref<64x128xf32, #tpu.memory_space<vmem>>, vector<1x128xf32>
    tpu.vector_store %arg13[%c41, %c0_125], %255 {strides = array<i32>} : memref<64x128xf32, #tpu.memory_space<vmem>>, vector<1x128xf32>,
    %c2_126 = arith.constant 2 : index
    %c5_127 = arith.constant 5 : index
    %257 = memref.load %arg1[%c2_126, %c5_127] : memref<4x8xi32, #tpu.memory_space<smem>>
    %258 = vector.broadcast %257 : i32 to vector<1x128xi32>
    %259 = arith.cmpi eq, %4, %258 : vector<1x128xi32>
    %260 = arith.extui %259 : vector<1x128xi1> to vector<1x128xi32>
    %261 = arith.sitofp %260 : vector<1x128xi32> to vector<1x128xf32>
    %c42 = arith.constant 42 : index
    %c0_128 = arith.constant 0 : index
    %262 = vector.load %arg13[%c42, %c0_128] : memref<64x128xf32, #tpu.memory_space<vmem>>, vector<1x128xf32>
    tpu.vector_store %arg13[%c42, %c0_128], %261 {strides = array<i32>} : memref<64x128xf32, #tpu.memory_space<vmem>>, vector<1x128xf32>,
    %c3_129 = arith.constant 3 : index
    %c5_130 = arith.constant 5 : index
    %263 = memref.load %arg1[%c3_129, %c5_130] : memref<4x8xi32, #tpu.memory_space<smem>>
    %264 = vector.broadcast %263 : i32 to vector<1x128xi32>
    %265 = arith.cmpi eq, %4, %264 : vector<1x128xi32>
    %266 = arith.extui %265 : vector<1x128xi1> to vector<1x128xi32>
    %267 = arith.sitofp %266 : vector<1x128xi32> to vector<1x128xf32>
    %c43 = arith.constant 43 : index
    %c0_131 = arith.constant 0 : index
    %268 = vector.load %arg13[%c43, %c0_131] : memref<64x128xf32, #tpu.memory_space<vmem>>, vector<1x128xf32>
    tpu.vector_store %arg13[%c43, %c0_131], %267 {strides = array<i32>} : memref<64x128xf32, #tpu.memory_space<vmem>>, vector<1x128xf32>,
    %c3_132 = arith.constant 3 : index
    %c5_133 = arith.constant 5 : index
    %269 = memref.load %arg1[%c3_132, %c5_133] : memref<4x8xi32, #tpu.memory_space<smem>>
    %270 = vector.broadcast %269 : i32 to vector<1x128xi32>
    %271 = arith.cmpi eq, %4, %270 : vector<1x128xi32>
    %272 = arith.extui %271 : vector<1x128xi1> to vector<1x128xi32>
    %273 = arith.sitofp %272 : vector<1x128xi32> to vector<1x128xf32>
    %c44 = arith.constant 44 : index
    %c0_134 = arith.constant 0 : index
    %274 = vector.load %arg13[%c44, %c0_134] : memref<64x128xf32, #tpu.memory_space<vmem>>, vector<1x128xf32>
    tpu.vector_store %arg13[%c44, %c0_134], %273 {strides = array<i32>} : memref<64x128xf32, #tpu.memory_space<vmem>>, vector<1x128xf32>,
    %c3_135 = arith.constant 3 : index
    %c5_136 = arith.constant 5 : index
    %275 = memref.load %arg1[%c3_135, %c5_136] : memref<4x8xi32, #tpu.memory_space<smem>>
    %276 = vector.broadcast %275 : i32 to vector<1x128xi32>
    %277 = arith.cmpi eq, %4, %276 : vector<1x128xi32>
    %278 = arith.extui %277 : vector<1x128xi1> to vector<1x128xi32>
    %279 = arith.sitofp %278 : vector<1x128xi32> to vector<1x128xf32>
    %c45 = arith.constant 45 : index
    %c0_137 = arith.constant 0 : index
    %280 = vector.load %arg13[%c45, %c0_137] : memref<64x128xf32, #tpu.memory_space<vmem>>, vector<1x128xf32>
    tpu.vector_store %arg13[%c45, %c0_137], %279 {strides = array<i32>} : memref<64x128xf32, #tpu.memory_space<vmem>>, vector<1x128xf32>,
    %c3_138 = arith.constant 3 : index
    %c5_139 = arith.constant 5 : index
    %281 = memref.load %arg1[%c3_138, %c5_139] : memref<4x8xi32, #tpu.memory_space<smem>>
    %282 = vector.broadcast %281 : i32 to vector<1x128xi32>
    %283 = arith.cmpi eq, %4, %282 : vector<1x128xi32>
    %284 = arith.extui %283 : vector<1x128xi1> to vector<1x128xi32>
    %285 = arith.sitofp %284 : vector<1x128xi32> to vector<1x128xf32>
    %c46 = arith.constant 46 : index
    %c0_140 = arith.constant 0 : index
    %286 = vector.load %arg13[%c46, %c0_140] : memref<64x128xf32, #tpu.memory_space<vmem>>, vector<1x128xf32>
    tpu.vector_store %arg13[%c46, %c0_140], %285 {strides = array<i32>} : memref<64x128xf32, #tpu.memory_space<vmem>>, vector<1x128xf32>,
    %c3_141 = arith.constant 3 : index
    %c5_142 = arith.constant 5 : index
    %287 = memref.load %arg1[%c3_141, %c5_142] : memref<4x8xi32, #tpu.memory_space<smem>>
    %288 = vector.broadcast %287 : i32 to vector<1x128xi32>
    %289 = arith.cmpi eq, %4, %288 : vector<1x128xi32>
    %290 = arith.extui %289 : vector<1x128xi1> to vector<1x128xi32>
    %291 = arith.sitofp %290 : vector<1x128xi32> to vector<1x128xf32>
    %c47 = arith.constant 47 : index
    %c0_143 = arith.constant 0 : index
    %292 = vector.load %arg13[%c47, %c0_143] : memref<64x128xf32, #tpu.memory_space<vmem>>, vector<1x128xf32>
    tpu.vector_store %arg13[%c47, %c0_143], %291 {strides = array<i32>} : memref<64x128xf32, #tpu.memory_space<vmem>>, vector<1x128xf32>,
    %c0_144 = arith.constant 0 : index
    %c6_145 = arith.constant 6 : index
    %293 = memref.load %arg1[%c0_144, %c6_145] : memref<4x8xi32, #tpu.memory_space<smem>>
    %294 = vector.broadcast %293 : i32 to vector<1x128xi32>
    %295 = arith.cmpi eq, %4, %294 : vector<1x128xi32>
    %296 = arith.extui %295 : vector<1x128xi1> to vector<1x128xi32>
    %297 = arith.sitofp %296 : vector<1x128xi32> to vector<1x128xf32>
    %c48 = arith.constant 48 : index
    %c0_146 = arith.constant 0 : index
    %298 = vector.load %arg13[%c48, %c0_146] : memref<64x128xf32, #tpu.memory_space<vmem>>, vector<1x128xf32>
    tpu.vector_store %arg13[%c48, %c0_146], %297 {strides = array<i32>} : memref<64x128xf32, #tpu.memory_space<vmem>>, vector<1x128xf32>,
    %c1_147 = arith.constant 1 : index
    %c6_148 = arith.constant 6 : index
    %299 = memref.load %arg1[%c1_147, %c6_148] : memref<4x8xi32, #tpu.memory_space<smem>>
    %300 = vector.broadcast %299 : i32 to vector<1x128xi32>
    %301 = arith.cmpi eq, %4, %300 : vector<1x128xi32>
    %302 = arith.extui %301 : vector<1x128xi1> to vector<1x128xi32>
    %303 = arith.sitofp %302 : vector<1x128xi32> to vector<1x128xf32>
    %c49 = arith.constant 49 : index
    %c0_149 = arith.constant 0 : index
    %304 = vector.load %arg13[%c49, %c0_149] : memref<64x128xf32, #tpu.memory_space<vmem>>, vector<1x128xf32>
    tpu.vector_store %arg13[%c49, %c0_149], %303 {strides = array<i32>} : memref<64x128xf32, #tpu.memory_space<vmem>>, vector<1x128xf32>,
    %c2_150 = arith.constant 2 : index
    %c6_151 = arith.constant 6 : index
    %305 = memref.load %arg1[%c2_150, %c6_151] : memref<4x8xi32, #tpu.memory_space<smem>>
    %306 = vector.broadcast %305 : i32 to vector<1x128xi32>
    %307 = arith.cmpi eq, %4, %306 : vector<1x128xi32>
    %308 = arith.extui %307 : vector<1x128xi1> to vector<1x128xi32>
    %309 = arith.sitofp %308 : vector<1x128xi32> to vector<1x128xf32>
    %c50 = arith.constant 50 : index
    %c0_152 = arith.constant 0 : index
    %310 = vector.load %arg13[%c50, %c0_152] : memref<64x128xf32, #tpu.memory_space<vmem>>, vector<1x128xf32>
    tpu.vector_store %arg13[%c50, %c0_152], %309 {strides = array<i32>} : memref<64x128xf32, #tpu.memory_space<vmem>>, vector<1x128xf32>,
    %c3_153 = arith.constant 3 : index
    %c6_154 = arith.constant 6 : index
    %311 = memref.load %arg1[%c3_153, %c6_154] : memref<4x8xi32, #tpu.memory_space<smem>>
    %312 = vector.broadcast %311 : i32 to vector<1x128xi32>
    %313 = arith.cmpi eq, %4, %312 : vector<1x128xi32>
    %314 = arith.extui %313 : vector<1x128xi1> to vector<1x128xi32>
    %315 = arith.sitofp %314 : vector<1x128xi32> to vector<1x128xf32>
    %c51 = arith.constant 51 : index
    %c0_155 = arith.constant 0 : index
    %316 = vector.load %arg13[%c51, %c0_155] : memref<64x128xf32, #tpu.memory_space<vmem>>, vector<1x128xf32>
    tpu.vector_store %arg13[%c51, %c0_155], %315 {strides = array<i32>} : memref<64x128xf32, #tpu.memory_space<vmem>>, vector<1x128xf32>,
    %c3_156 = arith.constant 3 : index
    %c6_157 = arith.constant 6 : index
    %317 = memref.load %arg1[%c3_156, %c6_157] : memref<4x8xi32, #tpu.memory_space<smem>>
    %318 = vector.broadcast %317 : i32 to vector<1x128xi32>
    %319 = arith.cmpi eq, %4, %318 : vector<1x128xi32>
    %320 = arith.extui %319 : vector<1x128xi1> to vector<1x128xi32>
    %321 = arith.sitofp %320 : vector<1x128xi32> to vector<1x128xf32>
    %c52 = arith.constant 52 : index
    %c0_158 = arith.constant 0 : index
    %322 = vector.load %arg13[%c52, %c0_158] : memref<64x128xf32, #tpu.memory_space<vmem>>, vector<1x128xf32>
    tpu.vector_store %arg13[%c52, %c0_158], %321 {strides = array<i32>} : memref<64x128xf32, #tpu.memory_space<vmem>>, vector<1x128xf32>,
    %c3_159 = arith.constant 3 : index
    %c6_160 = arith.constant 6 : index
    %323 = memref.load %arg1[%c3_159, %c6_160] : memref<4x8xi32, #tpu.memory_space<smem>>
    %324 = vector.broadcast %323 : i32 to vector<1x128xi32>
    %325 = arith.cmpi eq, %4, %324 : vector<1x128xi32>
    %326 = arith.extui %325 : vector<1x128xi1> to vector<1x128xi32>
    %327 = arith.sitofp %326 : vector<1x128xi32> to vector<1x128xf32>
    %c53 = arith.constant 53 : index
    %c0_161 = arith.constant 0 : index
    %328 = vector.load %arg13[%c53, %c0_161] : memref<64x128xf32, #tpu.memory_space<vmem>>, vector<1x128xf32>
    tpu.vector_store %arg13[%c53, %c0_161], %327 {strides = array<i32>} : memref<64x128xf32, #tpu.memory_space<vmem>>, vector<1x128xf32>,
    %c3_162 = arith.constant 3 : index
    %c6_163 = arith.constant 6 : index
    %329 = memref.load %arg1[%c3_162, %c6_163] : memref<4x8xi32, #tpu.memory_space<smem>>
    %330 = vector.broadcast %329 : i32 to vector<1x128xi32>
    %331 = arith.cmpi eq, %4, %330 : vector<1x128xi32>
    %332 = arith.extui %331 : vector<1x128xi1> to vector<1x128xi32>
    %333 = arith.sitofp %332 : vector<1x128xi32> to vector<1x128xf32>
    %c54 = arith.constant 54 : index
    %c0_164 = arith.constant 0 : index
    %334 = vector.load %arg13[%c54, %c0_164] : memref<64x128xf32, #tpu.memory_space<vmem>>, vector<1x128xf32>
    tpu.vector_store %arg13[%c54, %c0_164], %333 {strides = array<i32>} : memref<64x128xf32, #tpu.memory_space<vmem>>, vector<1x128xf32>,
    %c3_165 = arith.constant 3 : index
    %c6_166 = arith.constant 6 : index
    %335 = memref.load %arg1[%c3_165, %c6_166] : memref<4x8xi32, #tpu.memory_space<smem>>
    %336 = vector.broadcast %335 : i32 to vector<1x128xi32>
    %337 = arith.cmpi eq, %4, %336 : vector<1x128xi32>
    %338 = arith.extui %337 : vector<1x128xi1> to vector<1x128xi32>
    %339 = arith.sitofp %338 : vector<1x128xi32> to vector<1x128xf32>
    %c55 = arith.constant 55 : index
    %c0_167 = arith.constant 0 : index
    %340 = vector.load %arg13[%c55, %c0_167] : memref<64x128xf32, #tpu.memory_space<vmem>>, vector<1x128xf32>
    tpu.vector_store %arg13[%c55, %c0_167], %339 {strides = array<i32>} : memref<64x128xf32, #tpu.memory_space<vmem>>, vector<1x128xf32>,
    %c0_168 = arith.constant 0 : index
    %c7_169 = arith.constant 7 : index
    %341 = memref.load %arg1[%c0_168, %c7_169] : memref<4x8xi32, #tpu.memory_space<smem>>
    %342 = vector.broadcast %341 : i32 to vector<1x128xi32>
    %343 = arith.cmpi eq, %4, %342 : vector<1x128xi32>
    %344 = arith.extui %343 : vector<1x128xi1> to vector<1x128xi32>
    %345 = arith.sitofp %344 : vector<1x128xi32> to vector<1x128xf32>
    %c56 = arith.constant 56 : index
    %c0_170 = arith.constant 0 : index
    %346 = vector.load %arg13[%c56, %c0_170] : memref<64x128xf32, #tpu.memory_space<vmem>>, vector<1x128xf32>
    tpu.vector_store %arg13[%c56, %c0_170], %345 {strides = array<i32>} : memref<64x128xf32, #tpu.memory_space<vmem>>, vector<1x128xf32>,
    %c1_171 = arith.constant 1 : index
    %c7_172 = arith.constant 7 : index
    %347 = memref.load %arg1[%c1_171, %c7_172] : memref<4x8xi32, #tpu.memory_space<smem>>
    %348 = vector.broadcast %347 : i32 to vector<1x128xi32>
    %349 = arith.cmpi eq, %4, %348 : vector<1x128xi32>
    %350 = arith.extui %349 : vector<1x128xi1> to vector<1x128xi32>
    %351 = arith.sitofp %350 : vector<1x128xi32> to vector<1x128xf32>
    %c57 = arith.constant 57 : index
    %c0_173 = arith.constant 0 : index
    %352 = vector.load %arg13[%c57, %c0_173] : memref<64x128xf32, #tpu.memory_space<vmem>>, vector<1x128xf32>
    tpu.vector_store %arg13[%c57, %c0_173], %351 {strides = array<i32>} : memref<64x128xf32, #tpu.memory_space<vmem>>, vector<1x128xf32>,
    %c2_174 = arith.constant 2 : index
    %c7_175 = arith.constant 7 : index
    %353 = memref.load %arg1[%c2_174, %c7_175] : memref<4x8xi32, #tpu.memory_space<smem>>
    %354 = vector.broadcast %353 : i32 to vector<1x128xi32>
    %355 = arith.cmpi eq, %4, %354 : vector<1x128xi32>
    %356 = arith.extui %355 : vector<1x128xi1> to vector<1x128xi32>
    %357 = arith.sitofp %356 : vector<1x128xi32> to vector<1x128xf32>
    %c58 = arith.constant 58 : index
    %c0_176 = arith.constant 0 : index
    %358 = vector.load %arg13[%c58, %c0_176] : memref<64x128xf32, #tpu.memory_space<vmem>>, vector<1x128xf32>
    tpu.vector_store %arg13[%c58, %c0_176], %357 {strides = array<i32>} : memref<64x128xf32, #tpu.memory_space<vmem>>, vector<1x128xf32>,
    %c3_177 = arith.constant 3 : index
    %c7_178 = arith.constant 7 : index
    %359 = memref.load %arg1[%c3_177, %c7_178] : memref<4x8xi32, #tpu.memory_space<smem>>
    %360 = vector.broadcast %359 : i32 to vector<1x128xi32>
    %361 = arith.cmpi eq, %4, %360 : vector<1x128xi32>
    %362 = arith.extui %361 : vector<1x128xi1> to vector<1x128xi32>
    %363 = arith.sitofp %362 : vector<1x128xi32> to vector<1x128xf32>
    %c59 = arith.constant 59 : index
    %c0_179 = arith.constant 0 : index
    %364 = vector.load %arg13[%c59, %c0_179] : memref<64x128xf32, #tpu.memory_space<vmem>>, vector<1x128xf32>
    tpu.vector_store %arg13[%c59, %c0_179], %363 {strides = array<i32>} : memref<64x128xf32, #tpu.memory_space<vmem>>, vector<1x128xf32>,
    %c3_180 = arith.constant 3 : index
    %c7_181 = arith.constant 7 : index
    %365 = memref.load %arg1[%c3_180, %c7_181] : memref<4x8xi32, #tpu.memory_space<smem>>
    %366 = vector.broadcast %365 : i32 to vector<1x128xi32>
    %367 = arith.cmpi eq, %4, %366 : vector<1x128xi32>
    %368 = arith.extui %367 : vector<1x128xi1> to vector<1x128xi32>
    %369 = arith.sitofp %368 : vector<1x128xi32> to vector<1x128xf32>
    %c60 = arith.constant 60 : index
    %c0_182 = arith.constant 0 : index
    %370 = vector.load %arg13[%c60, %c0_182] : memref<64x128xf32, #tpu.memory_space<vmem>>, vector<1x128xf32>
    tpu.vector_store %arg13[%c60, %c0_182], %369 {strides = array<i32>} : memref<64x128xf32, #tpu.memory_space<vmem>>, vector<1x128xf32>,
    %c3_183 = arith.constant 3 : index
    %c7_184 = arith.constant 7 : index
    %371 = memref.load %arg1[%c3_183, %c7_184] : memref<4x8xi32, #tpu.memory_space<smem>>
    %372 = vector.broadcast %371 : i32 to vector<1x128xi32>
    %373 = arith.cmpi eq, %4, %372 : vector<1x128xi32>
    %374 = arith.extui %373 : vector<1x128xi1> to vector<1x128xi32>
    %375 = arith.sitofp %374 : vector<1x128xi32> to vector<1x128xf32>
    %c61 = arith.constant 61 : index
    %c0_185 = arith.constant 0 : index
    %376 = vector.load %arg13[%c61, %c0_185] : memref<64x128xf32, #tpu.memory_space<vmem>>, vector<1x128xf32>
    tpu.vector_store %arg13[%c61, %c0_185], %375 {strides = array<i32>} : memref<64x128xf32, #tpu.memory_space<vmem>>, vector<1x128xf32>,
    %c3_186 = arith.constant 3 : index
    %c7_187 = arith.constant 7 : index
    %377 = memref.load %arg1[%c3_186, %c7_187] : memref<4x8xi32, #tpu.memory_space<smem>>
    %378 = vector.broadcast %377 : i32 to vector<1x128xi32>
    %379 = arith.cmpi eq, %4, %378 : vector<1x128xi32>
    %380 = arith.extui %379 : vector<1x128xi1> to vector<1x128xi32>
    %381 = arith.sitofp %380 : vector<1x128xi32> to vector<1x128xf32>
    %c62 = arith.constant 62 : index
    %c0_188 = arith.constant 0 : index
    %382 = vector.load %arg13[%c62, %c0_188] : memref<64x128xf32, #tpu.memory_space<vmem>>, vector<1x128xf32>
    tpu.vector_store %arg13[%c62, %c0_188], %381 {strides = array<i32>} : memref<64x128xf32, #tpu.memory_space<vmem>>, vector<1x128xf32>,
    %c3_189 = arith.constant 3 : index
    %c7_190 = arith.constant 7 : index
    %383 = memref.load %arg1[%c3_189, %c7_190] : memref<4x8xi32, #tpu.memory_space<smem>>
    %384 = vector.broadcast %383 : i32 to vector<1x128xi32>
    %385 = arith.cmpi eq, %4, %384 : vector<1x128xi32>
    %386 = arith.extui %385 : vector<1x128xi1> to vector<1x128xi32>
    %387 = arith.sitofp %386 : vector<1x128xi32> to vector<1x128xf32>
    %c63 = arith.constant 63 : index
    %c0_191 = arith.constant 0 : index
    %388 = vector.load %arg13[%c63, %c0_191] : memref<64x128xf32, #tpu.memory_space<vmem>>, vector<1x128xf32>
    tpu.vector_store %arg13[%c63, %c0_191], %387 {strides = array<i32>} : memref<64x128xf32, #tpu.memory_space<vmem>>, vector<1x128xf32>,
    %c0_192 = arith.constant 0 : index
    %c0_193 = arith.constant 0 : index
    %389 = vector.load %arg13[%c0_192, %c0_193] : memref<64x128xf32, #tpu.memory_space<vmem>>, vector<64x128xf32>
    %390 = arith.truncf %389 : vector<64x128xf32> to vector<64x128xbf16>
    %c0_194 = arith.constant 0 : index
    %c0_195 = arith.constant 0 : index
    %391 = vector.load %arg2[%c0_194, %c0_195] : memref<128x64xbf16, #tpu.memory_space<vmem>>, vector<128x64xbf16>
    %cst = arith.constant dense<0.000000e+00> : vector<64x64xf32>
    %392 = tpu.matmul %390, %391, %cst {dimension_numbers = #tpu.dot_dimension_numbers<[1], [0], [0], [1], [0, 0, 1, 1], [], []>} : vector<64x128xbf16>, vector<128x64xbf16>, vector<64x64xf32> -> vector<64x64xf32>
    %393 = arith.truncf %392 : vector<64x64xf32> to vector<64x64xbf16>
    %c0_196 = arith.constant 0 : index
    %c0_197 = arith.constant 0 : index
    %394 = vector.load %arg3[%c0_196, %c0_197] : memref<64x1024xbf16, #tpu.memory_space<vmem>>, vector<64x1024xbf16>
    %cst_198 = arith.constant dense<0.000000e+00> : vector<64x1024xf32>
    %395 = tpu.matmul %393, %394, %cst_198 {dimension_numbers = #tpu.dot_dimension_numbers<[1], [0], [0], [1], [0, 0, 1, 1], [], []>} : vector<64x64xbf16>, vector<64x1024xbf16>, vector<64x1024xf32> -> vector<64x1024xf32>
    %c0_199 = arith.constant 0 : index
    %c0_200 = arith.constant 0 : index
    %396 = vector.load %arg4[%c0_199, %c0_200] : memref<1x1024xf32, #tpu.memory_space<vmem>>, vector<1x1024xf32>
    %397 = vector.broadcast %396 : vector<1x1024xf32> to vector<64x1024xf32>
    %398 = arith.addf %395, %397 : vector<64x1024xf32>
    %c0_201 = arith.constant 0 : index
    %c0_202 = arith.constant 0 : index
    %399 = vector.load %arg14[%c0_201, %c0_202] : memref<64x1024xf32, #tpu.memory_space<vmem>>, vector<64x1024xf32>
    tpu.vector_store %arg14[%c0_201, %c0_202], %398 {strides = array<i32>} : memref<64x1024xf32, #tpu.memory_space<vmem>>, vector<64x1024xf32>,
    %c0_i32_203 = arith.constant 0 : i32
    %400 = tpu.memref_slice %arg17[%c0_i32_203] : memref<2x!tpu.dma_semaphore, #tpu.memory_space<semaphore_mem>> -> memref<1x!tpu.dma_semaphore, #tpu.memory_space<semaphore_mem>>
    %401 = tpu.memref_squeeze %400 : memref<1x!tpu.dma_semaphore, #tpu.memory_space<semaphore_mem>> -> memref<!tpu.dma_semaphore, #tpu.memory_space<semaphore_mem>>
    tpu.wait_dma2 semaphore(%401 : memref<!tpu.dma_semaphore, #tpu.memory_space<semaphore_mem>>) src(%arg5 : memref<256x1024xbf16, #tpu.memory_space<any>>) dst(%arg15 : memref<256x1024xbf16, #tpu.memory_space<vmem>>)
    %c0_204 = arith.constant 0 : index
    %c0_205 = arith.constant 0 : index
    %402 = vector.load %arg8[%c0_204, %c0_205] : memref<8x256xf32, #tpu.memory_space<vmem>>, vector<8x256xf32>
    %c0_206 = arith.constant 0 : index
    %c0_207 = arith.constant 0 : index
    %403 = vector.load %arg9[%c0_206, %c0_207] : memref<8x256xf32, #tpu.memory_space<vmem>>, vector<8x256xf32>
    %c0_208 = arith.constant 0 : index
    %c0_209 = arith.constant 0 : index
    %404 = vector.load %arg14[%c0_208, %c0_209] : memref<64x1024xf32, #tpu.memory_space<vmem>>, vector<8x1024xf32>
    %405 = arith.truncf %402 : vector<8x256xf32> to vector<8x256xbf16>
    %c0_210 = arith.constant 0 : index
    %c0_211 = arith.constant 0 : index
    %406 = vector.load %arg15[%c0_210, %c0_211] : memref<256x1024xbf16, #tpu.memory_space<vmem>>, vector<256x1024xbf16>
    %cst_212 = arith.constant dense<0.000000e+00> : vector<8x1024xf32>
    %407 = tpu.matmul %405, %406, %cst_212 {dimension_numbers = #tpu.dot_dimension_numbers<[1], [0], [0], [1], [0, 0, 1, 1], [], []>} : vector<8x256xbf16>, vector<256x1024xbf16>, vector<8x1024xf32> -> vector<8x1024xf32>
    %408 = arith.addf %404, %407 : vector<8x1024xf32>
    %409 = vector.extract_strided_slice %408 {offsets = [0, 0], sizes = [8, 256], strides = [1, 1]} : vector<8x1024xf32> to vector<8x256xf32>
    %cst_213 = arith.constant 5.000000e-01 : f32
    %410 = vector.broadcast %cst_213 : f32 to vector<8x256xf32>
    %411 = arith.mulf %410, %409 : vector<8x256xf32>
    %412 = math.tanh %411 : vector<8x256xf32>
    %cst_214 = arith.constant 5.000000e-01 : f32
    %413 = vector.broadcast %cst_214 : f32 to vector<8x256xf32>
    %414 = arith.mulf %413, %412 : vector<8x256xf32>
    %cst_215 = arith.constant 5.000000e-01 : f32
    %415 = vector.broadcast %cst_215 : f32 to vector<8x256xf32>
    %416 = arith.addf %414, %415 : vector<8x256xf32>
    %417 = vector.extract_strided_slice %408 {offsets = [0, 256], sizes = [8, 256], strides = [1, 1]} : vector<8x1024xf32> to vector<8x256xf32>
    %cst_216 = arith.constant 5.000000e-01 : f32
    %418 = vector.broadcast %cst_216 : f32 to vector<8x256xf32>
    %419 = arith.mulf %418, %417 : vector<8x256xf32>
    %420 = math.tanh %419 : vector<8x256xf32>
    %cst_217 = arith.constant 5.000000e-01 : f32
    %421 = vector.broadcast %cst_217 : f32 to vector<8x256xf32>
    %422 = arith.mulf %421, %420 : vector<8x256xf32>
    %cst_218 = arith.constant 5.000000e-01 : f32
    %423 = vector.broadcast %cst_218 : f32 to vector<8x256xf32>
    %424 = arith.addf %422, %423 : vector<8x256xf32>
    %425 = vector.extract_strided_slice %408 {offsets = [0, 512], sizes = [8, 256], strides = [1, 1]} : vector<8x1024xf32> to vector<8x256xf32>
    %426 = math.tanh %425 : vector<8x256xf32>
    %427 = vector.extract_strided_slice %408 {offsets = [0, 768], sizes = [8, 256], strides = [1, 1]} : vector<8x1024xf32> to vector<8x256xf32>
    %cst_219 = arith.constant 5.000000e-01 : f32
    %428 = vector.broadcast %cst_219 : f32 to vector<8x256xf32>
    %429 = arith.mulf %428, %427 : vector<8x256xf32>
    %430 = math.tanh %429 : vector<8x256xf32>
    %cst_220 = arith.constant 5.000000e-01 : f32
    %431 = vector.broadcast %cst_220 : f32 to vector<8x256xf32>
    %432 = arith.mulf %431, %430 : vector<8x256xf32>
    %cst_221 = arith.constant 5.000000e-01 : f32
    %433 = vector.broadcast %cst_221 : f32 to vector<8x256xf32>
    %434 = arith.addf %432, %433 : vector<8x256xf32>
    %435 = arith.mulf %424, %403 : vector<8x256xf32>
    %436 = arith.mulf %416, %426 : vector<8x256xf32>
    %437 = arith.addf %435, %436 : vector<8x256xf32>
    %438 = math.tanh %437 : vector<8x256xf32>
    %439 = arith.mulf %434, %438 : vector<8x256xf32>
    %c8_222 = arith.constant 8 : index
    %c0_223 = arith.constant 0 : index
    %440 = vector.load %arg14[%c8_222, %c0_223] : memref<64x1024xf32, #tpu.memory_space<vmem>>, vector<8x1024xf32>
    %441 = arith.truncf %439 : vector<8x256xf32> to vector<8x256xbf16>
    %c0_224 = arith.constant 0 : index
    %c0_225 = arith.constant 0 : index
    %442 = vector.load %arg15[%c0_224, %c0_225] : memref<256x1024xbf16, #tpu.memory_space<vmem>>, vector<256x1024xbf16>
    %cst_226 = arith.constant dense<0.000000e+00> : vector<8x1024xf32>
    %443 = tpu.matmul %441, %442, %cst_226 {dimension_numbers = #tpu.dot_dimension_numbers<[1], [0], [0], [1], [0, 0, 1, 1], [], []>} : vector<8x256xbf16>, vector<256x1024xbf16>, vector<8x1024xf32> -> vector<8x1024xf32>
    %444 = arith.addf %440, %443 : vector<8x1024xf32>
    %445 = vector.extract_strided_slice %444 {offsets = [0, 0], sizes = [8, 256], strides = [1, 1]} : vector<8x1024xf32> to vector<8x256xf32>
    %cst_227 = arith.constant 5.000000e-01 : f32
    %446 = vector.broadcast %cst_227 : f32 to vector<8x256xf32>
    %447 = arith.mulf %446, %445 : vector<8x256xf32>
    %448 = math.tanh %447 : vector<8x256xf32>
    %cst_228 = arith.constant 5.000000e-01 : f32
    %449 = vector.broadcast %cst_228 : f32 to vector<8x256xf32>
    %450 = arith.mulf %449, %448 : vector<8x256xf32>
    %cst_229 = arith.constant 5.000000e-01 : f32
    %451 = vector.broadcast %cst_229 : f32 to vector<8x256xf32>
    %452 = arith.addf %450, %451 : vector<8x256xf32>
    %453 = vector.extract_strided_slice %444 {offsets = [0, 256], sizes = [8, 256], strides = [1, 1]} : vector<8x1024xf32> to vector<8x256xf32>
    %cst_230 = arith.constant 5.000000e-01 : f32
    %454 = vector.broadcast %cst_230 : f32 to vector<8x256xf32>
    %455 = arith.mulf %454, %453 : vector<8x256xf32>
    %456 = math.tanh %455 : vector<8x256xf32>
    %cst_231 = arith.constant 5.000000e-01 : f32
    %457 = vector.broadcast %cst_231 : f32 to vector<8x256xf32>
    %458 = arith.mulf %457, %456 : vector<8x256xf32>
    %cst_232 = arith.constant 5.000000e-01 : f32
    %459 = vector.broadcast %cst_232 : f32 to vector<8x256xf32>
    %460 = arith.addf %458, %459 : vector<8x256xf32>
    %461 = vector.extract_strided_slice %444 {offsets = [0, 512], sizes = [8, 256], strides = [1, 1]} : vector<8x1024xf32> to vector<8x256xf32>
    %462 = math.tanh %461 : vector<8x256xf32>
    %463 = vector.extract_strided_slice %444 {offsets = [0, 768], sizes = [8, 256], strides = [1, 1]} : vector<8x1024xf32> to vector<8x256xf32>
    %cst_233 = arith.constant 5.000000e-01 : f32
    %464 = vector.broadcast %cst_233 : f32 to vector<8x256xf32>
    %465 = arith.mulf %464, %463 : vector<8x256xf32>
    %466 = math.tanh %465 : vector<8x256xf32>
    %cst_234 = arith.constant 5.000000e-01 : f32
    %467 = vector.broadcast %cst_234 : f32 to vector<8x256xf32>
    %468 = arith.mulf %467, %466 : vector<8x256xf32>
    %cst_235 = arith.constant 5.000000e-01 : f32
    %469 = vector.broadcast %cst_235 : f32 to vector<8x256xf32>
    %470 = arith.addf %468, %469 : vector<8x256xf32>
    %471 = arith.mulf %460, %437 : vector<8x256xf32>
    %472 = arith.mulf %452, %462 : vector<8x256xf32>
    %473 = arith.addf %471, %472 : vector<8x256xf32>
    %474 = math.tanh %473 : vector<8x256xf32>
    %475 = arith.mulf %470, %474 : vector<8x256xf32>
    %c16_236 = arith.constant 16 : index
    %c0_237 = arith.constant 0 : index
    %476 = vector.load %arg14[%c16_236, %c0_237] : memref<64x1024xf32, #tpu.memory_space<vmem>>, vector<8x1024xf32>
    %477 = arith.truncf %475 : vector<8x256xf32> to vector<8x256xbf16>
    %c0_238 = arith.constant 0 : index
    %c0_239 = arith.constant 0 : index
    %478 = vector.load %arg15[%c0_238, %c0_239] : memref<256x1024xbf16, #tpu.memory_space<vmem>>, vector<256x1024xbf16>
    %cst_240 = arith.constant dense<0.000000e+00> : vector<8x1024xf32>
    %479 = tpu.matmul %477, %478, %cst_240 {dimension_numbers = #tpu.dot_dimension_numbers<[1], [0], [0], [1], [0, 0, 1, 1], [], []>} : vector<8x256xbf16>, vector<256x1024xbf16>, vector<8x1024xf32> -> vector<8x1024xf32>
    %480 = arith.addf %476, %479 : vector<8x1024xf32>
    %481 = vector.extract_strided_slice %480 {offsets = [0, 0], sizes = [8, 256], strides = [1, 1]} : vector<8x1024xf32> to vector<8x256xf32>
    %cst_241 = arith.constant 5.000000e-01 : f32
    %482 = vector.broadcast %cst_241 : f32 to vector<8x256xf32>
    %483 = arith.mulf %482, %481 : vector<8x256xf32>
    %484 = math.tanh %483 : vector<8x256xf32>
    %cst_242 = arith.constant 5.000000e-01 : f32
    %485 = vector.broadcast %cst_242 : f32 to vector<8x256xf32>
    %486 = arith.mulf %485, %484 : vector<8x256xf32>
    %cst_243 = arith.constant 5.000000e-01 : f32
    %487 = vector.broadcast %cst_243 : f32 to vector<8x256xf32>
    %488 = arith.addf %486, %487 : vector<8x256xf32>
    %489 = vector.extract_strided_slice %480 {offsets = [0, 256], sizes = [8, 256], strides = [1, 1]} : vector<8x1024xf32> to vector<8x256xf32>
    %cst_244 = arith.constant 5.000000e-01 : f32
    %490 = vector.broadcast %cst_244 : f32 to vector<8x256xf32>
    %491 = arith.mulf %490, %489 : vector<8x256xf32>
    %492 = math.tanh %491 : vector<8x256xf32>
    %cst_245 = arith.constant 5.000000e-01 : f32
    %493 = vector.broadcast %cst_245 : f32 to vector<8x256xf32>
    %494 = arith.mulf %493, %492 : vector<8x256xf32>
    %cst_246 = arith.constant 5.000000e-01 : f32
    %495 = vector.broadcast %cst_246 : f32 to vector<8x256xf32>
    %496 = arith.addf %494, %495 : vector<8x256xf32>
    %497 = vector.extract_strided_slice %480 {offsets = [0, 512], sizes = [8, 256], strides = [1, 1]} : vector<8x1024xf32> to vector<8x256xf32>
    %498 = math.tanh %497 : vector<8x256xf32>
    %499 = vector.extract_strided_slice %480 {offsets = [0, 768], sizes = [8, 256], strides = [1, 1]} : vector<8x1024xf32> to vector<8x256xf32>
    %cst_247 = arith.constant 5.000000e-01 : f32
    %500 = vector.broadcast %cst_247 : f32 to vector<8x256xf32>
    %501 = arith.mulf %500, %499 : vector<8x256xf32>
    %502 = math.tanh %501 : vector<8x256xf32>
    %cst_248 = arith.constant 5.000000e-01 : f32
    %503 = vector.broadcast %cst_248 : f32 to vector<8x256xf32>
    %504 = arith.mulf %503, %502 : vector<8x256xf32>
    %cst_249 = arith.constant 5.000000e-01 : f32
    %505 = vector.broadcast %cst_249 : f32 to vector<8x256xf32>
    %506 = arith.addf %504, %505 : vector<8x256xf32>
    %507 = arith.mulf %496, %473 : vector<8x256xf32>
    %508 = arith.mulf %488, %498 : vector<8x256xf32>
    %509 = arith.addf %507, %508 : vector<8x256xf32>
    %510 = math.tanh %509 : vector<8x256xf32>
    %511 = arith.mulf %506, %510 : vector<8x256xf32>
    %c24_250 = arith.constant 24 : index
    %c0_251 = arith.constant 0 : index
    %512 = vector.load %arg14[%c24_250, %c0_251] : memref<64x1024xf32, #tpu.memory_space<vmem>>, vector<8x1024xf32>
    %513 = arith.truncf %511 : vector<8x256xf32> to vector<8x256xbf16>
    %c0_252 = arith.constant 0 : index
    %c0_253 = arith.constant 0 : index
    %514 = vector.load %arg15[%c0_252, %c0_253] : memref<256x1024xbf16, #tpu.memory_space<vmem>>, vector<256x1024xbf16>
    %cst_254 = arith.constant dense<0.000000e+00> : vector<8x1024xf32>
    %515 = tpu.matmul %513, %514, %cst_254 {dimension_numbers = #tpu.dot_dimension_numbers<[1], [0], [0], [1], [0, 0, 1, 1], [], []>} : vector<8x256xbf16>, vector<256x1024xbf16>, vector<8x1024xf32> -> vector<8x1024xf32>
    %516 = arith.addf %512, %515 : vector<8x1024xf32>
    %517 = vector.extract_strided_slice %516 {offsets = [0, 0], sizes = [8, 256], strides = [1, 1]} : vector<8x1024xf32> to vector<8x256xf32>
    %cst_255 = arith.constant 5.000000e-01 : f32
    %518 = vector.broadcast %cst_255 : f32 to vector<8x256xf32>
    %519 = arith.mulf %518, %517 : vector<8x256xf32>
    %520 = math.tanh %519 : vector<8x256xf32>
    %cst_256 = arith.constant 5.000000e-01 : f32
    %521 = vector.broadcast %cst_256 : f32 to vector<8x256xf32>
    %522 = arith.mulf %521, %520 : vector<8x256xf32>
    %cst_257 = arith.constant 5.000000e-01 : f32
    %523 = vector.broadcast %cst_257 : f32 to vector<8x256xf32>
    %524 = arith.addf %522, %523 : vector<8x256xf32>
    %525 = vector.extract_strided_slice %516 {offsets = [0, 256], sizes = [8, 256], strides = [1, 1]} : vector<8x1024xf32> to vector<8x256xf32>
    %cst_258 = arith.constant 5.000000e-01 : f32
    %526 = vector.broadcast %cst_258 : f32 to vector<8x256xf32>
    %527 = arith.mulf %526, %525 : vector<8x256xf32>
    %528 = math.tanh %527 : vector<8x256xf32>
    %cst_259 = arith.constant 5.000000e-01 : f32
    %529 = vector.broadcast %cst_259 : f32 to vector<8x256xf32>
    %530 = arith.mulf %529, %528 : vector<8x256xf32>
    %cst_260 = arith.constant 5.000000e-01 : f32
    %531 = vector.broadcast %cst_260 : f32 to vector<8x256xf32>
    %532 = arith.addf %530, %531 : vector<8x256xf32>
    %533 = vector.extract_strided_slice %516 {offsets = [0, 512], sizes = [8, 256], strides = [1, 1]} : vector<8x1024xf32> to vector<8x256xf32>
    %534 = math.tanh %533 : vector<8x256xf32>
    %535 = vector.extract_strided_slice %516 {offsets = [0, 768], sizes = [8, 256], strides = [1, 1]} : vector<8x1024xf32> to vector<8x256xf32>
    %cst_261 = arith.constant 5.000000e-01 : f32
    %536 = vector.broadcast %cst_261 : f32 to vector<8x256xf32>
    %537 = arith.mulf %536, %535 : vector<8x256xf32>
    %538 = math.tanh %537 : vector<8x256xf32>
    %cst_262 = arith.constant 5.000000e-01 : f32
    %539 = vector.broadcast %cst_262 : f32 to vector<8x256xf32>
    %540 = arith.mulf %539, %538 : vector<8x256xf32>
    %cst_263 = arith.constant 5.000000e-01 : f32
    %541 = vector.broadcast %cst_263 : f32 to vector<8x256xf32>
    %542 = arith.addf %540, %541 : vector<8x256xf32>
    %543 = arith.mulf %532, %509 : vector<8x256xf32>
    %544 = arith.mulf %524, %534 : vector<8x256xf32>
    %545 = arith.addf %543, %544 : vector<8x256xf32>
    %546 = math.tanh %545 : vector<8x256xf32>
    %547 = arith.mulf %542, %546 : vector<8x256xf32>
    %c32_264 = arith.constant 32 : index
    %c0_265 = arith.constant 0 : index
    %548 = vector.load %arg14[%c32_264, %c0_265] : memref<64x1024xf32, #tpu.memory_space<vmem>>, vector<8x1024xf32>
    %549 = arith.truncf %547 : vector<8x256xf32> to vector<8x256xbf16>
    %c0_266 = arith.constant 0 : index
    %c0_267 = arith.constant 0 : index
    %550 = vector.load %arg15[%c0_266, %c0_267] : memref<256x1024xbf16, #tpu.memory_space<vmem>>, vector<256x1024xbf16>
    %cst_268 = arith.constant dense<0.000000e+00> : vector<8x1024xf32>
    %551 = tpu.matmul %549, %550, %cst_268 {dimension_numbers = #tpu.dot_dimension_numbers<[1], [0], [0], [1], [0, 0, 1, 1], [], []>} : vector<8x256xbf16>, vector<256x1024xbf16>, vector<8x1024xf32> -> vector<8x1024xf32>
    %552 = arith.addf %548, %551 : vector<8x1024xf32>
    %553 = vector.extract_strided_slice %552 {offsets = [0, 0], sizes = [8, 256], strides = [1, 1]} : vector<8x1024xf32> to vector<8x256xf32>
    %cst_269 = arith.constant 5.000000e-01 : f32
    %554 = vector.broadcast %cst_269 : f32 to vector<8x256xf32>
    %555 = arith.mulf %554, %553 : vector<8x256xf32>
    %556 = math.tanh %555 : vector<8x256xf32>
    %cst_270 = arith.constant 5.000000e-01 : f32
    %557 = vector.broadcast %cst_270 : f32 to vector<8x256xf32>
    %558 = arith.mulf %557, %556 : vector<8x256xf32>
    %cst_271 = arith.constant 5.000000e-01 : f32
    %559 = vector.broadcast %cst_271 : f32 to vector<8x256xf32>
    %560 = arith.addf %558, %559 : vector<8x256xf32>
    %561 = vector.extract_strided_slice %552 {offsets = [0, 256], sizes = [8, 256], strides = [1, 1]} : vector<8x1024xf32> to vector<8x256xf32>
    %cst_272 = arith.constant 5.000000e-01 : f32
    %562 = vector.broadcast %cst_272 : f32 to vector<8x256xf32>
    %563 = arith.mulf %562, %561 : vector<8x256xf32>
    %564 = math.tanh %563 : vector<8x256xf32>
    %cst_273 = arith.constant 5.000000e-01 : f32
    %565 = vector.broadcast %cst_273 : f32 to vector<8x256xf32>
    %566 = arith.mulf %565, %564 : vector<8x256xf32>
    %cst_274 = arith.constant 5.000000e-01 : f32
    %567 = vector.broadcast %cst_274 : f32 to vector<8x256xf32>
    %568 = arith.addf %566, %567 : vector<8x256xf32>
    %569 = vector.extract_strided_slice %552 {offsets = [0, 512], sizes = [8, 256], strides = [1, 1]} : vector<8x1024xf32> to vector<8x256xf32>
    %570 = math.tanh %569 : vector<8x256xf32>
    %571 = vector.extract_strided_slice %552 {offsets = [0, 768], sizes = [8, 256], strides = [1, 1]} : vector<8x1024xf32> to vector<8x256xf32>
    %cst_275 = arith.constant 5.000000e-01 : f32
    %572 = vector.broadcast %cst_275 : f32 to vector<8x256xf32>
    %573 = arith.mulf %572, %571 : vector<8x256xf32>
    %574 = math.tanh %573 : vector<8x256xf32>
    %cst_276 = arith.constant 5.000000e-01 : f32
    %575 = vector.broadcast %cst_276 : f32 to vector<8x256xf32>
    %576 = arith.mulf %575, %574 : vector<8x256xf32>
    %cst_277 = arith.constant 5.000000e-01 : f32
    %577 = vector.broadcast %cst_277 : f32 to vector<8x256xf32>
    %578 = arith.addf %576, %577 : vector<8x256xf32>
    %579 = arith.mulf %568, %545 : vector<8x256xf32>
    %580 = arith.mulf %560, %570 : vector<8x256xf32>
    %581 = arith.addf %579, %580 : vector<8x256xf32>
    %582 = math.tanh %581 : vector<8x256xf32>
    %583 = arith.mulf %578, %582 : vector<8x256xf32>
    %c40_278 = arith.constant 40 : index
    %c0_279 = arith.constant 0 : index
    %584 = vector.load %arg14[%c40_278, %c0_279] : memref<64x1024xf32, #tpu.memory_space<vmem>>, vector<8x1024xf32>
    %585 = arith.truncf %583 : vector<8x256xf32> to vector<8x256xbf16>
    %c0_280 = arith.constant 0 : index
    %c0_281 = arith.constant 0 : index
    %586 = vector.load %arg15[%c0_280, %c0_281] : memref<256x1024xbf16, #tpu.memory_space<vmem>>, vector<256x1024xbf16>
    %cst_282 = arith.constant dense<0.000000e+00> : vector<8x1024xf32>
    %587 = tpu.matmul %585, %586, %cst_282 {dimension_numbers = #tpu.dot_dimension_numbers<[1], [0], [0], [1], [0, 0, 1, 1], [], []>} : vector<8x256xbf16>, vector<256x1024xbf16>, vector<8x1024xf32> -> vector<8x1024xf32>
    %588 = arith.addf %584, %587 : vector<8x1024xf32>
    %589 = vector.extract_strided_slice %588 {offsets = [0, 0], sizes = [8, 256], strides = [1, 1]} : vector<8x1024xf32> to vector<8x256xf32>
    %cst_283 = arith.constant 5.000000e-01 : f32
    %590 = vector.broadcast %cst_283 : f32 to vector<8x256xf32>
    %591 = arith.mulf %590, %589 : vector<8x256xf32>
    %592 = math.tanh %591 : vector<8x256xf32>
    %cst_284 = arith.constant 5.000000e-01 : f32
    %593 = vector.broadcast %cst_284 : f32 to vector<8x256xf32>
    %594 = arith.mulf %593, %592 : vector<8x256xf32>
    %cst_285 = arith.constant 5.000000e-01 : f32
    %595 = vector.broadcast %cst_285 : f32 to vector<8x256xf32>
    %596 = arith.addf %594, %595 : vector<8x256xf32>
    %597 = vector.extract_strided_slice %588 {offsets = [0, 256], sizes = [8, 256], strides = [1, 1]} : vector<8x1024xf32> to vector<8x256xf32>
    %cst_286 = arith.constant 5.000000e-01 : f32
    %598 = vector.broadcast %cst_286 : f32 to vector<8x256xf32>
    %599 = arith.mulf %598, %597 : vector<8x256xf32>
    %600 = math.tanh %599 : vector<8x256xf32>
    %cst_287 = arith.constant 5.000000e-01 : f32
    %601 = vector.broadcast %cst_287 : f32 to vector<8x256xf32>
    %602 = arith.mulf %601, %600 : vector<8x256xf32>
    %cst_288 = arith.constant 5.000000e-01 : f32
    %603 = vector.broadcast %cst_288 : f32 to vector<8x256xf32>
    %604 = arith.addf %602, %603 : vector<8x256xf32>
    %605 = vector.extract_strided_slice %588 {offsets = [0, 512], sizes = [8, 256], strides = [1, 1]} : vector<8x1024xf32> to vector<8x256xf32>
    %606 = math.tanh %605 : vector<8x256xf32>
    %607 = vector.extract_strided_slice %588 {offsets = [0, 768], sizes = [8, 256], strides = [1, 1]} : vector<8x1024xf32> to vector<8x256xf32>
    %cst_289 = arith.constant 5.000000e-01 : f32
    %608 = vector.broadcast %cst_289 : f32 to vector<8x256xf32>
    %609 = arith.mulf %608, %607 : vector<8x256xf32>
    %610 = math.tanh %609 : vector<8x256xf32>
    %cst_290 = arith.constant 5.000000e-01 : f32
    %611 = vector.broadcast %cst_290 : f32 to vector<8x256xf32>
    %612 = arith.mulf %611, %610 : vector<8x256xf32>
    %cst_291 = arith.constant 5.000000e-01 : f32
    %613 = vector.broadcast %cst_291 : f32 to vector<8x256xf32>
    %614 = arith.addf %612, %613 : vector<8x256xf32>
    %615 = arith.mulf %604, %581 : vector<8x256xf32>
    %616 = arith.mulf %596, %606 : vector<8x256xf32>
    %617 = arith.addf %615, %616 : vector<8x256xf32>
    %618 = math.tanh %617 : vector<8x256xf32>
    %619 = arith.mulf %614, %618 : vector<8x256xf32>
    %c48_292 = arith.constant 48 : index
    %c0_293 = arith.constant 0 : index
    %620 = vector.load %arg14[%c48_292, %c0_293] : memref<64x1024xf32, #tpu.memory_space<vmem>>, vector<8x1024xf32>
    %621 = arith.truncf %619 : vector<8x256xf32> to vector<8x256xbf16>
    %c0_294 = arith.constant 0 : index
    %c0_295 = arith.constant 0 : index
    %622 = vector.load %arg15[%c0_294, %c0_295] : memref<256x1024xbf16, #tpu.memory_space<vmem>>, vector<256x1024xbf16>
    %cst_296 = arith.constant dense<0.000000e+00> : vector<8x1024xf32>
    %623 = tpu.matmul %621, %622, %cst_296 {dimension_numbers = #tpu.dot_dimension_numbers<[1], [0], [0], [1], [0, 0, 1, 1], [], []>} : vector<8x256xbf16>, vector<256x1024xbf16>, vector<8x1024xf32> -> vector<8x1024xf32>
    %624 = arith.addf %620, %623 : vector<8x1024xf32>
    %625 = vector.extract_strided_slice %624 {offsets = [0, 0], sizes = [8, 256], strides = [1, 1]} : vector<8x1024xf32> to vector<8x256xf32>
    %cst_297 = arith.constant 5.000000e-01 : f32
    %626 = vector.broadcast %cst_297 : f32 to vector<8x256xf32>
    %627 = arith.mulf %626, %625 : vector<8x256xf32>
    %628 = math.tanh %627 : vector<8x256xf32>
    %cst_298 = arith.constant 5.000000e-01 : f32
    %629 = vector.broadcast %cst_298 : f32 to vector<8x256xf32>
    %630 = arith.mulf %629, %628 : vector<8x256xf32>
    %cst_299 = arith.constant 5.000000e-01 : f32
    %631 = vector.broadcast %cst_299 : f32 to vector<8x256xf32>
    %632 = arith.addf %630, %631 : vector<8x256xf32>
    %633 = vector.extract_strided_slice %624 {offsets = [0, 256], sizes = [8, 256], strides = [1, 1]} : vector<8x1024xf32> to vector<8x256xf32>
    %cst_300 = arith.constant 5.000000e-01 : f32
    %634 = vector.broadcast %cst_300 : f32 to vector<8x256xf32>
    %635 = arith.mulf %634, %633 : vector<8x256xf32>
    %636 = math.tanh %635 : vector<8x256xf32>
    %cst_301 = arith.constant 5.000000e-01 : f32
    %637 = vector.broadcast %cst_301 : f32 to vector<8x256xf32>
    %638 = arith.mulf %637, %636 : vector<8x256xf32>
    %cst_302 = arith.constant 5.000000e-01 : f32
    %639 = vector.broadcast %cst_302 : f32 to vector<8x256xf32>
    %640 = arith.addf %638, %639 : vector<8x256xf32>
    %641 = vector.extract_strided_slice %624 {offsets = [0, 512], sizes = [8, 256], strides = [1, 1]} : vector<8x1024xf32> to vector<8x256xf32>
    %642 = math.tanh %641 : vector<8x256xf32>
    %643 = vector.extract_strided_slice %624 {offsets = [0, 768], sizes = [8, 256], strides = [1, 1]} : vector<8x1024xf32> to vector<8x256xf32>
    %cst_303 = arith.constant 5.000000e-01 : f32
    %644 = vector.broadcast %cst_303 : f32 to vector<8x256xf32>
    %645 = arith.mulf %644, %643 : vector<8x256xf32>
    %646 = math.tanh %645 : vector<8x256xf32>
    %cst_304 = arith.constant 5.000000e-01 : f32
    %647 = vector.broadcast %cst_304 : f32 to vector<8x256xf32>
    %648 = arith.mulf %647, %646 : vector<8x256xf32>
    %cst_305 = arith.constant 5.000000e-01 : f32
    %649 = vector.broadcast %cst_305 : f32 to vector<8x256xf32>
    %650 = arith.addf %648, %649 : vector<8x256xf32>
    %651 = arith.mulf %640, %617 : vector<8x256xf32>
    %652 = arith.mulf %632, %642 : vector<8x256xf32>
    %653 = arith.addf %651, %652 : vector<8x256xf32>
    %654 = math.tanh %653 : vector<8x256xf32>
    %655 = arith.mulf %650, %654 : vector<8x256xf32>
    %c56_306 = arith.constant 56 : index
    %c0_307 = arith.constant 0 : index
    %656 = vector.load %arg14[%c56_306, %c0_307] : memref<64x1024xf32, #tpu.memory_space<vmem>>, vector<8x1024xf32>
    %657 = arith.truncf %655 : vector<8x256xf32> to vector<8x256xbf16>
    %c0_308 = arith.constant 0 : index
    %c0_309 = arith.constant 0 : index
    %658 = vector.load %arg15[%c0_308, %c0_309] : memref<256x1024xbf16, #tpu.memory_space<vmem>>, vector<256x1024xbf16>
    %cst_310 = arith.constant dense<0.000000e+00> : vector<8x1024xf32>
    %659 = tpu.matmul %657, %658, %cst_310 {dimension_numbers = #tpu.dot_dimension_numbers<[1], [0], [0], [1], [0, 0, 1, 1], [], []>} : vector<8x256xbf16>, vector<256x1024xbf16>, vector<8x1024xf32> -> vector<8x1024xf32>
    %660 = arith.addf %656, %659 : vector<8x1024xf32>
    %661 = vector.extract_strided_slice %660 {offsets = [0, 0], sizes = [8, 256], strides = [1, 1]} : vector<8x1024xf32> to vector<8x256xf32>
    %cst_311 = arith.constant 5.000000e-01 : f32
    %662 = vector.broadcast %cst_311 : f32 to vector<8x256xf32>
    %663 = arith.mulf %662, %661 : vector<8x256xf32>
    %664 = math.tanh %663 : vector<8x256xf32>
    %cst_312 = arith.constant 5.000000e-01 : f32
    %665 = vector.broadcast %cst_312 : f32 to vector<8x256xf32>
    %666 = arith.mulf %665, %664 : vector<8x256xf32>
    %cst_313 = arith.constant 5.000000e-01 : f32
    %667 = vector.broadcast %cst_313 : f32 to vector<8x256xf32>
    %668 = arith.addf %666, %667 : vector<8x256xf32>
    %669 = vector.extract_strided_slice %660 {offsets = [0, 256], sizes = [8, 256], strides = [1, 1]} : vector<8x1024xf32> to vector<8x256xf32>
    %cst_314 = arith.constant 5.000000e-01 : f32
    %670 = vector.broadcast %cst_314 : f32 to vector<8x256xf32>
    %671 = arith.mulf %670, %669 : vector<8x256xf32>
    %672 = math.tanh %671 : vector<8x256xf32>
    %cst_315 = arith.constant 5.000000e-01 : f32
    %673 = vector.broadcast %cst_315 : f32 to vector<8x256xf32>
    %674 = arith.mulf %673, %672 : vector<8x256xf32>
    %cst_316 = arith.constant 5.000000e-01 : f32
    %675 = vector.broadcast %cst_316 : f32 to vector<8x256xf32>
    %676 = arith.addf %674, %675 : vector<8x256xf32>
    %677 = vector.extract_strided_slice %660 {offsets = [0, 512], sizes = [8, 256], strides = [1, 1]} : vector<8x1024xf32> to vector<8x256xf32>
    %678 = math.tanh %677 : vector<8x256xf32>
    %679 = vector.extract_strided_slice %660 {offsets = [0, 768], sizes = [8, 256], strides = [1, 1]} : vector<8x1024xf32> to vector<8x256xf32>
    %cst_317 = arith.constant 5.000000e-01 : f32
    %680 = vector.broadcast %cst_317 : f32 to vector<8x256xf32>
    %681 = arith.mulf %680, %679 : vector<8x256xf32>
    %682 = math.tanh %681 : vector<8x256xf32>
    %cst_318 = arith.constant 5.000000e-01 : f32
    %683 = vector.broadcast %cst_318 : f32 to vector<8x256xf32>
    %684 = arith.mulf %683, %682 : vector<8x256xf32>
    %cst_319 = arith.constant 5.000000e-01 : f32
    %685 = vector.broadcast %cst_319 : f32 to vector<8x256xf32>
    %686 = arith.addf %684, %685 : vector<8x256xf32>
    %687 = arith.mulf %676, %653 : vector<8x256xf32>
    %688 = arith.mulf %668, %678 : vector<8x256xf32>
    %689 = arith.addf %687, %688 : vector<8x256xf32>
    %690 = math.tanh %689 : vector<8x256xf32>
    %691 = arith.mulf %686, %690 : vector<8x256xf32>
    %c1_i32_320 = arith.constant 1 : i32
    %692 = tpu.memref_slice %arg17[%c1_i32_320] : memref<2x!tpu.dma_semaphore, #tpu.memory_space<semaphore_mem>> -> memref<1x!tpu.dma_semaphore, #tpu.memory_space<semaphore_mem>>
    %693 = tpu.memref_squeeze %692 : memref<1x!tpu.dma_semaphore, #tpu.memory_space<semaphore_mem>> -> memref<!tpu.dma_semaphore, #tpu.memory_space<semaphore_mem>>
    tpu.wait_dma2 semaphore(%693 : memref<!tpu.dma_semaphore, #tpu.memory_space<semaphore_mem>>) src(%arg6 : memref<256x128xbf16, #tpu.memory_space<any>>) dst(%arg16 : memref<256x128xbf16, #tpu.memory_space<vmem>>)
    %694 = arith.truncf %691 : vector<8x256xf32> to vector<8x256xbf16>
    %c0_321 = arith.constant 0 : index
    %c0_322 = arith.constant 0 : index
    %695 = vector.load %arg16[%c0_321, %c0_322] : memref<256x128xbf16, #tpu.memory_space<vmem>>, vector<256x128xbf16>
    %cst_323 = arith.constant dense<0.000000e+00> : vector<8x128xf32>
    %696 = tpu.matmul %694, %695, %cst_323 {dimension_numbers = #tpu.dot_dimension_numbers<[1], [0], [0], [1], [0, 0, 1, 1], [], []>} : vector<8x256xbf16>, vector<256x128xbf16>, vector<8x128xf32> -> vector<8x128xf32>
    %c0_324 = arith.constant 0 : index
    %c0_325 = arith.constant 0 : index
    %697 = vector.load %arg7[%c0_324, %c0_325] : memref<1x128xf32, #tpu.memory_space<vmem>>, vector<1x128xf32>
    %698 = vector.broadcast %697 : vector<1x128xf32> to vector<8x128xf32>
    %699 = arith.addf %696, %698 : vector<8x128xf32>
    %c0_326 = arith.constant 0 : index
    %c0_327 = arith.constant 0 : index
    %700 = vector.load %arg10[%c0_326, %c0_327] : memref<8x128xf32, #tpu.memory_space<vmem>>, vector<8x128xf32>
    tpu.vector_store %arg10[%c0_326, %c0_327], %699 {strides = array<i32>} : memref<8x128xf32, #tpu.memory_space<vmem>>, vector<8x128xf32>,
    %c0_328 = arith.constant 0 : index
    %c0_329 = arith.constant 0 : index
    %701 = vector.load %arg11[%c0_328, %c0_329] : memref<8x256xf32, #tpu.memory_space<vmem>>, vector<8x256xf32>
    tpu.vector_store %arg11[%c0_328, %c0_329], %691 {strides = array<i32>} : memref<8x256xf32, #tpu.memory_space<vmem>>, vector<8x256xf32>,
    %c0_330 = arith.constant 0 : index
    %c0_331 = arith.constant 0 : index
    %702 = vector.load %arg12[%c0_330, %c0_331] : memref<8x256xf32, #tpu.memory_space<vmem>>, vector<8x256xf32>
    tpu.vector_store %arg12[%c0_330, %c0_331], %689 {strides = array<i32>} : memref<8x256xf32, #tpu.memory_space<vmem>>, vector<8x256xf32>,
    return
  }
  func.func @transform_0(%arg0: i32, %arg1: memref<4x8xi32, #tpu.memory_space<smem>>) -> (i32, i32) {
    %c0_i32 = arith.constant 0 : i32
    %c0_i32_0 = arith.constant 0 : i32
    %c0_i32_1 = arith.constant 0 : i32
    return %c0_i32, %c0_i32_0 : i32, i32
  }
  func.func @transform_1(%arg0: i32, %arg1: memref<4x8xi32, #tpu.memory_space<smem>>) -> (i32, i32) {
    %c0_i32 = arith.constant 0 : i32
    %c0_i32_0 = arith.constant 0 : i32
    %c0_i32_1 = arith.constant 0 : i32
    return %c0_i32, %c0_i32_0 : i32, i32
  }
  func.func @transform_2(%arg0: i32, %arg1: memref<4x8xi32, #tpu.memory_space<smem>>) -> (i32, i32) {
    %c0_i32 = arith.constant 0 : i32
    %c0_i32_0 = arith.constant 0 : i32
    %c0_i32_1 = arith.constant 0 : i32
    return %c0_i32, %c0_i32_0 : i32, i32
  }
  func.func @transform_5(%arg0: i32, %arg1: memref<4x8xi32, #tpu.memory_space<smem>>) -> (i32, i32) {
    %c0_i32 = arith.constant 0 : i32
    %c0_i32_0 = arith.constant 0 : i32
    %c0_i32_1 = arith.constant 0 : i32
    return %c0_i32, %c0_i32_0 : i32, i32
  }
  func.func @transform_6(%arg0: i32, %arg1: memref<4x8xi32, #tpu.memory_space<smem>>) -> (i32, i32) {
    %c0_i32 = arith.constant 0 : i32
    %c0_i32_0 = arith.constant 0 : i32
    %c0_i32_1 = arith.constant 0 : i32
    return %c0_i32, %c0_i32_0 : i32, i32
  }
  func.func @transform_7(%arg0: i32, %arg1: memref<4x8xi32, #tpu.memory_space<smem>>) -> (i32, i32) {
    %c0_i32 = arith.constant 0 : i32
    %c0_i32_0 = arith.constant 0 : i32
    %c0_i32_1 = arith.constant 0 : i32
    return %c0_i32, %c0_i32_0 : i32, i32
  }
  func.func @transform_8(%arg0: i32, %arg1: memref<4x8xi32, #tpu.memory_space<smem>>) -> (i32, i32) {
    %c0_i32 = arith.constant 0 : i32
    %c0_i32_0 = arith.constant 0 : i32
    %c0_i32_1 = arith.constant 0 : i32
    return %c0_i32, %c0_i32_0 : i32, i32
  }
  func.func @transform_9(%arg0: i32, %arg1: memref<4x8xi32, #tpu.memory_space<smem>>) -> (i32, i32) {
    %c0_i32 = arith.constant 0 : i32
    %c0_i32_0 = arith.constant 0 : i32
    %c0_i32_1 = arith.constant 0 : i32
    return %c0_i32, %c0_i32_0 : i32, i32
  }
  func.func @transform_10(%arg0: i32, %arg1: memref<4x8xi32, #tpu.memory_space<smem>>) -> (i32, i32) {
    %c0_i32 = arith.constant 0 : i32
    %c0_i32_0 = arith.constant 0 : i32
    %c0_i32_1 = arith.constant 0 : i32
    return %c0_i32, %c0_i32_0 : i32, i32
  }
}

</mosaic_0001>

<bundles_post_ra>
// kernel: lstm_shakespeare_forward.1
= control target key start
LH: loop header
LB: loop body
LE: loop exit
PB: predicated region body
PF: predicated region fallthrough
CT: control target
= control target key end

     0   :  { %s6675_s0 = inlined_call_operand.vmem [shape: s32[4,8], index: 0, kind: input, shape index: {}]   ;;  %s6676_s1 = inlined_call_operand.vmem [shape: bf16[128,64], index: 1, kind: input, shape index: {}]   ;;  %s6677_s2 = inlined_call_operand.hbm [shape: bf16[64,1024], index: 2, kind: input, shape index: {}]   ;;  %s6678_s3 = inlined_call_operand.vmem [shape: f32[1,1024], index: 3, kind: input, shape index: {}]   ;;  %s6679_s4 = inlined_call_operand.hbm [shape: bf16[256,1024], index: 4, kind: input, shape index: {}]   ;;  %s6680_s5 = inlined_call_operand.vmem [shape: bf16[256,128], index: 5, kind: input, shape index: {}]   ;;  %s6681_s6 = inlined_call_operand.vmem [shape: f32[1,128], index: 6, kind: input, shape index: {}]   ;;  %s6682_s7 = inlined_call_operand.vmem [shape: f32[8,256], index: 7, kind: input, shape index: {}, may-alias: {7,8}]   ;;  %s6683_s8 = inlined_call_operand.vmem [shape: f32[8,256], index: 8, kind: input, shape index: {}, may-alias: {7,8}]   ;;  %s6684_s9 = inlined_call_operand.vmem [shape: f32[8,128], index: 9, kind: output, shape index: {0}]   ;;  %s6685_s10 = inlined_call_operand.vmem [shape: f32[8,256], index: 10, kind: output, shape index: {1}]   ;;  %s6686_s11 = inlined_call_operand.vmem [shape: f32[8,256], index: 11, kind: output, shape index: {2}]  }
   0x1   :  { %s17_s19 = sshll.u32 %s6675_s0, 4  ;;  %s18_s19 = int_to_ptr.vmem [resolvable:$true] %s17_s19 }
   0x2   :  { %s3964_s20 = scalar_lea.vmem %s18_s19, 64  ;;  %p3969_p1 = scmp.lt.s32.totalorder %s18_s19, %s18_s19 }
   0x3   :  { %p3965_p0 = scmp.ne.s32.totalorder %s18_s19, %s3964_s20  ;;  %p3970_p2 = scmp.lt.s32.totalorder %s3964_s20, %s3964_s20 }
   0x5   :  { %p3971_p3 = por %p3970_p2, %p3969_p1 }
   0x7   :  { %p3972_p4 = pnand %p3971_p3, %p3965_p0 }
   0x9   :  { %3975 = shalt.err (!%p3972_p4)  }
   0xa   :  { %s4006_s21 = smov [#allocation8]  }
   0xb   :  { %20 = dma.vmem_to_smem %s18_s19, 64, %s4006_s21, [#allocation7] }
   0xc   :  { %3998 = dma.done.wait [#allocation7], 64 }
   0xd   :  { %3999 = vsyncadd [#allocation7], 4294967232 }
   0xe   :  { %22 = sfence }
   0xf   :  { %23 = vsyncpa [#allocation10], 0  ;;  %s4007_s22 = smov [#allocation9]   ;;  %s3976_s0 = scalar_lea.hbm %s6677_s2, 4096 }
  0x10   :  { %s31_s23 = sshll.u32 %s4007_s22, 4  ;;  %p3977_p5 = scmp.ne.s32.totalorder %s6677_s2, %s3976_s0  ;;  %s32_s23 = int_to_ptr.vmem [resolvable:$true] %s31_s23 }
  0x11   :  { %p3980_p6 = scmp.lt.u32.totalorder %s3976_s0, %s6677_s2 }
  0x13   :  { %p3982_p7 = pnand %p3980_p6, %p3977_p5 }
  0x15   :  { %3985 = shalt.err (!%p3982_p7)
}
  0x16   :  { %s3986_s30 = scalar_lea.vmem %s32_s23, 4096  ;;  %p3991_p9 = scmp.lt.s32.totalorder %s32_s23, %s32_s23 }
  0x17   :  { %p3987_p8 = scmp.ne.s32.totalorder %s32_s23, %s3986_s30  ;;  %p3992_p10 = scmp.lt.s32.totalorder %s3986_s30, %s3986_s30 }
  0x19   :  { %p3993_p11 = por %p3992_p10, %p3991_p9 }
  0x1b   :  { %p3994_p12 = pnand %p3993_p11, %p3987_p8 }
  0x1d   :  { %3997 = shalt.err (!%p3994_p12)
}
  0x1e   :  { %s4008_s12 = smov 512   ;;  %s4009_s13 = smov 32  }
  0x1f   :  { %37 = dma.hbm_to_vmem [thread:$0]  %s6677_s2, 4096, %s32_s23, [#allocation10], %s4008_s12, %s4008_s12, %s4009_s13  }
  0x20   :  { %4000 = dma.done.wait [#allocation10], 4096  }
  0x21   :  { %4001 = vsyncadd [#allocation10], 4294963200  ;;  %s54_s16 = sld [smem:[#allocation0]]   ;;  %s4010_s17 = smov 1024  }
  0x22   :  { %66 = sst [smem:[#allocation12]] %s4010_s17  ;;  %s4011_s18 = smov 8  }
  0x23   :  { %68 = sst [smem:[#allocation12 + $0x1]] %s4010_s17  ;;  %s4012_s19 = smov 64  }
  0x24   :  { %70 = sst [smem:[#allocation12 + $0x2]] %s4011_s18  ;;  %s4013_s20 = smov 128  }
  0x25   :  { %72 = sst [smem:[#allocation12 + $0x3]] %s4012_s19  ;;  %s4014_s21 = smov 2  }
  0x26   :  { %74 = sst [smem:[#allocation12 + $0x4]] %s4013_s20  ;;  %s4015_s25 = smov 4  }
  0x27   :  { %76 = sst [smem:[#allocation12 + $0x5]] %s4014_s21  ;;  %s3279_s22 = sshll.u32 %s54_s16, 26 }
  0x28   :  { %78 = sst [smem:[#allocation12 + $0x6]] %s4008_s12  ;;  %s3280_s24 = sadd.s32 134217728, %s3279_s22 }
  0x29   :  { %80 = sst [smem:[#allocation12 + $0x7]] %s4012_s19  ;;  %s4016_s2 = smov [#allocation4]  }
  0x2a   :  { %82 = sst [smem:[#allocation12 + $0x8]] %s4015_s25  ;;  %s62_s23 = sshll.u32 %s4016_s2, 4  ;;  %s63_s23 = int_to_ptr.vmem [resolvable:$true] %s62_s23 }
  0x2b   :  { %s4017_s0 = smov [#allocation6]   ;;  %s4018_s26 = smov [#allocation11]  }
  0x2c   :  { %84 = dma.general %s6679_s4, 16384, %s63_s23, %s4017_s0, %s4018_s26, [#allocation12], %s3280_s24, 0  }
  0x2d   :  { %v4102_v0 = vld [vmem:[%s6680_s5] sm:$0xff]  ;;  %v4107_v1 = vld [vmem:[%s6680_s5 + $0x8] sm:$0xff]  ;;  %v4112_v2 = vld [vmem:[%s6680_s5 + $0x10] sm:$0xff] }
  0x2e   :  { %7066 = vst [vmem:[#allocation18_spill] sm:$0xff] %v4102_v0  ;;  %7067 = vst [vmem:[#allocation19_spill] sm:$0xff] %v4107_v1  ;;  %v4117_v3 = vld [vmem:[%s6680_s5 + $0x18] sm:$0xff]  ;;  %v4122_v4 = vld [vmem:[%s6680_s5 + $0x20] sm:$0xff] }
  0x2f   :  { %7068 = vst [vmem:[#allocation20_spill] sm:$0xff] %v4112_v2  ;;  %7069 = vst [vmem:[#allocation21_spill] sm:$0xff] %v4117_v3  ;;  %v4127_v5 = vld [vmem:[%s6680_s5 + $0x28] sm:$0xff]  ;;  %v4132_v6 = vld [vmem:[%s6680_s5 + $0x30] sm:$0xff] }
  0x30   :  { %7070 = vst [vmem:[#allocation22_spill] sm:$0xff] %v4122_v4  ;;  %7071 = vst [vmem:[#allocation23_spill] sm:$0xff] %v4127_v5  ;;  %v4137_v7 = vld [vmem:[%s6680_s5 + $0x38] sm:$0xff]  ;;  %v4142_v8 = vld [vmem:[%s6680_s5 + $0x40] sm:$0xff] }
  0x31   :  { %7072 = vst [vmem:[#allocation24_spill] sm:$0xff] %v4132_v6  ;;  %7073 = vst [vmem:[#allocation25_spill] sm:$0xff] %v4137_v7  ;;  %v4147_v9 = vld [vmem:[%s6680_s5 + $0x48] sm:$0xff]  ;;  %v4152_v10 = vld [vmem:[%s6680_s5 + $0x50] sm:$0xff] }
  0x32   :  { %7074 = vst [vmem:[#allocation26_spill] sm:$0xff] %v4142_v8  ;;  %7075 = vst [vmem:[#allocation27_spill] sm:$0xff] %v4147_v9  ;;  %v4157_v11 = vld [vmem:[%s6680_s5 + $0x58] sm:$0xff]  ;;  %v4162_v12 = vld [vmem:[%s6680_s5 + $0x60] sm:$0xff] }
  0x33   :  { %7076 = vst [vmem:[#allocation28_spill] sm:$0xff] %v4152_v10  ;;  %7077 = vst [vmem:[#allocation29_spill] sm:$0xff] %v4157_v11  ;;  %v4167_v13 = vld [vmem:[%s6680_s5 + $0x68] sm:$0xff]  ;;  %v4172_v14 = vld [vmem:[%s6680_s5 + $0x70] sm:$0xff] }
  0x34   :  { %7078 = vst [vmem:[#allocation30_spill] sm:$0xff] %v4162_v12  ;;  %7079 = vst [vmem:[#allocation31_spill] sm:$0xff] %v4167_v13  ;;  %v4177_v15 = vld [vmem:[%s6680_s5 + $0x78] sm:$0xff] }
  0x35   :  { %7080 = vst [vmem:[#allocation32_spill] sm:$0xff] %v4172_v14  ;;  %7081 = vst [vmem:[#allocation33_spill] sm:$0xff] %v4177_v15 }
  0x36   :  { %157 = vsyncadd [#allocation6 + $0x1], 2048  ;;  %v3540_v16 = vld [vmem:[%s6676_s1] sm:$0xff]   ;;  %v3541_v17 = vld [vmem:[%s6676_s1 + $0x8] sm:$0xff]   ;;  %v158_v18 = vlaneseq  ;;  %s4194_s23 = sld [smem:[#allocation8]]  ;;  %s4204_s28 = sld [smem:[#allocation8 + $0x1]] }
  0x37   :  { %3501 = vmatprep.subr.bf16.mxu0 %v3540_v16  ;;  %v3542_v19 = vld [vmem:[%s6676_s1 + $0x10] sm:$0xff]   ;;  %v3543_v21 = vld [vmem:[%s6676_s1 + $0x18] sm:$0xff]   ;;  %s4196_s0 = sld [smem:[#allocation8 + $0x80]]  ;;  %v689_v22 = vld [vmem:[#allocation9] sm:$0xff]  ;;  %s4206_s29 = sld [smem:[#allocation8 + $0x81]]  ;;  %v4019_v47 = vmov 0.0  }
  0x38   :  { %3502 = vmatpush3.bf16.msra.mxu0 %v3540_v16  ;;  %v4189_v20 = vand.u32 127, %v158_v18  ;;  %s4198_s26 = sld [smem:[#allocation8 + $0x100]]  ;;  %v693_v23 = vld [vmem:[#allocation9 + $0x20] sm:$0xff]  ;;  %v4202_v24 = vld [vmem:[#allocation9 + $0x8] sm:$0xff]  ;;  %s4210_s30 = sld [smem:[#allocation8 + $0x101]]  ;;  %v4293_v63 = vld [vmem:[%s6676_s1 + $0x30] sm:$0xff]  }
  0x39   :  { %3503 = vmatprep.subr.bf16.mxu0 %v3541_v17  ;;  %s4200_s27 = sld [smem:[#allocation8 + $0x180]]  ;;  %v3417_v25 = vcombine.high %v689_v22, %v693_v23  ;;  %v4208_v26 = vld [vmem:[#allocation9 + $0x28] sm:$0xff]  ;;  %v3416_v27 = vcombine.low %v689_v22, %v693_v23  ;;  %v697_v28 = vld [vmem:[#allocation9 + $0x40] sm:$0xff]  ;;  %s4212_s13 = sld [smem:[#allocation8 + $0x181]] }
  0x3a   :  { %v701_v29 = vld [vmem:[#allocation9 + $0x60] sm:$0xff]  ;;  %v4214_v30 = vld [vmem:[#allocation9 + $0x48] sm:$0xff]  ;;  %s4216_s12 = sld [smem:[#allocation8 + $0x2]]  ;;  %v3418_v31 = vcombine.low %v4202_v24, %v4208_v26  ;;  %v3419_v32 = vcombine.high %v4202_v24, %v4208_v26  ;;  %s4251_s18 = sld [smem:[#allocation8 + $0x3]] }
  0x3b   :  { %s4218_s14 = sld [smem:[#allocation8 + $0x82]]  ;;  %936 = vmatprep.subr.bf16.mxu1 %v3417_v25  ;;  %v3425_v33 = vcombine.high %v697_v28, %v701_v29  ;;  %v4224_v34 = vld [vmem:[#allocation9 + $0x68] sm:$0xff]  ;;  %v4226_v35 = vld [vmem:[#allocation9 + $0x80] sm:$0xff]  ;;  %v3424_v39 = vcombine.low %v697_v28, %v701_v29  ;;  %s4253_s19 = sld [smem:[#allocation8 + $0x83]]  ;;  %v4321_v28 = vld [vmem:[%s6676_s1 + $0x38] sm:$0xff]  }
  0x3c   :  { %3504 = vmatpush3.bf16.msra.mxu0 %v3541_v17  ;;  %v3544_v36 = vld [vmem:[%s6676_s1 + $0x20] sm:$0xff]   ;;  %s4231_s17 = sld [smem:[#allocation8 + $0x102]]  ;;  %937 = vmatpush1.bf16.msra.mxu1 %v3416_v27  ;;  %v3426_v37 = vcombine.low %v4214_v30, %v4224_v34  ;;  %v3427_v38 = vcombine.high %v4214_v30, %v4224_v34  ;;  %v161_v41 = vstv %s4194_s23  ;;  %s4259_s20 = sld [smem:[#allocation8 + $0x103]]  ;;  %v3545_v50 = vld [vmem:[%s6676_s1 + $0x28] sm:$0xff]   ;;  %v209_v53 = vstv %s4204_s28  ;;  %v691_v30 = vld [vmem:[#allocation9 + $0x10] sm:$0xff] }
  0x3d   :  { %3505 = vmatprep.subr.bf16.mxu0 %v3542_v19  ;;  %s4233_s4 = sld [smem:[#allocation8 + $0x182]]  ;;  %v4239_v40 = vld [vmem:[#allocation9 + $0xa0] sm:$0xff]  ;;  %v167_v42 = vstv %s4196_s0  ;;  %938 = vmatprep.subr.bf16.mxu1 %v3425_v33  ;;  %vm162_vm0 = vcmp.eq.s32.totalorder %v4189_v20, %v161_v41  ;;  %s4261_s21 = sld [smem:[#allocation8 + $0x183]]  ;;  %v215_v54 = vstv %s4206_s29  ;;  %vm210_vm4 = vcmp.eq.s32.totalorder %v4189_v20, %v209_v53  ;;  %v695_v34 = vld [vmem:[#allocation9 + $0x30] sm:$0xff] }
  0x3e   :  { %v3433_v43 = vcombine.high %v4226_v35, %v4239_v40  ;;  %v3432_v44 = vcombine.low %v4226_v35, %v4239_v40  ;;  %vm168_vm1 = vcmp.eq.s32.totalorder %v4189_v20, %v167_v42  ;;  %v173_v45 = vstv %s4198_s26  ;;  %s4274_s25 = sld [smem:[#allocation8 + $0x4]]  ;;  %s4301_s28 = sld [smem:[#allocation8 + $0x85]] }
  0x3f   :  { %v179_v46 = vstv %s4200_s27  ;;  %v3281_v48 = vsel %vm162_vm0, 1.0, %v4019_v47  ;;  %v3283_v49 = vsel %vm168_vm1, 1.0, %v4019_v47  ;;  %vm174_vm2 = vcmp.eq.s32.totalorder %v4189_v20, %v173_v45  ;;  %s4276_s5 = sld [smem:[#allocation8 + $0x84]]  ;;  %s4299_s27 = sld [smem:[#allocation8 + $0x5]] }
  0x40   :  { %3506 = vmatpush3.bf16.msra.mxu0 %v3542_v19  ;;  %vm180_vm3 = vcmp.eq.s32.totalorder %v4189_v20, %v179_v46  ;;  %165 = vst [vmem:[#allocation2] sm:$0x1] %v3281_v48  ;;  %171 = vst [vmem:[#allocation2 + $0x1] sm:$0x1] %v3283_v49  ;;  %v3285_v51 = vsel %vm174_vm2, 1.0, %v4019_v47  ;;  %939 = vmatpush1.bf16.msra.mxu1 %v3424_v39  ;;  %vm216_vm5 = vcmp.eq.s32.totalorder %v4189_v20, %v215_v54  ;;  %s4282_s2 = sld [smem:[#allocation8 + $0x104]] }
  0x41   :  { %3507 = vmatprep.subr.bf16.mxu0 %v3543_v21  ;;  %v3287_v52 = vsel %vm180_vm3, 1.0, %v4019_v47  ;;  %177 = vst [vmem:[#allocation2 + $0x2] sm:$0x1] %v3285_v51  ;;  %v221_v55 = vstv %s4210_s30  ;;  %v227_v56 = vstv %s4212_s13  ;;  %940 = vmatprep.subr.bf16.mxu1 %v3433_v43  ;;  %v3297_v57 = vsel %vm210_vm4, 1.0, %v4019_v47  ;;  %s4284_s23 = sld [smem:[#allocation8 + $0x184]]  ;;  %s4310_s29 = sld [smem:[#allocation8 + $0x105]] }
  0x42   :  { %183 = vst [vmem:[#allocation2 + $0x3] sm:$0x1] %v3287_v52  ;;  %189 = vst [vmem:[#allocation2 + $0x4] sm:$0x1] %v3287_v52  ;;  %v3299_v58 = vsel %vm216_vm5, 1.0, %v4019_v47  ;;  %vm222_vm6 = vcmp.eq.s32.totalorder %v4189_v20, %v221_v55  ;;  %vm228_vm7 = vcmp.eq.s32.totalorder %v4189_v20, %v227_v56  ;;  %v257_v61 = vstv %s4216_s12  ;;  %s4312_s30 = sld [smem:[#allocation8 + $0x185]] }
  0x43   :  { %195 = vst [vmem:[#allocation2 + $0x5] sm:$0x1] %v3287_v52  ;;  %201 = vst [vmem:[#allocation2 + $0x6] sm:$0x1] %v3287_v52  ;;  %v3301_v59 = vsel %vm222_vm6, 1.0, %v4019_v47  ;;  %v3303_v60 = vsel %vm228_vm7, 1.0, %v4019_v47  ;;  %v263_v62 = vstv %s4218_s14  ;;  %vm258_vm8 = vcmp.eq.s32.totalorder %v4189_v20, %v257_v61 }
  0x44   :  { %3508 = vmatpush3.bf16.msra.mxu0 %v3543_v21  ;;  %207 = vst [vmem:[#allocation2 + $0x7] sm:$0x1] %v3287_v52  ;;  %213 = vst [vmem:[#allocation2 + $0x8] sm:$0x1] %v3297_v57  ;;  %vm264_vm9 = vcmp.eq.s32.totalorder %v4189_v20, %v263_v62  ;;  %v269_v16 = vstv %s4231_s17  ;;  %v275_v17 = vstv %s4233_s4  ;;  %941 = vmatpush1.bf16.msra.mxu1 %v3432_v44  ;;  %v3313_v19 = vsel %vm258_vm8, 1.0, %v4019_v47  ;;  %s4327_s14 = sld [smem:[#allocation8 + $0x6]] }
  0x45   :  { %3509 = vmatprep.subr.bf16.mxu0 %v3544_v36  ;;  %219 = vst [vmem:[#allocation2 + $0x9] sm:$0x1] %v3299_v58  ;;  %225 = vst [vmem:[#allocation2 + $0xa] sm:$0x1] %v3301_v59  ;;  %v3315_v21 = vsel %vm264_vm9, 1.0, %v4019_v47  ;;  %vm270_vm10 = vcmp.eq.s32.totalorder %v4189_v20, %v269_v16  ;;  %vm276_vm11 = vcmp.eq.s32.totalorder %v4189_v20, %v275_v17  ;;  %v305_v25 = vstv %s4251_s18  ;;  %s4329_s15 = sld [smem:[#allocation8 + $0x86]] }
  0x46   :  { %231 = vst [vmem:[#allocation2 + $0xb] sm:$0x1] %v3303_v60  ;;  %237 = vst [vmem:[#allocation2 + $0xc] sm:$0x1] %v3303_v60  ;;  %v3317_v22 = vsel %vm270_vm10, 1.0, %v4019_v47  ;;  %v3319_v23 = vsel %vm276_vm11, 1.0, %v4019_v47  ;;  %v311_v27 = vstv %s4253_s19  ;;  %vm306_vm12 = vcmp.eq.s32.totalorder %v4189_v20, %v305_v25 }
  0x47   :  { %243 = vst [vmem:[#allocation2 + $0xd] sm:$0x1] %v3303_v60  ;;  %249 = vst [vmem:[#allocation2 + $0xe] sm:$0x1] %v3303_v60  ;;  %vm312_vm13 = vcmp.eq.s32.totalorder %v4189_v20, %v311_v27  ;;  %v317_v29 = vstv %s4259_s20  ;;  %v323_v33 = vstv %s4261_s21  ;;  %v3329_v35 = vsel %vm306_vm12, 1.0, %v4019_v47  ;;  %s4336_s1 = sld [smem:[#allocation8 + $0x106]] }
  0x48   :  { %3510 = vmatpush3.bf16.msra.mxu0 %v3544_v36  ;;  %255 = vst [vmem:[#allocation2 + $0xf] sm:$0x1] %v3303_v60  ;;  %261 = vst [vmem:[#allocation2 + $0x10] sm:$0x1] %v3313_v19  ;;  %v3331_v36 = vsel %vm312_vm13, 1.0, %v4019_v47  ;;  %vm318_vm14 = vcmp.eq.s32.totalorder %v4189_v20, %v317_v29  ;;  %vm324_vm15 = vcmp.eq.s32.totalorder %v4189_v20, %v323_v33  ;;  %s4338_s16 = sld [smem:[#allocation8 + $0x186]]  ;;  %v353_v42 = vstv %s4274_s25 }
  0x49   :  { %3511 = vmatprep.subr.bf16.mxu0 %v3545_v50  ;;  %267 = vst [vmem:[#allocation2 + $0x11] sm:$0x1] %v3315_v21  ;;  %273 = vst [vmem:[#allocation2 + $0x12] sm:$0x1] %v3317_v22  ;;  %v3333_v40 = vsel %vm318_vm14, 1.0, %v4019_v47  ;;  %v3335_v41 = vsel %vm324_vm15, 1.0, %v4019_v47  ;;  %v359_v43 = vstv %s4276_s5  ;;  %vm354_vm0 = vcmp.eq.s32.totalorder %v4189_v20, %v353_v42 }
  0x4a   :  { %279 = vst [vmem:[#allocation2 + $0x13] sm:$0x1] %v3319_v23  ;;  %285 = vst [vmem:[#allocation2 + $0x14] sm:$0x1] %v3319_v23  ;;  %s4344_s17 = sld [smem:[#allocation8 + $0x7]]  ;;  %vm360_vm1 = vcmp.eq.s32.totalorder %v4189_v20, %v359_v43  ;;  %v365_v44 = vstv %s4282_s2  ;;  %v371_v45 = vstv %s4284_s23  ;;  %v3345_v48 = vsel %vm354_vm0, 1.0, %v4019_v47 }
  0x4b   :  { %291 = vst [vmem:[#allocation2 + $0x15] sm:$0x1] %v3319_v23  ;;  %297 = vst [vmem:[#allocation2 + $0x16] sm:$0x1] %v3319_v23  ;;  %v544_v39 = vld [vmem:[#allocation2] sm:$0xff]  ;;  %s4350_s4 = sld [smem:[#allocation8 + $0x87]]  ;;  %vm366_vm2 = vcmp.eq.s32.totalorder %v4189_v20, %v365_v44  ;;  %vm372_vm3 = vcmp.eq.s32.totalorder %v4189_v20, %v371_v45  ;;  %v401_v53 = vstv %s4299_s27  ;;  %v407_v54 = vstv %s4301_s28 }
  0x4c   :  { %3512 = vmatpush3.bf16.msra.mxu0 %v3545_v50  ;;  %303 = vst [vmem:[#allocation2 + $0x17] sm:$0x1] %v3319_v23  ;;  %309 = vst [vmem:[#allocation2 + $0x18] sm:$0x1] %v3329_v35  ;;  %s4352_s18 = sld [smem:[#allocation8 + $0x107]]  ;;  %v3347_v49 = vsel %vm360_vm1, 1.0, %v4019_v47  ;;  %vm402_vm4 = vcmp.eq.s32.totalorder %v4189_v20, %v401_v53  ;;  %v413_v55 = vstv %s4310_s29  ;;  %v419_v56 = vstv %s4312_s30 }
  0x4d   :  { %3513 = vmatprep.subr.bf16.mxu0 %v4293_v63  ;;  %315 = vst [vmem:[#allocation2 + $0x19] sm:$0x1] %v3331_v36  ;;  %321 = vst [vmem:[#allocation2 + $0x1a] sm:$0x1] %v3333_v40  ;;  %s4359_s19 = sld [smem:[#allocation8 + $0x187]]  ;;  %v3349_v51 = vsel %vm366_vm2, 1.0, %v4019_v47  ;;  %vm408_vm5 = vcmp.eq.s32.totalorder %v4189_v20, %v407_v54  ;;  %vm414_vm6 = vcmp.eq.s32.totalorder %v4189_v20, %v413_v55  ;;  %v449_v62 = vstv %s4327_s14 }
  0x4e   :  { %327 = vst [vmem:[#allocation2 + $0x1b] sm:$0x1] %v3335_v41  ;;  %333 = vst [vmem:[#allocation2 + $0x1c] sm:$0x1] %v3335_v41  ;;  %v3351_v52 = vsel %vm372_vm3, 1.0, %v4019_v47  ;;  %v3361_v57 = vsel %vm402_vm4, 1.0, %v4019_v47  ;;  %vm420_vm7 = vcmp.eq.s32.totalorder %v4189_v20, %v419_v56  ;;  %vm450_vm8 = vcmp.eq.s32.totalorder %v4189_v20, %v449_v62 }
  0x4f   :  { %339 = vst [vmem:[#allocation2 + $0x1d] sm:$0x1] %v3335_v41  ;;  %345 = vst [vmem:[#allocation2 + $0x1e] sm:$0x1] %v3335_v41  ;;  %v545_v46 = vld [vmem:[#allocation2 + $0x8] sm:$0xff]  ;;  %v3363_v59 = vsel %vm408_vm5, 1.0, %v4019_v47  ;;  %v461_v16 = vstv %s4336_s1  ;;  %v467_v17 = vstv %s4338_s16  ;;  %v3420_v55 = vcombine.low %v691_v30, %v695_v34 }
  0x50   :  { %351 = vst [vmem:[#allocation2 + $0x1f] sm:$0x1] %v3335_v41  ;;  %3514 = vmatpush3.bf16.msra.mxu0 %v4293_v63  ;;  %v552_v50 = vpack.c.bf16 %v545_v46, %v544_v39  ;;  %357 = vst [vmem:[#allocation2 + $0x20] sm:$0x1] %v3345_v48  ;;  %v3365_v60 = vsel %vm414_vm6, 1.0, %v4019_v47  ;;  %v3367_v61 = vsel %vm420_vm7, 1.0, %v4019_v47  ;;  %v455_v63 = vstv %s4329_s15 }
  0x51   :  { %3515 = vmatprep.subr.bf16.mxu0 %v4321_v28  ;;  %363 = vst [vmem:[#allocation2 + $0x21] sm:$0x1] %v3347_v49  ;;  %369 = vst [vmem:[#allocation2 + $0x22] sm:$0x1] %v3349_v51  ;;  %v3377_v21 = vsel %vm450_vm8, 1.0, %v4019_v47  ;;  %vm456_vm9 = vcmp.eq.s32.totalorder %v4189_v20, %v455_v63  ;;  %vm462_vm10 = vcmp.eq.s32.totalorder %v4189_v20, %v461_v16  ;;  %v497_v27 = vstv %s4344_s17  ;;  %v706_v35 = vld [vmem:[#allocation9 + $0x88] sm:$0xff] }
  0x52   :  { %375 = vst [vmem:[#allocation2 + $0x23] sm:$0x1] %v3351_v52  ;;  %381 = vst [vmem:[#allocation2 + $0x24] sm:$0x1] %v3351_v52  ;;  %3517 = vmatprep.mubr.bf16.mxu0 %v552_v50  ;;  %vm468_vm11 = vcmp.eq.s32.totalorder %v4189_v20, %v467_v17  ;;  %v3379_v23 = vsel %vm456_vm9, 1.0, %v4019_v47  ;;  %v3381_v25 = vsel %vm462_vm10, 1.0, %v4019_v47  ;;  %v509_v29 = vstv %s4352_s18 }
  0x53   :  { %387 = vst [vmem:[#allocation2 + $0x25] sm:$0x1] %v3351_v52  ;;  %393 = vst [vmem:[#allocation2 + $0x26] sm:$0x1] %v3351_v52  ;;  %v546_v58 = vld [vmem:[#allocation2 + $0x10] sm:$0xff]  ;;  %v515_v33 = vstv %s4359_s19  ;;  %v710_v36 = vld [vmem:[#allocation9 + $0xa8] sm:$0xff]  ;;  %vm498_vm12 = vcmp.eq.s32.totalorder %v4189_v20, %v497_v27  ;;  %vm510_vm14 = vcmp.eq.s32.totalorder %v4189_v20, %v509_v29  ;;  %v3421_v56 = vcombine.high %v691_v30, %v695_v34 }
  0x54   :  { %399 = vst [vmem:[#allocation2 + $0x27] sm:$0x1] %v3351_v52  ;;  %3516 = vmatpush3.bf16.msra.mxu0 %v4321_v28  ;;  %405 = vst [vmem:[#allocation2 + $0x28] sm:$0x1] %v3361_v57  ;;  %v503_v28 = vstv %s4350_s4  ;;  %vm516_vm15 = vcmp.eq.s32.totalorder %v4189_v20, %v515_v33  ;;  %v3393_v40 = vsel %vm498_vm12, 1.0, %v4019_v47  ;;  %v3397_v42 = vsel %vm510_vm14, 1.0, %v4019_v47 }
  0x55   :  { %411 = vst [vmem:[#allocation2 + $0x29] sm:$0x1] %v3363_v59  ;;  %417 = vst [vmem:[#allocation2 + $0x2a] sm:$0x1] %v3365_v60  ;;  %1009 = vmatprep.subr.bf16.mxu0 %v3419_v32  ;;  %v3383_v32 = vsel %vm468_vm11, 1.0, %v4019_v47  ;;  %vm504_vm13 = vcmp.eq.s32.totalorder %v4189_v20, %v503_v28  ;;  %v3399_v43 = vsel %vm516_vm15, 1.0, %v4019_v47  ;;  %v3435_v20 = vcombine.high %v706_v35, %v710_v36 }
  0x56   :  { %423 = vst [vmem:[#allocation2 + $0x2b] sm:$0x1] %v3367_v61  ;;  %429 = vst [vmem:[#allocation2 + $0x2c] sm:$0x1] %v3367_v61  ;;  %v3395_v41 = vsel %vm504_vm13, 1.0, %v4019_v47  ;;  %v3434_v24 = vcombine.low %v706_v35, %v710_v36  ;;  %v713_v46 = vld [vmem:[#allocation9 + $0xc0] sm:$0xff] }
  0x57   :  { %435 = vst [vmem:[#allocation2 + $0x2d] sm:$0x1] %v3367_v61  ;;  %441 = vst [vmem:[#allocation2 + $0x2e] sm:$0x1] %v3367_v61  ;;  %v547_v19 = vld [vmem:[#allocation2 + $0x18] sm:$0xff]  ;;  %v717_v48 = vld [vmem:[#allocation9 + $0xe0] sm:$0xff] }
  0x58   :  { %447 = vst [vmem:[#allocation2 + $0x2f] sm:$0x1] %v3367_v61  ;;  %v553_v22 = vpack.c.bf16 %v547_v19, %v546_v58  ;;  %453 = vst [vmem:[#allocation2 + $0x30] sm:$0x1] %v3377_v21  ;;  %v714_v49 = vld [vmem:[#allocation9 + $0xc8] sm:$0xff]  ;;  %v3441_v50 = vcombine.high %v713_v46, %v717_v48  ;;  %v3440_v53 = vcombine.low %v713_v46, %v717_v48  ;;  %v4020_v54 = vmov 0  }
  0x59   :  { %459 = vst [vmem:[#allocation2 + $0x31] sm:$0x1] %v3379_v23  ;;  %465 = vst [vmem:[#allocation2 + $0x32] sm:$0x1] %v3381_v25  ;;  %968 = vmatprep.mubr.bf16.mxu1 %v4020_v54  ;;  %v696_v57 = vld [vmem:[#allocation9 + $0x38] sm:$0xff]  ;;  %v699_v62 = vld [vmem:[#allocation9 + $0x50] sm:$0xff] }
  0x5a   :  { %471 = vst [vmem:[#allocation2 + $0x33] sm:$0x1] %v3383_v32  ;;  %477 = vst [vmem:[#allocation2 + $0x34] sm:$0x1] %v3383_v32  ;;  %3518 = vmatmul.mubr.bf16.vlgmr.msra.gmra.mrb[0].mxu0 %v553_v22  ;;  %942 = vmatprep.subr.bf16.mxu1 %v3441_v50  ;;  %v703_v16 = vld [vmem:[#allocation9 + $0x70] sm:$0xff]  ;;  %v700_v17 = vld [vmem:[#allocation9 + $0x58] sm:$0xff] }
  0x5b   :  { %483 = vst [vmem:[#allocation2 + $0x35] sm:$0x1] %v3383_v32  ;;  %489 = vst [vmem:[#allocation2 + $0x36] sm:$0x1] %v3383_v32  ;;  %v548_v39 = vld [vmem:[#allocation2 + $0x20] sm:$0xff]  ;;  %1010 = vmatpush1.bf16.msra.mxu0 %v3418_v31  ;;  %943 = vmatpush1.bf16.msra.mxu1 %v3440_v53  ;;  %v704_v19 = vld [vmem:[#allocation9 + $0x78] sm:$0xff]  ;;  %v3428_v35 = vcombine.low %v699_v62, %v703_v16 }
  0x5c   :  { %495 = vst [vmem:[#allocation2 + $0x37] sm:$0x1] %v3383_v32  ;;  %501 = vst [vmem:[#allocation2 + $0x38] sm:$0x1] %v3393_v40  ;;  %1011 = vmatprep.subr.bf16.mxu0 %v3427_v38  ;;  %v718_v38 = vld [vmem:[#allocation9 + $0xe8] sm:$0xff]  ;;  %1082 = vmatprep.subr.bf16.mxu1 %v3421_v56  ;;  %vm923_vm0 = vcmask 523264   ;;  %v3429_v32 = vcombine.high %v699_v62, %v703_v16  ;;  %v3431_v27 = vcombine.high %v700_v17, %v704_v19 }
  0x5d   :  { %507 = vst [vmem:[#allocation2 + $0x39] sm:$0x1] %v3395_v41  ;;  %513 = vst [vmem:[#allocation2 + $0x3a] sm:$0x1] %v3397_v42  ;;  %v3442_v51 = vcombine.low %v714_v49, %v718_v38  ;;  %v3443_v52 = vcombine.high %v714_v49, %v718_v38  ;;  %v707_v25 = vld [vmem:[#allocation9 + $0x90] sm:$0xff]  ;;  %v708_v29 = vld [vmem:[#allocation9 + $0x98] sm:$0xff]  ;;  %v3430_v36 = vcombine.low %v700_v17, %v704_v19 }
  0x5e   :  { %519 = vst [vmem:[#allocation2 + $0x3b] sm:$0x1] %v3399_v43  ;;  %525 = vst [vmem:[#allocation2 + $0x3c] sm:$0x1] %v3399_v43  ;;  %v711_v28 = vld [vmem:[#allocation9 + $0xb0] sm:$0xff]  ;;  %v712_v33 = vld [vmem:[#allocation9 + $0xb8] sm:$0xff] }
  0x5f   :  { %531 = vst [vmem:[#allocation2 + $0x3d] sm:$0x1] %v3399_v43  ;;  %537 = vst [vmem:[#allocation2 + $0x3e] sm:$0x1] %v3399_v43  ;;  %v549_v44 = vld [vmem:[#allocation2 + $0x28] sm:$0xff]  ;;  %1012 = vmatpush1.bf16.msra.mxu0 %v3426_v37  ;;  %v692_v37 = vld [vmem:[#allocation9 + $0x18] sm:$0xff]  ;;  %v3439_v40 = vcombine.high %v708_v29, %v712_v33 }
  0x60   :  { %543 = vst [vmem:[#allocation2 + $0x3f] sm:$0x1] %v3399_v43  ;;  %v554_v45 = vpack.c.bf16 %v549_v44, %v548_v39  ;;  %1013 = vmatprep.subr.bf16.mxu0 %v3435_v20  ;;  %v3422_v58 = vcombine.low %v692_v37, %v696_v57  ;;  %v3423_v59 = vcombine.high %v692_v37, %v696_v57  ;;  %v715_v41 = vld [vmem:[#allocation9 + $0xd0] sm:$0xff]  ;;  %v716_v43 = vld [vmem:[#allocation9 + $0xd8] sm:$0xff]  ;;  %v4459_v34 = vld [vmem:[%s6678_s3] sm:$0xff] }
  0x61   :  { %v3437_v39 = vcombine.high %v707_v25, %v711_v28  ;;  %v719_v42 = vld [vmem:[#allocation9 + $0xf0] sm:$0xff]  ;;  %v720_v20 = vld [vmem:[#allocation9 + $0xf8] sm:$0xff] }
  0x62   :  { %3521 = vmatprep.mubr.bf16.mxu0 %v554_v45  ;;  %v3436_v45 = vcombine.low %v707_v25, %v711_v28  ;;  %v3444_v38 = vcombine.low %v715_v41, %v719_v42 }
  0x63   :  { %v550_v26 = vld [vmem:[#allocation2 + $0x30] sm:$0xff]  ;;  %1014 = vmatpush1.bf16.msra.mxu0 %v3434_v24  ;;  %v3438_v24 = vcombine.low %v708_v29, %v712_v33 }
  0x64   :  { %1015 = vmatprep.subr.bf16.mxu0 %v3443_v52  ;;  %v4452_v52 = vshrl.u32 %v158_v18, 7 }
  0x66   :  { %v725_v53 = vsub.s32 0, %v4452_v52  ;;  %v733_v30 = vsub.s32 2, %v4452_v52  ;;  %v729_v37 = vsub.s32 1, %v4452_v52 }
  0x67   :  { %v551_v31 = vld [vmem:[#allocation2 + $0x38] sm:$0xff]  ;;  %1016 = vmatpush1.bf16.msra.mxu0 %v3442_v51  ;;  %v3446_v51 = vcombine.low %v716_v43, %v720_v20 }
  0x68   :  { %v555_v47 = vpack.c.bf16 %v551_v31, %v550_v26  ;;  %1155 = vmatprep.subr.bf16.mxu0 %v3423_v59  ;;  %v3445_v31 = vcombine.high %v715_v41, %v719_v42  ;;  %v4467_v56 = vrot.slane %v4459_v34, %v733_v30  ;;  %v4470_v18 = vrot.slane %v4459_v34, %v729_v37 }
  0x6a   :  { %3522 = vmatmul.mubr.bf16.gmra.mrb[4].mxu0 %v555_v47  ;;  %v3447_v47 = vcombine.high %v716_v43, %v720_v20 }
  0x6b   :  { %1041 = vmatprep.mubr.bf16.mxu0 %v4020_v54 }
 0x12d   :  { %v3519_v60 = vpop.f32.mrb[0].mxu0 }
 0x12e   :  { %v654_v61 = vpop.f32.mrb[1].mxu0 }
 0x12f   :  { %v3520_v63 = vpop.f32.mrb[2].mxu0 }
 0x130   :  { %v4415_v21 = vpack.c.bf16 %v3520_v63, %v3519_v60  ;;  %v657_v22 = vpop.f32.mrb[3].mxu0 }
 0x131   :  { %v685_v23 = vpack.c.bf16 %v657_v22, %v654_v61 }
 0x133   :  { %3448 = vmatmul.mubr.msk.bf16.vlgmr.msra.gmra.mrb[0].mxu1 %vm923_vm0, %v685_v23  ;;  %3452 = vmatmul.mubr.msk.bf16.vlgmr.msra.gmra.mrb[8].mxu0 %vm923_vm0, %v685_v23 }
 0x134   :  { %1083 = vmatpush1.bf16.msra.mxu1 %v3420_v55  ;;  %1156 = vmatpush1.bf16.msra.mxu0 %v3422_v58  ;;  %v4464_v55 = vrot.slane %v4459_v34, %v725_v53 }
 0x135   :  { %978 = vmatprep.mubr.bf16.mxu1 %v4020_v54  ;;  %1051 = vmatprep.mubr.bf16.mxu0 %v4020_v54 }
 0x136   :  { %1084 = vmatprep.subr.bf16.mxu1 %v3429_v32  ;;  %1157 = vmatprep.subr.bf16.mxu0 %v3431_v27 }
 0x138   :  { %1085 = vmatpush1.bf16.msra.mxu1 %v3428_v35  ;;  %1158 = vmatpush1.bf16.msra.mxu0 %v3430_v36 }
 0x139   :  { %1086 = vmatprep.subr.bf16.mxu1 %v3437_v39  ;;  %1159 = vmatprep.subr.bf16.mxu0 %v3439_v40 }
 0x13b   :  { %3449 = vmatmul.mubr.msk.bf16.gmra.mrb[4].mxu1 %vm923_vm0, %v4415_v21  ;;  %3453 = vmatmul.mubr.msk.bf16.gmra.mrb[12].mxu0 %vm923_vm0, %v4415_v21 }
 0x13c   :  { %988 = vmatprep.mubr.bf16.mxu1 %v4020_v54  ;;  %1061 = vmatprep.mubr.bf16.mxu0 %v4020_v54 }
 0x13d   :  { %v3523_v44 = vpop.f32.mrb[4].mxu0  ;;  %1087 = vmatpush1.bf16.msra.mxu1 %v3436_v45  ;;  %1160 = vmatpush1.bf16.msra.mxu0 %v3438_v24 }
 0x13e   :  { %v670_v26 = vpop.f32.mrb[5].mxu0  ;;  %1088 = vmatprep.subr.bf16.mxu1 %v3445_v31  ;;  %1161 = vmatprep.subr.bf16.mxu0 %v3447_v47 }
 0x13f   :  { %v3524_v46 = vpop.f32.mrb[6].mxu0 }
 0x140   :  { %v688_v48 = vpack.c.bf16 %v3524_v46, %v3523_v44  ;;  %v673_v49 = vpop.f32.mrb[7].mxu0 }
 0x141   :  { %v687_v50 = vpack.c.bf16 %v673_v49, %v670_v26  ;;  %1089 = vmatpush1.bf16.msra.mxu1 %v3444_v38  ;;  %1162 = vmatpush1.bf16.msra.mxu0 %v3446_v51 }
 0x143   :  { %3450 = vmatmul.mubr.msk.bf16.gmra.mrb[8].mxu1 %vm923_vm0, %v687_v50  ;;  %3454 = vmatmul.mubr.msk.bf16.gmra.mrb[16].mxu0 %vm923_vm0, %v687_v50 }
 0x144   :  { %998 = vmatprep.mubr.bf16.mxu1 %v4020_v54  ;;  %1071 = vmatprep.mubr.bf16.mxu0 %v4020_v54 }
 0x14b   :  { %3451 = vmatmul.mubr.msk.bf16.gmra.mrb[12].mxu1 %vm923_vm0, %v688_v48  ;;  %3455 = vmatmul.mubr.msk.bf16.gmra.mrb[20].mxu0 %vm923_vm0, %v688_v48 }
 0x14c   :  { %1114 = vmatprep.mubr.bf16.mxu1 %v4020_v54  ;;  %1187 = vmatprep.mubr.bf16.mxu0 %v4020_v54 }
 0x153   :  { %3456 = vmatmul.mubr.msk.bf16.vlgmr.msra.gmra.mrb[16].mxu1 %vm923_vm0, %v685_v23  ;;  %3460 = vmatmul.mubr.msk.bf16.vlgmr.msra.gmra.mrb[24].mxu0 %vm923_vm0, %v685_v23 }
 0x154   :  { %1124 = vmatprep.mubr.bf16.mxu1 %v4020_v54  ;;  %1197 = vmatprep.mubr.bf16.mxu0 %v4020_v54 }
 0x15b   :  { %3457 = vmatmul.mubr.msk.bf16.gmra.mrb[20].mxu1 %vm923_vm0, %v4415_v21  ;;  %3461 = vmatmul.mubr.msk.bf16.gmra.mrb[28].mxu0 %vm923_vm0, %v4415_v21 }
 0x15c   :  { %1134 = vmatprep.mubr.bf16.mxu1 %v4020_v54  ;;  %1207 = vmatprep.mubr.bf16.mxu0 %v4020_v54 }
 0x163   :  { %3458 = vmatmul.mubr.msk.bf16.gmra.mrb[24].mxu1 %vm923_vm0, %v687_v50  ;;  %3462 = vmatmul.mubr.msk.bf16.gmra.mrb[32].mxu0 %vm923_vm0, %v687_v50 }
 0x164   :  { %1144 = vmatprep.mubr.bf16.mxu1 %v4020_v54  ;;  %1217 = vmatprep.mubr.bf16.mxu0 %v4020_v54  ;;  %v737_v54 = vsub.s32 3, %v4452_v52 }
 0x166   :  { %v4473_v57 = vrot.slane %v4459_v34, %v737_v54 }
 0x16b   :  { %3459 = vmatmul.mubr.msk.bf16.gmra.mrb[28].mxu1 %vm923_vm0, %v688_v48  ;;  %3463 = vmatmul.mubr.msk.bf16.gmra.mrb[36].mxu0 %vm923_vm0, %v688_v48 }
 0x206   :  { %v970_v58 = vpop.f32.mrb[0].mxu1  ;;  %v1043_v59 = vpop.f32.mrb[8].mxu0 }
 0x207   :  { %v4476_v60 = vadd.f32 %v970_v58, %v4464_v55  ;;  %v4479_v61 = vadd.f32 %v1043_v59, %v4467_v56  ;;  %v972_v62 = vpop.f32.mrb[1].mxu1  ;;  %v1045_v63 = vpop.f32.mrb[9].mxu0 }
 0x208   :  { %v4482_v16 = vadd.f32 %v972_v62, %v4470_v18  ;;  %v4485_v17 = vadd.f32 %v1045_v63, %v4473_v57  ;;  %v974_v19 = vpop.f32.mrb[2].mxu1  ;;  %v1047_v21 = vpop.f32.mrb[10].mxu0 }
 0x209   :  { %7082 = vst [vmem:[#allocation34_spill] sm:$0xff] %v4476_v60  ;;  %7083 = vst [vmem:[#allocation35_spill] sm:$0xff] %v4479_v61  ;;  %v4488_v22 = vadd.f32 %v974_v19, %v4464_v55  ;;  %v4491_v23 = vadd.f32 %v1047_v21, %v4467_v56  ;;  %v976_v25 = vpop.f32.mrb[3].mxu1  ;;  %v1049_v32 = vpop.f32.mrb[11].mxu0 }
 0x20a   :  { %7084 = vst [vmem:[#allocation36_spill] sm:$0xff] %v4482_v16  ;;  %7085 = vst [vmem:[#allocation37_spill] sm:$0xff] %v4485_v17  ;;  %v4494_v27 = vadd.f32 %v976_v25, %v4470_v18  ;;  %v4497_v28 = vadd.f32 %v1049_v32, %v4473_v57 }
 0x20b   :  { %7086 = vst [vmem:[#allocation38_spill] sm:$0xff] %v4488_v22  ;;  %7087 = vst [vmem:[#allocation39_spill] sm:$0xff] %v4491_v23 }
 0x20c   :  { %7088 = vst [vmem:[#allocation40_spill] sm:$0xff] %v4494_v27  ;;  %7089 = vst [vmem:[#allocation41_spill] sm:$0xff] %v4497_v28 }
 0x20e   :  { %v980_v29 = vpop.f32.mrb[4].mxu1  ;;  %v1053_v33 = vpop.f32.mrb[12].mxu0 }
 0x20f   :  { %v4500_v35 = vadd.f32 %v980_v29, %v4464_v55  ;;  %v4503_v36 = vadd.f32 %v1053_v33, %v4467_v56  ;;  %v982_v39 = vpop.f32.mrb[5].mxu1  ;;  %v1055_v40 = vpop.f32.mrb[13].mxu0 }
 0x210   :  { %v4506_v41 = vadd.f32 %v982_v39, %v4470_v18  ;;  %v4509_v42 = vadd.f32 %v1055_v40, %v4473_v57  ;;  %v984_v43 = vpop.f32.mrb[6].mxu1  ;;  %v1057_v20 = vpop.f32.mrb[14].mxu0 }
 0x211   :  { %7090 = vst [vmem:[#allocation42_spill] sm:$0xff] %v4500_v35  ;;  %7091 = vst [vmem:[#allocation43_spill] sm:$0xff] %v4503_v36  ;;  %v4512_v44 = vadd.f32 %v984_v43, %v4464_v55  ;;  %v4515_v45 = vadd.f32 %v1057_v20, %v4467_v56  ;;  %v986_v24 = vpop.f32.mrb[7].mxu1  ;;  %v1059_v26 = vpop.f32.mrb[15].mxu0  ;;  %v741_v43 = vsub.s32 4, %v4452_v52  ;;  %v749_v20 = vsub.s32 6, %v4452_v52 }
 0x212   :  { %7092 = vst [vmem:[#allocation44_spill] sm:$0xff] %v4506_v41  ;;  %7093 = vst [vmem:[#allocation45_spill] sm:$0xff] %v4509_v42  ;;  %v4518_v31 = vadd.f32 %v986_v24, %v4470_v18  ;;  %v4521_v47 = vadd.f32 %v1059_v26, %v4473_v57 }
 0x213   :  { %7094 = vst [vmem:[#allocation46_spill] sm:$0xff] %v4512_v44  ;;  %7095 = vst [vmem:[#allocation47_spill] sm:$0xff] %v4515_v45 }
 0x214   :  { %7096 = vst [vmem:[#allocation48_spill] sm:$0xff] %v4518_v31  ;;  %7097 = vst [vmem:[#allocation49_spill] sm:$0xff] %v4521_v47 }
 0x216   :  { %v990_v46 = vpop.f32.mrb[8].mxu1  ;;  %v1063_v48 = vpop.f32.mrb[16].mxu0 }
 0x217   :  { %v4524_v49 = vadd.f32 %v990_v46, %v4464_v55  ;;  %v4527_v50 = vadd.f32 %v1063_v48, %v4467_v56  ;;  %v992_v38 = vpop.f32.mrb[9].mxu1  ;;  %v1065_v51 = vpop.f32.mrb[17].mxu0 }
 0x218   :  { %v4530_v53 = vadd.f32 %v992_v38, %v4470_v18  ;;  %v4533_v30 = vadd.f32 %v1065_v51, %v4473_v57  ;;  %v994_v37 = vpop.f32.mrb[10].mxu1  ;;  %v1067_v54 = vpop.f32.mrb[18].mxu0  ;;  %v745_v38 = vsub.s32 5, %v4452_v52  ;;  %v753_v51 = vsub.s32 7, %v4452_v52 }
 0x219   :  { %7098 = vst [vmem:[#allocation50_spill] sm:$0xff] %v4524_v49  ;;  %7099 = vst [vmem:[#allocation51_spill] sm:$0xff] %v4527_v50  ;;  %v4536_v58 = vadd.f32 %v994_v37, %v4464_v55  ;;  %v4539_v59 = vadd.f32 %v1067_v54, %v4467_v56  ;;  %v996_v62 = vpop.f32.mrb[11].mxu1  ;;  %v1069_v63 = vpop.f32.mrb[19].mxu0 }
 0x21a   :  { %7100 = vst [vmem:[#allocation52_spill] sm:$0xff] %v4530_v53  ;;  %7101 = vst [vmem:[#allocation53_spill] sm:$0xff] %v4533_v30  ;;  %v4542_v19 = vadd.f32 %v996_v62, %v4470_v18  ;;  %v4545_v21 = vadd.f32 %v1069_v63, %v4473_v57  ;;  %v4578_v52 = vrot.slane %v4459_v34, %v745_v38 }
 0x21b   :  { %7102 = vst [vmem:[#allocation54_spill] sm:$0xff] %v4536_v58  ;;  %7103 = vst [vmem:[#allocation55_spill] sm:$0xff] %v4539_v59 }
 0x21c   :  { %7104 = vst [vmem:[#allocation56_spill] sm:$0xff] %v4542_v19  ;;  %7105 = vst [vmem:[#allocation57_spill] sm:$0xff] %v4545_v21 }
 0x21e   :  { %v1000_v25 = vpop.f32.mrb[12].mxu1  ;;  %v1073_v32 = vpop.f32.mrb[20].mxu0 }
 0x21f   :  { %v4548_v29 = vadd.f32 %v1000_v25, %v4464_v55  ;;  %v4551_v33 = vadd.f32 %v1073_v32, %v4467_v56  ;;  %v1002_v39 = vpop.f32.mrb[13].mxu1  ;;  %v1075_v40 = vpop.f32.mrb[21].mxu0 }
 0x220   :  { %v4556_v24 = vadd.f32 %v1002_v39, %v4470_v18  ;;  %v4559_v26 = vadd.f32 %v1075_v40, %v4473_v57  ;;  %v1004_v46 = vpop.f32.mrb[14].mxu1  ;;  %v1077_v48 = vpop.f32.mrb[22].mxu0  ;;  %v742_v39 = vrot.slane %v4459_v34, %v741_v43  ;;  %v750_v40 = vrot.slane %v4459_v34, %v749_v20 }
 0x221   :  { %7106 = vst [vmem:[#allocation58_spill] sm:$0xff] %v4548_v29  ;;  %7107 = vst [vmem:[#allocation59_spill] sm:$0xff] %v4551_v33  ;;  %v4564_v37 = vadd.f32 %v1004_v46, %v4464_v55  ;;  %v4567_v54 = vadd.f32 %v1077_v48, %v4467_v56  ;;  %v1006_v62 = vpop.f32.mrb[15].mxu1  ;;  %v1079_v63 = vpop.f32.mrb[23].mxu0  ;;  %v4581_v55 = vrot.slane %v4459_v34, %v753_v51 }
 0x222   :  { %7108 = vst [vmem:[#allocation60_spill] sm:$0xff] %v4556_v24  ;;  %7109 = vst [vmem:[#allocation61_spill] sm:$0xff] %v4559_v26  ;;  %v4570_v25 = vadd.f32 %v1006_v62, %v4470_v18  ;;  %v4573_v32 = vadd.f32 %v1079_v63, %v4473_v57 }
 0x223   :  { %7110 = vst [vmem:[#allocation62_spill] sm:$0xff] %v4564_v37  ;;  %7111 = vst [vmem:[#allocation63_spill] sm:$0xff] %v4567_v54 }
 0x224   :  { %7112 = vst [vmem:[#allocation64_spill] sm:$0xff] %v4570_v25  ;;  %7113 = vst [vmem:[#allocation65_spill] sm:$0xff] %v4573_v32 }
 0x226   :  { %v1116_v56 = vpop.f32.mrb[16].mxu1  ;;  %v1189_v46 = vpop.f32.mrb[24].mxu0 }
 0x227   :  { %v4583_v48 = vadd.f32 %v1116_v56, %v742_v39  ;;  %v4585_v7 = vadd.f32 %v1189_v46, %v750_v40  ;;  %v1118_v18 = vpop.f32.mrb[17].mxu1  ;;  %v1191_v62 = vpop.f32.mrb[25].mxu0 }
 0x228   :  { %v4588_v57 = vadd.f32 %v1118_v18, %v4578_v52  ;;  %v4591_v43 = vadd.f32 %v1191_v62, %v4581_v55  ;;  %v1120_v20 = vpop.f32.mrb[18].mxu1  ;;  %v1193_v38 = vpop.f32.mrb[26].mxu0 }
 0x229   :  { %7114 = vst [vmem:[#allocation66_spill] sm:$0xff] %v4583_v48  ;;  %7115 = vst [vmem:[#allocation67_spill] sm:$0xff] %v4585_v7  ;;  %v4593_v63 = vadd.f32 %v1120_v20, %v742_v39  ;;  %v4595_v34 = vadd.f32 %v1193_v38, %v750_v40  ;;  %v1122_v51 = vpop.f32.mrb[19].mxu1  ;;  %v1195_v15 = vpop.f32.mrb[27].mxu0 }
 0x22a   :  { %7116 = vst [vmem:[#allocation68_spill] sm:$0xff] %v4588_v57  ;;  %7117 = vst [vmem:[#allocation69_spill] sm:$0xff] %v4591_v43  ;;  %v4598_v56 = vadd.f32 %v1122_v51, %v4578_v52  ;;  %v4601_v46 = vadd.f32 %v1195_v15, %v4581_v55 }
 0x22b   :  { %7118 = vst [vmem:[#allocation70_spill] sm:$0xff] %v4593_v63  ;;  %7119 = vst [vmem:[#allocation71_spill] sm:$0xff] %v4595_v34 }
 0x22c   :  { %7120 = vst [vmem:[#allocation72_spill] sm:$0xff] %v4598_v56  ;;  %7121 = vst [vmem:[#allocation73_spill] sm:$0xff] %v4601_v46 }
 0x22e   :  { %v1126_v6 = vpop.f32.mrb[20].mxu1  ;;  %v1199_v18 = vpop.f32.mrb[28].mxu0 }
 0x22f   :  { %v4603_v14 = vadd.f32 %v1126_v6, %v742_v39  ;;  %v4605_v62 = vadd.f32 %v1199_v18, %v750_v40  ;;  %v1128_v5 = vpop.f32.mrb[21].mxu1  ;;  %v1201_v13 = vpop.f32.mrb[29].mxu0 }
 0x230   :  { %v4608_v20 = vadd.f32 %v1128_v5, %v4578_v52  ;;  %v4611_v38 = vadd.f32 %v1201_v13, %v4581_v55  ;;  %v1130_v4 = vpop.f32.mrb[22].mxu1  ;;  %v1203_v51 = vpop.f32.mrb[30].mxu0 }
 0x231   :  { %7122 = vst [vmem:[#allocation74_spill] sm:$0xff] %v4603_v14  ;;  %7123 = vst [vmem:[#allocation75_spill] sm:$0xff] %v4605_v62  ;;  %v4613_v12 = vadd.f32 %v1130_v4, %v742_v39  ;;  %v4615_v15 = vadd.f32 %v1203_v51, %v750_v40  ;;  %v1132_v3 = vpop.f32.mrb[23].mxu1  ;;  %v1205_v11 = vpop.f32.mrb[31].mxu0 }
 0x232   :  { %7124 = vst [vmem:[#allocation76_spill] sm:$0xff] %v4608_v20  ;;  %7125 = vst [vmem:[#allocation77_spill] sm:$0xff] %v4611_v38  ;;  %v4618_v6 = vadd.f32 %v1132_v3, %v4578_v52  ;;  %v4621_v18 = vadd.f32 %v1205_v11, %v4581_v55 }
 0x233   :  { %7126 = vst [vmem:[#allocation78_spill] sm:$0xff] %v4613_v12  ;;  %7127 = vst [vmem:[#allocation79_spill] sm:$0xff] %v4615_v15 }
 0x234   :  { %7128 = vst [vmem:[#allocation80_spill] sm:$0xff] %v4618_v6  ;;  %7129 = vst [vmem:[#allocation81_spill] sm:$0xff] %v4621_v18 }
 0x236   :  { %v1136_v2 = vpop.f32.mrb[24].mxu1  ;;  %v1209_v5 = vpop.f32.mrb[32].mxu0 }
 0x237   :  { %v4623_v10 = vadd.f32 %v1136_v2, %v742_v39  ;;  %v4625_v13 = vadd.f32 %v1209_v5, %v750_v40  ;;  %v1138_v1 = vpop.f32.mrb[25].mxu1  ;;  %v1211_v9 = vpop.f32.mrb[33].mxu0 }
 0x238   :  { %v4628_v4 = vadd.f32 %v1138_v1, %v4578_v52  ;;  %v4631_v51 = vadd.f32 %v1211_v9, %v4581_v55  ;;  %v1140_v0 = vpop.f32.mrb[26].mxu1  ;;  %v1213_v3 = vpop.f32.mrb[34].mxu0 }
 0x239   :  { %7130 = vst [vmem:[#allocation82_spill] sm:$0xff] %v4623_v10  ;;  %7131 = vst [vmem:[#allocation83_spill] sm:$0xff] %v4625_v13  ;;  %v4633_v8 = vadd.f32 %v1140_v0, %v742_v39  ;;  %v4635_v11 = vadd.f32 %v1213_v3, %v750_v40  ;;  %v1142_v25 = vpop.f32.mrb[27].mxu1  ;;  %v1215_v37 = vpop.f32.mrb[35].mxu0 }
 0x23a   :  { %7132 = vst [vmem:[#allocation84_spill] sm:$0xff] %v4628_v4  ;;  %7133 = vst [vmem:[#allocation85_spill] sm:$0xff] %v4631_v51  ;;  %v4638_v2 = vadd.f32 %v1142_v25, %v4578_v52  ;;  %v4641_v5 = vadd.f32 %v1215_v37, %v4581_v55 }
 0x23b   :  { %7134 = vst [vmem:[#allocation86_spill] sm:$0xff] %v4633_v8  ;;  %7135 = vst [vmem:[#allocation87_spill] sm:$0xff] %v4635_v11 }
 0x23c   :  { %7136 = vst [vmem:[#allocation88_spill] sm:$0xff] %v4638_v2  ;;  %7137 = vst [vmem:[#allocation89_spill] sm:$0xff] %v4641_v5 }
 0x23e   :  { %v1146_v32 = vpop.f32.mrb[28].mxu1  ;;  %v1219_v1 = vpop.f32.mrb[36].mxu0 }
 0x23f   :  { %v4643_v54 = vadd.f32 %v1146_v32, %v742_v39  ;;  %v4645_v9 = vadd.f32 %v1219_v1, %v750_v40  ;;  %v1148_v24 = vpop.f32.mrb[29].mxu1  ;;  %v1221_v29 = vpop.f32.mrb[37].mxu0 }
 0x240   :  { %v4648_v0 = vadd.f32 %v1148_v24, %v4578_v52  ;;  %v4651_v3 = vadd.f32 %v1221_v29, %v4581_v55  ;;  %v1150_v26 = vpop.f32.mrb[30].mxu1  ;;  %v1223_v25 = vpop.f32.mrb[38].mxu0 }
 0x241   :  { %7138 = vst [vmem:[#allocation90_spill] sm:$0xff] %v4643_v54  ;;  %7139 = vst [vmem:[#allocation91_spill] sm:$0xff] %v4645_v9  ;;  %v4653_v33 = vadd.f32 %v1150_v26, %v742_v39  ;;  %v4655_v37 = vadd.f32 %v1223_v25, %v750_v40  ;;  %v1152_v5 = vpop.f32.mrb[31].mxu1  ;;  %v1225_v2 = vpop.f32.mrb[39].mxu0 }
 0x242   :  { %7140 = vst [vmem:[#allocation92_spill] sm:$0xff] %v4648_v0  ;;  %7141 = vst [vmem:[#allocation93_spill] sm:$0xff] %v4651_v3  ;;  %v4658_v32 = vadd.f32 %v1152_v5, %v4578_v52  ;;  %v4661_v1 = vadd.f32 %v1225_v2, %v4581_v55 }
 0x243   :  { %7142 = vst [vmem:[#allocation94_spill] sm:$0xff] %v4653_v33  ;;  %7143 = vst [vmem:[#allocation95_spill] sm:$0xff] %v4655_v37 }
 0x244   :  { %7144 = vst [vmem:[#allocation96_spill] sm:$0xff] %v4658_v32  ;;  %7145 = vst [vmem:[#allocation97_spill] sm:$0xff] %v4661_v1 }
 0x245   :  { %4002 = dma.done.wait [#allocation6], 16384 }
 0x246   :  { %4003 = vsyncadd [#allocation6], 4294950912  ;;  %v4663_v24 = vld [vmem:[#allocation4 + $0x8] sm:$0xff]  ;;  %v4665_v29 = vld [vmem:[#allocation4] sm:$0xff] }
 0x247   :  { %v4667_v3 = vld [vmem:[#allocation4 + $0x48] sm:$0xff]  ;;  %1438 = vmatprep.subr.bf16.mxu1 %v4663_v24  ;;  %v4670_v26 = vld [vmem:[#allocation4 + $0x18] sm:$0xff]  ;;  %v4672_v39 = vld [vmem:[#allocation4 + $0x10] sm:$0xff] }
 0x248   :  { %1439 = vmatpush1.bf16.msra.mxu1 %v4665_v29  ;;  %1479 = vmatprep.subr.bf16.mxu0 %v4670_v26  ;;  %v4676_v40 = vld [vmem:[#allocation4 + $0x58] sm:$0xff]  ;;  %v4679_v52 = vld [vmem:[#allocation4 + $0x40] sm:$0xff]  ;;  %v4682_v55 = vld [vmem:[#allocation4 + $0x88] sm:$0xff] }
 0x249   :  { %1440 = vmatprep.subr.bf16.mxu1 %v4667_v3  ;;  %1480 = vmatpush1.bf16.msra.mxu0 %v4672_v39  ;;  %v4685_v2 = vld [vmem:[#allocation4 + $0x50] sm:$0xff]  ;;  %v4687_v5 = vld [vmem:[#allocation4 + $0x98] sm:$0xff]  ;;  %v4691_v25 = vld [vmem:[#allocation4 + $0x80] sm:$0xff] }
 0x24a   :  { %1481 = vmatprep.subr.bf16.mxu0 %v4676_v40  ;;  %v4694_v1 = vld [vmem:[#allocation4 + $0xc8] sm:$0xff]  ;;  %v4697_v32 = vld [vmem:[#allocation4 + $0x90] sm:$0xff]  ;;  %v4699_v37 = vld [vmem:[#allocation4 + $0xd8] sm:$0xff] }
 0x24b   :  { %v4703_v33 = vld [vmem:[#allocation4 + $0xc0] sm:$0xff]  ;;  %v4706_v0 = vld [vmem:[#allocation4 + $0x108] sm:$0xff]  ;;  %v4709_v9 = vld [vmem:[#allocation4 + $0xd0] sm:$0xff] }
 0x24c   :  { %1441 = vmatpush1.bf16.msra.mxu1 %v4679_v52  ;;  %v4711_v54 = vld [vmem:[#allocation4 + $0x118] sm:$0xff]  ;;  %v4715_v11 = vld [vmem:[#allocation4 + $0x100] sm:$0xff]  ;;  %v4718_v8 = vld [vmem:[#allocation4 + $0x148] sm:$0xff] }
 0x24d   :  { %1442 = vmatprep.subr.bf16.mxu1 %v4682_v55  ;;  %1482 = vmatpush1.bf16.msra.mxu0 %v4685_v2  ;;  %v4721_v19 = vld [vmem:[#allocation4 + $0x110] sm:$0xff]  ;;  %v4723_v58 = vld [vmem:[#allocation4 + $0x158] sm:$0xff]  ;;  %v4727_v21 = vld [vmem:[#allocation4 + $0x140] sm:$0xff] }
 0x24e   :  { %1483 = vmatprep.subr.bf16.mxu0 %v4687_v5  ;;  %v4730_v59 = vld [vmem:[#allocation4 + $0x188] sm:$0xff]  ;;  %v4733_v51 = vld [vmem:[#allocation4 + $0x150] sm:$0xff]  ;;  %v4738_v13 = vld [vmem:[#allocation4 + $0x198] sm:$0xff] }
 0x24f   :  { %v1297_v4 = vld [vmem:[%s6682_s7 + $0x8] sm:$0xff]  ;;  %v4744_v53 = vld [vmem:[#allocation4 + $0x180] sm:$0xff]  ;;  %v4750_v30 = vld [vmem:[#allocation4 + $0x190] sm:$0xff] }
 0x250   :  { %1443 = vmatpush1.bf16.msra.mxu1 %v4691_v25  ;;  %v4740_v10 = vpack.c.bf16 %v1297_v4, %v1297_v4  ;;  %v4747_v49 = vld [vmem:[#allocation4 + $0x1c8] sm:$0xff]  ;;  %v4753_v50 = vld [vmem:[#allocation4 + $0x1d8] sm:$0xff]  ;;  %v4758_v4 = vld [vmem:[#allocation4 + $0x1c0] sm:$0xff] }
 0x251   :  { %1444 = vmatprep.subr.bf16.mxu1 %v4694_v1  ;;  %1484 = vmatpush1.bf16.msra.mxu0 %v4697_v32  ;;  %v4761_v18 = vld [vmem:[#allocation4 + $0x208] sm:$0xff]  ;;  %v4764_v6 = vld [vmem:[#allocation4 + $0x1d0] sm:$0xff]  ;;  %v4766_v15 = vld [vmem:[#allocation4 + $0x218] sm:$0xff] }
 0x252   :  { %1485 = vmatprep.subr.bf16.mxu0 %v4699_v37  ;;  %1470 = vmatprep.mubr.bf16.mxu1 %v4740_v10  ;;  %7146 = vst [vmem:[#allocation98_spill] sm:$0xff] %v4766_v15  ;;  %v4770_v12 = vld [vmem:[#allocation4 + $0x200] sm:$0xff]  ;;  %v4773_v31 = vld [vmem:[#allocation4 + $0x248] sm:$0xff]  ;;  %v4776_v44 = vld [vmem:[#allocation4 + $0x210] sm:$0xff] }
 0x253   :  { %1511 = vmatprep.mubr.bf16.mxu0 %v4740_v10  ;;  %7147 = vst [vmem:[#allocation99_spill] sm:$0xff] %v4770_v12  ;;  %7148 = vst [vmem:[#allocation100_spill] sm:$0xff] %v4773_v31  ;;  %v4778_v47 = vld [vmem:[#allocation4 + $0x258] sm:$0xff]  ;;  %v4782_v45 = vld [vmem:[#allocation4 + $0x240] sm:$0xff] }
 0x254   :  { %1445 = vmatpush1.bf16.msra.mxu1 %v4703_v33  ;;  %7149 = vst [vmem:[#allocation101_spill] sm:$0xff] %v4776_v44  ;;  %7150 = vst [vmem:[#allocation102_spill] sm:$0xff] %v4778_v47  ;;  %v4785_v38 = vld [vmem:[#allocation4 + $0x288] sm:$0xff]  ;;  %v4788_v20 = vld [vmem:[#allocation4 + $0x250] sm:$0xff] }
 0x255   :  { %1446 = vmatprep.subr.bf16.mxu1 %v4706_v0  ;;  %1486 = vmatpush1.bf16.msra.mxu0 %v4709_v9  ;;  %7151 = vst [vmem:[#allocation103_spill] sm:$0xff] %v4782_v45  ;;  %7152 = vst [vmem:[#allocation104_spill] sm:$0xff] %v4785_v38  ;;  %v4790_v62 = vld [vmem:[#allocation4 + $0x298] sm:$0xff]  ;;  %v4794_v14 = vld [vmem:[#allocation4 + $0x280] sm:$0xff] }
 0x256   :  { %1487 = vmatprep.subr.bf16.mxu0 %v4711_v54  ;;  %7153 = vst [vmem:[#allocation105_spill] sm:$0xff] %v4788_v20  ;;  %7154 = vst [vmem:[#allocation106_spill] sm:$0xff] %v4790_v62  ;;  %v4797_v41 = vld [vmem:[#allocation4 + $0x2c8] sm:$0xff]  ;;  %v4800_v35 = vld [vmem:[#allocation4 + $0x290] sm:$0xff] }
 0x257   :  { %7155 = vst [vmem:[#allocation107_spill] sm:$0xff] %v4794_v14  ;;  %7156 = vst [vmem:[#allocation108_spill] sm:$0xff] %v4797_v41  ;;  %v4802_v42 = vld [vmem:[#allocation4 + $0x2d8] sm:$0xff]  ;;  %v4806_v36 = vld [vmem:[#allocation4 + $0x2c0] sm:$0xff] }
 0x258   :  { %1447 = vmatpush1.bf16.msra.mxu1 %v4715_v11  ;;  %7157 = vst [vmem:[#allocation109_spill] sm:$0xff] %v4800_v35  ;;  %7158 = vst [vmem:[#allocation110_spill] sm:$0xff] %v4802_v42  ;;  %v4809_v46 = vld [vmem:[#allocation4 + $0x308] sm:$0xff]  ;;  %v4812_v56 = vld [vmem:[#allocation4 + $0x2d0] sm:$0xff] }
 0x259   :  { %1448 = vmatprep.subr.bf16.mxu1 %v4718_v8  ;;  %1488 = vmatpush1.bf16.msra.mxu0 %v4721_v19  ;;  %7159 = vst [vmem:[#allocation111_spill] sm:$0xff] %v4806_v36  ;;  %7160 = vst [vmem:[#allocation112_spill] sm:$0xff] %v4809_v46  ;;  %v4814_v34 = vld [vmem:[#allocation4 + $0x318] sm:$0xff]  ;;  %v4818_v63 = vld [vmem:[#allocation4 + $0x300] sm:$0xff] }
 0x25a   :  { %1489 = vmatprep.subr.bf16.mxu0 %v4723_v58  ;;  %7161 = vst [vmem:[#allocation113_spill] sm:$0xff] %v4812_v56  ;;  %7162 = vst [vmem:[#allocation114_spill] sm:$0xff] %v4814_v34  ;;  %v4821_v27 = vld [vmem:[#allocation4 + $0x348] sm:$0xff]  ;;  %v4824_v22 = vld [vmem:[#allocation4 + $0x310] sm:$0xff] }
 0x25b   :  { %7163 = vst [vmem:[#allocation115_spill] sm:$0xff] %v4818_v63  ;;  %7164 = vst [vmem:[#allocation116_spill] sm:$0xff] %v4821_v27  ;;  %v4826_v28 = vld [vmem:[#allocation4 + $0x358] sm:$0xff]  ;;  %v4830_v23 = vld [vmem:[#allocation4 + $0x340] sm:$0xff] }
 0x25c   :  { %1449 = vmatpush1.bf16.msra.mxu1 %v4727_v21  ;;  %7165 = vst [vmem:[#allocation117_spill] sm:$0xff] %v4824_v22  ;;  %7166 = vst [vmem:[#allocation118_spill] sm:$0xff] %v4826_v28  ;;  %v4833_v43 = vld [vmem:[#allocation4 + $0x388] sm:$0xff]  ;;  %v4836_v7 = vld [vmem:[#allocation4 + $0x350] sm:$0xff] }
 0x25d   :  { %1450 = vmatprep.subr.bf16.mxu1 %v4730_v59  ;;  %1490 = vmatpush1.bf16.msra.mxu0 %v4733_v51  ;;  %7167 = vst [vmem:[#allocation119_spill] sm:$0xff] %v4830_v23  ;;  %7168 = vst [vmem:[#allocation120_spill] sm:$0xff] %v4833_v43  ;;  %v4838_v57 = vld [vmem:[#allocation4 + $0x398] sm:$0xff]  ;;  %v4842_v48 = vld [vmem:[#allocation4 + $0x380] sm:$0xff] }
 0x25e   :  { %1491 = vmatprep.subr.bf16.mxu0 %v4738_v13  ;;  %7169 = vst [vmem:[#allocation121_spill] sm:$0xff] %v4836_v7  ;;  %7170 = vst [vmem:[#allocation122_spill] sm:$0xff] %v4838_v57  ;;  %v4845_v16 = vld [vmem:[#allocation4 + $0x3c8] sm:$0xff]  ;;  %v4848_v60 = vld [vmem:[#allocation4 + $0x390] sm:$0xff] }
 0x25f   :  { %7171 = vst [vmem:[#allocation123_spill] sm:$0xff] %v4842_v48  ;;  %7172 = vst [vmem:[#allocation124_spill] sm:$0xff] %v4845_v16  ;;  %v4850_v17 = vld [vmem:[#allocation4 + $0x3d8] sm:$0xff]  ;;  %v1296_v61 = vld [vmem:[%s6682_s7] sm:$0xff] }
 0x260   :  { %1451 = vmatpush1.bf16.msra.mxu1 %v4744_v53  ;;  %7173 = vst [vmem:[#allocation125_spill] sm:$0xff] %v4848_v60  ;;  %7174 = vst [vmem:[#allocation126_spill] sm:$0xff] %v4850_v17 }
 0x261   :  { %1452 = vmatprep.subr.bf16.mxu1 %v4747_v49  ;;  %1492 = vmatpush1.bf16.msra.mxu0 %v4750_v30 }
 0x262   :  { %1493 = vmatprep.subr.bf16.mxu0 %v4753_v50 }
 0x264   :  { %1453 = vmatpush1.bf16.msra.mxu1 %v4758_v4 }
 0x265   :  { %1454 = vmatprep.subr.bf16.mxu1 %v4761_v18  ;;  %1494 = vmatpush1.bf16.msra.mxu0 %v4764_v6 }
 0x266   :  { %1495 = vmatprep.subr.bf16.mxu0 %v4766_v15 }
 0x268   :  { %1455 = vmatpush1.bf16.msra.mxu1 %v4770_v12 }
 0x269   :  { %1456 = vmatprep.subr.bf16.mxu1 %v4773_v31  ;;  %1496 = vmatpush1.bf16.msra.mxu0 %v4776_v44 }
 0x26a   :  { %1497 = vmatprep.subr.bf16.mxu0 %v4778_v47 }
 0x26c   :  { %1457 = vmatpush1.bf16.msra.mxu1 %v4782_v45 }
 0x26d   :  { %1458 = vmatprep.subr.bf16.mxu1 %v4785_v38  ;;  %1498 = vmatpush1.bf16.msra.mxu0 %v4788_v20 }
 0x26e   :  { %1499 = vmatprep.subr.bf16.mxu0 %v4790_v62 }
 0x270   :  { %1459 = vmatpush1.bf16.msra.mxu1 %v4794_v14 }
 0x271   :  { %1460 = vmatprep.subr.bf16.mxu1 %v4797_v41  ;;  %1500 = vmatpush1.bf16.msra.mxu0 %v4800_v35 }
 0x272   :  { %1501 = vmatprep.subr.bf16.mxu0 %v4802_v42 }
 0x274   :  { %1461 = vmatpush1.bf16.msra.mxu1 %v4806_v36 }
 0x275   :  { %1462 = vmatprep.subr.bf16.mxu1 %v4809_v46  ;;  %1502 = vmatpush1.bf16.msra.mxu0 %v4812_v56 }
 0x276   :  { %1503 = vmatprep.subr.bf16.mxu0 %v4814_v34 }
 0x278   :  { %1463 = vmatpush1.bf16.msra.mxu1 %v4818_v63 }
 0x279   :  { %1464 = vmatprep.subr.bf16.mxu1 %v4821_v27  ;;  %1504 = vmatpush1.bf16.msra.mxu0 %v4824_v22 }
 0x27a   :  { %1505 = vmatprep.subr.bf16.mxu0 %v4826_v28  ;;  %v4867_v28 = vld [vmem:[#allocation4 + $0x38] sm:$0xff] }
 0x27b   :  { %7178 = vst [vmem:[#allocation130_spill] sm:$0xff] %v4867_v28 }
 0x27c   :  { %1465 = vmatpush1.bf16.msra.mxu1 %v4830_v23  ;;  %v4865_v23 = vpack.c.bf16 %v1296_v61, %v1296_v61  ;;  %v4880_v61 = vld [vmem:[#allocation4 + $0x78] sm:$0xff] }
 0x27d   :  { %1466 = vmatprep.subr.bf16.mxu1 %v4833_v43  ;;  %1506 = vmatpush1.bf16.msra.mxu0 %v4836_v7  ;;  %v4857_v43 = vld [vmem:[#allocation4 + $0x3c0] sm:$0xff]  ;;  %v4860_v7 = vld [vmem:[#allocation4 + $0x28] sm:$0xff]  ;;  %7182 = vst [vmem:[#allocation134_spill] sm:$0xff] %v4880_v61 }
 0x27e   :  { %1507 = vmatprep.subr.bf16.mxu0 %v4838_v57  ;;  %7175 = vst [vmem:[#allocation127_spill] sm:$0xff] %v4857_v43  ;;  %7176 = vst [vmem:[#allocation128_spill] sm:$0xff] %v4860_v7  ;;  %v4863_v57 = vld [vmem:[#allocation4 + $0x3d0] sm:$0xff] }
 0x27f   :  { %7177 = vst [vmem:[#allocation129_spill] sm:$0xff] %v4863_v57 }
 0x280   :  { %1467 = vmatpush1.bf16.msra.mxu1 %v4842_v48  ;;  %v4871_v48 = vld [vmem:[#allocation4 + $0x20] sm:$0xff] }
 0x281   :  { %1468 = vmatprep.subr.bf16.mxu1 %v4845_v16  ;;  %1508 = vmatpush1.bf16.msra.mxu0 %v4848_v60  ;;  %7179 = vst [vmem:[#allocation131_spill] sm:$0xff] %v4871_v48  ;;  %v4874_v16 = vld [vmem:[#allocation4 + $0x68] sm:$0xff]  ;;  %v4877_v60 = vld [vmem:[#allocation4 + $0x30] sm:$0xff] }
 0x282   :  { %1509 = vmatprep.subr.bf16.mxu0 %v4850_v17  ;;  %7180 = vst [vmem:[#allocation132_spill] sm:$0xff] %v4874_v16  ;;  %7181 = vst [vmem:[#allocation133_spill] sm:$0xff] %v4877_v60 }
 0x284   :  { %1469 = vmatpush1.bf16.msra.mxu1 %v4857_v43  ;;  %v4894_v43 = vld [vmem:[#allocation4 + $0xb8] sm:$0xff] }
 0x285   :  { %1520 = vmatprep.subr.bf16.mxu1 %v4860_v7  ;;  %1510 = vmatpush1.bf16.msra.mxu0 %v4863_v57  ;;  %v4885_v7 = vld [vmem:[#allocation4 + $0x60] sm:$0xff]  ;;  %v4888_v57 = vld [vmem:[#allocation4 + $0xa8] sm:$0xff]  ;;  %7186 = vst [vmem:[#allocation138_spill] sm:$0xff] %v4894_v43 }
 0x286   :  { %1561 = vmatprep.subr.bf16.mxu0 %v4867_v28  ;;  %7183 = vst [vmem:[#allocation135_spill] sm:$0xff] %v4885_v7  ;;  %7184 = vst [vmem:[#allocation136_spill] sm:$0xff] %v4888_v57  ;;  %v4891_v28 = vld [vmem:[#allocation4 + $0x70] sm:$0xff] }
 0x287   :  { %1471 = vmatmul.mubr.bf16.vlgmr.msra.gmra.mrb[32].mxu1 %v4865_v23  ;;  %7185 = vst [vmem:[#allocation137_spill] sm:$0xff] %v4891_v28 }
 0x288   :  { %1521 = vmatpush1.bf16.msra.mxu1 %v4871_v48  ;;  %1512 = vmatmul.mubr.bf16.vlgmr.msra.gmra.mrb[40].mxu0 %v4865_v23  ;;  %v4907_v48 = vld [vmem:[#allocation4 + $0xf8] sm:$0xff] }
 0x289   :  { %1522 = vmatprep.subr.bf16.mxu1 %v4874_v16  ;;  %1562 = vmatpush1.bf16.msra.mxu0 %v4877_v60  ;;  %v4899_v16 = vld [vmem:[#allocation4 + $0xa0] sm:$0xff]  ;;  %v4902_v60 = vld [vmem:[#allocation4 + $0xe8] sm:$0xff]  ;;  %7190 = vst [vmem:[#allocation142_spill] sm:$0xff] %v4907_v48 }
 0x28a   :  { %1563 = vmatprep.subr.bf16.mxu0 %v4880_v61  ;;  %1552 = vmatprep.mubr.bf16.mxu1 %v4740_v10  ;;  %7187 = vst [vmem:[#allocation139_spill] sm:$0xff] %v4899_v16  ;;  %7188 = vst [vmem:[#allocation140_spill] sm:$0xff] %v4902_v60  ;;  %v4905_v61 = vld [vmem:[#allocation4 + $0xb0] sm:$0xff] }
 0x28b   :  { %1593 = vmatprep.mubr.bf16.mxu0 %v4740_v10  ;;  %7189 = vst [vmem:[#allocation141_spill] sm:$0xff] %v4905_v61  ;;  %v4911_v10 = vld [vmem:[#allocation4 + $0xe0] sm:$0xff] }
 0x28c   :  { %1523 = vmatpush1.bf16.msra.mxu1 %v4885_v7  ;;  %7191 = vst [vmem:[#allocation143_spill] sm:$0xff] %v4911_v10  ;;  %v4919_v7 = vld [vmem:[#allocation4 + $0x138] sm:$0xff] }
 0x28d   :  { %1524 = vmatprep.subr.bf16.mxu1 %v4888_v57  ;;  %1564 = vmatpush1.bf16.msra.mxu0 %v4891_v28  ;;  %v4914_v57 = vld [vmem:[#allocation4 + $0x128] sm:$0xff]  ;;  %v4917_v28 = vld [vmem:[#allocation4 + $0xf0] sm:$0xff]  ;;  %7194 = vst [vmem:[#allocation146_spill] sm:$0xff] %v4919_v7 }
 0x28e   :  { %1565 = vmatprep.subr.bf16.mxu0 %v4894_v43  ;;  %7192 = vst [vmem:[#allocation144_spill] sm:$0xff] %v4914_v57  ;;  %7193 = vst [vmem:[#allocation145_spill] sm:$0xff] %v4917_v28  ;;  %v4923_v43 = vld [vmem:[#allocation4 + $0x120] sm:$0xff] }
 0x28f   :  { %7195 = vst [vmem:[#allocation147_spill] sm:$0xff] %v4923_v43 }
 0x290   :  { %1525 = vmatpush1.bf16.msra.mxu1 %v4899_v16  ;;  %v4931_v16 = vld [vmem:[#allocation4 + $0x178] sm:$0xff] }
 0x291   :  { %1526 = vmatprep.subr.bf16.mxu1 %v4902_v60  ;;  %1566 = vmatpush1.bf16.msra.mxu0 %v4905_v61  ;;  %v4926_v60 = vld [vmem:[#allocation4 + $0x168] sm:$0xff]  ;;  %v4929_v61 = vld [vmem:[#allocation4 + $0x130] sm:$0xff]  ;;  %7198 = vst [vmem:[#allocation150_spill] sm:$0xff] %v4931_v16 }
 0x292   :  { %1567 = vmatprep.subr.bf16.mxu0 %v4907_v48  ;;  %7196 = vst [vmem:[#allocation148_spill] sm:$0xff] %v4926_v60  ;;  %7197 = vst [vmem:[#allocation149_spill] sm:$0xff] %v4929_v61  ;;  %v4935_v48 = vld [vmem:[#allocation4 + $0x160] sm:$0xff] }
 0x293   :  { %7199 = vst [vmem:[#allocation151_spill] sm:$0xff] %v4935_v48 }
 0x294   :  { %1527 = vmatpush1.bf16.msra.mxu1 %v4911_v10  ;;  %v4943_v10 = vld [vmem:[#allocation4 + $0x1b8] sm:$0xff] }
 0x295   :  { %1528 = vmatprep.subr.bf16.mxu1 %v4914_v57  ;;  %1568 = vmatpush1.bf16.msra.mxu0 %v4917_v28  ;;  %v4938_v57 = vld [vmem:[#allocation4 + $0x1a8] sm:$0xff]  ;;  %v4941_v28 = vld [vmem:[#allocation4 + $0x170] sm:$0xff]  ;;  %7202 = vst [vmem:[#allocation154_spill] sm:$0xff] %v4943_v10 }
 0x296   :  { %1569 = vmatprep.subr.bf16.mxu0 %v4919_v7  ;;  %7200 = vst [vmem:[#allocation152_spill] sm:$0xff] %v4938_v57  ;;  %7201 = vst [vmem:[#allocation153_spill] sm:$0xff] %v4941_v28  ;;  %v4947_v7 = vld [vmem:[#allocation4 + $0x1a0] sm:$0xff] }
 0x297   :  { %7203 = vst [vmem:[#allocation155_spill] sm:$0xff] %v4947_v7 }
 0x298   :  { %1529 = vmatpush1.bf16.msra.mxu1 %v4923_v43  ;;  %v4955_v43 = vld [vmem:[#allocation4 + $0x1f8] sm:$0xff] }
 0x299   :  { %1530 = vmatprep.subr.bf16.mxu1 %v4926_v60  ;;  %1570 = vmatpush1.bf16.msra.mxu0 %v4929_v61  ;;  %v4950_v60 = vld [vmem:[#allocation4 + $0x1e8] sm:$0xff]  ;;  %v4953_v61 = vld [vmem:[#allocation4 + $0x1b0] sm:$0xff]  ;;  %7206 = vst [vmem:[#allocation158_spill] sm:$0xff] %v4955_v43 }
 0x29a   :  { %1571 = vmatprep.subr.bf16.mxu0 %v4931_v16  ;;  %7204 = vst [vmem:[#allocation156_spill] sm:$0xff] %v4950_v60  ;;  %7205 = vst [vmem:[#allocation157_spill] sm:$0xff] %v4953_v61  ;;  %v4959_v16 = vld [vmem:[#allocation4 + $0x1e0] sm:$0xff] }
 0x29b   :  { %7207 = vst [vmem:[#allocation159_spill] sm:$0xff] %v4959_v16 }
 0x29c   :  { %1531 = vmatpush1.bf16.msra.mxu1 %v4935_v48  ;;  %v4967_v48 = vld [vmem:[#allocation4 + $0x238] sm:$0xff] }
 0x29d   :  { %1532 = vmatprep.subr.bf16.mxu1 %v4938_v57  ;;  %1572 = vmatpush1.bf16.msra.mxu0 %v4941_v28  ;;  %v4962_v57 = vld [vmem:[#allocation4 + $0x228] sm:$0xff]  ;;  %v4965_v28 = vld [vmem:[#allocation4 + $0x1f0] sm:$0xff]  ;;  %7210 = vst [vmem:[#allocation162_spill] sm:$0xff] %v4967_v48 }
 0x29e   :  { %1573 = vmatprep.subr.bf16.mxu0 %v4943_v10  ;;  %7208 = vst [vmem:[#allocation160_spill] sm:$0xff] %v4962_v57  ;;  %7209 = vst [vmem:[#allocation161_spill] sm:$0xff] %v4965_v28  ;;  %v4971_v10 = vld [vmem:[#allocation4 + $0x220] sm:$0xff] }
 0x29f   :  { %7211 = vst [vmem:[#allocation163_spill] sm:$0xff] %v4971_v10 }
 0x2a0   :  { %1533 = vmatpush1.bf16.msra.mxu1 %v4947_v7  ;;  %v4979_v7 = vld [vmem:[#allocation4 + $0x278] sm:$0xff] }
 0x2a1   :  { %1534 = vmatprep.subr.bf16.mxu1 %v4950_v60  ;;  %1574 = vmatpush1.bf16.msra.mxu0 %v4953_v61  ;;  %v4974_v60 = vld [vmem:[#allocation4 + $0x268] sm:$0xff]  ;;  %v4977_v61 = vld [vmem:[#allocation4 + $0x230] sm:$0xff]  ;;  %7214 = vst [vmem:[#allocation166_spill] sm:$0xff] %v4979_v7 }
 0x2a2   :  { %1575 = vmatprep.subr.bf16.mxu0 %v4955_v43  ;;  %7212 = vst [vmem:[#allocation164_spill] sm:$0xff] %v4974_v60  ;;  %7213 = vst [vmem:[#allocation165_spill] sm:$0xff] %v4977_v61  ;;  %v4983_v43 = vld [vmem:[#allocation4 + $0x260] sm:$0xff] }
 0x2a3   :  { %7215 = vst [vmem:[#allocation167_spill] sm:$0xff] %v4983_v43 }
 0x2a4   :  { %1535 = vmatpush1.bf16.msra.mxu1 %v4959_v16  ;;  %v4991_v16 = vld [vmem:[#allocation4 + $0x2b8] sm:$0xff] }
 0x2a5   :  { %1536 = vmatprep.subr.bf16.mxu1 %v4962_v57  ;;  %1576 = vmatpush1.bf16.msra.mxu0 %v4965_v28  ;;  %v4986_v57 = vld [vmem:[#allocation4 + $0x2a8] sm:$0xff]  ;;  %v4989_v28 = vld [vmem:[#allocation4 + $0x270] sm:$0xff]  ;;  %7218 = vst [vmem:[#allocation170_spill] sm:$0xff] %v4991_v16 }
 0x2a6   :  { %1577 = vmatprep.subr.bf16.mxu0 %v4967_v48  ;;  %7216 = vst [vmem:[#allocation168_spill] sm:$0xff] %v4986_v57  ;;  %7217 = vst [vmem:[#allocation169_spill] sm:$0xff] %v4989_v28  ;;  %v4995_v48 = vld [vmem:[#allocation4 + $0x2a0] sm:$0xff] }
 0x2a7   :  { %7219 = vst [vmem:[#allocation171_spill] sm:$0xff] %v4995_v48 }
 0x2a8   :  { %1537 = vmatpush1.bf16.msra.mxu1 %v4971_v10  ;;  %v5003_v10 = vld [vmem:[#allocation4 + $0x2f8] sm:$0xff] }
 0x2a9   :  { %1538 = vmatprep.subr.bf16.mxu1 %v4974_v60  ;;  %1578 = vmatpush1.bf16.msra.mxu0 %v4977_v61  ;;  %v4998_v60 = vld [vmem:[#allocation4 + $0x2e8] sm:$0xff]  ;;  %v5001_v61 = vld [vmem:[#allocation4 + $0x2b0] sm:$0xff]  ;;  %7222 = vst [vmem:[#allocation174_spill] sm:$0xff] %v5003_v10 }
 0x2aa   :  { %1579 = vmatprep.subr.bf16.mxu0 %v4979_v7  ;;  %7220 = vst [vmem:[#allocation172_spill] sm:$0xff] %v4998_v60  ;;  %7221 = vst [vmem:[#allocation173_spill] sm:$0xff] %v5001_v61  ;;  %v5007_v7 = vld [vmem:[#allocation4 + $0x2e0] sm:$0xff] }
 0x2ab   :  { %7223 = vst [vmem:[#allocation175_spill] sm:$0xff] %v5007_v7 }
 0x2ac   :  { %1539 = vmatpush1.bf16.msra.mxu1 %v4983_v43  ;;  %v5015_v43 = vld [vmem:[#allocation4 + $0x338] sm:$0xff] }
 0x2ad   :  { %1540 = vmatprep.subr.bf16.mxu1 %v4986_v57  ;;  %1580 = vmatpush1.bf16.msra.mxu0 %v4989_v28  ;;  %v5010_v57 = vld [vmem:[#allocation4 + $0x328] sm:$0xff]  ;;  %v5013_v28 = vld [vmem:[#allocation4 + $0x2f0] sm:$0xff]  ;;  %7226 = vst [vmem:[#allocation178_spill] sm:$0xff] %v5015_v43 }
 0x2ae   :  { %1581 = vmatprep.subr.bf16.mxu0 %v4991_v16  ;;  %7224 = vst [vmem:[#allocation176_spill] sm:$0xff] %v5010_v57  ;;  %7225 = vst [vmem:[#allocation177_spill] sm:$0xff] %v5013_v28  ;;  %v5019_v16 = vld [vmem:[#allocation4 + $0x320] sm:$0xff] }
 0x2af   :  { %7227 = vst [vmem:[#allocation179_spill] sm:$0xff] %v5019_v16 }
 0x2b0   :  { %1541 = vmatpush1.bf16.msra.mxu1 %v4995_v48  ;;  %v5027_v48 = vld [vmem:[#allocation4 + $0x378] sm:$0xff] }
 0x2b1   :  { %1542 = vmatprep.subr.bf16.mxu1 %v4998_v60  ;;  %1582 = vmatpush1.bf16.msra.mxu0 %v5001_v61  ;;  %v5022_v60 = vld [vmem:[#allocation4 + $0x368] sm:$0xff]  ;;  %v5025_v61 = vld [vmem:[#allocation4 + $0x330] sm:$0xff]  ;;  %7230 = vst [vmem:[#allocation182_spill] sm:$0xff] %v5027_v48 }
 0x2b2   :  { %1583 = vmatprep.subr.bf16.mxu0 %v5003_v10  ;;  %7228 = vst [vmem:[#allocation180_spill] sm:$0xff] %v5022_v60  ;;  %7229 = vst [vmem:[#allocation181_spill] sm:$0xff] %v5025_v61  ;;  %v5031_v10 = vld [vmem:[#allocation4 + $0x360] sm:$0xff] }
 0x2b4   :  { %1543 = vmatpush1.bf16.msra.mxu1 %v5007_v7  ;;  %v5039_v7 = vld [vmem:[#allocation4 + $0x3b8] sm:$0xff] }
 0x2b5   :  { %1544 = vmatprep.subr.bf16.mxu1 %v5010_v57  ;;  %1584 = vmatpush1.bf16.msra.mxu0 %v5013_v28  ;;  %v5034_v57 = vld [vmem:[#allocation4 + $0x3a8] sm:$0xff]  ;;  %v5037_v28 = vld [vmem:[#allocation4 + $0x370] sm:$0xff] }
 0x2b6   :  { %1585 = vmatprep.subr.bf16.mxu0 %v5015_v43  ;;  %7231 = vst [vmem:[#allocation183_spill] sm:$0xff] %v5034_v57  ;;  %v5043_v43 = vld [vmem:[#allocation4 + $0x3a0] sm:$0xff] }
 0x2b8   :  { %1545 = vmatpush1.bf16.msra.mxu1 %v5019_v16  ;;  %v5051_v16 = vld [vmem:[#allocation4 + $0x3f8] sm:$0xff] }
 0x2b9   :  { %1546 = vmatprep.subr.bf16.mxu1 %v5022_v60  ;;  %1586 = vmatpush1.bf16.msra.mxu0 %v5025_v61  ;;  %v5046_v60 = vld [vmem:[#allocation4 + $0x3e8] sm:$0xff]  ;;  %v5049_v61 = vld [vmem:[#allocation4 + $0x3b0] sm:$0xff] }
 0x2ba   :  { %1587 = vmatprep.subr.bf16.mxu0 %v5027_v48  ;;  %v5055_v48 = vld [vmem:[#allocation4 + $0x3e0] sm:$0xff] }
 0x2bc   :  { %1547 = vmatpush1.bf16.msra.mxu1 %v5031_v10 }
 0x2bd   :  { %1548 = vmatprep.subr.bf16.mxu1 %v5034_v57  ;;  %1588 = vmatpush1.bf16.msra.mxu0 %v5037_v28  ;;  %v5059_v57 = vld [vmem:[#allocation4 + $0x3f0] sm:$0xff] }
 0x2be   :  { %1589 = vmatprep.subr.bf16.mxu0 %v5039_v7 }
 0x2c0   :  { %1549 = vmatpush1.bf16.msra.mxu1 %v5043_v43 }
 0x2c1   :  { %1550 = vmatprep.subr.bf16.mxu1 %v5046_v60  ;;  %1590 = vmatpush1.bf16.msra.mxu0 %v5049_v61 }
 0x2c2   :  { %1591 = vmatprep.subr.bf16.mxu0 %v5051_v16 }
 0x2c4   :  { %1551 = vmatpush1.bf16.msra.mxu1 %v5055_v48 }
 0x2c5   :  { %1592 = vmatpush1.bf16.msra.mxu0 %v5059_v57  ;;  %1656 = vmatprep.subr.bf16.mxu1 %v4663_v24 }
 0x2c6   :  { %1697 = vmatprep.subr.bf16.mxu0 %v4670_v26 }
 0x2c7   :  { %1553 = vmatmul.mubr.bf16.vlgmr.msra.gmra.mrb[36].mxu1 %v4865_v23 }
 0x2c8   :  { %1594 = vmatmul.mubr.bf16.vlgmr.msra.gmra.mrb[44].mxu0 %v4865_v23  ;;  %1657 = vmatpush1.bf16.msra.mxu1 %v4665_v29  ;;  %v7232_v23 = vld [vmem:[#allocation118_spill] sm:$0xff] }
 0x2c9   :  { %1698 = vmatpush1.bf16.msra.mxu0 %v4672_v39  ;;  %1658 = vmatprep.subr.bf16.mxu1 %v4667_v3 }
 0x2ca   :  { %1699 = vmatprep.subr.bf16.mxu0 %v4676_v40 }
 0x2cc   :  { %1659 = vmatpush1.bf16.msra.mxu1 %v4679_v52 }
 0x2cd   :  { %1700 = vmatpush1.bf16.msra.mxu0 %v4685_v2  ;;  %1660 = vmatprep.subr.bf16.mxu1 %v4682_v55 }
 0x2ce   :  { %1701 = vmatprep.subr.bf16.mxu0 %v4687_v5 }
 0x2d0   :  { %1661 = vmatpush1.bf16.msra.mxu1 %v4691_v25 }
 0x2d1   :  { %1702 = vmatpush1.bf16.msra.mxu0 %v4697_v32  ;;  %1662 = vmatprep.subr.bf16.mxu1 %v4694_v1 }
 0x2d2   :  { %1703 = vmatprep.subr.bf16.mxu0 %v4699_v37 }
 0x2d4   :  { %1663 = vmatpush1.bf16.msra.mxu1 %v4703_v33 }
 0x2d5   :  { %1704 = vmatpush1.bf16.msra.mxu0 %v4709_v9  ;;  %1664 = vmatprep.subr.bf16.mxu1 %v4706_v0 }
 0x2d6   :  { %1705 = vmatprep.subr.bf16.mxu0 %v4711_v54 }
 0x2d8   :  { %1665 = vmatpush1.bf16.msra.mxu1 %v4715_v11 }
 0x2d9   :  { %1706 = vmatpush1.bf16.msra.mxu0 %v4721_v19  ;;  %1666 = vmatprep.subr.bf16.mxu1 %v4718_v8 }
 0x2da   :  { %1707 = vmatprep.subr.bf16.mxu0 %v4723_v58 }
 0x2dc   :  { %1667 = vmatpush1.bf16.msra.mxu1 %v4727_v21 }
 0x2dd   :  { %1708 = vmatpush1.bf16.msra.mxu0 %v4733_v51  ;;  %1668 = vmatprep.subr.bf16.mxu1 %v4730_v59 }
 0x2de   :  { %1709 = vmatprep.subr.bf16.mxu0 %v4738_v13 }
 0x2e0   :  { %1669 = vmatpush1.bf16.msra.mxu1 %v4744_v53 }
 0x2e1   :  { %1710 = vmatpush1.bf16.msra.mxu0 %v4750_v30  ;;  %1670 = vmatprep.subr.bf16.mxu1 %v4747_v49 }
 0x2e2   :  { %1711 = vmatprep.subr.bf16.mxu0 %v4753_v50 }
 0x2e4   :  { %1671 = vmatpush1.bf16.msra.mxu1 %v4758_v4 }
 0x2e5   :  { %1712 = vmatpush1.bf16.msra.mxu0 %v4764_v6  ;;  %1672 = vmatprep.subr.bf16.mxu1 %v4761_v18 }
 0x2e6   :  { %1713 = vmatprep.subr.bf16.mxu0 %v4766_v15 }
 0x2e8   :  { %1673 = vmatpush1.bf16.msra.mxu1 %v4770_v12 }
 0x2e9   :  { %1714 = vmatpush1.bf16.msra.mxu0 %v4776_v44  ;;  %1674 = vmatprep.subr.bf16.mxu1 %v4773_v31 }
 0x2ea   :  { %1715 = vmatprep.subr.bf16.mxu0 %v4778_v47  ;;  %v7247_v47 = vld [vmem:[#allocation36_spill] sm:$0xff] }
 0x2ec   :  { %1675 = vmatpush1.bf16.msra.mxu1 %v4782_v45  ;;  %v7246_v45 = vld [vmem:[#allocation34_spill] sm:$0xff] }
 0x2ed   :  { %1716 = vmatpush1.bf16.msra.mxu0 %v4788_v20  ;;  %1676 = vmatprep.subr.bf16.mxu1 %v4785_v38  ;;  %v7244_v38 = vld [vmem:[#allocation35_spill] sm:$0xff]  ;;  %v7245_v20 = vld [vmem:[#allocation37_spill] sm:$0xff] }
 0x2ee   :  { %1717 = vmatprep.subr.bf16.mxu0 %v4790_v62 }
 0x2f0   :  { %1677 = vmatpush1.bf16.msra.mxu1 %v4794_v14 }
 0x2f1   :  { %1718 = vmatpush1.bf16.msra.mxu0 %v4800_v35  ;;  %1678 = vmatprep.subr.bf16.mxu1 %v4797_v41  ;;  %v7233_v35 = vld [vmem:[#allocation119_spill] sm:$0xff]  ;;  %v7234_v41 = vld [vmem:[#allocation121_spill] sm:$0xff] }
 0x2f2   :  { %1719 = vmatprep.subr.bf16.mxu0 %v4802_v42  ;;  %v7235_v42 = vld [vmem:[#allocation120_spill] sm:$0xff] }
 0x2f4   :  { %1679 = vmatpush1.bf16.msra.mxu1 %v4806_v36  ;;  %v7236_v36 = vld [vmem:[#allocation122_spill] sm:$0xff] }
 0x2f5   :  { %1720 = vmatpush1.bf16.msra.mxu0 %v4812_v56  ;;  %1680 = vmatprep.subr.bf16.mxu1 %v4809_v46  ;;  %v7237_v56 = vld [vmem:[#allocation123_spill] sm:$0xff]  ;;  %v7238_v46 = vld [vmem:[#allocation125_spill] sm:$0xff] }
 0x2f6   :  { %1721 = vmatprep.subr.bf16.mxu0 %v4814_v34  ;;  %v7239_v34 = vld [vmem:[#allocation124_spill] sm:$0xff] }
 0x2f8   :  { %1681 = vmatpush1.bf16.msra.mxu1 %v4818_v63 }
 0x2f9   :  { %1722 = vmatpush1.bf16.msra.mxu0 %v4824_v22  ;;  %1682 = vmatprep.subr.bf16.mxu1 %v4821_v27  ;;  %v7240_v22 = vld [vmem:[#allocation127_spill] sm:$0xff]  ;;  %v7241_v27 = vld [vmem:[#allocation129_spill] sm:$0xff] }
 0x2fa   :  { %1723 = vmatprep.subr.bf16.mxu0 %v7232_v23  ;;  %v7242_v23 = vld [vmem:[#allocation128_spill] sm:$0xff] }
 0x2fc   :  { %1683 = vmatpush1.bf16.msra.mxu1 %v7233_v35  ;;  %v7243_v35 = vld [vmem:[#allocation130_spill] sm:$0xff] }
 0x2fd   :  { %1724 = vmatpush1.bf16.msra.mxu0 %v7234_v41  ;;  %1684 = vmatprep.subr.bf16.mxu1 %v7235_v42 }
 0x2fe   :  { %1725 = vmatprep.subr.bf16.mxu0 %v7236_v36 }
 0x300   :  { %1685 = vmatpush1.bf16.msra.mxu1 %v7237_v56 }
 0x301   :  { %1726 = vmatpush1.bf16.msra.mxu0 %v7238_v46  ;;  %1686 = vmatprep.subr.bf16.mxu1 %v7239_v34 }
 0x302   :  { %1727 = vmatprep.subr.bf16.mxu0 %v4850_v17 }
 0x304   :  { %1687 = vmatpush1.bf16.msra.mxu1 %v7240_v22 }
 0x305   :  { %1728 = vmatpush1.bf16.msra.mxu0 %v7241_v27  ;;  %1738 = vmatprep.subr.bf16.mxu1 %v7242_v23 }
 0x306   :  { %1779 = vmatprep.subr.bf16.mxu0 %v7243_v35 }
 0x35a   :  { %v1472_v41 = vpop.f32.mrb[32].mxu1 }
 0x35b   :  { %v1474_v42 = vpop.f32.mrb[33].mxu1  ;;  %v1513_v63 = vpop.f32.mrb[40].mxu0  ;;  %v1602_v22 = vadd.f32 %v1472_v41, %v7246_v45 }
 0x35c   :  { %v1476_v36 = vpop.f32.mrb[34].mxu1  ;;  %v1515_v14 = vpop.f32.mrb[41].mxu0  ;;  %v1604_v34 = vadd.f32 %v1513_v63, %v7244_v38  ;;  %v1603_v27 = vadd.f32 %v1474_v42, %v7247_v47  ;;  %v7249_v63 = vld [vmem:[#allocation68_spill] sm:$0xff] }
 0x35d   :  { %v1477_v56 = vpop.f32.mrb[35].mxu1  ;;  %v1517_v62 = vpop.f32.mrb[42].mxu0  ;;  %v1605_v17 = vadd.f32 %v1515_v14, %v7245_v20  ;;  %v1610_v44 = vmul.f32 0.5, %v1602_v22  ;;  %v7250_v20 = vld [vmem:[#allocation67_spill] sm:$0xff]  ;;  %v7251_v22 = vld [vmem:[#allocation69_spill] sm:$0xff] }
 0x35e   :  { %v1518_v46 = vpop.f32.mrb[43].mxu0  ;;  %v1618_v31 = vmul.f32 0.5, %v1604_v34  ;;  %v1611_v35 = vmul.f32 0.5, %v1603_v27  ;;  %v7248_v56 = vld [vmem:[#allocation66_spill] sm:$0xff] }
 0x35f   :  { %v1619_v23 = vmul.f32 0.5, %v1605_v17 }
 0x360   :  { %3548 = vtanh.f32 %v1618_v31 }
 0x361   :  { %3550 = vtanh.f32 %v1619_v23 }
 0x362   :  { %3552 = vtanh.f32 %v1610_v44 }
 0x363   :  { %3554 = vtanh.f32 %v1611_v35 }
 0x36a   :  { %v3549_v42 = vpop.eup %3548 }
 0x36b   :  { %v3551_v47 = vpop.eup %3550 }
 0x36c   :  { %v3553_v34 = vpop.eup %3552  ;;  %v1623_v15 = vmul.f32 0.5, %v3551_v47 }
 0x39a   :  { %v1554_v36 = vpop.f32.mrb[36].mxu1 }
 0x39b   :  { %v1606_v62 = vadd.f32 %v1554_v36, %v7248_v56  ;;  %v1556_v46 = vpop.f32.mrb[37].mxu1  ;;  %v1595_v12 = vpop.f32.mrb[44].mxu0  ;;  %v1622_v56 = vmul.f32 0.5, %v3549_v42 }
 0x39c   :  { %v1607_v38 = vadd.f32 %v1556_v46, %v7249_v63  ;;  %v1558_v14 = vpop.f32.mrb[38].mxu1  ;;  %v1608_v41 = vadd.f32 %v1595_v12, %v7250_v20  ;;  %v1597_v45 = vpop.f32.mrb[45].mxu0  ;;  %v1614_v46 = vmul.f32 0.5, %v3553_v34 }
 0x39d   :  { %3556 = vtanh.f32 %v1606_v62  ;;  %v1559_v17 = vpop.f32.mrb[39].mxu1  ;;  %v1609_v27 = vadd.f32 %v1597_v45, %v7251_v22  ;;  %v1599_v31 = vpop.f32.mrb[46].mxu0  ;;  %v1624_v12 = vadd.f32 0.5, %v1622_v56  ;;  %v1298_v62 = vld [vmem:[%s6683_s8] sm:$0xff]  ;;  %v1625_v14 = vadd.f32 0.5, %v1623_v15 }
 0x39e   :  { %3558 = vtanh.f32 %v1607_v38  ;;  %v1628_v35 = vmul.f32 0.5, %v1608_v41  ;;  %v1600_v44 = vpop.f32.mrb[47].mxu0  ;;  %v3555_v36 = vpop.eup %3554  ;;  %v1616_v20 = vadd.f32 0.5, %v1614_v46  ;;  %v1299_v38 = vld [vmem:[%s6683_s8 + $0x8] sm:$0xff] }
 0x39f   :  { %v1629_v23 = vmul.f32 0.5, %v1609_v27  ;;  %v1615_v63 = vmul.f32 0.5, %v3555_v36  ;;  %v1636_v42 = vmul.f32 %v1624_v12, %v1298_v62  ;;  %v1637_v27 = vmul.f32 %v1625_v14, %v1299_v38  ;;  %v7252_v38 = vld [vmem:[#allocation131_spill] sm:$0xff] }
 0x3a0   :  { %3560 = vtanh.f32 %v1628_v35 }
 0x3a1   :  { %3562 = vtanh.f32 %v1629_v23  ;;  %v1617_v45 = vadd.f32 0.5, %v1615_v63 }
 0x3a7   :  { %v3557_v41 = vpop.eup %3556 }
 0x3a8   :  { %v3559_v17 = vpop.eup %3558  ;;  %v1638_v22 = vmul.f32 %v3557_v41, %v1616_v20  ;;  %v7253_v41 = vld [vmem:[#allocation133_spill] sm:$0xff] }
 0x3a9   :  { %v1639_v31 = vmul.f32 %v3559_v17, %v1617_v45  ;;  %v7254_v45 = vld [vmem:[#allocation132_spill] sm:$0xff]  ;;  %v7255_v17 = vld [vmem:[#allocation134_spill] sm:$0xff] }
 0x3aa   :  { %v5145_v47 = vadd.f32 %v1638_v22, %v1636_v42  ;;  %v3561_v44 = vpop.eup %3560  ;;  %v7256_v42 = vld [vmem:[#allocation135_spill] sm:$0xff]  ;;  %v7257_v22 = vld [vmem:[#allocation137_spill] sm:$0xff] }
 0x3ab   :  { %v5147_v35 = vadd.f32 %v1639_v31, %v1637_v27  ;;  %v3563_v15 = vpop.eup %3562  ;;  %v1632_v34 = vmul.f32 0.5, %v3561_v44  ;;  %v7258_v27 = vld [vmem:[#allocation136_spill] sm:$0xff]  ;;  %v7259_v31 = vld [vmem:[#allocation138_spill] sm:$0xff]  ;;  %v7260_v44 = vld [vmem:[#allocation139_spill] sm:$0xff] }
 0x3ac   :  { %3564 = vtanh.f32 %v5145_v47  ;;  %v1633_v23 = vmul.f32 0.5, %v3563_v15  ;;  %v7261_v15 = vld [vmem:[#allocation141_spill] sm:$0xff] }
 0x3ad   :  { %3566 = vtanh.f32 %v5147_v35  ;;  %v1634_v36 = vadd.f32 0.5, %v1632_v34  ;;  %v7262_v34 = vld [vmem:[#allocation140_spill] sm:$0xff] }
 0x3ae   :  { %v1635_v56 = vadd.f32 0.5, %v1633_v23  ;;  %v7263_v23 = vld [vmem:[#allocation142_spill] sm:$0xff] }
 0x3b6   :  { %v3565_v46 = vpop.eup %3564 }
 0x3b7   :  { %v3567_v63 = vpop.eup %3566  ;;  %v1644_v12 = vmul.f32 %v3565_v46, %v1634_v36  ;;  %v7264_v36 = vld [vmem:[#allocation143_spill] sm:$0xff]  ;;  %v7266_v46 = vld [vmem:[#allocation144_spill] sm:$0xff] }
 0x3b8   :  { %v1645_v62 = vmul.f32 %v3567_v63, %v1635_v56  ;;  %v7265_v56 = vld [vmem:[#allocation145_spill] sm:$0xff]  ;;  %v7267_v63 = vld [vmem:[#allocation146_spill] sm:$0xff] }
 0x3b9   :  { %v5151_v20 = vpack.c.bf16 %v1644_v12, %v1644_v12  ;;  %v7268_v12 = vld [vmem:[#allocation147_spill] sm:$0xff] }
 0x3ba   :  { %v1655_v14 = vpack.c.bf16 %v1645_v62, %v1645_v62  ;;  %v7269_v62 = vld [vmem:[#allocation149_spill] sm:$0xff] }
 0x3bc   :  { %1688 = vmatprep.mubr.bf16.mxu1 %v1655_v14  ;;  %1729 = vmatprep.mubr.bf16.mxu0 %v1655_v14 }
 0x3bd   :  { %1689 = vmatmul.mubr.bf16.vlgmr.msra.gmra.mrb[40].mxu1 %v5151_v20  ;;  %1730 = vmatmul.mubr.bf16.vlgmr.msra.gmra.mrb[48].mxu0 %v5151_v20 }
 0x3be   :  { %1739 = vmatpush1.bf16.msra.mxu1 %v7252_v38  ;;  %1780 = vmatpush1.bf16.msra.mxu0 %v7253_v41 }
 0x3bf   :  { %1770 = vmatprep.mubr.bf16.mxu1 %v1655_v14  ;;  %1811 = vmatprep.mubr.bf16.mxu0 %v1655_v14  ;;  %v7270_v14 = vld [vmem:[#allocation148_spill] sm:$0xff] }
 0x3c0   :  { %1740 = vmatprep.subr.bf16.mxu1 %v7254_v45  ;;  %1781 = vmatprep.subr.bf16.mxu0 %v7255_v17 }
 0x3c2   :  { %1741 = vmatpush1.bf16.msra.mxu1 %v7256_v42  ;;  %1782 = vmatpush1.bf16.msra.mxu0 %v7257_v22 }
 0x3c3   :  { %1742 = vmatprep.subr.bf16.mxu1 %v7258_v27  ;;  %1783 = vmatprep.subr.bf16.mxu0 %v7259_v31 }
 0x3c6   :  { %1743 = vmatpush1.bf16.msra.mxu1 %v7260_v44  ;;  %1784 = vmatpush1.bf16.msra.mxu0 %v7261_v15  ;;  %v7271_v44 = vld [vmem:[#allocation150_spill] sm:$0xff]  ;;  %v7272_v15 = vld [vmem:[#allocation151_spill] sm:$0xff] }
 0x3c7   :  { %1744 = vmatprep.subr.bf16.mxu1 %v7262_v34  ;;  %1785 = vmatprep.subr.bf16.mxu0 %v7263_v23  ;;  %v7273_v34 = vld [vmem:[#allocation153_spill] sm:$0xff]  ;;  %v7274_v23 = vld [vmem:[#allocation152_spill] sm:$0xff] }
 0x3ca   :  { %1745 = vmatpush1.bf16.msra.mxu1 %v7264_v36  ;;  %1786 = vmatpush1.bf16.msra.mxu0 %v7265_v56  ;;  %v7275_v36 = vld [vmem:[#allocation154_spill] sm:$0xff]  ;;  %v7276_v56 = vld [vmem:[#allocation155_spill] sm:$0xff] }
 0x3cb   :  { %1746 = vmatprep.subr.bf16.mxu1 %v7266_v46  ;;  %1787 = vmatprep.subr.bf16.mxu0 %v7267_v63  ;;  %v7277_v46 = vld [vmem:[#allocation157_spill] sm:$0xff]  ;;  %v7278_v63 = vld [vmem:[#allocation156_spill] sm:$0xff] }
 0x3ce   :  { %1747 = vmatpush1.bf16.msra.mxu1 %v7268_v12  ;;  %1788 = vmatpush1.bf16.msra.mxu0 %v7269_v62  ;;  %v7279_v12 = vld [vmem:[#allocation158_spill] sm:$0xff]  ;;  %v7280_v62 = vld [vmem:[#allocation159_spill] sm:$0xff] }
 0x3cf   :  { %1748 = vmatprep.subr.bf16.mxu1 %v7270_v14  ;;  %1789 = vmatprep.subr.bf16.mxu0 %v7271_v44  ;;  %v7281_v14 = vld [vmem:[#allocation161_spill] sm:$0xff]  ;;  %v7282_v44 = vld [vmem:[#allocation160_spill] sm:$0xff] }
 0x3d2   :  { %1749 = vmatpush1.bf16.msra.mxu1 %v7272_v15  ;;  %1790 = vmatpush1.bf16.msra.mxu0 %v7273_v34  ;;  %v7283_v15 = vld [vmem:[#allocation162_spill] sm:$0xff]  ;;  %v7284_v34 = vld [vmem:[#allocation163_spill] sm:$0xff] }
 0x3d3   :  { %1750 = vmatprep.subr.bf16.mxu1 %v7274_v23  ;;  %1791 = vmatprep.subr.bf16.mxu0 %v7275_v36  ;;  %v7285_v23 = vld [vmem:[#allocation165_spill] sm:$0xff]  ;;  %v7286_v36 = vld [vmem:[#allocation164_spill] sm:$0xff] }
 0x3d6   :  { %1751 = vmatpush1.bf16.msra.mxu1 %v7276_v56  ;;  %1792 = vmatpush1.bf16.msra.mxu0 %v7277_v46  ;;  %v7287_v56 = vld [vmem:[#allocation166_spill] sm:$0xff]  ;;  %v7288_v46 = vld [vmem:[#allocation167_spill] sm:$0xff] }
 0x3d7   :  { %1752 = vmatprep.subr.bf16.mxu1 %v7278_v63  ;;  %1793 = vmatprep.subr.bf16.mxu0 %v7279_v12  ;;  %v7289_v63 = vld [vmem:[#allocation169_spill] sm:$0xff]  ;;  %v7290_v12 = vld [vmem:[#allocation168_spill] sm:$0xff] }
 0x3da   :  { %1753 = vmatpush1.bf16.msra.mxu1 %v7280_v62  ;;  %1794 = vmatpush1.bf16.msra.mxu0 %v7281_v14  ;;  %v7291_v62 = vld [vmem:[#allocation170_spill] sm:$0xff]  ;;  %v7292_v14 = vld [vmem:[#allocation171_spill] sm:$0xff] }
 0x3db   :  { %1754 = vmatprep.subr.bf16.mxu1 %v7282_v44  ;;  %1795 = vmatprep.subr.bf16.mxu0 %v7283_v15  ;;  %v7293_v44 = vld [vmem:[#allocation173_spill] sm:$0xff]  ;;  %v7294_v15 = vld [vmem:[#allocation172_spill] sm:$0xff] }
 0x3de   :  { %1755 = vmatpush1.bf16.msra.mxu1 %v7284_v34  ;;  %1796 = vmatpush1.bf16.msra.mxu0 %v7285_v23  ;;  %v7295_v34 = vld [vmem:[#allocation174_spill] sm:$0xff]  ;;  %v7296_v23 = vld [vmem:[#allocation175_spill] sm:$0xff] }
 0x3df   :  { %1756 = vmatprep.subr.bf16.mxu1 %v7286_v36  ;;  %1797 = vmatprep.subr.bf16.mxu0 %v7287_v56  ;;  %v7297_v36 = vld [vmem:[#allocation177_spill] sm:$0xff]  ;;  %v7298_v56 = vld [vmem:[#allocation176_spill] sm:$0xff] }
 0x3e2   :  { %1757 = vmatpush1.bf16.msra.mxu1 %v7288_v46  ;;  %1798 = vmatpush1.bf16.msra.mxu0 %v7289_v63  ;;  %v7299_v46 = vld [vmem:[#allocation178_spill] sm:$0xff]  ;;  %v7300_v63 = vld [vmem:[#allocation179_spill] sm:$0xff] }
 0x3e3   :  { %1758 = vmatprep.subr.bf16.mxu1 %v7290_v12  ;;  %1799 = vmatprep.subr.bf16.mxu0 %v7291_v62  ;;  %v7301_v12 = vld [vmem:[#allocation181_spill] sm:$0xff]  ;;  %v7302_v62 = vld [vmem:[#allocation180_spill] sm:$0xff] }
 0x3e6   :  { %1759 = vmatpush1.bf16.msra.mxu1 %v7292_v14  ;;  %1800 = vmatpush1.bf16.msra.mxu0 %v7293_v44  ;;  %v7303_v14 = vld [vmem:[#allocation182_spill] sm:$0xff] }
 0x3e7   :  { %1760 = vmatprep.subr.bf16.mxu1 %v7294_v15  ;;  %1801 = vmatprep.subr.bf16.mxu0 %v7295_v34  ;;  %v7304_v34 = vld [vmem:[#allocation183_spill] sm:$0xff] }
 0x3ea   :  { %1761 = vmatpush1.bf16.msra.mxu1 %v7296_v23  ;;  %1802 = vmatpush1.bf16.msra.mxu0 %v7297_v36 }
 0x3eb   :  { %1762 = vmatprep.subr.bf16.mxu1 %v7298_v56  ;;  %1803 = vmatprep.subr.bf16.mxu0 %v7299_v46 }
 0x3ee   :  { %1763 = vmatpush1.bf16.msra.mxu1 %v7300_v63  ;;  %1804 = vmatpush1.bf16.msra.mxu0 %v7301_v12 }
 0x3ef   :  { %1764 = vmatprep.subr.bf16.mxu1 %v7302_v62  ;;  %1805 = vmatprep.subr.bf16.mxu0 %v7303_v14 }
 0x3f2   :  { %1765 = vmatpush1.bf16.msra.mxu1 %v5031_v10  ;;  %1806 = vmatpush1.bf16.msra.mxu0 %v5037_v28 }
 0x3f3   :  { %1766 = vmatprep.subr.bf16.mxu1 %v7304_v34  ;;  %1807 = vmatprep.subr.bf16.mxu0 %v5039_v7 }
 0x3f6   :  { %1767 = vmatpush1.bf16.msra.mxu1 %v5043_v43  ;;  %1808 = vmatpush1.bf16.msra.mxu0 %v5049_v61 }
 0x3f7   :  { %1768 = vmatprep.subr.bf16.mxu1 %v5046_v60  ;;  %1809 = vmatprep.subr.bf16.mxu0 %v5051_v16 }
 0x3fa   :  { %1769 = vmatpush1.bf16.msra.mxu1 %v5055_v48  ;;  %1810 = vmatpush1.bf16.msra.mxu0 %v5059_v57 }
 0x3fb   :  { %1874 = vmatprep.subr.bf16.mxu1 %v4663_v24  ;;  %1915 = vmatprep.subr.bf16.mxu0 %v4670_v26  ;;  %v7327_v24 = vld [vmem:[#allocation121_spill] sm:$0xff]  ;;  %v7329_v26 = vld [vmem:[#allocation122_spill] sm:$0xff] }
 0x3fd   :  { %1771 = vmatmul.mubr.bf16.vlgmr.msra.gmra.mrb[44].mxu1 %v5151_v20  ;;  %1812 = vmatmul.mubr.bf16.vlgmr.msra.gmra.mrb[52].mxu0 %v5151_v20 }
 0x3fe   :  { %1875 = vmatpush1.bf16.msra.mxu1 %v4665_v29  ;;  %1916 = vmatpush1.bf16.msra.mxu0 %v4672_v39  ;;  %v7328_v29 = vld [vmem:[#allocation120_spill] sm:$0xff]  ;;  %v7330_v39 = vld [vmem:[#allocation123_spill] sm:$0xff] }
 0x3ff   :  { %1876 = vmatprep.subr.bf16.mxu1 %v4667_v3  ;;  %1917 = vmatprep.subr.bf16.mxu0 %v4676_v40  ;;  %v7323_v3 = vld [vmem:[#allocation117_spill] sm:$0xff] }
 0x400   :  { %v7331_v40 = vld [vmem:[#allocation125_spill] sm:$0xff] }
 0x402   :  { %1877 = vmatpush1.bf16.msra.mxu1 %v4679_v52  ;;  %1918 = vmatpush1.bf16.msra.mxu0 %v4685_v2  ;;  %v7332_v52 = vld [vmem:[#allocation124_spill] sm:$0xff]  ;;  %v7334_v2 = vld [vmem:[#allocation127_spill] sm:$0xff] }
 0x403   :  { %1878 = vmatprep.subr.bf16.mxu1 %v4682_v55  ;;  %1919 = vmatprep.subr.bf16.mxu0 %v4687_v5  ;;  %v7333_v55 = vld [vmem:[#allocation126_spill] sm:$0xff]  ;;  %v7335_v5 = vld [vmem:[#allocation129_spill] sm:$0xff] }
 0x406   :  { %1879 = vmatpush1.bf16.msra.mxu1 %v4691_v25  ;;  %1920 = vmatpush1.bf16.msra.mxu0 %v4697_v32  ;;  %v7325_v32 = vld [vmem:[#allocation118_spill] sm:$0xff]  ;;  %v7336_v25 = vld [vmem:[#allocation128_spill] sm:$0xff] }
 0x407   :  { %1880 = vmatprep.subr.bf16.mxu1 %v4694_v1  ;;  %1921 = vmatprep.subr.bf16.mxu0 %v4699_v37  ;;  %v7324_v37 = vld [vmem:[#allocation116_spill] sm:$0xff]  ;;  %v7326_v1 = vld [vmem:[#allocation119_spill] sm:$0xff] }
 0x40a   :  { %1881 = vmatpush1.bf16.msra.mxu1 %v4703_v33  ;;  %1922 = vmatpush1.bf16.msra.mxu0 %v4709_v9  ;;  %v7314_v33 = vld [vmem:[#allocation107_spill] sm:$0xff]  ;;  %v7321_v9 = vld [vmem:[#allocation114_spill] sm:$0xff] }
 0x40b   :  { %1882 = vmatprep.subr.bf16.mxu1 %v4706_v0  ;;  %1923 = vmatprep.subr.bf16.mxu0 %v4711_v54  ;;  %v7315_v54 = vld [vmem:[#allocation109_spill] sm:$0xff]  ;;  %v7322_v0 = vld [vmem:[#allocation115_spill] sm:$0xff] }
 0x40e   :  { %1883 = vmatpush1.bf16.msra.mxu1 %v4715_v11  ;;  %1924 = vmatpush1.bf16.msra.mxu0 %v4721_v19  ;;  %v7308_v19 = vld [vmem:[#allocation100_spill] sm:$0xff] }
 0x40f   :  { %1884 = vmatprep.subr.bf16.mxu1 %v4718_v8  ;;  %1925 = vmatprep.subr.bf16.mxu0 %v4723_v58  ;;  %v7305_v8 = vld [vmem:[#allocation98_spill] sm:$0xff]  ;;  %v7306_v58 = vld [vmem:[#allocation99_spill] sm:$0xff]  ;;  %v7320_v11 = vld [vmem:[#allocation112_spill] sm:$0xff] }
 0x412   :  { %1885 = vmatpush1.bf16.msra.mxu1 %v4727_v21  ;;  %1926 = vmatpush1.bf16.msra.mxu0 %v4733_v51  ;;  %v7313_v21 = vld [vmem:[#allocation106_spill] sm:$0xff]  ;;  %v7319_v51 = vld [vmem:[#allocation113_spill] sm:$0xff] }
 0x413   :  { %1886 = vmatprep.subr.bf16.mxu1 %v4730_v59  ;;  %1927 = vmatprep.subr.bf16.mxu0 %v4738_v13  ;;  %v7307_v59 = vld [vmem:[#allocation101_spill] sm:$0xff]  ;;  %v7318_v13 = vld [vmem:[#allocation111_spill] sm:$0xff] }
 0x416   :  { %1887 = vmatpush1.bf16.msra.mxu1 %v4744_v53  ;;  %1928 = vmatpush1.bf16.msra.mxu0 %v4750_v30  ;;  %v7309_v53 = vld [vmem:[#allocation102_spill] sm:$0xff]  ;;  %v7310_v30 = vld [vmem:[#allocation103_spill] sm:$0xff] }
 0x417   :  { %1888 = vmatprep.subr.bf16.mxu1 %v4747_v49  ;;  %1929 = vmatprep.subr.bf16.mxu0 %v4753_v50  ;;  %v7311_v49 = vld [vmem:[#allocation105_spill] sm:$0xff]  ;;  %v7312_v50 = vld [vmem:[#allocation104_spill] sm:$0xff] }
 0x41a   :  { %1889 = vmatpush1.bf16.msra.mxu1 %v4758_v4  ;;  %1930 = vmatpush1.bf16.msra.mxu0 %v4764_v6  ;;  %v7316_v6 = vld [vmem:[#allocation108_spill] sm:$0xff]  ;;  %v7337_v4 = vld [vmem:[#allocation130_spill] sm:$0xff] }
 0x41b   :  { %1890 = vmatprep.subr.bf16.mxu1 %v4761_v18  ;;  %1931 = vmatprep.subr.bf16.mxu0 %v7305_v8  ;;  %v7317_v18 = vld [vmem:[#allocation110_spill] sm:$0xff] }
 0x41e   :  { %1891 = vmatpush1.bf16.msra.mxu1 %v7306_v58  ;;  %1932 = vmatpush1.bf16.msra.mxu0 %v7307_v59 }
 0x41f   :  { %1892 = vmatprep.subr.bf16.mxu1 %v7308_v19  ;;  %1933 = vmatprep.subr.bf16.mxu0 %v7309_v53 }
 0x422   :  { %1893 = vmatpush1.bf16.msra.mxu1 %v7310_v30  ;;  %1934 = vmatpush1.bf16.msra.mxu0 %v7311_v49 }
 0x423   :  { %1894 = vmatprep.subr.bf16.mxu1 %v7312_v50  ;;  %1935 = vmatprep.subr.bf16.mxu0 %v7313_v21  ;;  %v7338_v50 = vld [vmem:[#allocation39_spill] sm:$0xff] }
 0x426   :  { %1895 = vmatpush1.bf16.msra.mxu1 %v7314_v33  ;;  %1936 = vmatpush1.bf16.msra.mxu0 %v7315_v54  ;;  %v7339_v33 = vld [vmem:[#allocation41_spill] sm:$0xff] }
 0x427   :  { %1896 = vmatprep.subr.bf16.mxu1 %v7316_v6  ;;  %1937 = vmatprep.subr.bf16.mxu0 %v7317_v18  ;;  %v7340_v6 = vld [vmem:[#allocation38_spill] sm:$0xff] }
 0x42a   :  { %1897 = vmatpush1.bf16.msra.mxu1 %v7318_v13  ;;  %1938 = vmatpush1.bf16.msra.mxu0 %v7319_v51  ;;  %v7341_v13 = vld [vmem:[#allocation40_spill] sm:$0xff] }
 0x42b   :  { %1898 = vmatprep.subr.bf16.mxu1 %v7320_v11  ;;  %1939 = vmatprep.subr.bf16.mxu0 %v7321_v9 }
 0x42e   :  { %1899 = vmatpush1.bf16.msra.mxu1 %v7322_v0  ;;  %1940 = vmatpush1.bf16.msra.mxu0 %v7323_v3 }
 0x42f   :  { %1900 = vmatprep.subr.bf16.mxu1 %v7324_v37  ;;  %1941 = vmatprep.subr.bf16.mxu0 %v7325_v32 }
 0x432   :  { %1901 = vmatpush1.bf16.msra.mxu1 %v7326_v1  ;;  %1942 = vmatpush1.bf16.msra.mxu0 %v7327_v24  ;;  %v7342_v1 = vld [vmem:[#allocation70_spill] sm:$0xff] }
 0x433   :  { %1902 = vmatprep.subr.bf16.mxu1 %v7328_v29  ;;  %1943 = vmatprep.subr.bf16.mxu0 %v7329_v26 }
 0x436   :  { %1903 = vmatpush1.bf16.msra.mxu1 %v7330_v39  ;;  %1944 = vmatpush1.bf16.msra.mxu0 %v7331_v40  ;;  %v7343_v39 = vld [vmem:[#allocation71_spill] sm:$0xff] }
 0x437   :  { %1904 = vmatprep.subr.bf16.mxu1 %v7332_v52  ;;  %1945 = vmatprep.subr.bf16.mxu0 %v7333_v55  ;;  %v7344_v52 = vld [vmem:[#allocation72_spill] sm:$0xff] }
 0x43a   :  { %1905 = vmatpush1.bf16.msra.mxu1 %v7334_v2  ;;  %1946 = vmatpush1.bf16.msra.mxu0 %v7335_v5 }
 0x43b   :  { %1956 = vmatprep.subr.bf16.mxu1 %v7336_v25  ;;  %1997 = vmatprep.subr.bf16.mxu0 %v7337_v4  ;;  %v7345_v4 = vld [vmem:[#allocation73_spill] sm:$0xff] }
 0x490   :  { %v1690_v20 = vpop.f32.mrb[40].mxu1  ;;  %v1731_v8 = vpop.f32.mrb[48].mxu0 }
 0x491   :  { %v1692_v58 = vpop.f32.mrb[41].mxu1  ;;  %v1733_v59 = vpop.f32.mrb[49].mxu0  ;;  %v1822_v21 = vadd.f32 %v1731_v8, %v7338_v50  ;;  %v1820_v18 = vadd.f32 %v1690_v20, %v7340_v6 }
 0x492   :  { %v1694_v19 = vpop.f32.mrb[42].mxu1  ;;  %v1735_v53 = vpop.f32.mrb[50].mxu0  ;;  %v1823_v54 = vadd.f32 %v1733_v59, %v7339_v33  ;;  %v1821_v51 = vadd.f32 %v1692_v58, %v7341_v13 }
 0x493   :  { %v1695_v30 = vpop.f32.mrb[43].mxu1  ;;  %v1736_v49 = vpop.f32.mrb[51].mxu0  ;;  %v1836_v11 = vmul.f32 0.5, %v1822_v21  ;;  %v1828_v0 = vmul.f32 0.5, %v1820_v18 }
 0x494   :  { %v1837_v9 = vmul.f32 0.5, %v1823_v54  ;;  %v1829_v3 = vmul.f32 0.5, %v1821_v51 }
 0x495   :  { %3568 = vtanh.f32 %v1836_v11 }
 0x496   :  { %3570 = vtanh.f32 %v1837_v9 }
 0x497   :  { %3572 = vtanh.f32 %v1828_v0 }
 0x498   :  { %3574 = vtanh.f32 %v1829_v3 }
 0x49f   :  { %v3569_v25 = vpop.eup %3568 }
 0x4a0   :  { %v3571_v59 = vpop.eup %3570  ;;  %v1840_v30 = vmul.f32 0.5, %v3569_v25 }
 0x4a1   :  { %v3573_v19 = vpop.eup %3572  ;;  %v1841_v50 = vmul.f32 0.5, %v3571_v59  ;;  %v7357_v59 = vld [vmem:[#allocation150_spill] sm:$0xff] }
 0x4a2   :  { %v3575_v53 = vpop.eup %3574  ;;  %v1832_v33 = vmul.f32 0.5, %v3573_v19  ;;  %v1842_v6 = vadd.f32 0.5, %v1840_v30  ;;  %v7358_v19 = vld [vmem:[#allocation151_spill] sm:$0xff]  ;;  %v7360_v30 = vld [vmem:[#allocation152_spill] sm:$0xff] }
 0x4a3   :  { %v1833_v54 = vmul.f32 0.5, %v3575_v53  ;;  %v1843_v18 = vadd.f32 0.5, %v1841_v50  ;;  %v7359_v53 = vld [vmem:[#allocation153_spill] sm:$0xff]  ;;  %v7362_v50 = vld [vmem:[#allocation155_spill] sm:$0xff] }
 0x4a4   :  { %v1834_v13 = vadd.f32 0.5, %v1832_v33  ;;  %v1854_v0 = vmul.f32 %v1842_v6, %v5145_v47  ;;  %v7364_v33 = vld [vmem:[#allocation156_spill] sm:$0xff]  ;;  %v7366_v6 = vld [vmem:[#allocation159_spill] sm:$0xff] }
 0x4a5   :  { %v1835_v11 = vadd.f32 0.5, %v1833_v54  ;;  %v7365_v54 = vld [vmem:[#allocation158_spill] sm:$0xff] }
 0x4d0   :  { %v1772_v37 = vpop.f32.mrb[44].mxu1  ;;  %v1813_v32 = vpop.f32.mrb[52].mxu0 }
 0x4d1   :  { %v1824_v24 = vadd.f32 %v1772_v37, %v7342_v1  ;;  %v1774_v29 = vpop.f32.mrb[45].mxu1  ;;  %v1815_v26 = vpop.f32.mrb[53].mxu0  ;;  %v1826_v40 = vadd.f32 %v1813_v32, %v7343_v39  ;;  %v1855_v37 = vmul.f32 %v1843_v18, %v5147_v35  ;;  %v7367_v18 = vld [vmem:[#allocation161_spill] sm:$0xff] }
 0x4d2   :  { %v1825_v55 = vadd.f32 %v1774_v29, %v7344_v52  ;;  %v1776_v2 = vpop.f32.mrb[46].mxu1  ;;  %v1817_v5 = vpop.f32.mrb[54].mxu0  ;;  %v1827_v20 = vadd.f32 %v1815_v26, %v7345_v4 }
 0x4d3   :  { %3576 = vtanh.f32 %v1824_v24  ;;  %v1777_v8 = vpop.f32.mrb[47].mxu1  ;;  %v1818_v58 = vpop.f32.mrb[55].mxu0  ;;  %v1846_v49 = vmul.f32 0.5, %v1826_v40 }
 0x4d4   :  { %3578 = vtanh.f32 %v1825_v55  ;;  %v1847_v21 = vmul.f32 0.5, %v1827_v20  ;;  %v7346_v20 = vld [vmem:[#allocation139_spill] sm:$0xff]  ;;  %v7347_v8 = vld [vmem:[#allocation141_spill] sm:$0xff] }
 0x4d5   :  { %3580 = vtanh.f32 %v1846_v49  ;;  %v7350_v58 = vld [vmem:[#allocation143_spill] sm:$0xff]  ;;  %v7361_v49 = vld [vmem:[#allocation154_spill] sm:$0xff] }
 0x4d6   :  { %3582 = vtanh.f32 %v1847_v21  ;;  %v7363_v21 = vld [vmem:[#allocation157_spill] sm:$0xff] }
 0x4dd   :  { %v3577_v51 = vpop.eup %3576 }
 0x4de   :  { %v3579_v9 = vpop.eup %3578  ;;  %v1856_v3 = vmul.f32 %v3577_v51, %v1834_v13  ;;  %v7368_v13 = vld [vmem:[#allocation160_spill] sm:$0xff]  ;;  %v7369_v51 = vld [vmem:[#allocation162_spill] sm:$0xff] }
 0x4df   :  { %v1857_v32 = vmul.f32 %v3579_v9, %v1835_v11  ;;  %v3581_v29 = vpop.eup %3580  ;;  %v7370_v11 = vld [vmem:[#allocation163_spill] sm:$0xff]  ;;  %v7371_v9 = vld [vmem:[#allocation165_spill] sm:$0xff] }
 0x4e0   :  { %v5295_v1 = vadd.f32 %v1856_v3, %v1854_v0  ;;  %v3583_v26 = vpop.eup %3582  ;;  %v1850_v39 = vmul.f32 0.5, %v3581_v29  ;;  %v7372_v0 = vld [vmem:[#allocation164_spill] sm:$0xff]  ;;  %v7373_v3 = vld [vmem:[#allocation166_spill] sm:$0xff] }
 0x4e1   :  { %v5297_v24 = vadd.f32 %v1857_v32, %v1855_v37  ;;  %v1851_v40 = vmul.f32 0.5, %v3583_v26  ;;  %v7374_v37 = vld [vmem:[#allocation167_spill] sm:$0xff]  ;;  %v7375_v32 = vld [vmem:[#allocation169_spill] sm:$0xff]  ;;  %v7376_v29 = vld [vmem:[#allocation168_spill] sm:$0xff] }
 0x4e2   :  { %3584 = vtanh.f32 %v5295_v1  ;;  %v1852_v52 = vadd.f32 0.5, %v1850_v39  ;;  %v7377_v26 = vld [vmem:[#allocation170_spill] sm:$0xff]  ;;  %v7378_v39 = vld [vmem:[#allocation171_spill] sm:$0xff] }
 0x4e3   :  { %3586 = vtanh.f32 %v5297_v24  ;;  %v1853_v2 = vadd.f32 0.5, %v1851_v40  ;;  %v7379_v40 = vld [vmem:[#allocation174_spill] sm:$0xff] }
 0x4ec   :  { %v3585_v55 = vpop.eup %3584 }
 0x4ed   :  { %v3587_v47 = vpop.eup %3586  ;;  %v1862_v5 = vmul.f32 %v3585_v55, %v1852_v52  ;;  %v5429_v52 = vld [vmem:[#allocation4 + $0x148] sm:$0xff]  ;;  %v5432_v55 = vld [vmem:[#allocation4 + $0x158] sm:$0xff] }
 0x4ee   :  { %v1863_v25 = vmul.f32 %v3587_v47, %v1853_v2  ;;  %7383 = vst [vmem:[#allocation36_spill] sm:$0xff] %v5429_v52  ;;  %7384 = vst [vmem:[#allocation66_spill] sm:$0xff] %v5432_v55  ;;  %v5435_v2 = vld [vmem:[#allocation4 + $0x140] sm:$0xff]  ;;  %v5438_v47 = vld [vmem:[#allocation4 + $0x150] sm:$0xff] }
 0x4ef   :  { %v5301_v4 = vpack.c.bf16 %v1862_v5, %v1862_v5  ;;  %7385 = vst [vmem:[#allocation68_spill] sm:$0xff] %v5435_v2  ;;  %7386 = vst [vmem:[#allocation67_spill] sm:$0xff] %v5438_v47  ;;  %v5441_v5 = vld [vmem:[#allocation4 + $0x188] sm:$0xff] }
 0x4f0   :  { %v1873_v35 = vpack.c.bf16 %v1863_v25, %v1863_v25  ;;  %7387 = vst [vmem:[#allocation69_spill] sm:$0xff] %v5441_v5  ;;  %v5444_v25 = vld [vmem:[#allocation4 + $0x198] sm:$0xff] }
 0x4f1   :  { %7388 = vst [vmem:[#allocation131_spill] sm:$0xff] %v5444_v25 }
 0x4f2   :  { %1906 = vmatprep.mubr.bf16.mxu1 %v1873_v35  ;;  %1947 = vmatprep.mubr.bf16.mxu0 %v1873_v35 }
 0x4f3   :  { %1907 = vmatmul.mubr.bf16.vlgmr.msra.gmra.mrb[48].mxu1 %v5301_v4  ;;  %1948 = vmatmul.mubr.bf16.vlgmr.msra.gmra.mrb[56].mxu0 %v5301_v4 }
 0x4f4   :  { %1957 = vmatpush1.bf16.msra.mxu1 %v7252_v38  ;;  %1998 = vmatpush1.bf16.msra.mxu0 %v7253_v41  ;;  %v7348_v38 = vld [vmem:[#allocation140_spill] sm:$0xff]  ;;  %v7349_v41 = vld [vmem:[#allocation142_spill] sm:$0xff] }
 0x4f5   :  { %1988 = vmatprep.mubr.bf16.mxu1 %v1873_v35  ;;  %2029 = vmatprep.mubr.bf16.mxu0 %v1873_v35  ;;  %v5447_v35 = vld [vmem:[#allocation4 + $0x180] sm:$0xff] }
 0x4f6   :  { %1958 = vmatprep.subr.bf16.mxu1 %v7254_v45  ;;  %1999 = vmatprep.subr.bf16.mxu0 %v7255_v17  ;;  %v7351_v45 = vld [vmem:[#allocation145_spill] sm:$0xff]  ;;  %v7352_v17 = vld [vmem:[#allocation144_spill] sm:$0xff]  ;;  %7389 = vst [vmem:[#allocation133_spill] sm:$0xff] %v5447_v35 }
 0x4f8   :  { %1959 = vmatpush1.bf16.msra.mxu1 %v7256_v42  ;;  %2000 = vmatpush1.bf16.msra.mxu0 %v7257_v22  ;;  %v7353_v42 = vld [vmem:[#allocation146_spill] sm:$0xff]  ;;  %v7354_v22 = vld [vmem:[#allocation147_spill] sm:$0xff] }
 0x4f9   :  { %1960 = vmatprep.subr.bf16.mxu1 %v7258_v27  ;;  %2001 = vmatprep.subr.bf16.mxu0 %v7259_v31  ;;  %v7355_v27 = vld [vmem:[#allocation149_spill] sm:$0xff]  ;;  %v7356_v31 = vld [vmem:[#allocation148_spill] sm:$0xff] }
 0x4fc   :  { %1961 = vmatpush1.bf16.msra.mxu1 %v7346_v20  ;;  %2002 = vmatpush1.bf16.msra.mxu0 %v7347_v8  ;;  %v5453_v20 = vld [vmem:[#allocation4 + $0x1c8] sm:$0xff]  ;;  %v5456_v8 = vld [vmem:[#allocation4 + $0x1d8] sm:$0xff] }
 0x4fd   :  { %1962 = vmatprep.subr.bf16.mxu1 %v7348_v38  ;;  %2003 = vmatprep.subr.bf16.mxu0 %v7349_v41  ;;  %7391 = vst [vmem:[#allocation134_spill] sm:$0xff] %v5453_v20  ;;  %7392 = vst [vmem:[#allocation135_spill] sm:$0xff] %v5456_v8  ;;  %v5459_v38 = vld [vmem:[#allocation4 + $0x1c0] sm:$0xff]  ;;  %v5462_v41 = vld [vmem:[#allocation4 + $0x1d0] sm:$0xff] }
 0x4fe   :  { %7393 = vst [vmem:[#allocation137_spill] sm:$0xff] %v5459_v38  ;;  %7394 = vst [vmem:[#allocation136_spill] sm:$0xff] %v5462_v41 }
 0x500   :  { %1963 = vmatpush1.bf16.msra.mxu1 %v7350_v58  ;;  %2004 = vmatpush1.bf16.msra.mxu0 %v7351_v45  ;;  %v5465_v58 = vld [vmem:[#allocation4 + $0x208] sm:$0xff]  ;;  %v5468_v45 = vld [vmem:[#allocation4 + $0x218] sm:$0xff] }
 0x501   :  { %1964 = vmatprep.subr.bf16.mxu1 %v7352_v17  ;;  %2005 = vmatprep.subr.bf16.mxu0 %v7353_v42  ;;  %7395 = vst [vmem:[#allocation138_spill] sm:$0xff] %v5465_v58  ;;  %7396 = vst [vmem:[#allocation173_spill] sm:$0xff] %v5468_v45  ;;  %v5471_v17 = vld [vmem:[#allocation4 + $0x200] sm:$0xff]  ;;  %v5474_v42 = vld [vmem:[#allocation4 + $0x210] sm:$0xff] }
 0x502   :  { %7397 = vst [vmem:[#allocation172_spill] sm:$0xff] %v5471_v17  ;;  %7398 = vst [vmem:[#allocation175_spill] sm:$0xff] %v5474_v42 }
 0x504   :  { %1965 = vmatpush1.bf16.msra.mxu1 %v7354_v22  ;;  %2006 = vmatpush1.bf16.msra.mxu0 %v7355_v27  ;;  %v5477_v22 = vld [vmem:[#allocation4 + $0x248] sm:$0xff]  ;;  %v5480_v27 = vld [vmem:[#allocation4 + $0x258] sm:$0xff] }
 0x505   :  { %1966 = vmatprep.subr.bf16.mxu1 %v7356_v31  ;;  %2007 = vmatprep.subr.bf16.mxu0 %v7357_v59  ;;  %7399 = vst [vmem:[#allocation177_spill] sm:$0xff] %v5477_v22  ;;  %7400 = vst [vmem:[#allocation176_spill] sm:$0xff] %v5480_v27  ;;  %v5483_v31 = vld [vmem:[#allocation4 + $0x240] sm:$0xff]  ;;  %v5486_v59 = vld [vmem:[#allocation4 + $0x250] sm:$0xff] }
 0x506   :  { %7401 = vst [vmem:[#allocation178_spill] sm:$0xff] %v5483_v31  ;;  %7402 = vst [vmem:[#allocation179_spill] sm:$0xff] %v5486_v59 }
 0x508   :  { %1967 = vmatpush1.bf16.msra.mxu1 %v7358_v19  ;;  %2008 = vmatpush1.bf16.msra.mxu0 %v7359_v53  ;;  %v5489_v19 = vld [vmem:[#allocation4 + $0x288] sm:$0xff]  ;;  %v5492_v53 = vld [vmem:[#allocation4 + $0x298] sm:$0xff] }
 0x509   :  { %1968 = vmatprep.subr.bf16.mxu1 %v7360_v30  ;;  %2009 = vmatprep.subr.bf16.mxu0 %v7361_v49  ;;  %7403 = vst [vmem:[#allocation181_spill] sm:$0xff] %v5489_v19  ;;  %7404 = vst [vmem:[#allocation180_spill] sm:$0xff] %v5492_v53  ;;  %v5495_v30 = vld [vmem:[#allocation4 + $0x280] sm:$0xff]  ;;  %v5498_v49 = vld [vmem:[#allocation4 + $0x290] sm:$0xff] }
 0x50a   :  { %7405 = vst [vmem:[#allocation182_spill] sm:$0xff] %v5495_v30  ;;  %7406 = vst [vmem:[#allocation183_spill] sm:$0xff] %v5498_v49 }
 0x50c   :  { %1969 = vmatpush1.bf16.msra.mxu1 %v7362_v50  ;;  %2010 = vmatpush1.bf16.msra.mxu0 %v7363_v21  ;;  %v5501_v50 = vld [vmem:[#allocation4 + $0x2c8] sm:$0xff]  ;;  %v5504_v21 = vld [vmem:[#allocation4 + $0x2d8] sm:$0xff] }
 0x50d   :  { %1970 = vmatprep.subr.bf16.mxu1 %v7364_v33  ;;  %2011 = vmatprep.subr.bf16.mxu0 %v7365_v54  ;;  %7407 = vst [vmem:[#allocation98_spill] sm:$0xff] %v5501_v50  ;;  %7408 = vst [vmem:[#allocation99_spill] sm:$0xff] %v5504_v21  ;;  %v5507_v33 = vld [vmem:[#allocation4 + $0x2c0] sm:$0xff]  ;;  %v5510_v54 = vld [vmem:[#allocation4 + $0x2d0] sm:$0xff] }
 0x50e   :  { %7409 = vst [vmem:[#allocation101_spill] sm:$0xff] %v5507_v33  ;;  %7410 = vst [vmem:[#allocation100_spill] sm:$0xff] %v5510_v54 }
 0x510   :  { %1971 = vmatpush1.bf16.msra.mxu1 %v7366_v6  ;;  %2012 = vmatpush1.bf16.msra.mxu0 %v7367_v18  ;;  %v5513_v6 = vld [vmem:[#allocation4 + $0x308] sm:$0xff]  ;;  %v5516_v18 = vld [vmem:[#allocation4 + $0x318] sm:$0xff] }
 0x511   :  { %1972 = vmatprep.subr.bf16.mxu1 %v7368_v13  ;;  %2013 = vmatprep.subr.bf16.mxu0 %v7369_v51  ;;  %7411 = vst [vmem:[#allocation102_spill] sm:$0xff] %v5513_v6  ;;  %7412 = vst [vmem:[#allocation103_spill] sm:$0xff] %v5516_v18  ;;  %v5519_v13 = vld [vmem:[#allocation4 + $0x300] sm:$0xff]  ;;  %v5522_v51 = vld [vmem:[#allocation4 + $0x310] sm:$0xff] }
 0x512   :  { %7413 = vst [vmem:[#allocation105_spill] sm:$0xff] %v5519_v13  ;;  %7414 = vst [vmem:[#allocation104_spill] sm:$0xff] %v5522_v51 }
 0x514   :  { %1973 = vmatpush1.bf16.msra.mxu1 %v7370_v11  ;;  %2014 = vmatpush1.bf16.msra.mxu0 %v7371_v9  ;;  %v5525_v11 = vld [vmem:[#allocation4 + $0x348] sm:$0xff]  ;;  %v5528_v9 = vld [vmem:[#allocation4 + $0x358] sm:$0xff] }
 0x515   :  { %1974 = vmatprep.subr.bf16.mxu1 %v7372_v0  ;;  %2015 = vmatprep.subr.bf16.mxu0 %v7373_v3  ;;  %7415 = vst [vmem:[#allocation106_spill] sm:$0xff] %v5525_v11  ;;  %7416 = vst [vmem:[#allocation107_spill] sm:$0xff] %v5528_v9  ;;  %v5531_v0 = vld [vmem:[#allocation4 + $0x340] sm:$0xff]  ;;  %v5534_v3 = vld [vmem:[#allocation4 + $0x350] sm:$0xff] }
 0x516   :  { %7417 = vst [vmem:[#allocation109_spill] sm:$0xff] %v5531_v0  ;;  %7418 = vst [vmem:[#allocation108_spill] sm:$0xff] %v5534_v3 }
 0x518   :  { %1975 = vmatpush1.bf16.msra.mxu1 %v7374_v37  ;;  %2016 = vmatpush1.bf16.msra.mxu0 %v7375_v32  ;;  %v5537_v37 = vld [vmem:[#allocation4 + $0x388] sm:$0xff]  ;;  %v5540_v32 = vld [vmem:[#allocation4 + $0x398] sm:$0xff] }
 0x519   :  { %1976 = vmatprep.subr.bf16.mxu1 %v7376_v29  ;;  %2017 = vmatprep.subr.bf16.mxu0 %v7377_v26  ;;  %7419 = vst [vmem:[#allocation110_spill] sm:$0xff] %v5537_v37  ;;  %7420 = vst [vmem:[#allocation111_spill] sm:$0xff] %v5540_v32  ;;  %v5543_v29 = vld [vmem:[#allocation4 + $0x380] sm:$0xff]  ;;  %v5546_v26 = vld [vmem:[#allocation4 + $0x390] sm:$0xff] }
 0x51a   :  { %7421 = vst [vmem:[#allocation113_spill] sm:$0xff] %v5543_v29  ;;  %7422 = vst [vmem:[#allocation112_spill] sm:$0xff] %v5546_v26 }
 0x51c   :  { %1977 = vmatpush1.bf16.msra.mxu1 %v7378_v39  ;;  %2018 = vmatpush1.bf16.msra.mxu0 %v7293_v44  ;;  %v5367_v44 = vld [vmem:[#allocation4 + $0x8] sm:$0xff] }
 0x51d   :  { %1978 = vmatprep.subr.bf16.mxu1 %v7294_v15  ;;  %2019 = vmatprep.subr.bf16.mxu0 %v7379_v40  ;;  %v5399_v15 = vld [vmem:[#allocation4 + $0x80] sm:$0xff]  ;;  %v5549_v39 = vld [vmem:[#allocation4 + $0x3c8] sm:$0xff]  ;;  %v5552_v40 = vld [vmem:[#allocation4 + $0x3d8] sm:$0xff] }
 0x51e   :  { %7423 = vst [vmem:[#allocation114_spill] sm:$0xff] %v5549_v39  ;;  %7424 = vst [vmem:[#allocation115_spill] sm:$0xff] %v5552_v40 }
 0x520   :  { %1979 = vmatpush1.bf16.msra.mxu1 %v7296_v23  ;;  %2020 = vmatpush1.bf16.msra.mxu0 %v7297_v36  ;;  %v5405_v23 = vld [vmem:[#allocation4 + $0xc8] sm:$0xff]  ;;  %v5408_v36 = vld [vmem:[#allocation4 + $0xd8] sm:$0xff] }
 0x521   :  { %1980 = vmatprep.subr.bf16.mxu1 %v7298_v56  ;;  %2021 = vmatprep.subr.bf16.mxu0 %v7299_v46  ;;  %v5411_v56 = vld [vmem:[#allocation4 + $0xc0] sm:$0xff]  ;;  %v5414_v46 = vld [vmem:[#allocation4 + $0xd0] sm:$0xff] }
 0x524   :  { %1981 = vmatpush1.bf16.msra.mxu1 %v7300_v63  ;;  %2022 = vmatpush1.bf16.msra.mxu0 %v7301_v12  ;;  %v5417_v63 = vld [vmem:[#allocation4 + $0x108] sm:$0xff]  ;;  %v5420_v12 = vld [vmem:[#allocation4 + $0x118] sm:$0xff] }
 0x525   :  { %1982 = vmatprep.subr.bf16.mxu1 %v7302_v62  ;;  %2023 = vmatprep.subr.bf16.mxu0 %v7303_v14  ;;  %7380 = vst [vmem:[#allocation35_spill] sm:$0xff] %v5420_v12  ;;  %v5423_v62 = vld [vmem:[#allocation4 + $0x100] sm:$0xff]  ;;  %v5426_v14 = vld [vmem:[#allocation4 + $0x110] sm:$0xff] }
 0x526   :  { %7381 = vst [vmem:[#allocation37_spill] sm:$0xff] %v5423_v62  ;;  %7382 = vst [vmem:[#allocation34_spill] sm:$0xff] %v5426_v14 }
 0x528   :  { %1983 = vmatpush1.bf16.msra.mxu1 %v5031_v10  ;;  %2024 = vmatpush1.bf16.msra.mxu0 %v5037_v28  ;;  %v5370_v28 = vld [vmem:[#allocation4 + $0x18] sm:$0xff] }
 0x529   :  { %1984 = vmatprep.subr.bf16.mxu1 %v7304_v34  ;;  %2025 = vmatprep.subr.bf16.mxu0 %v5039_v7  ;;  %v5375_v7 = vld [vmem:[#allocation4] sm:$0xff]  ;;  %v5396_v10 = vld [vmem:[#allocation4 + $0x98] sm:$0xff]  ;;  %v5402_v34 = vld [vmem:[#allocation4 + $0x90] sm:$0xff] }
 0x52c   :  { %1985 = vmatpush1.bf16.msra.mxu1 %v5043_v43  ;;  %2026 = vmatpush1.bf16.msra.mxu0 %v5049_v61  ;;  %v5390_v43 = vld [vmem:[#allocation4 + $0x50] sm:$0xff]  ;;  %v5393_v61 = vld [vmem:[#allocation4 + $0x88] sm:$0xff] }
 0x52d   :  { %1986 = vmatprep.subr.bf16.mxu1 %v5046_v60  ;;  %2027 = vmatprep.subr.bf16.mxu0 %v5051_v16  ;;  %v5378_v60 = vld [vmem:[#allocation4 + $0x10] sm:$0xff]  ;;  %v5381_v16 = vld [vmem:[#allocation4 + $0x48] sm:$0xff] }
 0x530   :  { %1987 = vmatpush1.bf16.msra.mxu1 %v5055_v48  ;;  %2028 = vmatpush1.bf16.msra.mxu0 %v5059_v57  ;;  %v5384_v48 = vld [vmem:[#allocation4 + $0x58] sm:$0xff]  ;;  %v5387_v57 = vld [vmem:[#allocation4 + $0x40] sm:$0xff] }
 0x531   :  { %2092 = vmatprep.subr.bf16.mxu1 %v5367_v44  ;;  %2133 = vmatprep.subr.bf16.mxu0 %v5370_v28 }
 0x533   :  { %1989 = vmatmul.mubr.bf16.vlgmr.msra.gmra.mrb[52].mxu1 %v5301_v4  ;;  %2030 = vmatmul.mubr.bf16.vlgmr.msra.gmra.mrb[60].mxu0 %v5301_v4  ;;  %v5450_v4 = vld [vmem:[#allocation4 + $0x190] sm:$0xff] }
 0x534   :  { %2093 = vmatpush1.bf16.msra.mxu1 %v5375_v7  ;;  %2134 = vmatpush1.bf16.msra.mxu0 %v5378_v60  ;;  %7390 = vst [vmem:[#allocation132_spill] sm:$0xff] %v5450_v4 }
 0x535   :  { %2094 = vmatprep.subr.bf16.mxu1 %v5381_v16  ;;  %2135 = vmatprep.subr.bf16.mxu0 %v5384_v48 }
 0x538   :  { %2095 = vmatpush1.bf16.msra.mxu1 %v5387_v57  ;;  %2136 = vmatpush1.bf16.msra.mxu0 %v5390_v43 }
 0x539   :  { %2096 = vmatprep.subr.bf16.mxu1 %v5393_v61  ;;  %2137 = vmatprep.subr.bf16.mxu0 %v5396_v10 }
 0x53c   :  { %2097 = vmatpush1.bf16.msra.mxu1 %v5399_v15  ;;  %2138 = vmatpush1.bf16.msra.mxu0 %v5402_v34 }
 0x53d   :  { %2098 = vmatprep.subr.bf16.mxu1 %v5405_v23  ;;  %2139 = vmatprep.subr.bf16.mxu0 %v5408_v36 }
 0x540   :  { %2099 = vmatpush1.bf16.msra.mxu1 %v5411_v56  ;;  %2140 = vmatpush1.bf16.msra.mxu0 %v5414_v46 }
 0x541   :  { %2100 = vmatprep.subr.bf16.mxu1 %v5417_v63  ;;  %2141 = vmatprep.subr.bf16.mxu0 %v5420_v12 }
 0x544   :  { %2101 = vmatpush1.bf16.msra.mxu1 %v5423_v62  ;;  %2142 = vmatpush1.bf16.msra.mxu0 %v5426_v14 }
 0x545   :  { %2102 = vmatprep.subr.bf16.mxu1 %v5429_v52  ;;  %2143 = vmatprep.subr.bf16.mxu0 %v5432_v55 }
 0x548   :  { %2103 = vmatpush1.bf16.msra.mxu1 %v5435_v2  ;;  %2144 = vmatpush1.bf16.msra.mxu0 %v5438_v47 }
 0x549   :  { %2104 = vmatprep.subr.bf16.mxu1 %v5441_v5  ;;  %2145 = vmatprep.subr.bf16.mxu0 %v5444_v25 }
 0x54c   :  { %2105 = vmatpush1.bf16.msra.mxu1 %v5447_v35  ;;  %2146 = vmatpush1.bf16.msra.mxu0 %v5450_v4 }
 0x54d   :  { %2106 = vmatprep.subr.bf16.mxu1 %v5453_v20  ;;  %2147 = vmatprep.subr.bf16.mxu0 %v5456_v8 }
 0x550   :  { %2107 = vmatpush1.bf16.msra.mxu1 %v5459_v38  ;;  %2148 = vmatpush1.bf16.msra.mxu0 %v5462_v41 }
 0x551   :  { %2108 = vmatprep.subr.bf16.mxu1 %v5465_v58  ;;  %2149 = vmatprep.subr.bf16.mxu0 %v5468_v45 }
 0x554   :  { %2109 = vmatpush1.bf16.msra.mxu1 %v5471_v17  ;;  %2150 = vmatpush1.bf16.msra.mxu0 %v5474_v42 }
 0x555   :  { %2110 = vmatprep.subr.bf16.mxu1 %v5477_v22  ;;  %2151 = vmatprep.subr.bf16.mxu0 %v5480_v27 }
 0x558   :  { %2111 = vmatpush1.bf16.msra.mxu1 %v5483_v31  ;;  %2152 = vmatpush1.bf16.msra.mxu0 %v5486_v59 }
 0x559   :  { %2112 = vmatprep.subr.bf16.mxu1 %v5489_v19  ;;  %2153 = vmatprep.subr.bf16.mxu0 %v5492_v53 }
 0x55c   :  { %2113 = vmatpush1.bf16.msra.mxu1 %v5495_v30  ;;  %2154 = vmatpush1.bf16.msra.mxu0 %v5498_v49 }
 0x55d   :  { %2114 = vmatprep.subr.bf16.mxu1 %v5501_v50  ;;  %2155 = vmatprep.subr.bf16.mxu0 %v5504_v21  ;;  %v7432_v21 = vld [vmem:[#allocation44_spill] sm:$0xff] }
 0x560   :  { %2115 = vmatpush1.bf16.msra.mxu1 %v5507_v33  ;;  %2156 = vmatpush1.bf16.msra.mxu0 %v5510_v54  ;;  %v7431_v54 = vld [vmem:[#allocation42_spill] sm:$0xff] }
 0x561   :  { %2116 = vmatprep.subr.bf16.mxu1 %v5513_v6  ;;  %2157 = vmatprep.subr.bf16.mxu0 %v5516_v18  ;;  %v7430_v6 = vld [vmem:[#allocation45_spill] sm:$0xff] }
 0x564   :  { %2117 = vmatpush1.bf16.msra.mxu1 %v5519_v13  ;;  %2158 = vmatpush1.bf16.msra.mxu0 %v5522_v51  ;;  %v7429_v13 = vld [vmem:[#allocation43_spill] sm:$0xff] }
 0x565   :  { %2118 = vmatprep.subr.bf16.mxu1 %v5525_v11  ;;  %2159 = vmatprep.subr.bf16.mxu0 %v5528_v9 }
 0x568   :  { %2119 = vmatpush1.bf16.msra.mxu1 %v5531_v0  ;;  %2160 = vmatpush1.bf16.msra.mxu0 %v5534_v3 }
 0x569   :  { %2120 = vmatprep.subr.bf16.mxu1 %v5537_v37  ;;  %2161 = vmatprep.subr.bf16.mxu0 %v5540_v32  ;;  %v5555_v37 = vld [vmem:[#allocation4 + $0x3c0] sm:$0xff]  ;;  %v5558_v32 = vld [vmem:[#allocation4 + $0x3d0] sm:$0xff] }
 0x56a   :  { %7425 = vst [vmem:[#allocation117_spill] sm:$0xff] %v5555_v37  ;;  %7426 = vst [vmem:[#allocation116_spill] sm:$0xff] %v5558_v32 }
 0x56c   :  { %2121 = vmatpush1.bf16.msra.mxu1 %v5543_v29  ;;  %2162 = vmatpush1.bf16.msra.mxu0 %v5546_v26  ;;  %v5561_v29 = vld [vmem:[#allocation4 + $0x28] sm:$0xff]  ;;  %v5564_v26 = vld [vmem:[#allocation4 + $0x38] sm:$0xff] }
 0x56d   :  { %2122 = vmatprep.subr.bf16.mxu1 %v5549_v39  ;;  %2163 = vmatprep.subr.bf16.mxu0 %v5552_v40  ;;  %7427 = vst [vmem:[#allocation118_spill] sm:$0xff] %v5561_v29  ;;  %7428 = vst [vmem:[#allocation119_spill] sm:$0xff] %v5564_v26 }
 0x570   :  { %2123 = vmatpush1.bf16.msra.mxu1 %v5555_v37  ;;  %2164 = vmatpush1.bf16.msra.mxu0 %v5558_v32 }
 0x571   :  { %2174 = vmatprep.subr.bf16.mxu1 %v5561_v29  ;;  %2215 = vmatprep.subr.bf16.mxu0 %v5564_v26 }
 0x5c6   :  { %v1908_v39 = vpop.f32.mrb[48].mxu1  ;;  %v1949_v3 = vpop.f32.mrb[56].mxu0 }
 0x5c7   :  { %v1910_v0 = vpop.f32.mrb[49].mxu1  ;;  %v1951_v40 = vpop.f32.mrb[57].mxu0  ;;  %v2040_v18 = vadd.f32 %v1949_v3, %v7429_v13  ;;  %v2038_v33 = vadd.f32 %v1908_v39, %v7431_v54  ;;  %v7434_v3 = vld [vmem:[#allocation75_spill] sm:$0xff] }
 0x5c8   :  { %v1912_v9 = vpop.f32.mrb[50].mxu1  ;;  %v1953_v11 = vpop.f32.mrb[58].mxu0  ;;  %v2041_v32 = vadd.f32 %v1951_v40, %v7430_v6  ;;  %v2039_v29 = vadd.f32 %v1910_v0, %v7432_v21  ;;  %v7435_v40 = vld [vmem:[#allocation76_spill] sm:$0xff] }
 0x5c9   :  { %v1913_v51 = vpop.f32.mrb[51].mxu1  ;;  %v1954_v37 = vpop.f32.mrb[59].mxu0  ;;  %v2054_v50 = vmul.f32 0.5, %v2040_v18  ;;  %v2046_v30 = vmul.f32 0.5, %v2038_v33  ;;  %v7436_v33 = vld [vmem:[#allocation77_spill] sm:$0xff] }
 0x5ca   :  { %v2055_v49 = vmul.f32 0.5, %v2041_v32  ;;  %v2047_v26 = vmul.f32 0.5, %v2039_v29  ;;  %v7433_v51 = vld [vmem:[#allocation74_spill] sm:$0xff] }
 0x5cb   :  { %3588 = vtanh.f32 %v2054_v50 }
 0x5cc   :  { %3590 = vtanh.f32 %v2055_v49 }
 0x5cd   :  { %3592 = vtanh.f32 %v2046_v30 }
 0x5ce   :  { %3594 = vtanh.f32 %v2047_v26 }
 0x5d5   :  { %v3589_v18 = vpop.eup %3588 }
 0x5d6   :  { %v3591_v30 = vpop.eup %3590  ;;  %v2058_v26 = vmul.f32 0.5, %v3589_v18 }
 0x5d7   :  { %v3593_v32 = vpop.eup %3592 }
 0x5d8   :  { %v3595_v29 = vpop.eup %3594  ;;  %v2050_v59 = vmul.f32 0.5, %v3593_v32 }
 0x606   :  { %v1990_v9 = vpop.f32.mrb[52].mxu1  ;;  %v2031_v11 = vpop.f32.mrb[60].mxu0 }
 0x607   :  { %v2042_v37 = vadd.f32 %v1990_v9, %v7433_v51  ;;  %v1992_v53 = vpop.f32.mrb[53].mxu1  ;;  %v2033_v13 = vpop.f32.mrb[61].mxu0  ;;  %v2044_v6 = vadd.f32 %v2031_v11, %v7434_v3  ;;  %v2059_v51 = vmul.f32 0.5, %v3591_v30  ;;  %v2051_v11 = vmul.f32 0.5, %v3595_v29 }
 0x608   :  { %v2043_v54 = vadd.f32 %v1992_v53, %v7435_v40  ;;  %v1994_v39 = vpop.f32.mrb[54].mxu1  ;;  %v2035_v21 = vpop.f32.mrb[62].mxu0  ;;  %v2045_v0 = vadd.f32 %v2033_v13, %v7436_v33  ;;  %v2060_v3 = vadd.f32 0.5, %v2058_v26  ;;  %v2052_v40 = vadd.f32 0.5, %v2050_v59 }
 0x609   :  { %3596 = vtanh.f32 %v2042_v37  ;;  %v1995_v50 = vpop.f32.mrb[55].mxu1  ;;  %v2036_v49 = vpop.f32.mrb[63].mxu0  ;;  %v2064_v9 = vmul.f32 0.5, %v2044_v6  ;;  %v2061_v53 = vadd.f32 0.5, %v2059_v51  ;;  %v2053_v39 = vadd.f32 0.5, %v2051_v11  ;;  %v5587_v11 = vld [vmem:[#allocation4 + $0x20] sm:$0xff] }
 0x60a   :  { %3598 = vtanh.f32 %v2043_v54  ;;  %v2065_v19 = vmul.f32 0.5, %v2045_v0  ;;  %v2072_v21 = vmul.f32 %v2060_v3, %v5295_v1  ;;  %v5590_v3 = vld [vmem:[#allocation4 + $0x30] sm:$0xff] }
 0x60b   :  { %3600 = vtanh.f32 %v2064_v9  ;;  %v2073_v54 = vmul.f32 %v2061_v53, %v5297_v24  ;;  %v5593_v53 = vld [vmem:[#allocation4 + $0x68] sm:$0xff] }
 0x60c   :  { %3602 = vtanh.f32 %v2065_v19 }
 0x613   :  { %v3597_v37 = vpop.eup %3596 }
 0x614   :  { %v3599_v13 = vpop.eup %3598  ;;  %v2074_v33 = vmul.f32 %v3597_v37, %v2052_v40  ;;  %v5596_v40 = vld [vmem:[#allocation4 + $0x78] sm:$0xff]  ;;  %v5599_v37 = vld [vmem:[#allocation4 + $0x60] sm:$0xff] }
 0x615   :  { %v2075_v50 = vmul.f32 %v3599_v13, %v2053_v39  ;;  %v3601_v0 = vpop.eup %3600  ;;  %v5602_v39 = vld [vmem:[#allocation4 + $0x70] sm:$0xff]  ;;  %v5605_v13 = vld [vmem:[#allocation4 + $0xa8] sm:$0xff] }
 0x616   :  { %v5577_v18 = vadd.f32 %v2074_v33, %v2072_v21  ;;  %v3603_v19 = vpop.eup %3602  ;;  %v2068_v59 = vmul.f32 0.5, %v3601_v0  ;;  %v5608_v21 = vld [vmem:[#allocation4 + $0xb8] sm:$0xff]  ;;  %v5611_v33 = vld [vmem:[#allocation4 + $0xa0] sm:$0xff] }
 0x617   :  { %v5579_v6 = vadd.f32 %v2075_v50, %v2073_v54  ;;  %v2069_v49 = vmul.f32 0.5, %v3603_v19  ;;  %v5614_v54 = vld [vmem:[#allocation4 + $0xb0] sm:$0xff]  ;;  %v5617_v50 = vld [vmem:[#allocation4 + $0xe8] sm:$0xff]  ;;  %v5620_v0 = vld [vmem:[#allocation4 + $0xf8] sm:$0xff] }
 0x618   :  { %3604 = vtanh.f32 %v5577_v18  ;;  %v2070_v30 = vadd.f32 0.5, %v2068_v59  ;;  %v5623_v19 = vld [vmem:[#allocation4 + $0xe0] sm:$0xff]  ;;  %v5626_v59 = vld [vmem:[#allocation4 + $0xf0] sm:$0xff] }
 0x619   :  { %3606 = vtanh.f32 %v5579_v6  ;;  %v2071_v29 = vadd.f32 0.5, %v2069_v49  ;;  %v5629_v49 = vld [vmem:[#allocation4 + $0x128] sm:$0xff] }
 0x622   :  { %v3605_v32 = vpop.eup %3604 }
 0x623   :  { %v3607_v1 = vpop.eup %3606  ;;  %v2080_v26 = vmul.f32 %v3605_v32, %v2070_v30  ;;  %v5632_v30 = vld [vmem:[#allocation4 + $0x138] sm:$0xff]  ;;  %v5635_v32 = vld [vmem:[#allocation4 + $0x120] sm:$0xff] }
 0x624   :  { %v2081_v9 = vmul.f32 %v3607_v1, %v2071_v29  ;;  %7437 = vst [vmem:[#allocation121_spill] sm:$0xff] %v5635_v32  ;;  %v5638_v29 = vld [vmem:[#allocation4 + $0x130] sm:$0xff]  ;;  %v5641_v1 = vld [vmem:[#allocation4 + $0x168] sm:$0xff] }
 0x625   :  { %v5583_v51 = vpack.c.bf16 %v2080_v26, %v2080_v26  ;;  %7438 = vst [vmem:[#allocation120_spill] sm:$0xff] %v5638_v29  ;;  %7439 = vst [vmem:[#allocation122_spill] sm:$0xff] %v5641_v1  ;;  %v5644_v26 = vld [vmem:[#allocation4 + $0x178] sm:$0xff] }
 0x626   :  { %v2091_v24 = vpack.c.bf16 %v2081_v9, %v2081_v9  ;;  %7440 = vst [vmem:[#allocation123_spill] sm:$0xff] %v5644_v26  ;;  %v5647_v9 = vld [vmem:[#allocation4 + $0x160] sm:$0xff] }
 0x627   :  { %7441 = vst [vmem:[#allocation125_spill] sm:$0xff] %v5647_v9 }
 0x628   :  { %2124 = vmatprep.mubr.bf16.mxu1 %v2091_v24  ;;  %2165 = vmatprep.mubr.bf16.mxu0 %v2091_v24 }
 0x629   :  { %2125 = vmatmul.mubr.bf16.vlgmr.msra.gmra.mrb[56].mxu1 %v5583_v51  ;;  %2166 = vmatmul.mubr.bf16.vlgmr.msra.gmra.mrb[64].mxu0 %v5583_v51 }
 0x62a   :  { %2175 = vmatpush1.bf16.msra.mxu1 %v5587_v11  ;;  %2216 = vmatpush1.bf16.msra.mxu0 %v5590_v3 }
 0x62b   :  { %2206 = vmatprep.mubr.bf16.mxu1 %v2091_v24  ;;  %2247 = vmatprep.mubr.bf16.mxu0 %v2091_v24  ;;  %v5650_v24 = vld [vmem:[#allocation4 + $0x170] sm:$0xff] }
 0x62c   :  { %2176 = vmatprep.subr.bf16.mxu1 %v5593_v53  ;;  %2217 = vmatprep.subr.bf16.mxu0 %v5596_v40  ;;  %7442 = vst [vmem:[#allocation124_spill] sm:$0xff] %v5650_v24 }
 0x62e   :  { %2177 = vmatpush1.bf16.msra.mxu1 %v5599_v37  ;;  %2218 = vmatpush1.bf16.msra.mxu0 %v5602_v39 }
 0x62f   :  { %2178 = vmatprep.subr.bf16.mxu1 %v5605_v13  ;;  %2219 = vmatprep.subr.bf16.mxu0 %v5608_v21 }
 0x632   :  { %2179 = vmatpush1.bf16.msra.mxu1 %v5611_v33  ;;  %2220 = vmatpush1.bf16.msra.mxu0 %v5614_v54 }
 0x633   :  { %2180 = vmatprep.subr.bf16.mxu1 %v5617_v50  ;;  %2221 = vmatprep.subr.bf16.mxu0 %v5620_v0 }
 0x636   :  { %2181 = vmatpush1.bf16.msra.mxu1 %v5623_v19  ;;  %2222 = vmatpush1.bf16.msra.mxu0 %v5626_v59 }
 0x637   :  { %2182 = vmatprep.subr.bf16.mxu1 %v5629_v49  ;;  %2223 = vmatprep.subr.bf16.mxu0 %v5632_v30 }
 0x63a   :  { %2183 = vmatpush1.bf16.msra.mxu1 %v5635_v32  ;;  %2224 = vmatpush1.bf16.msra.mxu0 %v5638_v29  ;;  %v5653_v32 = vld [vmem:[#allocation4 + $0x1a8] sm:$0xff]  ;;  %v5656_v29 = vld [vmem:[#allocation4 + $0x1b8] sm:$0xff] }
 0x63b   :  { %2184 = vmatprep.subr.bf16.mxu1 %v5641_v1  ;;  %2225 = vmatprep.subr.bf16.mxu0 %v5644_v26  ;;  %7443 = vst [vmem:[#allocation126_spill] sm:$0xff] %v5653_v32  ;;  %7444 = vst [vmem:[#allocation127_spill] sm:$0xff] %v5656_v29  ;;  %v5659_v1 = vld [vmem:[#allocation4 + $0x1a0] sm:$0xff]  ;;  %v5662_v26 = vld [vmem:[#allocation4 + $0x1b0] sm:$0xff] }
 0x63c   :  { %7445 = vst [vmem:[#allocation129_spill] sm:$0xff] %v5659_v1  ;;  %7446 = vst [vmem:[#allocation128_spill] sm:$0xff] %v5662_v26 }
 0x63e   :  { %2185 = vmatpush1.bf16.msra.mxu1 %v5647_v9  ;;  %2226 = vmatpush1.bf16.msra.mxu0 %v5650_v24  ;;  %v5665_v9 = vld [vmem:[#allocation4 + $0x1e8] sm:$0xff]  ;;  %v5668_v24 = vld [vmem:[#allocation4 + $0x1f8] sm:$0xff] }
 0x63f   :  { %2186 = vmatprep.subr.bf16.mxu1 %v5653_v32  ;;  %2227 = vmatprep.subr.bf16.mxu0 %v5656_v29  ;;  %7447 = vst [vmem:[#allocation130_spill] sm:$0xff] %v5665_v9  ;;  %7448 = vst [vmem:[#allocation39_spill] sm:$0xff] %v5668_v24  ;;  %v5671_v32 = vld [vmem:[#allocation4 + $0x1e0] sm:$0xff]  ;;  %v5674_v29 = vld [vmem:[#allocation4 + $0x1f0] sm:$0xff] }
 0x640   :  { %7449 = vst [vmem:[#allocation41_spill] sm:$0xff] %v5671_v32  ;;  %7450 = vst [vmem:[#allocation38_spill] sm:$0xff] %v5674_v29 }
 0x642   :  { %2187 = vmatpush1.bf16.msra.mxu1 %v5659_v1  ;;  %2228 = vmatpush1.bf16.msra.mxu0 %v5662_v26  ;;  %v5677_v1 = vld [vmem:[#allocation4 + $0x228] sm:$0xff]  ;;  %v5680_v26 = vld [vmem:[#allocation4 + $0x238] sm:$0xff] }
 0x643   :  { %2188 = vmatprep.subr.bf16.mxu1 %v5665_v9  ;;  %2229 = vmatprep.subr.bf16.mxu0 %v5668_v24  ;;  %7451 = vst [vmem:[#allocation40_spill] sm:$0xff] %v5677_v1  ;;  %7452 = vst [vmem:[#allocation70_spill] sm:$0xff] %v5680_v26  ;;  %v5683_v9 = vld [vmem:[#allocation4 + $0x220] sm:$0xff]  ;;  %v5686_v24 = vld [vmem:[#allocation4 + $0x230] sm:$0xff] }
 0x644   :  { %7453 = vst [vmem:[#allocation71_spill] sm:$0xff] %v5683_v9  ;;  %7454 = vst [vmem:[#allocation72_spill] sm:$0xff] %v5686_v24 }
 0x646   :  { %2189 = vmatpush1.bf16.msra.mxu1 %v5671_v32  ;;  %2230 = vmatpush1.bf16.msra.mxu0 %v5674_v29  ;;  %v5689_v32 = vld [vmem:[#allocation4 + $0x268] sm:$0xff]  ;;  %v5692_v29 = vld [vmem:[#allocation4 + $0x278] sm:$0xff] }
 0x647   :  { %2190 = vmatprep.subr.bf16.mxu1 %v5677_v1  ;;  %2231 = vmatprep.subr.bf16.mxu0 %v5680_v26  ;;  %7455 = vst [vmem:[#allocation73_spill] sm:$0xff] %v5689_v32  ;;  %7456 = vst [vmem:[#allocation139_spill] sm:$0xff] %v5692_v29  ;;  %v5695_v1 = vld [vmem:[#allocation4 + $0x260] sm:$0xff]  ;;  %v5698_v26 = vld [vmem:[#allocation4 + $0x270] sm:$0xff] }
 0x648   :  { %7457 = vst [vmem:[#allocation141_spill] sm:$0xff] %v5695_v1  ;;  %7458 = vst [vmem:[#allocation140_spill] sm:$0xff] %v5698_v26 }
 0x64a   :  { %2191 = vmatpush1.bf16.msra.mxu1 %v5683_v9  ;;  %2232 = vmatpush1.bf16.msra.mxu0 %v5686_v24  ;;  %v5701_v9 = vld [vmem:[#allocation4 + $0x2a8] sm:$0xff]  ;;  %v5704_v24 = vld [vmem:[#allocation4 + $0x2b8] sm:$0xff] }
 0x64b   :  { %2192 = vmatprep.subr.bf16.mxu1 %v5689_v32  ;;  %2233 = vmatprep.subr.bf16.mxu0 %v5692_v29  ;;  %7459 = vst [vmem:[#allocation142_spill] sm:$0xff] %v5701_v9  ;;  %7460 = vst [vmem:[#allocation143_spill] sm:$0xff] %v5704_v24  ;;  %v5707_v32 = vld [vmem:[#allocation4 + $0x2a0] sm:$0xff]  ;;  %v5710_v29 = vld [vmem:[#allocation4 + $0x2b0] sm:$0xff] }
 0x64c   :  { %7461 = vst [vmem:[#allocation145_spill] sm:$0xff] %v5707_v32  ;;  %7462 = vst [vmem:[#allocation144_spill] sm:$0xff] %v5710_v29 }
 0x64e   :  { %2193 = vmatpush1.bf16.msra.mxu1 %v5695_v1  ;;  %2234 = vmatpush1.bf16.msra.mxu0 %v5698_v26  ;;  %v5713_v1 = vld [vmem:[#allocation4 + $0x2e8] sm:$0xff]  ;;  %v5716_v26 = vld [vmem:[#allocation4 + $0x2f8] sm:$0xff] }
 0x64f   :  { %2194 = vmatprep.subr.bf16.mxu1 %v5701_v9  ;;  %2235 = vmatprep.subr.bf16.mxu0 %v5704_v24  ;;  %7463 = vst [vmem:[#allocation146_spill] sm:$0xff] %v5713_v1  ;;  %7464 = vst [vmem:[#allocation147_spill] sm:$0xff] %v5716_v26  ;;  %v5719_v9 = vld [vmem:[#allocation4 + $0x2e0] sm:$0xff]  ;;  %v5722_v24 = vld [vmem:[#allocation4 + $0x2f0] sm:$0xff] }
 0x650   :  { %7465 = vst [vmem:[#allocation149_spill] sm:$0xff] %v5719_v9  ;;  %7466 = vst [vmem:[#allocation148_spill] sm:$0xff] %v5722_v24 }
 0x652   :  { %2195 = vmatpush1.bf16.msra.mxu1 %v5707_v32  ;;  %2236 = vmatpush1.bf16.msra.mxu0 %v5710_v29  ;;  %v5725_v32 = vld [vmem:[#allocation4 + $0x328] sm:$0xff]  ;;  %v5728_v29 = vld [vmem:[#allocation4 + $0x338] sm:$0xff] }
 0x653   :  { %2196 = vmatprep.subr.bf16.mxu1 %v5713_v1  ;;  %2237 = vmatprep.subr.bf16.mxu0 %v5716_v26  ;;  %7467 = vst [vmem:[#allocation150_spill] sm:$0xff] %v5725_v32  ;;  %7468 = vst [vmem:[#allocation151_spill] sm:$0xff] %v5728_v29  ;;  %v5731_v1 = vld [vmem:[#allocation4 + $0x320] sm:$0xff]  ;;  %v5734_v26 = vld [vmem:[#allocation4 + $0x330] sm:$0xff] }
 0x654   :  { %7469 = vst [vmem:[#allocation153_spill] sm:$0xff] %v5731_v1  ;;  %7470 = vst [vmem:[#allocation152_spill] sm:$0xff] %v5734_v26 }
 0x656   :  { %2197 = vmatpush1.bf16.msra.mxu1 %v5719_v9  ;;  %2238 = vmatpush1.bf16.msra.mxu0 %v5722_v24  ;;  %v5737_v9 = vld [vmem:[#allocation4 + $0x368] sm:$0xff]  ;;  %v5740_v24 = vld [vmem:[#allocation4 + $0x378] sm:$0xff] }
 0x657   :  { %2198 = vmatprep.subr.bf16.mxu1 %v5725_v32  ;;  %2239 = vmatprep.subr.bf16.mxu0 %v5728_v29  ;;  %7471 = vst [vmem:[#allocation154_spill] sm:$0xff] %v5737_v9  ;;  %7472 = vst [vmem:[#allocation155_spill] sm:$0xff] %v5740_v24  ;;  %v5743_v32 = vld [vmem:[#allocation4 + $0x360] sm:$0xff]  ;;  %v5746_v29 = vld [vmem:[#allocation4 + $0x370] sm:$0xff] }
 0x658   :  { %7473 = vst [vmem:[#allocation157_spill] sm:$0xff] %v5743_v32  ;;  %7474 = vst [vmem:[#allocation156_spill] sm:$0xff] %v5746_v29 }
 0x65a   :  { %2199 = vmatpush1.bf16.msra.mxu1 %v5731_v1  ;;  %2240 = vmatpush1.bf16.msra.mxu0 %v5734_v26  ;;  %v5749_v1 = vld [vmem:[#allocation4 + $0x3a8] sm:$0xff]  ;;  %v5752_v26 = vld [vmem:[#allocation4 + $0x3b8] sm:$0xff] }
 0x65b   :  { %2200 = vmatprep.subr.bf16.mxu1 %v5737_v9  ;;  %2241 = vmatprep.subr.bf16.mxu0 %v5740_v24  ;;  %7475 = vst [vmem:[#allocation158_spill] sm:$0xff] %v5749_v1  ;;  %7476 = vst [vmem:[#allocation159_spill] sm:$0xff] %v5752_v26  ;;  %v5755_v9 = vld [vmem:[#allocation4 + $0x3a0] sm:$0xff]  ;;  %v5758_v24 = vld [vmem:[#allocation4 + $0x3b0] sm:$0xff] }
 0x65c   :  { %7477 = vst [vmem:[#allocation161_spill] sm:$0xff] %v5758_v24 }
 0x65e   :  { %2201 = vmatpush1.bf16.msra.mxu1 %v5743_v32  ;;  %2242 = vmatpush1.bf16.msra.mxu0 %v5746_v29  ;;  %v5761_v32 = vld [vmem:[#allocation4 + $0x3e8] sm:$0xff]  ;;  %v5764_v29 = vld [vmem:[#allocation4 + $0x3f8] sm:$0xff] }
 0x65f   :  { %2202 = vmatprep.subr.bf16.mxu1 %v5749_v1  ;;  %2243 = vmatprep.subr.bf16.mxu0 %v5752_v26  ;;  %7478 = vst [vmem:[#allocation160_spill] sm:$0xff] %v5761_v32  ;;  %7479 = vst [vmem:[#allocation162_spill] sm:$0xff] %v5764_v29  ;;  %v5767_v1 = vld [vmem:[#allocation4 + $0x3e0] sm:$0xff]  ;;  %v5770_v26 = vld [vmem:[#allocation4 + $0x3f0] sm:$0xff] }
 0x660   :  { %7480 = vst [vmem:[#allocation163_spill] sm:$0xff] %v5767_v1  ;;  %7481 = vst [vmem:[#allocation165_spill] sm:$0xff] %v5770_v26 }
 0x662   :  { %2203 = vmatpush1.bf16.msra.mxu1 %v5755_v9  ;;  %2244 = vmatpush1.bf16.msra.mxu0 %v5758_v24 }
 0x663   :  { %2204 = vmatprep.subr.bf16.mxu1 %v5761_v32  ;;  %2245 = vmatprep.subr.bf16.mxu0 %v5764_v29 }
 0x666   :  { %2205 = vmatpush1.bf16.msra.mxu1 %v5767_v1  ;;  %2246 = vmatpush1.bf16.msra.mxu0 %v5770_v26 }
 0x667   :  { %2310 = vmatprep.subr.bf16.mxu1 %v5367_v44  ;;  %2351 = vmatprep.subr.bf16.mxu0 %v5370_v28 }
 0x669   :  { %2207 = vmatmul.mubr.bf16.vlgmr.msra.gmra.mrb[60].mxu1 %v5583_v51  ;;  %2248 = vmatmul.mubr.bf16.vlgmr.msra.gmra.mrb[68].mxu0 %v5583_v51  ;;  %v7482_v51 = vld [vmem:[#allocation179_spill] sm:$0xff] }
 0x66a   :  { %2311 = vmatpush1.bf16.msra.mxu1 %v5375_v7  ;;  %2352 = vmatpush1.bf16.msra.mxu0 %v5378_v60 }
 0x66b   :  { %2312 = vmatprep.subr.bf16.mxu1 %v5381_v16  ;;  %2353 = vmatprep.subr.bf16.mxu0 %v5384_v48 }
 0x66e   :  { %2313 = vmatpush1.bf16.msra.mxu1 %v5387_v57  ;;  %2354 = vmatpush1.bf16.msra.mxu0 %v5390_v43 }
 0x66f   :  { %2314 = vmatprep.subr.bf16.mxu1 %v5393_v61  ;;  %2355 = vmatprep.subr.bf16.mxu0 %v5396_v10 }
 0x672   :  { %2315 = vmatpush1.bf16.msra.mxu1 %v5399_v15  ;;  %2356 = vmatpush1.bf16.msra.mxu0 %v5402_v34 }
 0x673   :  { %2316 = vmatprep.subr.bf16.mxu1 %v5405_v23  ;;  %2357 = vmatprep.subr.bf16.mxu0 %v5408_v36 }
 0x676   :  { %2317 = vmatpush1.bf16.msra.mxu1 %v5411_v56  ;;  %2358 = vmatpush1.bf16.msra.mxu0 %v5414_v46 }
 0x677   :  { %2318 = vmatprep.subr.bf16.mxu1 %v5417_v63  ;;  %2359 = vmatprep.subr.bf16.mxu0 %v5420_v12 }
 0x67a   :  { %2319 = vmatpush1.bf16.msra.mxu1 %v5423_v62  ;;  %2360 = vmatpush1.bf16.msra.mxu0 %v5426_v14 }
 0x67b   :  { %2320 = vmatprep.subr.bf16.mxu1 %v5429_v52  ;;  %2361 = vmatprep.subr.bf16.mxu0 %v5432_v55 }
 0x67e   :  { %2321 = vmatpush1.bf16.msra.mxu1 %v5435_v2  ;;  %2362 = vmatpush1.bf16.msra.mxu0 %v5438_v47  ;;  %v7511_v47 = vld [vmem:[#allocation46_spill] sm:$0xff]  ;;  %v7512_v2 = vld [vmem:[#allocation48_spill] sm:$0xff] }
 0x67f   :  { %2322 = vmatprep.subr.bf16.mxu1 %v5441_v5  ;;  %2363 = vmatprep.subr.bf16.mxu0 %v5444_v25  ;;  %v7509_v25 = vld [vmem:[#allocation47_spill] sm:$0xff]  ;;  %v7510_v5 = vld [vmem:[#allocation49_spill] sm:$0xff] }
 0x682   :  { %2323 = vmatpush1.bf16.msra.mxu1 %v5447_v35  ;;  %2364 = vmatpush1.bf16.msra.mxu0 %v5450_v4 }
 0x683   :  { %2324 = vmatprep.subr.bf16.mxu1 %v5453_v20  ;;  %2365 = vmatprep.subr.bf16.mxu0 %v5456_v8  ;;  %v7483_v8 = vld [vmem:[#allocation181_spill] sm:$0xff] }
 0x686   :  { %2325 = vmatpush1.bf16.msra.mxu1 %v5459_v38  ;;  %2366 = vmatpush1.bf16.msra.mxu0 %v5462_v41  ;;  %v7484_v38 = vld [vmem:[#allocation180_spill] sm:$0xff]  ;;  %v7485_v41 = vld [vmem:[#allocation182_spill] sm:$0xff] }
 0x687   :  { %2326 = vmatprep.subr.bf16.mxu1 %v5465_v58  ;;  %2367 = vmatprep.subr.bf16.mxu0 %v5468_v45  ;;  %v7486_v58 = vld [vmem:[#allocation183_spill] sm:$0xff]  ;;  %v7487_v45 = vld [vmem:[#allocation98_spill] sm:$0xff] }
 0x68a   :  { %2327 = vmatpush1.bf16.msra.mxu1 %v5471_v17  ;;  %2368 = vmatpush1.bf16.msra.mxu0 %v5474_v42  ;;  %v7488_v17 = vld [vmem:[#allocation99_spill] sm:$0xff]  ;;  %v7489_v42 = vld [vmem:[#allocation101_spill] sm:$0xff] }
 0x68b   :  { %2328 = vmatprep.subr.bf16.mxu1 %v5477_v22  ;;  %2369 = vmatprep.subr.bf16.mxu0 %v5480_v27  ;;  %v7490_v22 = vld [vmem:[#allocation100_spill] sm:$0xff]  ;;  %v7491_v27 = vld [vmem:[#allocation102_spill] sm:$0xff] }
 0x68e   :  { %2329 = vmatpush1.bf16.msra.mxu1 %v5483_v31  ;;  %2370 = vmatpush1.bf16.msra.mxu0 %v7482_v51  ;;  %v7492_v31 = vld [vmem:[#allocation103_spill] sm:$0xff]  ;;  %v7493_v51 = vld [vmem:[#allocation105_spill] sm:$0xff] }
 0x68f   :  { %2330 = vmatprep.subr.bf16.mxu1 %v7483_v8  ;;  %2371 = vmatprep.subr.bf16.mxu0 %v7484_v38  ;;  %v7494_v8 = vld [vmem:[#allocation104_spill] sm:$0xff]  ;;  %v7495_v38 = vld [vmem:[#allocation106_spill] sm:$0xff] }
 0x692   :  { %2331 = vmatpush1.bf16.msra.mxu1 %v7485_v41  ;;  %2372 = vmatpush1.bf16.msra.mxu0 %v7486_v58  ;;  %v7496_v41 = vld [vmem:[#allocation107_spill] sm:$0xff]  ;;  %v7497_v58 = vld [vmem:[#allocation109_spill] sm:$0xff] }
 0x693   :  { %2332 = vmatprep.subr.bf16.mxu1 %v7487_v45  ;;  %2373 = vmatprep.subr.bf16.mxu0 %v7488_v17  ;;  %v7498_v45 = vld [vmem:[#allocation108_spill] sm:$0xff]  ;;  %v7499_v17 = vld [vmem:[#allocation110_spill] sm:$0xff] }
 0x696   :  { %2333 = vmatpush1.bf16.msra.mxu1 %v7489_v42  ;;  %2374 = vmatpush1.bf16.msra.mxu0 %v7490_v22  ;;  %v7500_v42 = vld [vmem:[#allocation111_spill] sm:$0xff]  ;;  %v7501_v22 = vld [vmem:[#allocation113_spill] sm:$0xff] }
 0x697   :  { %2334 = vmatprep.subr.bf16.mxu1 %v7491_v27  ;;  %2375 = vmatprep.subr.bf16.mxu0 %v7492_v31  ;;  %v7502_v27 = vld [vmem:[#allocation112_spill] sm:$0xff]  ;;  %v7503_v31 = vld [vmem:[#allocation114_spill] sm:$0xff] }
 0x69a   :  { %2335 = vmatpush1.bf16.msra.mxu1 %v7493_v51  ;;  %2376 = vmatpush1.bf16.msra.mxu0 %v7494_v8  ;;  %v7504_v51 = vld [vmem:[#allocation115_spill] sm:$0xff]  ;;  %v7505_v8 = vld [vmem:[#allocation117_spill] sm:$0xff] }
 0x69b   :  { %2336 = vmatprep.subr.bf16.mxu1 %v7495_v38  ;;  %2377 = vmatprep.subr.bf16.mxu0 %v7496_v41  ;;  %v7506_v38 = vld [vmem:[#allocation116_spill] sm:$0xff]  ;;  %v7507_v41 = vld [vmem:[#allocation118_spill] sm:$0xff] }
 0x69e   :  { %2337 = vmatpush1.bf16.msra.mxu1 %v7497_v58  ;;  %2378 = vmatpush1.bf16.msra.mxu0 %v7498_v45  ;;  %v7508_v58 = vld [vmem:[#allocation119_spill] sm:$0xff] }
 0x69f   :  { %2338 = vmatprep.subr.bf16.mxu1 %v7499_v17  ;;  %2379 = vmatprep.subr.bf16.mxu0 %v7500_v42 }
 0x6a2   :  { %2339 = vmatpush1.bf16.msra.mxu1 %v7501_v22  ;;  %2380 = vmatpush1.bf16.msra.mxu0 %v7502_v27 }
 0x6a3   :  { %2340 = vmatprep.subr.bf16.mxu1 %v7503_v31  ;;  %2381 = vmatprep.subr.bf16.mxu0 %v7504_v51 }
 0x6a6   :  { %2341 = vmatpush1.bf16.msra.mxu1 %v7505_v8  ;;  %2382 = vmatpush1.bf16.msra.mxu0 %v7506_v38 }
 0x6a7   :  { %2392 = vmatprep.subr.bf16.mxu1 %v7507_v41  ;;  %2433 = vmatprep.subr.bf16.mxu0 %v7508_v58 }
 0x6fc   :  { %v2126_v45 = vpop.f32.mrb[56].mxu1  ;;  %v2167_v17 = vpop.f32.mrb[64].mxu0 }
 0x6fd   :  { %v2128_v20 = vpop.f32.mrb[57].mxu1  ;;  %v2169_v42 = vpop.f32.mrb[65].mxu0  ;;  %v2258_v31 = vadd.f32 %v2167_v17, %v7509_v25  ;;  %v2256_v8 = vadd.f32 %v2126_v45, %v7511_v47  ;;  %v7514_v17 = vld [vmem:[#allocation79_spill] sm:$0xff] }
 0x6fe   :  { %v2130_v4 = vpop.f32.mrb[58].mxu1  ;;  %v2171_v22 = vpop.f32.mrb[66].mxu0  ;;  %v2259_v51 = vadd.f32 %v2169_v42, %v7510_v5  ;;  %v2257_v38 = vadd.f32 %v2128_v20, %v7512_v2  ;;  %v7515_v42 = vld [vmem:[#allocation80_spill] sm:$0xff] }
 0x6ff   :  { %v2131_v35 = vpop.f32.mrb[59].mxu1  ;;  %v2172_v27 = vpop.f32.mrb[67].mxu0  ;;  %v2272_v55 = vmul.f32 0.5, %v2258_v31  ;;  %v2264_v52 = vmul.f32 0.5, %v2256_v8  ;;  %v7516_v8 = vld [vmem:[#allocation81_spill] sm:$0xff] }
 0x700   :  { %v2273_v41 = vmul.f32 0.5, %v2259_v51  ;;  %v2265_v58 = vmul.f32 0.5, %v2257_v38  ;;  %v7513_v35 = vld [vmem:[#allocation78_spill] sm:$0xff] }
 0x701   :  { %3608 = vtanh.f32 %v2272_v55 }
 0x702   :  { %3610 = vtanh.f32 %v2273_v41 }
 0x703   :  { %3612 = vtanh.f32 %v2264_v52 }
 0x704   :  { %3614 = vtanh.f32 %v2265_v58 }
 0x70b   :  { %v3609_v20 = vpop.eup %3608 }
 0x70c   :  { %v3611_v52 = vpop.eup %3610  ;;  %v2276_v51 = vmul.f32 0.5, %v3609_v20 }
 0x70d   :  { %v3613_v58 = vpop.eup %3612 }
 0x70e   :  { %v3615_v31 = vpop.eup %3614  ;;  %v2268_v12 = vmul.f32 0.5, %v3613_v58 }
 0x73c   :  { %v2208_v4 = vpop.f32.mrb[60].mxu1  ;;  %v2249_v22 = vpop.f32.mrb[68].mxu0 }
 0x73d   :  { %v2260_v27 = vadd.f32 %v2208_v4, %v7513_v35  ;;  %v2210_v14 = vpop.f32.mrb[61].mxu1  ;;  %v2251_v25 = vpop.f32.mrb[69].mxu0  ;;  %v2262_v5 = vadd.f32 %v2249_v22, %v7514_v17  ;;  %v2277_v35 = vmul.f32 0.5, %v3611_v52  ;;  %v2269_v22 = vmul.f32 0.5, %v3615_v31 }
 0x73e   :  { %v2261_v47 = vadd.f32 %v2210_v14, %v7515_v42  ;;  %v2212_v45 = vpop.f32.mrb[62].mxu1  ;;  %v2253_v2 = vpop.f32.mrb[70].mxu0  ;;  %v2263_v38 = vadd.f32 %v2251_v25, %v7516_v8  ;;  %v2278_v17 = vadd.f32 0.5, %v2276_v51  ;;  %v2270_v42 = vadd.f32 0.5, %v2268_v12 }
 0x73f   :  { %3616 = vtanh.f32 %v2260_v27  ;;  %v2213_v55 = vpop.f32.mrb[63].mxu1  ;;  %v2254_v41 = vpop.f32.mrb[71].mxu0  ;;  %v2282_v4 = vmul.f32 0.5, %v2262_v5  ;;  %v2279_v14 = vadd.f32 0.5, %v2277_v35  ;;  %v2271_v45 = vadd.f32 0.5, %v2269_v22  ;;  %v7517_v22 = vld [vmem:[#allocation121_spill] sm:$0xff] }
 0x740   :  { %3618 = vtanh.f32 %v2261_v47  ;;  %v2283_v62 = vmul.f32 0.5, %v2263_v38  ;;  %v2290_v2 = vmul.f32 %v2278_v17, %v5577_v18  ;;  %v7518_v17 = vld [vmem:[#allocation120_spill] sm:$0xff] }
 0x741   :  { %3620 = vtanh.f32 %v2282_v4  ;;  %v2291_v47 = vmul.f32 %v2279_v14, %v5579_v6  ;;  %v7519_v14 = vld [vmem:[#allocation122_spill] sm:$0xff] }
 0x742   :  { %3622 = vtanh.f32 %v2283_v62 }
 0x749   :  { %v3617_v27 = vpop.eup %3616 }
 0x74a   :  { %v3619_v25 = vpop.eup %3618  ;;  %v2292_v8 = vmul.f32 %v3617_v27, %v2270_v42  ;;  %v7520_v42 = vld [vmem:[#allocation123_spill] sm:$0xff]  ;;  %v7521_v27 = vld [vmem:[#allocation125_spill] sm:$0xff] }
 0x74b   :  { %v2293_v55 = vmul.f32 %v3619_v25, %v2271_v45  ;;  %v3621_v38 = vpop.eup %3620  ;;  %v7522_v45 = vld [vmem:[#allocation124_spill] sm:$0xff]  ;;  %v7523_v25 = vld [vmem:[#allocation126_spill] sm:$0xff] }
 0x74c   :  { %v5851_v20 = vadd.f32 %v2292_v8, %v2290_v2  ;;  %v3623_v62 = vpop.eup %3622  ;;  %v2286_v12 = vmul.f32 0.5, %v3621_v38  ;;  %v7524_v2 = vld [vmem:[#allocation127_spill] sm:$0xff]  ;;  %v7525_v8 = vld [vmem:[#allocation129_spill] sm:$0xff] }
 0x74d   :  { %v5853_v5 = vadd.f32 %v2293_v55, %v2291_v47  ;;  %v2287_v41 = vmul.f32 0.5, %v3623_v62  ;;  %v7526_v47 = vld [vmem:[#allocation128_spill] sm:$0xff]  ;;  %v7527_v55 = vld [vmem:[#allocation130_spill] sm:$0xff]  ;;  %v7528_v38 = vld [vmem:[#allocation39_spill] sm:$0xff] }
 0x74e   :  { %3624 = vtanh.f32 %v5851_v20  ;;  %v2288_v52 = vadd.f32 0.5, %v2286_v12  ;;  %v7529_v62 = vld [vmem:[#allocation41_spill] sm:$0xff]  ;;  %v7530_v12 = vld [vmem:[#allocation38_spill] sm:$0xff] }
 0x74f   :  { %3626 = vtanh.f32 %v5853_v5  ;;  %v2289_v31 = vadd.f32 0.5, %v2287_v41  ;;  %v7531_v41 = vld [vmem:[#allocation40_spill] sm:$0xff] }
 0x758   :  { %v3625_v58 = vpop.eup %3624 }
 0x759   :  { %v3627_v18 = vpop.eup %3626  ;;  %v2298_v51 = vmul.f32 %v3625_v58, %v2288_v52  ;;  %v7532_v52 = vld [vmem:[#allocation70_spill] sm:$0xff]  ;;  %v7533_v58 = vld [vmem:[#allocation71_spill] sm:$0xff] }
 0x75a   :  { %v2299_v4 = vmul.f32 %v3627_v18, %v2289_v31  ;;  %v7534_v31 = vld [vmem:[#allocation72_spill] sm:$0xff]  ;;  %v7535_v18 = vld [vmem:[#allocation73_spill] sm:$0xff] }
 0x75b   :  { %v5857_v35 = vpack.c.bf16 %v2298_v51, %v2298_v51  ;;  %v7536_v51 = vld [vmem:[#allocation139_spill] sm:$0xff] }
 0x75c   :  { %v2309_v6 = vpack.c.bf16 %v2299_v4, %v2299_v4  ;;  %v7537_v4 = vld [vmem:[#allocation141_spill] sm:$0xff] }
 0x75e   :  { %2342 = vmatprep.mubr.bf16.mxu1 %v2309_v6  ;;  %2383 = vmatprep.mubr.bf16.mxu0 %v2309_v6 }
 0x75f   :  { %2343 = vmatmul.mubr.bf16.vlgmr.msra.gmra.mrb[64].mxu1 %v5857_v35  ;;  %2384 = vmatmul.mubr.bf16.vlgmr.msra.gmra.mrb[72].mxu0 %v5857_v35 }
 0x760   :  { %2393 = vmatpush1.bf16.msra.mxu1 %v5587_v11  ;;  %2434 = vmatpush1.bf16.msra.mxu0 %v5590_v3 }
 0x761   :  { %2424 = vmatprep.mubr.bf16.mxu1 %v2309_v6  ;;  %2465 = vmatprep.mubr.bf16.mxu0 %v2309_v6  ;;  %v7538_v6 = vld [vmem:[#allocation140_spill] sm:$0xff] }
 0x762   :  { %2394 = vmatprep.subr.bf16.mxu1 %v5593_v53  ;;  %2435 = vmatprep.subr.bf16.mxu0 %v5596_v40 }
 0x764   :  { %2395 = vmatpush1.bf16.msra.mxu1 %v5599_v37  ;;  %2436 = vmatpush1.bf16.msra.mxu0 %v5602_v39 }
 0x765   :  { %2396 = vmatprep.subr.bf16.mxu1 %v5605_v13  ;;  %2437 = vmatprep.subr.bf16.mxu0 %v5608_v21 }
 0x768   :  { %2397 = vmatpush1.bf16.msra.mxu1 %v5611_v33  ;;  %2438 = vmatpush1.bf16.msra.mxu0 %v5614_v54 }
 0x769   :  { %2398 = vmatprep.subr.bf16.mxu1 %v5617_v50  ;;  %2439 = vmatprep.subr.bf16.mxu0 %v5620_v0 }
 0x76c   :  { %2399 = vmatpush1.bf16.msra.mxu1 %v5623_v19  ;;  %2440 = vmatpush1.bf16.msra.mxu0 %v5626_v59 }
 0x76d   :  { %2400 = vmatprep.subr.bf16.mxu1 %v5629_v49  ;;  %2441 = vmatprep.subr.bf16.mxu0 %v5632_v30 }
 0x770   :  { %2401 = vmatpush1.bf16.msra.mxu1 %v7517_v22  ;;  %2442 = vmatpush1.bf16.msra.mxu0 %v7518_v17 }
 0x771   :  { %2402 = vmatprep.subr.bf16.mxu1 %v7519_v14  ;;  %2443 = vmatprep.subr.bf16.mxu0 %v7520_v42 }
 0x774   :  { %2403 = vmatpush1.bf16.msra.mxu1 %v7521_v27  ;;  %2444 = vmatpush1.bf16.msra.mxu0 %v7522_v45 }
 0x775   :  { %2404 = vmatprep.subr.bf16.mxu1 %v7523_v25  ;;  %2445 = vmatprep.subr.bf16.mxu0 %v7524_v2 }
 0x778   :  { %2405 = vmatpush1.bf16.msra.mxu1 %v7525_v8  ;;  %2446 = vmatpush1.bf16.msra.mxu0 %v7526_v47 }
 0x779   :  { %2406 = vmatprep.subr.bf16.mxu1 %v7527_v55  ;;  %2447 = vmatprep.subr.bf16.mxu0 %v7528_v38  ;;  %v7539_v38 = vld [vmem:[#allocation142_spill] sm:$0xff] }
 0x77c   :  { %2407 = vmatpush1.bf16.msra.mxu1 %v7529_v62  ;;  %2448 = vmatpush1.bf16.msra.mxu0 %v7530_v12  ;;  %v7540_v62 = vld [vmem:[#allocation143_spill] sm:$0xff]  ;;  %v7541_v12 = vld [vmem:[#allocation145_spill] sm:$0xff] }
 0x77d   :  { %2408 = vmatprep.subr.bf16.mxu1 %v7531_v41  ;;  %2449 = vmatprep.subr.bf16.mxu0 %v7532_v52  ;;  %v7542_v41 = vld [vmem:[#allocation144_spill] sm:$0xff]  ;;  %v7543_v52 = vld [vmem:[#allocation146_spill] sm:$0xff] }
 0x780   :  { %2409 = vmatpush1.bf16.msra.mxu1 %v7533_v58  ;;  %2450 = vmatpush1.bf16.msra.mxu0 %v7534_v31  ;;  %v7544_v58 = vld [vmem:[#allocation147_spill] sm:$0xff]  ;;  %v7545_v31 = vld [vmem:[#allocation149_spill] sm:$0xff] }
 0x781   :  { %2410 = vmatprep.subr.bf16.mxu1 %v7535_v18  ;;  %2451 = vmatprep.subr.bf16.mxu0 %v7536_v51  ;;  %v7546_v18 = vld [vmem:[#allocation148_spill] sm:$0xff]  ;;  %v7547_v51 = vld [vmem:[#allocation150_spill] sm:$0xff] }
 0x784   :  { %2411 = vmatpush1.bf16.msra.mxu1 %v7537_v4  ;;  %2452 = vmatpush1.bf16.msra.mxu0 %v7538_v6  ;;  %v7548_v4 = vld [vmem:[#allocation151_spill] sm:$0xff]  ;;  %v7549_v6 = vld [vmem:[#allocation153_spill] sm:$0xff] }
 0x785   :  { %2412 = vmatprep.subr.bf16.mxu1 %v7539_v38  ;;  %2453 = vmatprep.subr.bf16.mxu0 %v7540_v62  ;;  %v7550_v38 = vld [vmem:[#allocation152_spill] sm:$0xff]  ;;  %v7551_v62 = vld [vmem:[#allocation154_spill] sm:$0xff] }
 0x788   :  { %2413 = vmatpush1.bf16.msra.mxu1 %v7541_v12  ;;  %2454 = vmatpush1.bf16.msra.mxu0 %v7542_v41  ;;  %v7552_v12 = vld [vmem:[#allocation155_spill] sm:$0xff]  ;;  %v7553_v41 = vld [vmem:[#allocation157_spill] sm:$0xff] }
 0x789   :  { %2414 = vmatprep.subr.bf16.mxu1 %v7543_v52  ;;  %2455 = vmatprep.subr.bf16.mxu0 %v7544_v58  ;;  %v7554_v52 = vld [vmem:[#allocation156_spill] sm:$0xff]  ;;  %v7555_v58 = vld [vmem:[#allocation158_spill] sm:$0xff] }
 0x78c   :  { %2415 = vmatpush1.bf16.msra.mxu1 %v7545_v31  ;;  %2456 = vmatpush1.bf16.msra.mxu0 %v7546_v18  ;;  %v7556_v31 = vld [vmem:[#allocation159_spill] sm:$0xff] }
 0x78d   :  { %2416 = vmatprep.subr.bf16.mxu1 %v7547_v51  ;;  %2457 = vmatprep.subr.bf16.mxu0 %v7548_v4 }
 0x790   :  { %2417 = vmatpush1.bf16.msra.mxu1 %v7549_v6  ;;  %2458 = vmatpush1.bf16.msra.mxu0 %v7550_v38 }
 0x791   :  { %2418 = vmatprep.subr.bf16.mxu1 %v7551_v62  ;;  %2459 = vmatprep.subr.bf16.mxu0 %v7552_v12 }
 0x794   :  { %2419 = vmatpush1.bf16.msra.mxu1 %v7553_v41  ;;  %2460 = vmatpush1.bf16.msra.mxu0 %v7554_v52 }
 0x795   :  { %2420 = vmatprep.subr.bf16.mxu1 %v7555_v58  ;;  %2461 = vmatprep.subr.bf16.mxu0 %v7556_v31 }
 0x798   :  { %2421 = vmatpush1.bf16.msra.mxu1 %v5755_v9  ;;  %2462 = vmatpush1.bf16.msra.mxu0 %v5758_v24 }
 0x799   :  { %2422 = vmatprep.subr.bf16.mxu1 %v5761_v32  ;;  %2463 = vmatprep.subr.bf16.mxu0 %v5764_v29 }
 0x79c   :  { %2423 = vmatpush1.bf16.msra.mxu1 %v5767_v1  ;;  %2464 = vmatpush1.bf16.msra.mxu0 %v5770_v26 }
 0x79d   :  { %2528 = vmatprep.subr.bf16.mxu1 %v5367_v44  ;;  %2569 = vmatprep.subr.bf16.mxu0 %v5370_v28  ;;  %v7557_v44 = vld [vmem:[#allocation35_spill] sm:$0xff]  ;;  %v7558_v28 = vld [vmem:[#allocation37_spill] sm:$0xff] }
 0x79f   :  { %2425 = vmatmul.mubr.bf16.vlgmr.msra.gmra.mrb[68].mxu1 %v5857_v35  ;;  %2466 = vmatmul.mubr.bf16.vlgmr.msra.gmra.mrb[76].mxu0 %v5857_v35  ;;  %v7574_v35 = vld [vmem:[#allocation172_spill] sm:$0xff] }
 0x7a0   :  { %2529 = vmatpush1.bf16.msra.mxu1 %v5375_v7  ;;  %2570 = vmatpush1.bf16.msra.mxu0 %v5378_v60  ;;  %v7559_v7 = vld [vmem:[#allocation34_spill] sm:$0xff]  ;;  %v7560_v60 = vld [vmem:[#allocation36_spill] sm:$0xff] }
 0x7a1   :  { %2530 = vmatprep.subr.bf16.mxu1 %v5381_v16  ;;  %2571 = vmatprep.subr.bf16.mxu0 %v5384_v48  ;;  %v7561_v16 = vld [vmem:[#allocation66_spill] sm:$0xff]  ;;  %v7562_v48 = vld [vmem:[#allocation68_spill] sm:$0xff] }
 0x7a4   :  { %2531 = vmatpush1.bf16.msra.mxu1 %v5387_v57  ;;  %2572 = vmatpush1.bf16.msra.mxu0 %v5390_v43  ;;  %v7563_v57 = vld [vmem:[#allocation67_spill] sm:$0xff]  ;;  %v7564_v43 = vld [vmem:[#allocation69_spill] sm:$0xff] }
 0x7a5   :  { %2532 = vmatprep.subr.bf16.mxu1 %v5393_v61  ;;  %2573 = vmatprep.subr.bf16.mxu0 %v5396_v10  ;;  %v7565_v61 = vld [vmem:[#allocation131_spill] sm:$0xff]  ;;  %v7566_v10 = vld [vmem:[#allocation133_spill] sm:$0xff] }
 0x7a8   :  { %2533 = vmatpush1.bf16.msra.mxu1 %v5399_v15  ;;  %2574 = vmatpush1.bf16.msra.mxu0 %v5402_v34  ;;  %v7567_v15 = vld [vmem:[#allocation132_spill] sm:$0xff]  ;;  %v7568_v34 = vld [vmem:[#allocation134_spill] sm:$0xff] }
 0x7a9   :  { %2534 = vmatprep.subr.bf16.mxu1 %v5405_v23  ;;  %2575 = vmatprep.subr.bf16.mxu0 %v5408_v36  ;;  %v7569_v23 = vld [vmem:[#allocation135_spill] sm:$0xff]  ;;  %v7570_v36 = vld [vmem:[#allocation137_spill] sm:$0xff] }
 0x7ac   :  { %2535 = vmatpush1.bf16.msra.mxu1 %v5411_v56  ;;  %2576 = vmatpush1.bf16.msra.mxu0 %v5414_v46  ;;  %v7571_v56 = vld [vmem:[#allocation136_spill] sm:$0xff]  ;;  %v7572_v46 = vld [vmem:[#allocation138_spill] sm:$0xff] }
 0x7ad   :  { %2536 = vmatprep.subr.bf16.mxu1 %v5417_v63  ;;  %2577 = vmatprep.subr.bf16.mxu0 %v7557_v44  ;;  %v7573_v63 = vld [vmem:[#allocation173_spill] sm:$0xff]  ;;  %v7575_v44 = vld [vmem:[#allocation175_spill] sm:$0xff] }
 0x7b0   :  { %2537 = vmatpush1.bf16.msra.mxu1 %v7558_v28  ;;  %2578 = vmatpush1.bf16.msra.mxu0 %v7559_v7  ;;  %v7576_v28 = vld [vmem:[#allocation177_spill] sm:$0xff]  ;;  %v7577_v7 = vld [vmem:[#allocation176_spill] sm:$0xff] }
 0x7b1   :  { %2538 = vmatprep.subr.bf16.mxu1 %v7560_v60  ;;  %2579 = vmatprep.subr.bf16.mxu0 %v7561_v16  ;;  %v7578_v60 = vld [vmem:[#allocation178_spill] sm:$0xff]  ;;  %v7579_v16 = vld [vmem:[#allocation179_spill] sm:$0xff] }
 0x7b4   :  { %2539 = vmatpush1.bf16.msra.mxu1 %v7562_v48  ;;  %2580 = vmatpush1.bf16.msra.mxu0 %v7563_v57  ;;  %v7580_v48 = vld [vmem:[#allocation181_spill] sm:$0xff]  ;;  %v7581_v57 = vld [vmem:[#allocation180_spill] sm:$0xff] }
 0x7b5   :  { %2540 = vmatprep.subr.bf16.mxu1 %v7564_v43  ;;  %2581 = vmatprep.subr.bf16.mxu0 %v7565_v61  ;;  %v7582_v43 = vld [vmem:[#allocation182_spill] sm:$0xff]  ;;  %v7583_v61 = vld [vmem:[#allocation183_spill] sm:$0xff] }
 0x7b8   :  { %2541 = vmatpush1.bf16.msra.mxu1 %v7566_v10  ;;  %2582 = vmatpush1.bf16.msra.mxu0 %v7567_v15  ;;  %v7584_v10 = vld [vmem:[#allocation98_spill] sm:$0xff]  ;;  %v7585_v15 = vld [vmem:[#allocation99_spill] sm:$0xff] }
 0x7b9   :  { %2542 = vmatprep.subr.bf16.mxu1 %v7568_v34  ;;  %2583 = vmatprep.subr.bf16.mxu0 %v7569_v23  ;;  %v7586_v34 = vld [vmem:[#allocation101_spill] sm:$0xff]  ;;  %v7587_v23 = vld [vmem:[#allocation100_spill] sm:$0xff] }
 0x7bc   :  { %2543 = vmatpush1.bf16.msra.mxu1 %v7570_v36  ;;  %2584 = vmatpush1.bf16.msra.mxu0 %v7571_v56  ;;  %v7588_v36 = vld [vmem:[#allocation102_spill] sm:$0xff]  ;;  %v7589_v56 = vld [vmem:[#allocation103_spill] sm:$0xff] }
 0x7bd   :  { %2544 = vmatprep.subr.bf16.mxu1 %v7572_v46  ;;  %2585 = vmatprep.subr.bf16.mxu0 %v7573_v63  ;;  %v7590_v46 = vld [vmem:[#allocation105_spill] sm:$0xff]  ;;  %v7591_v63 = vld [vmem:[#allocation104_spill] sm:$0xff] }
 0x7c0   :  { %2545 = vmatpush1.bf16.msra.mxu1 %v7574_v35  ;;  %2586 = vmatpush1.bf16.msra.mxu0 %v7575_v44  ;;  %v7592_v35 = vld [vmem:[#allocation106_spill] sm:$0xff]  ;;  %v7593_v44 = vld [vmem:[#allocation107_spill] sm:$0xff] }
 0x7c1   :  { %2546 = vmatprep.subr.bf16.mxu1 %v7576_v28  ;;  %2587 = vmatprep.subr.bf16.mxu0 %v7577_v7  ;;  %v7594_v28 = vld [vmem:[#allocation109_spill] sm:$0xff]  ;;  %v7595_v7 = vld [vmem:[#allocation108_spill] sm:$0xff] }
 0x7c4   :  { %2547 = vmatpush1.bf16.msra.mxu1 %v7578_v60  ;;  %2588 = vmatpush1.bf16.msra.mxu0 %v7579_v16  ;;  %v7596_v60 = vld [vmem:[#allocation110_spill] sm:$0xff]  ;;  %v7597_v16 = vld [vmem:[#allocation111_spill] sm:$0xff] }
 0x7c5   :  { %2548 = vmatprep.subr.bf16.mxu1 %v7580_v48  ;;  %2589 = vmatprep.subr.bf16.mxu0 %v7581_v57  ;;  %v7598_v48 = vld [vmem:[#allocation113_spill] sm:$0xff]  ;;  %v7599_v57 = vld [vmem:[#allocation112_spill] sm:$0xff] }
 0x7c8   :  { %2549 = vmatpush1.bf16.msra.mxu1 %v7582_v43  ;;  %2590 = vmatpush1.bf16.msra.mxu0 %v7583_v61  ;;  %v7600_v43 = vld [vmem:[#allocation114_spill] sm:$0xff]  ;;  %v7601_v61 = vld [vmem:[#allocation115_spill] sm:$0xff] }
 0x7c9   :  { %2550 = vmatprep.subr.bf16.mxu1 %v7584_v10  ;;  %2591 = vmatprep.subr.bf16.mxu0 %v7585_v15  ;;  %v7602_v10 = vld [vmem:[#allocation117_spill] sm:$0xff]  ;;  %v7603_v15 = vld [vmem:[#allocation116_spill] sm:$0xff] }
 0x7cc   :  { %2551 = vmatpush1.bf16.msra.mxu1 %v7586_v34  ;;  %2592 = vmatpush1.bf16.msra.mxu0 %v7587_v23  ;;  %v7604_v34 = vld [vmem:[#allocation118_spill] sm:$0xff]  ;;  %v7605_v23 = vld [vmem:[#allocation119_spill] sm:$0xff] }
 0x7cd   :  { %2552 = vmatprep.subr.bf16.mxu1 %v7588_v36  ;;  %2593 = vmatprep.subr.bf16.mxu0 %v7589_v56 }
 0x7d0   :  { %2553 = vmatpush1.bf16.msra.mxu1 %v7590_v46  ;;  %2594 = vmatpush1.bf16.msra.mxu0 %v7591_v63 }
 0x7d1   :  { %2554 = vmatprep.subr.bf16.mxu1 %v7592_v35  ;;  %2595 = vmatprep.subr.bf16.mxu0 %v7593_v44 }
 0x7d4   :  { %2555 = vmatpush1.bf16.msra.mxu1 %v7594_v28  ;;  %2596 = vmatpush1.bf16.msra.mxu0 %v7595_v7 }
 0x7d5   :  { %2556 = vmatprep.subr.bf16.mxu1 %v7596_v60  ;;  %2597 = vmatprep.subr.bf16.mxu0 %v7597_v16  ;;  %v7606_v60 = vld [vmem:[#allocation51_spill] sm:$0xff] }
 0x7d8   :  { %2557 = vmatpush1.bf16.msra.mxu1 %v7598_v48  ;;  %2598 = vmatpush1.bf16.msra.mxu0 %v7599_v57  ;;  %v7607_v48 = vld [vmem:[#allocation53_spill] sm:$0xff] }
 0x7d9   :  { %2558 = vmatprep.subr.bf16.mxu1 %v7600_v43  ;;  %2599 = vmatprep.subr.bf16.mxu0 %v7601_v61  ;;  %v7608_v43 = vld [vmem:[#allocation50_spill] sm:$0xff] }
 0x7dc   :  { %2559 = vmatpush1.bf16.msra.mxu1 %v7602_v10  ;;  %2600 = vmatpush1.bf16.msra.mxu0 %v7603_v15  ;;  %v7609_v10 = vld [vmem:[#allocation52_spill] sm:$0xff] }
 0x7dd   :  { %2610 = vmatprep.subr.bf16.mxu1 %v7604_v34  ;;  %2651 = vmatprep.subr.bf16.mxu0 %v7605_v23 }
 0x832   :  { %v2344_v36 = vpop.f32.mrb[64].mxu1  ;;  %v2385_v56 = vpop.f32.mrb[72].mxu0 }
 0x833   :  { %v2346_v46 = vpop.f32.mrb[65].mxu1  ;;  %v2387_v63 = vpop.f32.mrb[73].mxu0  ;;  %v2476_v16 = vadd.f32 %v2385_v56, %v7606_v60  ;;  %v2474_v61 = vadd.f32 %v2344_v36, %v7608_v43  ;;  %v7611_v60 = vld [vmem:[#allocation83_spill] sm:$0xff] }
 0x834   :  { %v2348_v35 = vpop.f32.mrb[66].mxu1  ;;  %v2389_v44 = vpop.f32.mrb[74].mxu0  ;;  %v2477_v57 = vadd.f32 %v2387_v63, %v7607_v48  ;;  %v2475_v15 = vadd.f32 %v2346_v46, %v7609_v10  ;;  %v7612_v48 = vld [vmem:[#allocation84_spill] sm:$0xff] }
 0x835   :  { %v2349_v28 = vpop.f32.mrb[67].mxu1  ;;  %v2390_v7 = vpop.f32.mrb[75].mxu0  ;;  %v2490_v26 = vmul.f32 0.5, %v2476_v16  ;;  %v2482_v1 = vmul.f32 0.5, %v2474_v61 }
 0x836   :  { %v2491_v34 = vmul.f32 0.5, %v2477_v57  ;;  %v2483_v23 = vmul.f32 0.5, %v2475_v15  ;;  %v7610_v28 = vld [vmem:[#allocation82_spill] sm:$0xff]  ;;  %v7613_v57 = vld [vmem:[#allocation85_spill] sm:$0xff] }
 0x837   :  { %3628 = vtanh.f32 %v2490_v26 }
 0x838   :  { %3630 = vtanh.f32 %v2491_v34 }
 0x839   :  { %3632 = vtanh.f32 %v2482_v1 }
 0x83a   :  { %3634 = vtanh.f32 %v2483_v23 }
 0x841   :  { %v3629_v16 = vpop.eup %3628 }
 0x842   :  { %v3631_v1 = vpop.eup %3630  ;;  %v2494_v23 = vmul.f32 0.5, %v3629_v16 }
 0x843   :  { %v3633_v15 = vpop.eup %3632 }
 0x844   :  { %v3635_v34 = vpop.eup %3634  ;;  %v2486_v24 = vmul.f32 0.5, %v3633_v15 }
 0x872   :  { %v2426_v35 = vpop.f32.mrb[68].mxu1  ;;  %v2467_v44 = vpop.f32.mrb[76].mxu0 }
 0x873   :  { %v2478_v7 = vadd.f32 %v2426_v35, %v7610_v28  ;;  %v2428_v29 = vpop.f32.mrb[69].mxu1  ;;  %v2469_v56 = vpop.f32.mrb[77].mxu0  ;;  %v2480_v63 = vadd.f32 %v2467_v44, %v7611_v60  ;;  %v2495_v28 = vmul.f32 0.5, %v3631_v1  ;;  %v2487_v44 = vmul.f32 0.5, %v3635_v34 }
 0x874   :  { %v2479_v36 = vadd.f32 %v2428_v29, %v7612_v48  ;;  %v2430_v43 = vpop.f32.mrb[70].mxu1  ;;  %v2471_v46 = vpop.f32.mrb[78].mxu0  ;;  %v2481_v61 = vadd.f32 %v2469_v56, %v7613_v57  ;;  %v2496_v60 = vadd.f32 0.5, %v2494_v23  ;;  %v2488_v48 = vadd.f32 0.5, %v2486_v24 }
 0x875   :  { %3636 = vtanh.f32 %v2478_v7  ;;  %v2431_v26 = vpop.f32.mrb[71].mxu1  ;;  %v2472_v10 = vpop.f32.mrb[79].mxu0  ;;  %v2500_v35 = vmul.f32 0.5, %v2480_v63  ;;  %v2497_v29 = vadd.f32 0.5, %v2495_v28  ;;  %v2489_v43 = vadd.f32 0.5, %v2487_v44  ;;  %v6123_v44 = vld [vmem:[#allocation4 + $0x108] sm:$0xff] }
 0x876   :  { %3638 = vtanh.f32 %v2479_v36  ;;  %v2501_v32 = vmul.f32 0.5, %v2481_v61  ;;  %v2508_v46 = vmul.f32 %v2496_v60, %v5851_v20  ;;  %v6126_v60 = vld [vmem:[#allocation4 + $0x118] sm:$0xff] }
 0x877   :  { %3640 = vtanh.f32 %v2500_v35  ;;  %v2509_v36 = vmul.f32 %v2497_v29, %v5853_v5  ;;  %v6129_v29 = vld [vmem:[#allocation4 + $0x100] sm:$0xff] }
 0x878   :  { %3642 = vtanh.f32 %v2501_v32 }
 0x87f   :  { %v3637_v7 = vpop.eup %3636 }
 0x880   :  { %v3639_v56 = vpop.eup %3638  ;;  %v2510_v57 = vmul.f32 %v3637_v7, %v2488_v48  ;;  %v6132_v48 = vld [vmem:[#allocation4 + $0x110] sm:$0xff]  ;;  %v6135_v7 = vld [vmem:[#allocation4 + $0x148] sm:$0xff] }
 0x881   :  { %v2511_v26 = vmul.f32 %v3639_v56, %v2489_v43  ;;  %v3641_v61 = vpop.eup %3640  ;;  %v6138_v43 = vld [vmem:[#allocation4 + $0x158] sm:$0xff]  ;;  %v6141_v56 = vld [vmem:[#allocation4 + $0x140] sm:$0xff] }
 0x882   :  { %v6001_v16 = vadd.f32 %v2510_v57, %v2508_v46  ;;  %v3643_v32 = vpop.eup %3642  ;;  %v2504_v24 = vmul.f32 0.5, %v3641_v61  ;;  %v6144_v46 = vld [vmem:[#allocation4 + $0x150] sm:$0xff]  ;;  %v6147_v57 = vld [vmem:[#allocation4 + $0x188] sm:$0xff] }
 0x883   :  { %v6003_v63 = vadd.f32 %v2511_v26, %v2509_v36  ;;  %v2505_v10 = vmul.f32 0.5, %v3643_v32  ;;  %v6150_v36 = vld [vmem:[#allocation4 + $0x198] sm:$0xff]  ;;  %v6153_v26 = vld [vmem:[#allocation4 + $0x180] sm:$0xff]  ;;  %v6156_v61 = vld [vmem:[#allocation4 + $0x190] sm:$0xff] }
 0x884   :  { %3644 = vtanh.f32 %v6001_v16  ;;  %v2506_v1 = vadd.f32 0.5, %v2504_v24  ;;  %v6159_v32 = vld [vmem:[#allocation4 + $0x1c8] sm:$0xff]  ;;  %v6162_v24 = vld [vmem:[#allocation4 + $0x1d8] sm:$0xff] }
 0x885   :  { %3646 = vtanh.f32 %v6003_v63  ;;  %v2507_v34 = vadd.f32 0.5, %v2505_v10  ;;  %v6165_v10 = vld [vmem:[#allocation4 + $0x1c0] sm:$0xff] }
 0x88e   :  { %v3645_v15 = vpop.eup %3644 }
 0x88f   :  { %v3647_v20 = vpop.eup %3646  ;;  %v2516_v23 = vmul.f32 %v3645_v15, %v2506_v1  ;;  %v6168_v1 = vld [vmem:[#allocation4 + $0x1d0] sm:$0xff]  ;;  %v6171_v15 = vld [vmem:[#allocation4 + $0x208] sm:$0xff] }
 0x890   :  { %v2517_v35 = vmul.f32 %v3647_v20, %v2507_v34  ;;  %v6174_v34 = vld [vmem:[#allocation4 + $0x218] sm:$0xff]  ;;  %v6177_v20 = vld [vmem:[#allocation4 + $0x200] sm:$0xff] }
 0x891   :  { %v6007_v28 = vpack.c.bf16 %v2516_v23, %v2516_v23  ;;  %v6180_v23 = vld [vmem:[#allocation4 + $0x210] sm:$0xff] }
 0x892   :  { %v2527_v5 = vpack.c.bf16 %v2517_v35, %v2517_v35  ;;  %v6183_v35 = vld [vmem:[#allocation4 + $0x248] sm:$0xff] }
 0x894   :  { %2560 = vmatprep.mubr.bf16.mxu1 %v2527_v5  ;;  %2601 = vmatprep.mubr.bf16.mxu0 %v2527_v5 }
 0x895   :  { %2561 = vmatmul.mubr.bf16.vlgmr.msra.gmra.mrb[72].mxu1 %v6007_v28  ;;  %2602 = vmatmul.mubr.bf16.vlgmr.msra.gmra.mrb[80].mxu0 %v6007_v28 }
 0x896   :  { %2611 = vmatpush1.bf16.msra.mxu1 %v5587_v11  ;;  %2652 = vmatpush1.bf16.msra.mxu0 %v5590_v3  ;;  %v7614_v11 = vld [vmem:[#allocation39_spill] sm:$0xff]  ;;  %v7615_v3 = vld [vmem:[#allocation41_spill] sm:$0xff] }
 0x897   :  { %2642 = vmatprep.mubr.bf16.mxu1 %v2527_v5  ;;  %2683 = vmatprep.mubr.bf16.mxu0 %v2527_v5  ;;  %v6186_v5 = vld [vmem:[#allocation4 + $0x258] sm:$0xff] }
 0x898   :  { %2612 = vmatprep.subr.bf16.mxu1 %v5593_v53  ;;  %2653 = vmatprep.subr.bf16.mxu0 %v5596_v40  ;;  %v7616_v53 = vld [vmem:[#allocation38_spill] sm:$0xff]  ;;  %v7617_v40 = vld [vmem:[#allocation40_spill] sm:$0xff] }
 0x89a   :  { %2613 = vmatpush1.bf16.msra.mxu1 %v5599_v37  ;;  %2654 = vmatpush1.bf16.msra.mxu0 %v5602_v39  ;;  %v7618_v37 = vld [vmem:[#allocation70_spill] sm:$0xff]  ;;  %v7619_v39 = vld [vmem:[#allocation71_spill] sm:$0xff] }
 0x89b   :  { %2614 = vmatprep.subr.bf16.mxu1 %v5605_v13  ;;  %2655 = vmatprep.subr.bf16.mxu0 %v5608_v21  ;;  %v7620_v13 = vld [vmem:[#allocation72_spill] sm:$0xff]  ;;  %v7621_v21 = vld [vmem:[#allocation73_spill] sm:$0xff] }
 0x89e   :  { %2615 = vmatpush1.bf16.msra.mxu1 %v5611_v33  ;;  %2656 = vmatpush1.bf16.msra.mxu0 %v5614_v54  ;;  %v7622_v33 = vld [vmem:[#allocation139_spill] sm:$0xff]  ;;  %v7623_v54 = vld [vmem:[#allocation141_spill] sm:$0xff] }
 0x89f   :  { %2616 = vmatprep.subr.bf16.mxu1 %v5617_v50  ;;  %2657 = vmatprep.subr.bf16.mxu0 %v5620_v0  ;;  %v7624_v50 = vld [vmem:[#allocation140_spill] sm:$0xff]  ;;  %v7625_v0 = vld [vmem:[#allocation142_spill] sm:$0xff] }
 0x8a2   :  { %2617 = vmatpush1.bf16.msra.mxu1 %v5623_v19  ;;  %2658 = vmatpush1.bf16.msra.mxu0 %v5626_v59  ;;  %v7626_v19 = vld [vmem:[#allocation143_spill] sm:$0xff]  ;;  %v7627_v59 = vld [vmem:[#allocation145_spill] sm:$0xff] }
 0x8a3   :  { %2618 = vmatprep.subr.bf16.mxu1 %v5629_v49  ;;  %2659 = vmatprep.subr.bf16.mxu0 %v5632_v30  ;;  %v7628_v49 = vld [vmem:[#allocation144_spill] sm:$0xff]  ;;  %v7629_v30 = vld [vmem:[#allocation146_spill] sm:$0xff] }
 0x8a6   :  { %2619 = vmatpush1.bf16.msra.mxu1 %v7517_v22  ;;  %2660 = vmatpush1.bf16.msra.mxu0 %v7518_v17  ;;  %v7630_v22 = vld [vmem:[#allocation147_spill] sm:$0xff]  ;;  %v7631_v17 = vld [vmem:[#allocation149_spill] sm:$0xff] }
 0x8a7   :  { %2620 = vmatprep.subr.bf16.mxu1 %v7519_v14  ;;  %2661 = vmatprep.subr.bf16.mxu0 %v7520_v42  ;;  %v7632_v14 = vld [vmem:[#allocation161_spill] sm:$0xff]  ;;  %v7633_v42 = vld [vmem:[#allocation160_spill] sm:$0xff] }
 0x8aa   :  { %2621 = vmatpush1.bf16.msra.mxu1 %v7521_v27  ;;  %2662 = vmatpush1.bf16.msra.mxu0 %v7522_v45  ;;  %v7634_v27 = vld [vmem:[#allocation162_spill] sm:$0xff]  ;;  %v7635_v45 = vld [vmem:[#allocation163_spill] sm:$0xff] }
 0x8ab   :  { %2622 = vmatprep.subr.bf16.mxu1 %v7523_v25  ;;  %2663 = vmatprep.subr.bf16.mxu0 %v7524_v2  ;;  %v7636_v25 = vld [vmem:[#allocation165_spill] sm:$0xff]  ;;  %v6073_v2 = vld [vmem:[#allocation4 + $0x8] sm:$0xff] }
 0x8ae   :  { %2623 = vmatpush1.bf16.msra.mxu1 %v7525_v8  ;;  %2664 = vmatpush1.bf16.msra.mxu0 %v7526_v47  ;;  %v6076_v8 = vld [vmem:[#allocation4 + $0x18] sm:$0xff]  ;;  %v6084_v47 = vld [vmem:[#allocation4 + $0x10] sm:$0xff] }
 0x8af   :  { %2624 = vmatprep.subr.bf16.mxu1 %v7527_v55  ;;  %2665 = vmatprep.subr.bf16.mxu0 %v7614_v11  ;;  %v6087_v55 = vld [vmem:[#allocation4 + $0x48] sm:$0xff]  ;;  %v6192_v11 = vld [vmem:[#allocation4 + $0x250] sm:$0xff] }
 0x8b0   :  { %7637 = vst [vmem:[#allocation164_spill] sm:$0xff] %v6192_v11 }
 0x8b2   :  { %2625 = vmatpush1.bf16.msra.mxu1 %v7615_v3  ;;  %2666 = vmatpush1.bf16.msra.mxu0 %v7616_v53  ;;  %v6195_v3 = vld [vmem:[#allocation4 + $0x288] sm:$0xff]  ;;  %v6198_v53 = vld [vmem:[#allocation4 + $0x298] sm:$0xff] }
 0x8b3   :  { %2626 = vmatprep.subr.bf16.mxu1 %v7617_v40  ;;  %2667 = vmatprep.subr.bf16.mxu0 %v7618_v37  ;;  %7638 = vst [vmem:[#allocation166_spill] sm:$0xff] %v6195_v3  ;;  %7639 = vst [vmem:[#allocation167_spill] sm:$0xff] %v6198_v53  ;;  %v6201_v40 = vld [vmem:[#allocation4 + $0x280] sm:$0xff]  ;;  %v6204_v37 = vld [vmem:[#allocation4 + $0x290] sm:$0xff] }
 0x8b4   :  { %7640 = vst [vmem:[#allocation169_spill] sm:$0xff] %v6201_v40  ;;  %7641 = vst [vmem:[#allocation168_spill] sm:$0xff] %v6204_v37 }
 0x8b6   :  { %2627 = vmatpush1.bf16.msra.mxu1 %v7619_v39  ;;  %2668 = vmatpush1.bf16.msra.mxu0 %v7620_v13  ;;  %v6207_v39 = vld [vmem:[#allocation4 + $0x2c8] sm:$0xff]  ;;  %v6210_v13 = vld [vmem:[#allocation4 + $0x2d8] sm:$0xff] }
 0x8b7   :  { %2628 = vmatprep.subr.bf16.mxu1 %v7621_v21  ;;  %2669 = vmatprep.subr.bf16.mxu0 %v7622_v33  ;;  %7642 = vst [vmem:[#allocation170_spill] sm:$0xff] %v6207_v39  ;;  %7643 = vst [vmem:[#allocation171_spill] sm:$0xff] %v6210_v13  ;;  %v6213_v21 = vld [vmem:[#allocation4 + $0x2c0] sm:$0xff]  ;;  %v6216_v33 = vld [vmem:[#allocation4 + $0x2d0] sm:$0xff] }
 0x8b8   :  { %7644 = vst [vmem:[#allocation174_spill] sm:$0xff] %v6213_v21  ;;  %7645 = vst [vmem:[#allocation43_spill] sm:$0xff] %v6216_v33 }
 0x8ba   :  { %2629 = vmatpush1.bf16.msra.mxu1 %v7623_v54  ;;  %2670 = vmatpush1.bf16.msra.mxu0 %v7624_v50  ;;  %v6219_v54 = vld [vmem:[#allocation4 + $0x308] sm:$0xff]  ;;  %v6222_v50 = vld [vmem:[#allocation4 + $0x318] sm:$0xff] }
 0x8bb   :  { %2630 = vmatprep.subr.bf16.mxu1 %v7625_v0  ;;  %2671 = vmatprep.subr.bf16.mxu0 %v7626_v19  ;;  %7646 = vst [vmem:[#allocation45_spill] sm:$0xff] %v6219_v54  ;;  %7647 = vst [vmem:[#allocation42_spill] sm:$0xff] %v6222_v50  ;;  %v6225_v0 = vld [vmem:[#allocation4 + $0x300] sm:$0xff]  ;;  %v6228_v19 = vld [vmem:[#allocation4 + $0x310] sm:$0xff] }
 0x8bc   :  { %7648 = vst [vmem:[#allocation44_spill] sm:$0xff] %v6225_v0  ;;  %7649 = vst [vmem:[#allocation74_spill] sm:$0xff] %v6228_v19 }
 0x8be   :  { %2631 = vmatpush1.bf16.msra.mxu1 %v7627_v59  ;;  %2672 = vmatpush1.bf16.msra.mxu0 %v7628_v49  ;;  %v6231_v59 = vld [vmem:[#allocation4 + $0x348] sm:$0xff]  ;;  %v6234_v49 = vld [vmem:[#allocation4 + $0x358] sm:$0xff] }
 0x8bf   :  { %2632 = vmatprep.subr.bf16.mxu1 %v7629_v30  ;;  %2673 = vmatprep.subr.bf16.mxu0 %v7630_v22  ;;  %7650 = vst [vmem:[#allocation75_spill] sm:$0xff] %v6231_v59  ;;  %7651 = vst [vmem:[#allocation76_spill] sm:$0xff] %v6234_v49  ;;  %v6237_v30 = vld [vmem:[#allocation4 + $0x340] sm:$0xff]  ;;  %v6240_v22 = vld [vmem:[#allocation4 + $0x350] sm:$0xff] }
 0x8c0   :  { %7652 = vst [vmem:[#allocation77_spill] sm:$0xff] %v6237_v30  ;;  %7653 = vst [vmem:[#allocation47_spill] sm:$0xff] %v6240_v22 }
 0x8c2   :  { %2633 = vmatpush1.bf16.msra.mxu1 %v7631_v17  ;;  %2674 = vmatpush1.bf16.msra.mxu0 %v7546_v18  ;;  %v6111_v18 = vld [vmem:[#allocation4 + $0xc8] sm:$0xff] }
 0x8c3   :  { %2634 = vmatprep.subr.bf16.mxu1 %v7547_v51  ;;  %2675 = vmatprep.subr.bf16.mxu0 %v7548_v4  ;;  %v6114_v51 = vld [vmem:[#allocation4 + $0xd8] sm:$0xff]  ;;  %v6117_v4 = vld [vmem:[#allocation4 + $0xc0] sm:$0xff]  ;;  %v6243_v17 = vld [vmem:[#allocation4 + $0x388] sm:$0xff] }
 0x8c4   :  { %7654 = vst [vmem:[#allocation49_spill] sm:$0xff] %v6243_v17 }
 0x8c6   :  { %2635 = vmatpush1.bf16.msra.mxu1 %v7549_v6  ;;  %2676 = vmatpush1.bf16.msra.mxu0 %v7550_v38  ;;  %v6090_v38 = vld [vmem:[#allocation4 + $0x58] sm:$0xff]  ;;  %v6120_v6 = vld [vmem:[#allocation4 + $0xd0] sm:$0xff] }
 0x8c7   :  { %2636 = vmatprep.subr.bf16.mxu1 %v7551_v62  ;;  %2677 = vmatprep.subr.bf16.mxu0 %v7552_v12  ;;  %v6093_v62 = vld [vmem:[#allocation4 + $0x40] sm:$0xff]  ;;  %v6096_v12 = vld [vmem:[#allocation4 + $0x50] sm:$0xff] }
 0x8ca   :  { %2637 = vmatpush1.bf16.msra.mxu1 %v7553_v41  ;;  %2678 = vmatpush1.bf16.msra.mxu0 %v7554_v52  ;;  %v6099_v41 = vld [vmem:[#allocation4 + $0x88] sm:$0xff]  ;;  %v6102_v52 = vld [vmem:[#allocation4 + $0x98] sm:$0xff] }
 0x8cb   :  { %2638 = vmatprep.subr.bf16.mxu1 %v7555_v58  ;;  %2679 = vmatprep.subr.bf16.mxu0 %v7556_v31  ;;  %v6105_v58 = vld [vmem:[#allocation4 + $0x80] sm:$0xff]  ;;  %v6108_v31 = vld [vmem:[#allocation4 + $0x90] sm:$0xff] }
 0x8ce   :  { %2639 = vmatpush1.bf16.msra.mxu1 %v5755_v9  ;;  %2680 = vmatpush1.bf16.msra.mxu0 %v7632_v14  ;;  %v6081_v9 = vld [vmem:[#allocation4] sm:$0xff]  ;;  %v6246_v14 = vld [vmem:[#allocation4 + $0x398] sm:$0xff] }
 0x8cf   :  { %2640 = vmatprep.subr.bf16.mxu1 %v7633_v42  ;;  %2681 = vmatprep.subr.bf16.mxu0 %v7634_v27  ;;  %7655 = vst [vmem:[#allocation46_spill] sm:$0xff] %v6246_v14  ;;  %v6249_v42 = vld [vmem:[#allocation4 + $0x380] sm:$0xff]  ;;  %v6252_v27 = vld [vmem:[#allocation4 + $0x390] sm:$0xff] }
 0x8d0   :  { %7656 = vst [vmem:[#allocation48_spill] sm:$0xff] %v6249_v42  ;;  %7657 = vst [vmem:[#allocation78_spill] sm:$0xff] %v6252_v27 }
 0x8d2   :  { %2641 = vmatpush1.bf16.msra.mxu1 %v7635_v45  ;;  %2682 = vmatpush1.bf16.msra.mxu0 %v7636_v25  ;;  %v6255_v45 = vld [vmem:[#allocation4 + $0x3c8] sm:$0xff]  ;;  %v6258_v25 = vld [vmem:[#allocation4 + $0x3d8] sm:$0xff] }
 0x8d3   :  { %2746 = vmatprep.subr.bf16.mxu1 %v6073_v2  ;;  %2787 = vmatprep.subr.bf16.mxu0 %v6076_v8  ;;  %7658 = vst [vmem:[#allocation79_spill] sm:$0xff] %v6255_v45  ;;  %7659 = vst [vmem:[#allocation80_spill] sm:$0xff] %v6258_v25 }
 0x8d5   :  { %2643 = vmatmul.mubr.bf16.vlgmr.msra.gmra.mrb[76].mxu1 %v6007_v28  ;;  %2684 = vmatmul.mubr.bf16.vlgmr.msra.gmra.mrb[84].mxu0 %v6007_v28  ;;  %v6189_v28 = vld [vmem:[#allocation4 + $0x240] sm:$0xff] }
 0x8d6   :  { %2747 = vmatpush1.bf16.msra.mxu1 %v6081_v9  ;;  %2788 = vmatpush1.bf16.msra.mxu0 %v6084_v47 }
 0x8d7   :  { %2748 = vmatprep.subr.bf16.mxu1 %v6087_v55  ;;  %2789 = vmatprep.subr.bf16.mxu0 %v6090_v38 }
 0x8da   :  { %2749 = vmatpush1.bf16.msra.mxu1 %v6093_v62  ;;  %2790 = vmatpush1.bf16.msra.mxu0 %v6096_v12 }
 0x8db   :  { %2750 = vmatprep.subr.bf16.mxu1 %v6099_v41  ;;  %2791 = vmatprep.subr.bf16.mxu0 %v6102_v52 }
 0x8de   :  { %2751 = vmatpush1.bf16.msra.mxu1 %v6105_v58  ;;  %2792 = vmatpush1.bf16.msra.mxu0 %v6108_v31 }
 0x8df   :  { %2752 = vmatprep.subr.bf16.mxu1 %v6111_v18  ;;  %2793 = vmatprep.subr.bf16.mxu0 %v6114_v51 }
 0x8e2   :  { %2753 = vmatpush1.bf16.msra.mxu1 %v6117_v4  ;;  %2794 = vmatpush1.bf16.msra.mxu0 %v6120_v6 }
 0x8e3   :  { %2754 = vmatprep.subr.bf16.mxu1 %v6123_v44  ;;  %2795 = vmatprep.subr.bf16.mxu0 %v6126_v60 }
 0x8e6   :  { %2755 = vmatpush1.bf16.msra.mxu1 %v6129_v29  ;;  %2796 = vmatpush1.bf16.msra.mxu0 %v6132_v48 }
 0x8e7   :  { %2756 = vmatprep.subr.bf16.mxu1 %v6135_v7  ;;  %2797 = vmatprep.subr.bf16.mxu0 %v6138_v43 }
 0x8ea   :  { %2757 = vmatpush1.bf16.msra.mxu1 %v6141_v56  ;;  %2798 = vmatpush1.bf16.msra.mxu0 %v6144_v46 }
 0x8eb   :  { %2758 = vmatprep.subr.bf16.mxu1 %v6147_v57  ;;  %2799 = vmatprep.subr.bf16.mxu0 %v6150_v36 }
 0x8ee   :  { %2759 = vmatpush1.bf16.msra.mxu1 %v6153_v26  ;;  %2800 = vmatpush1.bf16.msra.mxu0 %v6156_v61 }
 0x8ef   :  { %2760 = vmatprep.subr.bf16.mxu1 %v6159_v32  ;;  %2801 = vmatprep.subr.bf16.mxu0 %v6162_v24 }
 0x8f2   :  { %2761 = vmatpush1.bf16.msra.mxu1 %v6165_v10  ;;  %2802 = vmatpush1.bf16.msra.mxu0 %v6168_v1 }
 0x8f3   :  { %2762 = vmatprep.subr.bf16.mxu1 %v6171_v15  ;;  %2803 = vmatprep.subr.bf16.mxu0 %v6174_v34 }
 0x8f6   :  { %2763 = vmatpush1.bf16.msra.mxu1 %v6177_v20  ;;  %2804 = vmatpush1.bf16.msra.mxu0 %v6180_v23 }
 0x8f7   :  { %2764 = vmatprep.subr.bf16.mxu1 %v6183_v35  ;;  %2805 = vmatprep.subr.bf16.mxu0 %v6186_v5 }
 0x8fa   :  { %2765 = vmatpush1.bf16.msra.mxu1 %v6189_v28  ;;  %2806 = vmatpush1.bf16.msra.mxu0 %v6192_v11 }
 0x8fb   :  { %2766 = vmatprep.subr.bf16.mxu1 %v6195_v3  ;;  %2807 = vmatprep.subr.bf16.mxu0 %v6198_v53 }
 0x8fe   :  { %2767 = vmatpush1.bf16.msra.mxu1 %v6201_v40  ;;  %2808 = vmatpush1.bf16.msra.mxu0 %v6204_v37 }
 0x8ff   :  { %2768 = vmatprep.subr.bf16.mxu1 %v6207_v39  ;;  %2809 = vmatprep.subr.bf16.mxu0 %v6210_v13  ;;  %v7667_v13 = vld [vmem:[#allocation56_spill] sm:$0xff] }
 0x902   :  { %2769 = vmatpush1.bf16.msra.mxu1 %v6213_v21  ;;  %2810 = vmatpush1.bf16.msra.mxu0 %v6216_v33  ;;  %v7666_v33 = vld [vmem:[#allocation54_spill] sm:$0xff] }
 0x903   :  { %2770 = vmatprep.subr.bf16.mxu1 %v6219_v54  ;;  %2811 = vmatprep.subr.bf16.mxu0 %v6222_v50  ;;  %v7665_v54 = vld [vmem:[#allocation57_spill] sm:$0xff] }
 0x906   :  { %2771 = vmatpush1.bf16.msra.mxu1 %v6225_v0  ;;  %2812 = vmatpush1.bf16.msra.mxu0 %v6228_v19  ;;  %v7664_v0 = vld [vmem:[#allocation55_spill] sm:$0xff] }
 0x907   :  { %2772 = vmatprep.subr.bf16.mxu1 %v6231_v59  ;;  %2813 = vmatprep.subr.bf16.mxu0 %v6234_v49 }
 0x90a   :  { %2773 = vmatpush1.bf16.msra.mxu1 %v6237_v30  ;;  %2814 = vmatpush1.bf16.msra.mxu0 %v6240_v22 }
 0x90b   :  { %2774 = vmatprep.subr.bf16.mxu1 %v6243_v17  ;;  %2815 = vmatprep.subr.bf16.mxu0 %v6246_v14  ;;  %v6261_v17 = vld [vmem:[#allocation4 + $0x3c0] sm:$0xff]  ;;  %v6264_v14 = vld [vmem:[#allocation4 + $0x3d0] sm:$0xff] }
 0x90c   :  { %7660 = vst [vmem:[#allocation81_spill] sm:$0xff] %v6261_v17  ;;  %7661 = vst [vmem:[#allocation121_spill] sm:$0xff] %v6264_v14 }
 0x90e   :  { %2775 = vmatpush1.bf16.msra.mxu1 %v6249_v42  ;;  %2816 = vmatpush1.bf16.msra.mxu0 %v6252_v27  ;;  %v6267_v42 = vld [vmem:[#allocation4 + $0x28] sm:$0xff]  ;;  %v6270_v27 = vld [vmem:[#allocation4 + $0x38] sm:$0xff] }
 0x90f   :  { %2776 = vmatprep.subr.bf16.mxu1 %v6255_v45  ;;  %2817 = vmatprep.subr.bf16.mxu0 %v6258_v25  ;;  %7662 = vst [vmem:[#allocation120_spill] sm:$0xff] %v6267_v42  ;;  %7663 = vst [vmem:[#allocation122_spill] sm:$0xff] %v6270_v27 }
 0x912   :  { %2777 = vmatpush1.bf16.msra.mxu1 %v6261_v17  ;;  %2818 = vmatpush1.bf16.msra.mxu0 %v6264_v14 }
 0x913   :  { %2828 = vmatprep.subr.bf16.mxu1 %v6267_v42  ;;  %2869 = vmatprep.subr.bf16.mxu0 %v6270_v27 }
 0x968   :  { %v2562_v45 = vpop.f32.mrb[72].mxu1  ;;  %v2603_v22 = vpop.f32.mrb[80].mxu0 }
 0x969   :  { %v2564_v30 = vpop.f32.mrb[73].mxu1  ;;  %v2605_v25 = vpop.f32.mrb[81].mxu0  ;;  %v2694_v50 = vadd.f32 %v2603_v22, %v7664_v0  ;;  %v2692_v21 = vadd.f32 %v2562_v45, %v7666_v33  ;;  %v7669_v22 = vld [vmem:[#allocation87_spill] sm:$0xff] }
 0x96a   :  { %v2566_v49 = vpop.f32.mrb[74].mxu1  ;;  %v2607_v59 = vpop.f32.mrb[82].mxu0  ;;  %v2695_v14 = vadd.f32 %v2605_v25, %v7665_v54  ;;  %v2693_v42 = vadd.f32 %v2564_v30, %v7667_v13  ;;  %v7670_v25 = vld [vmem:[#allocation88_spill] sm:$0xff] }
 0x96b   :  { %v2567_v19 = vpop.f32.mrb[75].mxu1  ;;  %v2608_v17 = vpop.f32.mrb[83].mxu0  ;;  %v2708_v39 = vmul.f32 0.5, %v2694_v50  ;;  %v2700_v40 = vmul.f32 0.5, %v2692_v21  ;;  %v7671_v21 = vld [vmem:[#allocation89_spill] sm:$0xff] }
 0x96c   :  { %v2709_v37 = vmul.f32 0.5, %v2695_v14  ;;  %v2701_v27 = vmul.f32 0.5, %v2693_v42  ;;  %v7668_v19 = vld [vmem:[#allocation86_spill] sm:$0xff] }
 0x96d   :  { %3648 = vtanh.f32 %v2708_v39 }
 0x96e   :  { %3650 = vtanh.f32 %v2709_v37 }
 0x96f   :  { %3652 = vtanh.f32 %v2700_v40 }
 0x970   :  { %3654 = vtanh.f32 %v2701_v27 }
 0x977   :  { %v3649_v50 = vpop.eup %3648 }
 0x978   :  { %v3651_v40 = vpop.eup %3650  ;;  %v2712_v27 = vmul.f32 0.5, %v3649_v50 }
 0x979   :  { %v3653_v14 = vpop.eup %3652 }
 0x97a   :  { %v3655_v42 = vpop.eup %3654  ;;  %v2704_v11 = vmul.f32 0.5, %v3653_v14 }
 0x9a8   :  { %v2644_v49 = vpop.f32.mrb[76].mxu1  ;;  %v2685_v59 = vpop.f32.mrb[84].mxu0 }
 0x9a9   :  { %v2696_v17 = vadd.f32 %v2644_v49, %v7668_v19  ;;  %v2646_v53 = vpop.f32.mrb[77].mxu1  ;;  %v2687_v0 = vpop.f32.mrb[85].mxu0  ;;  %v2698_v54 = vadd.f32 %v2685_v59, %v7669_v22  ;;  %v2713_v19 = vmul.f32 0.5, %v3651_v40  ;;  %v2705_v59 = vmul.f32 0.5, %v3655_v42 }
 0x9aa   :  { %v2697_v33 = vadd.f32 %v2646_v53, %v7670_v25  ;;  %v2648_v45 = vpop.f32.mrb[78].mxu1  ;;  %v2689_v13 = vpop.f32.mrb[86].mxu0  ;;  %v2699_v30 = vadd.f32 %v2687_v0, %v7671_v21  ;;  %v2714_v22 = vadd.f32 0.5, %v2712_v27  ;;  %v2706_v25 = vadd.f32 0.5, %v2704_v11 }
 0x9ab   :  { %3656 = vtanh.f32 %v2696_v17  ;;  %v2649_v39 = vpop.f32.mrb[79].mxu1  ;;  %v2690_v37 = vpop.f32.mrb[87].mxu0  ;;  %v2718_v49 = vmul.f32 0.5, %v2698_v54  ;;  %v2715_v53 = vadd.f32 0.5, %v2713_v19  ;;  %v2707_v45 = vadd.f32 0.5, %v2705_v59  ;;  %v6293_v59 = vld [vmem:[#allocation4 + $0x20] sm:$0xff] }
 0x9ac   :  { %3658 = vtanh.f32 %v2697_v33  ;;  %v2719_v3 = vmul.f32 0.5, %v2699_v30  ;;  %v2726_v13 = vmul.f32 %v2714_v22, %v6001_v16  ;;  %v6296_v22 = vld [vmem:[#allocation4 + $0x30] sm:$0xff] }
 0x9ad   :  { %3660 = vtanh.f32 %v2718_v49  ;;  %v2727_v33 = vmul.f32 %v2715_v53, %v6003_v63  ;;  %v6299_v53 = vld [vmem:[#allocation4 + $0x68] sm:$0xff] }
 0x9ae   :  { %3662 = vtanh.f32 %v2719_v3 }
 0x9b5   :  { %v3657_v17 = vpop.eup %3656 }
 0x9b6   :  { %v3659_v0 = vpop.eup %3658  ;;  %v2728_v21 = vmul.f32 %v3657_v17, %v2706_v25  ;;  %v6302_v25 = vld [vmem:[#allocation4 + $0x78] sm:$0xff]  ;;  %v6305_v17 = vld [vmem:[#allocation4 + $0x60] sm:$0xff] }
 0x9b7   :  { %v2729_v39 = vmul.f32 %v3659_v0, %v2707_v45  ;;  %v3661_v30 = vpop.eup %3660  ;;  %v6308_v45 = vld [vmem:[#allocation4 + $0x70] sm:$0xff]  ;;  %v6311_v0 = vld [vmem:[#allocation4 + $0xa8] sm:$0xff] }
 0x9b8   :  { %v6283_v50 = vadd.f32 %v2728_v21, %v2726_v13  ;;  %v3663_v3 = vpop.eup %3662  ;;  %v2722_v11 = vmul.f32 0.5, %v3661_v30  ;;  %v6314_v13 = vld [vmem:[#allocation4 + $0xb8] sm:$0xff]  ;;  %v6317_v21 = vld [vmem:[#allocation4 + $0xa0] sm:$0xff] }
 0x9b9   :  { %v6285_v54 = vadd.f32 %v2729_v39, %v2727_v33  ;;  %v2723_v37 = vmul.f32 0.5, %v3663_v3  ;;  %v6320_v33 = vld [vmem:[#allocation4 + $0xb0] sm:$0xff]  ;;  %v6323_v39 = vld [vmem:[#allocation4 + $0xe8] sm:$0xff]  ;;  %v6326_v30 = vld [vmem:[#allocation4 + $0xf8] sm:$0xff] }
 0x9ba   :  { %3664 = vtanh.f32 %v6283_v50  ;;  %v2724_v40 = vadd.f32 0.5, %v2722_v11  ;;  %v6329_v3 = vld [vmem:[#allocation4 + $0xe0] sm:$0xff]  ;;  %v6332_v11 = vld [vmem:[#allocation4 + $0xf0] sm:$0xff] }
 0x9bb   :  { %3666 = vtanh.f32 %v6285_v54  ;;  %v2725_v42 = vadd.f32 0.5, %v2723_v37  ;;  %v6335_v37 = vld [vmem:[#allocation4 + $0x128] sm:$0xff] }
 0x9c4   :  { %v3665_v14 = vpop.eup %3664 }
 0x9c5   :  { %v3667_v16 = vpop.eup %3666  ;;  %v2734_v27 = vmul.f32 %v3665_v14, %v2724_v40  ;;  %v6338_v40 = vld [vmem:[#allocation4 + $0x138] sm:$0xff]  ;;  %v6341_v14 = vld [vmem:[#allocation4 + $0x120] sm:$0xff] }
 0x9c6   :  { %v2735_v49 = vmul.f32 %v3667_v16, %v2725_v42  ;;  %7672 = vst [vmem:[#allocation123_spill] sm:$0xff] %v6341_v14  ;;  %v6344_v42 = vld [vmem:[#allocation4 + $0x130] sm:$0xff]  ;;  %v6347_v16 = vld [vmem:[#allocation4 + $0x168] sm:$0xff] }
 0x9c7   :  { %v6289_v19 = vpack.c.bf16 %v2734_v27, %v2734_v27  ;;  %7673 = vst [vmem:[#allocation125_spill] sm:$0xff] %v6344_v42  ;;  %7674 = vst [vmem:[#allocation124_spill] sm:$0xff] %v6347_v16  ;;  %v6350_v27 = vld [vmem:[#allocation4 + $0x178] sm:$0xff] }
 0x9c8   :  { %v2745_v63 = vpack.c.bf16 %v2735_v49, %v2735_v49  ;;  %7675 = vst [vmem:[#allocation126_spill] sm:$0xff] %v6350_v27  ;;  %v6353_v49 = vld [vmem:[#allocation4 + $0x160] sm:$0xff] }
 0x9c9   :  { %7676 = vst [vmem:[#allocation127_spill] sm:$0xff] %v6353_v49 }
 0x9ca   :  { %2778 = vmatprep.mubr.bf16.mxu1 %v2745_v63  ;;  %2819 = vmatprep.mubr.bf16.mxu0 %v2745_v63 }
 0x9cb   :  { %2779 = vmatmul.mubr.bf16.vlgmr.msra.gmra.mrb[80].mxu1 %v6289_v19  ;;  %2820 = vmatmul.mubr.bf16.vlgmr.msra.gmra.mrb[88].mxu0 %v6289_v19 }
 0x9cc   :  { %2829 = vmatpush1.bf16.msra.mxu1 %v6293_v59  ;;  %2870 = vmatpush1.bf16.msra.mxu0 %v6296_v22 }
 0x9cd   :  { %2860 = vmatprep.mubr.bf16.mxu1 %v2745_v63  ;;  %2901 = vmatprep.mubr.bf16.mxu0 %v2745_v63  ;;  %v6356_v63 = vld [vmem:[#allocation4 + $0x170] sm:$0xff] }
 0x9ce   :  { %2830 = vmatprep.subr.bf16.mxu1 %v6299_v53  ;;  %2871 = vmatprep.subr.bf16.mxu0 %v6302_v25  ;;  %7677 = vst [vmem:[#allocation129_spill] sm:$0xff] %v6356_v63 }
 0x9d0   :  { %2831 = vmatpush1.bf16.msra.mxu1 %v6305_v17  ;;  %2872 = vmatpush1.bf16.msra.mxu0 %v6308_v45 }
 0x9d1   :  { %2832 = vmatprep.subr.bf16.mxu1 %v6311_v0  ;;  %2873 = vmatprep.subr.bf16.mxu0 %v6314_v13 }
 0x9d4   :  { %2833 = vmatpush1.bf16.msra.mxu1 %v6317_v21  ;;  %2874 = vmatpush1.bf16.msra.mxu0 %v6320_v33 }
 0x9d5   :  { %2834 = vmatprep.subr.bf16.mxu1 %v6323_v39  ;;  %2875 = vmatprep.subr.bf16.mxu0 %v6326_v30 }
 0x9d8   :  { %2835 = vmatpush1.bf16.msra.mxu1 %v6329_v3  ;;  %2876 = vmatpush1.bf16.msra.mxu0 %v6332_v11 }
 0x9d9   :  { %2836 = vmatprep.subr.bf16.mxu1 %v6335_v37  ;;  %2877 = vmatprep.subr.bf16.mxu0 %v6338_v40 }
 0x9dc   :  { %2837 = vmatpush1.bf16.msra.mxu1 %v6341_v14  ;;  %2878 = vmatpush1.bf16.msra.mxu0 %v6344_v42  ;;  %v6359_v14 = vld [vmem:[#allocation4 + $0x1a8] sm:$0xff]  ;;  %v6362_v42 = vld [vmem:[#allocation4 + $0x1b8] sm:$0xff] }
 0x9dd   :  { %2838 = vmatprep.subr.bf16.mxu1 %v6347_v16  ;;  %2879 = vmatprep.subr.bf16.mxu0 %v6350_v27  ;;  %7678 = vst [vmem:[#allocation128_spill] sm:$0xff] %v6359_v14  ;;  %7679 = vst [vmem:[#allocation130_spill] sm:$0xff] %v6362_v42  ;;  %v6365_v16 = vld [vmem:[#allocation4 + $0x1a0] sm:$0xff]  ;;  %v6368_v27 = vld [vmem:[#allocation4 + $0x1b0] sm:$0xff] }
 0x9de   :  { %7680 = vst [vmem:[#allocation148_spill] sm:$0xff] %v6365_v16  ;;  %7681 = vst [vmem:[#allocation150_spill] sm:$0xff] %v6368_v27 }
 0x9e0   :  { %2839 = vmatpush1.bf16.msra.mxu1 %v6353_v49  ;;  %2880 = vmatpush1.bf16.msra.mxu0 %v6356_v63  ;;  %v6371_v49 = vld [vmem:[#allocation4 + $0x1e8] sm:$0xff]  ;;  %v6374_v63 = vld [vmem:[#allocation4 + $0x1f8] sm:$0xff] }
 0x9e1   :  { %2840 = vmatprep.subr.bf16.mxu1 %v6359_v14  ;;  %2881 = vmatprep.subr.bf16.mxu0 %v6362_v42  ;;  %7682 = vst [vmem:[#allocation151_spill] sm:$0xff] %v6371_v49  ;;  %7683 = vst [vmem:[#allocation153_spill] sm:$0xff] %v6374_v63  ;;  %v6377_v14 = vld [vmem:[#allocation4 + $0x1e0] sm:$0xff]  ;;  %v6380_v42 = vld [vmem:[#allocation4 + $0x1f0] sm:$0xff] }
 0x9e2   :  { %7684 = vst [vmem:[#allocation152_spill] sm:$0xff] %v6377_v14  ;;  %7685 = vst [vmem:[#allocation154_spill] sm:$0xff] %v6380_v42 }
 0x9e4   :  { %2841 = vmatpush1.bf16.msra.mxu1 %v6365_v16  ;;  %2882 = vmatpush1.bf16.msra.mxu0 %v6368_v27  ;;  %v6383_v16 = vld [vmem:[#allocation4 + $0x228] sm:$0xff]  ;;  %v6386_v27 = vld [vmem:[#allocation4 + $0x238] sm:$0xff] }
 0x9e5   :  { %2842 = vmatprep.subr.bf16.mxu1 %v6371_v49  ;;  %2883 = vmatprep.subr.bf16.mxu0 %v6374_v63  ;;  %7686 = vst [vmem:[#allocation155_spill] sm:$0xff] %v6383_v16  ;;  %7687 = vst [vmem:[#allocation157_spill] sm:$0xff] %v6386_v27  ;;  %v6389_v49 = vld [vmem:[#allocation4 + $0x220] sm:$0xff]  ;;  %v6392_v63 = vld [vmem:[#allocation4 + $0x230] sm:$0xff] }
 0x9e6   :  { %7688 = vst [vmem:[#allocation156_spill] sm:$0xff] %v6389_v49  ;;  %7689 = vst [vmem:[#allocation158_spill] sm:$0xff] %v6392_v63 }
 0x9e8   :  { %2843 = vmatpush1.bf16.msra.mxu1 %v6377_v14  ;;  %2884 = vmatpush1.bf16.msra.mxu0 %v6380_v42  ;;  %v6395_v14 = vld [vmem:[#allocation4 + $0x268] sm:$0xff]  ;;  %v6398_v42 = vld [vmem:[#allocation4 + $0x278] sm:$0xff] }
 0x9e9   :  { %2844 = vmatprep.subr.bf16.mxu1 %v6383_v16  ;;  %2885 = vmatprep.subr.bf16.mxu0 %v6386_v27  ;;  %7690 = vst [vmem:[#allocation159_spill] sm:$0xff] %v6395_v14  ;;  %7691 = vst [vmem:[#allocation35_spill] sm:$0xff] %v6398_v42  ;;  %v6401_v16 = vld [vmem:[#allocation4 + $0x260] sm:$0xff]  ;;  %v6404_v27 = vld [vmem:[#allocation4 + $0x270] sm:$0xff] }
 0x9ea   :  { %7692 = vst [vmem:[#allocation37_spill] sm:$0xff] %v6401_v16  ;;  %7693 = vst [vmem:[#allocation34_spill] sm:$0xff] %v6404_v27 }
 0x9ec   :  { %2845 = vmatpush1.bf16.msra.mxu1 %v6389_v49  ;;  %2886 = vmatpush1.bf16.msra.mxu0 %v6392_v63  ;;  %v6407_v49 = vld [vmem:[#allocation4 + $0x2a8] sm:$0xff]  ;;  %v6410_v63 = vld [vmem:[#allocation4 + $0x2b8] sm:$0xff] }
 0x9ed   :  { %2846 = vmatprep.subr.bf16.mxu1 %v6395_v14  ;;  %2887 = vmatprep.subr.bf16.mxu0 %v6398_v42  ;;  %7694 = vst [vmem:[#allocation36_spill] sm:$0xff] %v6407_v49  ;;  %7695 = vst [vmem:[#allocation66_spill] sm:$0xff] %v6410_v63  ;;  %v6413_v14 = vld [vmem:[#allocation4 + $0x2a0] sm:$0xff]  ;;  %v6416_v42 = vld [vmem:[#allocation4 + $0x2b0] sm:$0xff] }
 0x9ee   :  { %7696 = vst [vmem:[#allocation68_spill] sm:$0xff] %v6413_v14  ;;  %7697 = vst [vmem:[#allocation67_spill] sm:$0xff] %v6416_v42 }
 0x9f0   :  { %2847 = vmatpush1.bf16.msra.mxu1 %v6401_v16  ;;  %2888 = vmatpush1.bf16.msra.mxu0 %v6404_v27  ;;  %v6419_v16 = vld [vmem:[#allocation4 + $0x2e8] sm:$0xff]  ;;  %v6422_v27 = vld [vmem:[#allocation4 + $0x2f8] sm:$0xff] }
 0x9f1   :  { %2848 = vmatprep.subr.bf16.mxu1 %v6407_v49  ;;  %2889 = vmatprep.subr.bf16.mxu0 %v6410_v63  ;;  %7698 = vst [vmem:[#allocation69_spill] sm:$0xff] %v6419_v16  ;;  %7699 = vst [vmem:[#allocation131_spill] sm:$0xff] %v6422_v27  ;;  %v6425_v49 = vld [vmem:[#allocation4 + $0x2e0] sm:$0xff]  ;;  %v6428_v63 = vld [vmem:[#allocation4 + $0x2f0] sm:$0xff] }
 0x9f2   :  { %7700 = vst [vmem:[#allocation133_spill] sm:$0xff] %v6425_v49  ;;  %7701 = vst [vmem:[#allocation132_spill] sm:$0xff] %v6428_v63 }
 0x9f4   :  { %2849 = vmatpush1.bf16.msra.mxu1 %v6413_v14  ;;  %2890 = vmatpush1.bf16.msra.mxu0 %v6416_v42  ;;  %v6431_v14 = vld [vmem:[#allocation4 + $0x328] sm:$0xff]  ;;  %v6434_v42 = vld [vmem:[#allocation4 + $0x338] sm:$0xff] }
 0x9f5   :  { %2850 = vmatprep.subr.bf16.mxu1 %v6419_v16  ;;  %2891 = vmatprep.subr.bf16.mxu0 %v6422_v27  ;;  %7702 = vst [vmem:[#allocation134_spill] sm:$0xff] %v6431_v14  ;;  %7703 = vst [vmem:[#allocation135_spill] sm:$0xff] %v6434_v42  ;;  %v6437_v16 = vld [vmem:[#allocation4 + $0x320] sm:$0xff]  ;;  %v6440_v27 = vld [vmem:[#allocation4 + $0x330] sm:$0xff] }
 0x9f6   :  { %7704 = vst [vmem:[#allocation137_spill] sm:$0xff] %v6437_v16  ;;  %7705 = vst [vmem:[#allocation136_spill] sm:$0xff] %v6440_v27 }
 0x9f8   :  { %2851 = vmatpush1.bf16.msra.mxu1 %v6425_v49  ;;  %2892 = vmatpush1.bf16.msra.mxu0 %v6428_v63  ;;  %v6443_v49 = vld [vmem:[#allocation4 + $0x368] sm:$0xff]  ;;  %v6446_v63 = vld [vmem:[#allocation4 + $0x378] sm:$0xff] }
 0x9f9   :  { %2852 = vmatprep.subr.bf16.mxu1 %v6431_v14  ;;  %2893 = vmatprep.subr.bf16.mxu0 %v6434_v42  ;;  %7706 = vst [vmem:[#allocation138_spill] sm:$0xff] %v6443_v49  ;;  %7707 = vst [vmem:[#allocation173_spill] sm:$0xff] %v6446_v63  ;;  %v6449_v14 = vld [vmem:[#allocation4 + $0x360] sm:$0xff]  ;;  %v6452_v42 = vld [vmem:[#allocation4 + $0x370] sm:$0xff] }
 0x9fa   :  { %7708 = vst [vmem:[#allocation172_spill] sm:$0xff] %v6449_v14  ;;  %7709 = vst [vmem:[#allocation175_spill] sm:$0xff] %v6452_v42 }
 0x9fc   :  { %2853 = vmatpush1.bf16.msra.mxu1 %v6437_v16  ;;  %2894 = vmatpush1.bf16.msra.mxu0 %v6440_v27  ;;  %v6455_v16 = vld [vmem:[#allocation4 + $0x3a8] sm:$0xff]  ;;  %v6458_v27 = vld [vmem:[#allocation4 + $0x3b8] sm:$0xff] }
 0x9fd   :  { %2854 = vmatprep.subr.bf16.mxu1 %v6443_v49  ;;  %2895 = vmatprep.subr.bf16.mxu0 %v6446_v63  ;;  %7710 = vst [vmem:[#allocation177_spill] sm:$0xff] %v6455_v16  ;;  %7711 = vst [vmem:[#allocation176_spill] sm:$0xff] %v6458_v27  ;;  %v6461_v49 = vld [vmem:[#allocation4 + $0x3a0] sm:$0xff]  ;;  %v6464_v63 = vld [vmem:[#allocation4 + $0x3b0] sm:$0xff] }
 0xa00   :  { %2855 = vmatpush1.bf16.msra.mxu1 %v6449_v14  ;;  %2896 = vmatpush1.bf16.msra.mxu0 %v6452_v42  ;;  %v6467_v14 = vld [vmem:[#allocation4 + $0x3e8] sm:$0xff]  ;;  %v6470_v42 = vld [vmem:[#allocation4 + $0x3f8] sm:$0xff] }
 0xa01   :  { %2856 = vmatprep.subr.bf16.mxu1 %v6455_v16  ;;  %2897 = vmatprep.subr.bf16.mxu0 %v6458_v27  ;;  %v6473_v16 = vld [vmem:[#allocation4 + $0x3e0] sm:$0xff]  ;;  %v6476_v27 = vld [vmem:[#allocation4 + $0x3f0] sm:$0xff] }
 0xa04   :  { %2857 = vmatpush1.bf16.msra.mxu1 %v6461_v49  ;;  %2898 = vmatpush1.bf16.msra.mxu0 %v6464_v63 }
 0xa05   :  { %2858 = vmatprep.subr.bf16.mxu1 %v6467_v14  ;;  %2899 = vmatprep.subr.bf16.mxu0 %v6470_v42 }
 0xa08   :  { %2859 = vmatpush1.bf16.msra.mxu1 %v6473_v16  ;;  %2900 = vmatpush1.bf16.msra.mxu0 %v6476_v27 }
 0xa09   :  { %2964 = vmatprep.subr.bf16.mxu1 %v6073_v2  ;;  %3005 = vmatprep.subr.bf16.mxu0 %v6076_v8  ;;  %v7712_v2 = vld [vmem:[#allocation164_spill] sm:$0xff]  ;;  %v7713_v8 = vld [vmem:[#allocation166_spill] sm:$0xff] }
 0xa0b   :  { %2861 = vmatmul.mubr.bf16.vlgmr.msra.gmra.mrb[84].mxu1 %v6289_v19  ;;  %2902 = vmatmul.mubr.bf16.vlgmr.msra.gmra.mrb[92].mxu0 %v6289_v19  ;;  %v7741_v19 = vld [vmem:[#allocation58_spill] sm:$0xff] }
 0xa0c   :  { %2965 = vmatpush1.bf16.msra.mxu1 %v6081_v9  ;;  %3006 = vmatpush1.bf16.msra.mxu0 %v6084_v47  ;;  %v7714_v9 = vld [vmem:[#allocation167_spill] sm:$0xff]  ;;  %v7715_v47 = vld [vmem:[#allocation169_spill] sm:$0xff] }
 0xa0d   :  { %2966 = vmatprep.subr.bf16.mxu1 %v6087_v55  ;;  %3007 = vmatprep.subr.bf16.mxu0 %v6090_v38  ;;  %v7716_v55 = vld [vmem:[#allocation168_spill] sm:$0xff]  ;;  %v7717_v38 = vld [vmem:[#allocation170_spill] sm:$0xff] }
 0xa10   :  { %2967 = vmatpush1.bf16.msra.mxu1 %v6093_v62  ;;  %3008 = vmatpush1.bf16.msra.mxu0 %v6096_v12  ;;  %v7718_v62 = vld [vmem:[#allocation171_spill] sm:$0xff]  ;;  %v7719_v12 = vld [vmem:[#allocation174_spill] sm:$0xff] }
 0xa11   :  { %2968 = vmatprep.subr.bf16.mxu1 %v6099_v41  ;;  %3009 = vmatprep.subr.bf16.mxu0 %v6102_v52  ;;  %v7720_v41 = vld [vmem:[#allocation43_spill] sm:$0xff]  ;;  %v7721_v52 = vld [vmem:[#allocation45_spill] sm:$0xff] }
 0xa14   :  { %2969 = vmatpush1.bf16.msra.mxu1 %v6105_v58  ;;  %3010 = vmatpush1.bf16.msra.mxu0 %v6108_v31  ;;  %v7722_v58 = vld [vmem:[#allocation42_spill] sm:$0xff]  ;;  %v7723_v31 = vld [vmem:[#allocation44_spill] sm:$0xff] }
 0xa15   :  { %2970 = vmatprep.subr.bf16.mxu1 %v6111_v18  ;;  %3011 = vmatprep.subr.bf16.mxu0 %v6114_v51  ;;  %v7724_v18 = vld [vmem:[#allocation74_spill] sm:$0xff]  ;;  %v7725_v51 = vld [vmem:[#allocation75_spill] sm:$0xff] }
 0xa18   :  { %2971 = vmatpush1.bf16.msra.mxu1 %v6117_v4  ;;  %3012 = vmatpush1.bf16.msra.mxu0 %v6120_v6  ;;  %v7726_v4 = vld [vmem:[#allocation76_spill] sm:$0xff]  ;;  %v7727_v6 = vld [vmem:[#allocation77_spill] sm:$0xff] }
 0xa19   :  { %2972 = vmatprep.subr.bf16.mxu1 %v6123_v44  ;;  %3013 = vmatprep.subr.bf16.mxu0 %v6126_v60  ;;  %v7728_v44 = vld [vmem:[#allocation47_spill] sm:$0xff]  ;;  %v7729_v60 = vld [vmem:[#allocation49_spill] sm:$0xff] }
 0xa1c   :  { %2973 = vmatpush1.bf16.msra.mxu1 %v6129_v29  ;;  %3014 = vmatpush1.bf16.msra.mxu0 %v6132_v48  ;;  %v7730_v29 = vld [vmem:[#allocation46_spill] sm:$0xff]  ;;  %v7731_v48 = vld [vmem:[#allocation48_spill] sm:$0xff] }
 0xa1d   :  { %2974 = vmatprep.subr.bf16.mxu1 %v6135_v7  ;;  %3015 = vmatprep.subr.bf16.mxu0 %v6138_v43  ;;  %v7732_v7 = vld [vmem:[#allocation78_spill] sm:$0xff]  ;;  %v7733_v43 = vld [vmem:[#allocation79_spill] sm:$0xff] }
 0xa20   :  { %2975 = vmatpush1.bf16.msra.mxu1 %v6141_v56  ;;  %3016 = vmatpush1.bf16.msra.mxu0 %v6144_v46  ;;  %v7734_v56 = vld [vmem:[#allocation80_spill] sm:$0xff]  ;;  %v7735_v46 = vld [vmem:[#allocation81_spill] sm:$0xff] }
 0xa21   :  { %2976 = vmatprep.subr.bf16.mxu1 %v6147_v57  ;;  %3017 = vmatprep.subr.bf16.mxu0 %v6150_v36  ;;  %v7736_v57 = vld [vmem:[#allocation121_spill] sm:$0xff]  ;;  %v7737_v36 = vld [vmem:[#allocation120_spill] sm:$0xff] }
 0xa24   :  { %2977 = vmatpush1.bf16.msra.mxu1 %v6153_v26  ;;  %3018 = vmatpush1.bf16.msra.mxu0 %v6156_v61  ;;  %v7738_v26 = vld [vmem:[#allocation122_spill] sm:$0xff] }
 0xa25   :  { %2978 = vmatprep.subr.bf16.mxu1 %v6159_v32  ;;  %3019 = vmatprep.subr.bf16.mxu0 %v6162_v24 }
 0xa28   :  { %2979 = vmatpush1.bf16.msra.mxu1 %v6165_v10  ;;  %3020 = vmatpush1.bf16.msra.mxu0 %v6168_v1 }
 0xa29   :  { %2980 = vmatprep.subr.bf16.mxu1 %v6171_v15  ;;  %3021 = vmatprep.subr.bf16.mxu0 %v6174_v34 }
 0xa2c   :  { %2981 = vmatpush1.bf16.msra.mxu1 %v6177_v20  ;;  %3022 = vmatpush1.bf16.msra.mxu0 %v6180_v23  ;;  %v7739_v23 = vld [vmem:[#allocation59_spill] sm:$0xff] }
 0xa2d   :  { %2982 = vmatprep.subr.bf16.mxu1 %v6183_v35  ;;  %3023 = vmatprep.subr.bf16.mxu0 %v6186_v5  ;;  %v7740_v5 = vld [vmem:[#allocation61_spill] sm:$0xff] }
 0xa30   :  { %2983 = vmatpush1.bf16.msra.mxu1 %v6189_v28  ;;  %3024 = vmatpush1.bf16.msra.mxu0 %v7712_v2 }
 0xa31   :  { %2984 = vmatprep.subr.bf16.mxu1 %v7713_v8  ;;  %3025 = vmatprep.subr.bf16.mxu0 %v7714_v9  ;;  %v7742_v8 = vld [vmem:[#allocation60_spill] sm:$0xff] }
 0xa34   :  { %2985 = vmatpush1.bf16.msra.mxu1 %v7715_v47  ;;  %3026 = vmatpush1.bf16.msra.mxu0 %v7716_v55 }
 0xa35   :  { %2986 = vmatprep.subr.bf16.mxu1 %v7717_v38  ;;  %3027 = vmatprep.subr.bf16.mxu0 %v7718_v62 }
 0xa38   :  { %2987 = vmatpush1.bf16.msra.mxu1 %v7719_v12  ;;  %3028 = vmatpush1.bf16.msra.mxu0 %v7720_v41 }
 0xa39   :  { %2988 = vmatprep.subr.bf16.mxu1 %v7721_v52  ;;  %3029 = vmatprep.subr.bf16.mxu0 %v7722_v58  ;;  %v7743_v52 = vld [vmem:[#allocation90_spill] sm:$0xff] }
 0xa3c   :  { %2989 = vmatpush1.bf16.msra.mxu1 %v7723_v31  ;;  %3030 = vmatpush1.bf16.msra.mxu0 %v7724_v18 }
 0xa3d   :  { %2990 = vmatprep.subr.bf16.mxu1 %v7725_v51  ;;  %3031 = vmatprep.subr.bf16.mxu0 %v7726_v4  ;;  %v7744_v51 = vld [vmem:[#allocation91_spill] sm:$0xff] }
 0xa40   :  { %2991 = vmatpush1.bf16.msra.mxu1 %v7727_v6  ;;  %3032 = vmatpush1.bf16.msra.mxu0 %v7728_v44  ;;  %v7745_v6 = vld [vmem:[#allocation92_spill] sm:$0xff] }
 0xa41   :  { %2992 = vmatprep.subr.bf16.mxu1 %v7729_v60  ;;  %3033 = vmatprep.subr.bf16.mxu0 %v7730_v29 }
 0xa44   :  { %2993 = vmatpush1.bf16.msra.mxu1 %v7731_v48  ;;  %3034 = vmatpush1.bf16.msra.mxu0 %v7732_v7  ;;  %v7746_v7 = vld [vmem:[#allocation93_spill] sm:$0xff] }
 0xa45   :  { %2994 = vmatprep.subr.bf16.mxu1 %v7733_v43  ;;  %3035 = vmatprep.subr.bf16.mxu0 %v7734_v56 }
 0xa48   :  { %2995 = vmatpush1.bf16.msra.mxu1 %v7735_v46  ;;  %3036 = vmatpush1.bf16.msra.mxu0 %v7736_v57 }
 0xa49   :  { %3046 = vmatprep.subr.bf16.mxu1 %v7737_v36  ;;  %3087 = vmatprep.subr.bf16.mxu0 %v7738_v26 }
 0xa9e   :  { %v2780_v61 = vpop.f32.mrb[80].mxu1  ;;  %v2821_v32 = vpop.f32.mrb[88].mxu0 }
 0xa9f   :  { %v2782_v24 = vpop.f32.mrb[81].mxu1  ;;  %v2823_v10 = vpop.f32.mrb[89].mxu0  ;;  %v2912_v35 = vadd.f32 %v2821_v32, %v7739_v23  ;;  %v2910_v2 = vadd.f32 %v2780_v61, %v7741_v19 }
 0xaa0   :  { %v2784_v1 = vpop.f32.mrb[82].mxu1  ;;  %v2825_v15 = vpop.f32.mrb[90].mxu0  ;;  %v2913_v28 = vadd.f32 %v2823_v10, %v7740_v5  ;;  %v2911_v9 = vadd.f32 %v2782_v24, %v7742_v8 }
 0xaa1   :  { %v2785_v34 = vpop.f32.mrb[83].mxu1  ;;  %v2826_v20 = vpop.f32.mrb[91].mxu0  ;;  %v2926_v47 = vmul.f32 0.5, %v2912_v35  ;;  %v2918_v38 = vmul.f32 0.5, %v2910_v2 }
 0xaa2   :  { %v2927_v55 = vmul.f32 0.5, %v2913_v28  ;;  %v2919_v62 = vmul.f32 0.5, %v2911_v9 }
 0xaa3   :  { %3668 = vtanh.f32 %v2926_v47 }
 0xaa4   :  { %3670 = vtanh.f32 %v2927_v55 }
 0xaa5   :  { %3672 = vtanh.f32 %v2918_v38 }
 0xaa6   :  { %3674 = vtanh.f32 %v2919_v62 }
 0xaad   :  { %v3669_v48 = vpop.eup %3668 }
 0xaae   :  { %v3671_v57 = vpop.eup %3670  ;;  %v2930_v61 = vmul.f32 0.5, %v3669_v48  ;;  %v7767_v48 = vld [vmem:[#allocation37_spill] sm:$0xff] }
 0xaaf   :  { %v3673_v36 = vpop.eup %3672  ;;  %v2931_v24 = vmul.f32 0.5, %v3671_v57  ;;  %v7772_v57 = vld [vmem:[#allocation67_spill] sm:$0xff] }
 0xab0   :  { %v3675_v26 = vpop.eup %3674  ;;  %v2922_v1 = vmul.f32 0.5, %v3673_v36  ;;  %v2932_v34 = vadd.f32 0.5, %v2930_v61  ;;  %v7773_v36 = vld [vmem:[#allocation69_spill] sm:$0xff] }
 0xab1   :  { %v2923_v15 = vmul.f32 0.5, %v3675_v26  ;;  %v2933_v20 = vadd.f32 0.5, %v2931_v24  ;;  %v7774_v26 = vld [vmem:[#allocation131_spill] sm:$0xff]  ;;  %v7775_v61 = vld [vmem:[#allocation133_spill] sm:$0xff]  ;;  %v7777_v24 = vld [vmem:[#allocation134_spill] sm:$0xff] }
 0xab2   :  { %v2924_v23 = vadd.f32 0.5, %v2922_v1  ;;  %v2944_v19 = vmul.f32 %v2932_v34, %v6283_v50  ;;  %v7779_v1 = vld [vmem:[#allocation137_spill] sm:$0xff]  ;;  %v7781_v34 = vld [vmem:[#allocation138_spill] sm:$0xff] }
 0xab3   :  { %v2925_v5 = vadd.f32 0.5, %v2923_v15  ;;  %v2945_v8 = vmul.f32 %v2933_v20, %v6285_v54  ;;  %v7780_v15 = vld [vmem:[#allocation136_spill] sm:$0xff]  ;;  %v7782_v20 = vld [vmem:[#allocation173_spill] sm:$0xff] }
 0xade   :  { %v2862_v12 = vpop.f32.mrb[84].mxu1  ;;  %v2903_v41 = vpop.f32.mrb[92].mxu0 }
 0xadf   :  { %v2914_v58 = vadd.f32 %v2862_v12, %v7743_v52  ;;  %v2864_v31 = vpop.f32.mrb[85].mxu1  ;;  %v2905_v18 = vpop.f32.mrb[93].mxu0  ;;  %v2916_v4 = vadd.f32 %v2903_v41, %v7744_v51 }
 0xae0   :  { %v2915_v44 = vadd.f32 %v2864_v31, %v7745_v6  ;;  %v2866_v60 = vpop.f32.mrb[86].mxu1  ;;  %v2907_v29 = vpop.f32.mrb[94].mxu0  ;;  %v2917_v43 = vadd.f32 %v2905_v18, %v7746_v7  ;;  %v7763_v6 = vld [vmem:[#allocation156_spill] sm:$0xff]  ;;  %v7768_v7 = vld [vmem:[#allocation34_spill] sm:$0xff] }
 0xae1   :  { %3676 = vtanh.f32 %v2914_v58  ;;  %v2867_v56 = vpop.f32.mrb[87].mxu1  ;;  %v2908_v46 = vpop.f32.mrb[95].mxu0  ;;  %v2936_v32 = vmul.f32 0.5, %v2916_v4  ;;  %v7765_v60 = vld [vmem:[#allocation159_spill] sm:$0xff] }
 0xae2   :  { %3678 = vtanh.f32 %v2915_v44  ;;  %v2937_v10 = vmul.f32 0.5, %v2917_v43  ;;  %v7764_v44 = vld [vmem:[#allocation158_spill] sm:$0xff]  ;;  %v7766_v29 = vld [vmem:[#allocation35_spill] sm:$0xff]  ;;  %v7769_v43 = vld [vmem:[#allocation36_spill] sm:$0xff] }
 0xae3   :  { %3680 = vtanh.f32 %v2936_v32  ;;  %v7770_v56 = vld [vmem:[#allocation66_spill] sm:$0xff]  ;;  %v7771_v46 = vld [vmem:[#allocation68_spill] sm:$0xff] }
 0xae4   :  { %3682 = vtanh.f32 %v2937_v10  ;;  %v7776_v32 = vld [vmem:[#allocation132_spill] sm:$0xff]  ;;  %v7778_v10 = vld [vmem:[#allocation135_spill] sm:$0xff] }
 0xaeb   :  { %v3677_v35 = vpop.eup %3676 }
 0xaec   :  { %v3679_v28 = vpop.eup %3678  ;;  %v2946_v2 = vmul.f32 %v3677_v35, %v2924_v23  ;;  %v7783_v23 = vld [vmem:[#allocation172_spill] sm:$0xff]  ;;  %v7784_v35 = vld [vmem:[#allocation175_spill] sm:$0xff] }
 0xaed   :  { %v2947_v9 = vmul.f32 %v3679_v28, %v2925_v5  ;;  %v3681_v38 = vpop.eup %3680  ;;  %v7785_v5 = vld [vmem:[#allocation177_spill] sm:$0xff]  ;;  %v7786_v28 = vld [vmem:[#allocation176_spill] sm:$0xff] }
 0xaee   :  { %v6557_v47 = vadd.f32 %v2946_v2, %v2944_v19  ;;  %v3683_v62 = vpop.eup %3682  ;;  %v2940_v12 = vmul.f32 0.5, %v3681_v38 }
 0xaef   :  { %v6559_v55 = vadd.f32 %v2947_v9, %v2945_v8  ;;  %v2941_v41 = vmul.f32 0.5, %v3683_v62 }
 0xaf0   :  { %3684 = vtanh.f32 %v6557_v47  ;;  %v2942_v52 = vadd.f32 0.5, %v2940_v12  ;;  %v7787_v12 = vld [vmem:[#allocation63_spill] sm:$0xff] }
 0xaf1   :  { %3686 = vtanh.f32 %v6559_v55  ;;  %v2943_v31 = vadd.f32 0.5, %v2941_v41  ;;  %v7788_v41 = vld [vmem:[#allocation65_spill] sm:$0xff] }
 0xafa   :  { %v3685_v58 = vpop.eup %3684 }
 0xafb   :  { %v3687_v50 = vpop.eup %3686  ;;  %v2952_v18 = vmul.f32 %v3685_v58, %v2942_v52  ;;  %v7789_v52 = vld [vmem:[#allocation62_spill] sm:$0xff]  ;;  %v7790_v58 = vld [vmem:[#allocation64_spill] sm:$0xff] }
 0xafc   :  { %v2953_v51 = vmul.f32 %v3687_v50, %v2943_v31 }
 0xafd   :  { %v6563_v4 = vpack.c.bf16 %v2952_v18, %v2952_v18 }
 0xafe   :  { %v2963_v54 = vpack.c.bf16 %v2953_v51, %v2953_v51 }
 0xb00   :  { %2996 = vmatprep.mubr.bf16.mxu1 %v2963_v54  ;;  %3037 = vmatprep.mubr.bf16.mxu0 %v2963_v54 }
 0xb01   :  { %2997 = vmatmul.mubr.bf16.vlgmr.msra.gmra.mrb[88].mxu1 %v6563_v4  ;;  %3038 = vmatmul.mubr.bf16.vlgmr.msra.gmra.mrb[96].mxu0 %v6563_v4 }
 0xb02   :  { %3047 = vmatpush1.bf16.msra.mxu1 %v6293_v59  ;;  %3088 = vmatpush1.bf16.msra.mxu0 %v6296_v22  ;;  %v7747_v59 = vld [vmem:[#allocation123_spill] sm:$0xff]  ;;  %v7748_v22 = vld [vmem:[#allocation125_spill] sm:$0xff] }
 0xb03   :  { %3078 = vmatprep.mubr.bf16.mxu1 %v2963_v54  ;;  %3119 = vmatprep.mubr.bf16.mxu0 %v2963_v54 }
 0xb04   :  { %3048 = vmatprep.subr.bf16.mxu1 %v6299_v53  ;;  %3089 = vmatprep.subr.bf16.mxu0 %v6302_v25  ;;  %v7749_v53 = vld [vmem:[#allocation124_spill] sm:$0xff]  ;;  %v7750_v25 = vld [vmem:[#allocation126_spill] sm:$0xff] }
 0xb06   :  { %3049 = vmatpush1.bf16.msra.mxu1 %v6305_v17  ;;  %3090 = vmatpush1.bf16.msra.mxu0 %v6308_v45  ;;  %v7751_v17 = vld [vmem:[#allocation127_spill] sm:$0xff]  ;;  %v7752_v45 = vld [vmem:[#allocation129_spill] sm:$0xff] }
 0xb07   :  { %3050 = vmatprep.subr.bf16.mxu1 %v6311_v0  ;;  %3091 = vmatprep.subr.bf16.mxu0 %v6314_v13  ;;  %v7753_v0 = vld [vmem:[#allocation128_spill] sm:$0xff]  ;;  %v7754_v13 = vld [vmem:[#allocation130_spill] sm:$0xff] }
 0xb0a   :  { %3051 = vmatpush1.bf16.msra.mxu1 %v6317_v21  ;;  %3092 = vmatpush1.bf16.msra.mxu0 %v6320_v33  ;;  %v7755_v21 = vld [vmem:[#allocation148_spill] sm:$0xff]  ;;  %v7756_v33 = vld [vmem:[#allocation150_spill] sm:$0xff] }
 0xb0b   :  { %3052 = vmatprep.subr.bf16.mxu1 %v6323_v39  ;;  %3093 = vmatprep.subr.bf16.mxu0 %v6326_v30  ;;  %v7757_v39 = vld [vmem:[#allocation151_spill] sm:$0xff]  ;;  %v7758_v30 = vld [vmem:[#allocation153_spill] sm:$0xff] }
 0xb0e   :  { %3053 = vmatpush1.bf16.msra.mxu1 %v6329_v3  ;;  %3094 = vmatpush1.bf16.msra.mxu0 %v6332_v11  ;;  %v7759_v3 = vld [vmem:[#allocation152_spill] sm:$0xff]  ;;  %v7760_v11 = vld [vmem:[#allocation154_spill] sm:$0xff] }
 0xb0f   :  { %3054 = vmatprep.subr.bf16.mxu1 %v6335_v37  ;;  %3095 = vmatprep.subr.bf16.mxu0 %v6338_v40  ;;  %v7761_v37 = vld [vmem:[#allocation155_spill] sm:$0xff]  ;;  %v7762_v40 = vld [vmem:[#allocation157_spill] sm:$0xff] }
 0xb12   :  { %3055 = vmatpush1.bf16.msra.mxu1 %v7747_v59  ;;  %3096 = vmatpush1.bf16.msra.mxu0 %v7748_v22  ;;  %v7791_v59 = vld [vmem:[#allocation94_spill] sm:$0xff] }
 0xb13   :  { %3056 = vmatprep.subr.bf16.mxu1 %v7749_v53  ;;  %3097 = vmatprep.subr.bf16.mxu0 %v7750_v25 }
 0xb16   :  { %3057 = vmatpush1.bf16.msra.mxu1 %v7751_v17  ;;  %3098 = vmatpush1.bf16.msra.mxu0 %v7752_v45  ;;  %v7792_v17 = vld [vmem:[#allocation95_spill] sm:$0xff] }
 0xb17   :  { %3058 = vmatprep.subr.bf16.mxu1 %v7753_v0  ;;  %3099 = vmatprep.subr.bf16.mxu0 %v7754_v13  ;;  %v7793_v0 = vld [vmem:[#allocation96_spill] sm:$0xff] }
 0xb1a   :  { %3059 = vmatpush1.bf16.msra.mxu1 %v7755_v21  ;;  %3100 = vmatpush1.bf16.msra.mxu0 %v7756_v33 }
 0xb1b   :  { %3060 = vmatprep.subr.bf16.mxu1 %v7757_v39  ;;  %3101 = vmatprep.subr.bf16.mxu0 %v7758_v30  ;;  %v7794_v30 = vld [vmem:[#allocation97_spill] sm:$0xff] }
 0xb1e   :  { %3061 = vmatpush1.bf16.msra.mxu1 %v7759_v3  ;;  %3102 = vmatpush1.bf16.msra.mxu0 %v7760_v11 }
 0xb1f   :  { %3062 = vmatprep.subr.bf16.mxu1 %v7761_v37  ;;  %3103 = vmatprep.subr.bf16.mxu0 %v7762_v40 }
 0xb22   :  { %3063 = vmatpush1.bf16.msra.mxu1 %v7763_v6  ;;  %3104 = vmatpush1.bf16.msra.mxu0 %v7764_v44 }
 0xb23   :  { %3064 = vmatprep.subr.bf16.mxu1 %v7765_v60  ;;  %3105 = vmatprep.subr.bf16.mxu0 %v7766_v29 }
 0xb26   :  { %3065 = vmatpush1.bf16.msra.mxu1 %v7767_v48  ;;  %3106 = vmatpush1.bf16.msra.mxu0 %v7768_v7 }
 0xb27   :  { %3066 = vmatprep.subr.bf16.mxu1 %v7769_v43  ;;  %3107 = vmatprep.subr.bf16.mxu0 %v7770_v56 }
 0xb2a   :  { %3067 = vmatpush1.bf16.msra.mxu1 %v7771_v46  ;;  %3108 = vmatpush1.bf16.msra.mxu0 %v7772_v57 }
 0xb2b   :  { %3068 = vmatprep.subr.bf16.mxu1 %v7773_v36  ;;  %3109 = vmatprep.subr.bf16.mxu0 %v7774_v26 }
 0xb2e   :  { %3069 = vmatpush1.bf16.msra.mxu1 %v7775_v61  ;;  %3110 = vmatpush1.bf16.msra.mxu0 %v7776_v32 }
 0xb2f   :  { %3070 = vmatprep.subr.bf16.mxu1 %v7777_v24  ;;  %3111 = vmatprep.subr.bf16.mxu0 %v7778_v10 }
 0xb32   :  { %3071 = vmatpush1.bf16.msra.mxu1 %v7779_v1  ;;  %3112 = vmatpush1.bf16.msra.mxu0 %v7780_v15 }
 0xb33   :  { %3072 = vmatprep.subr.bf16.mxu1 %v7781_v34  ;;  %3113 = vmatprep.subr.bf16.mxu0 %v7782_v20 }
 0xb36   :  { %3073 = vmatpush1.bf16.msra.mxu1 %v7783_v23  ;;  %3114 = vmatpush1.bf16.msra.mxu0 %v7784_v35 }
 0xb37   :  { %3074 = vmatprep.subr.bf16.mxu1 %v7785_v5  ;;  %3115 = vmatprep.subr.bf16.mxu0 %v7786_v28 }
 0xb3a   :  { %3075 = vmatpush1.bf16.msra.mxu1 %v6461_v49  ;;  %3116 = vmatpush1.bf16.msra.mxu0 %v6464_v63 }
 0xb3b   :  { %3076 = vmatprep.subr.bf16.mxu1 %v6467_v14  ;;  %3117 = vmatprep.subr.bf16.mxu0 %v6470_v42 }
 0xb3e   :  { %3077 = vmatpush1.bf16.msra.mxu1 %v6473_v16  ;;  %3118 = vmatpush1.bf16.msra.mxu0 %v6476_v27 }
 0xb41   :  { %3079 = vmatmul.mubr.bf16.vlgmr.msra.gmra.mrb[92].mxu1 %v6563_v4  ;;  %3120 = vmatmul.mubr.bf16.vlgmr.msra.gmra.mrb[100].mxu0 %v6563_v4 }
 0xbd4   :  { %v2998_v19 = vpop.f32.mrb[88].mxu1  ;;  %v3039_v2 = vpop.f32.mrb[96].mxu0 }
 0xbd5   :  { %v3000_v8 = vpop.f32.mrb[89].mxu1  ;;  %v3041_v9 = vpop.f32.mrb[97].mxu0  ;;  %v3130_v14 = vadd.f32 %v3039_v2, %v7787_v12  ;;  %v3128_v16 = vadd.f32 %v2998_v19, %v7789_v52 }
 0xbd6   :  { %v3002_v38 = vpop.f32.mrb[90].mxu1  ;;  %v3043_v49 = vpop.f32.mrb[98].mxu0  ;;  %v3131_v42 = vadd.f32 %v3041_v9, %v7788_v41  ;;  %v3129_v27 = vadd.f32 %v3000_v8, %v7790_v58 }
 0xbd7   :  { %v3003_v62 = vpop.f32.mrb[91].mxu1  ;;  %v3044_v63 = vpop.f32.mrb[99].mxu0  ;;  %v3144_v31 = vmul.f32 0.5, %v3130_v14  ;;  %v3136_v18 = vmul.f32 0.5, %v3128_v16 }
 0xbd8   :  { %v3145_v50 = vmul.f32 0.5, %v3131_v42  ;;  %v3137_v51 = vmul.f32 0.5, %v3129_v27  ;;  %v7795_v62 = vld [vmem:[#allocation26_spill] sm:$0xff] }
 0xbd9   :  { %3688 = vtanh.f32 %v3144_v31  ;;  %3479 = vmatprep.subr.bf16.mxu1 %v7795_v62 }
 0xbda   :  { %3690 = vtanh.f32 %v3145_v50 }
 0xbdb   :  { %3692 = vtanh.f32 %v3136_v18 }
 0xbdc   :  { %3694 = vtanh.f32 %v3137_v51 }
 0xbe3   :  { %v3689_v39 = vpop.eup %3688 }
 0xbe4   :  { %v3691_v40 = vpop.eup %3690  ;;  %v3148_v60 = vmul.f32 0.5, %v3689_v39 }
 0xbe5   :  { %v3693_v6 = vpop.eup %3692  ;;  %v3149_v48 = vmul.f32 0.5, %v3691_v40 }
 0xbe6   :  { %v3695_v44 = vpop.eup %3694  ;;  %v3140_v43 = vmul.f32 0.5, %v3693_v6  ;;  %v3150_v46 = vadd.f32 0.5, %v3148_v60 }
 0xbe7   :  { %v3141_v56 = vmul.f32 0.5, %v3695_v44  ;;  %v3151_v57 = vadd.f32 0.5, %v3149_v48 }
 0xbe8   :  { %v3142_v36 = vadd.f32 0.5, %v3140_v43  ;;  %v3162_v24 = vmul.f32 %v3150_v46, %v6557_v47 }
 0xbe9   :  { %v3143_v61 = vadd.f32 0.5, %v3141_v56  ;;  %v3163_v1 = vmul.f32 %v3151_v57, %v6559_v55 }
 0xc14   :  { %v3080_v54 = vpop.f32.mrb[92].mxu1  ;;  %v3121_v4 = vpop.f32.mrb[100].mxu0 }
 0xc15   :  { %v3132_v22 = vadd.f32 %v3080_v54, %v7791_v59  ;;  %v3082_v53 = vpop.f32.mrb[93].mxu1  ;;  %v3123_v25 = vpop.f32.mrb[101].mxu0  ;;  %v3134_v45 = vadd.f32 %v3121_v4, %v7792_v17 }
 0xc16   :  { %v3133_v13 = vadd.f32 %v3082_v53, %v7793_v0  ;;  %v3084_v21 = vpop.f32.mrb[94].mxu1  ;;  %v3125_v33 = vpop.f32.mrb[102].mxu0  ;;  %v3135_v3 = vadd.f32 %v3123_v25, %v7794_v30 }
 0xc17   :  { %3696 = vtanh.f32 %v3132_v22  ;;  %v3085_v11 = vpop.f32.mrb[95].mxu1  ;;  %v3126_v37 = vpop.f32.mrb[103].mxu0  ;;  %v3154_v29 = vmul.f32 0.5, %v3134_v45 }
 0xc18   :  { %3698 = vtanh.f32 %v3133_v13  ;;  %v3155_v7 = vmul.f32 0.5, %v3135_v3 }
 0xc19   :  { %3700 = vtanh.f32 %v3154_v29 }
 0xc1a   :  { %3702 = vtanh.f32 %v3155_v7 }
 0xc21   :  { %v3697_v26 = vpop.eup %3696 }
 0xc22   :  { %v3699_v32 = vpop.eup %3698  ;;  %v3164_v10 = vmul.f32 %v3697_v26, %v3142_v36 }
 0xc23   :  { %v3165_v15 = vmul.f32 %v3699_v32, %v3143_v61  ;;  %v3701_v23 = vpop.eup %3700 }
 0xc24   :  { %v3166_v34 = vadd.f32 %v3164_v10, %v3162_v24  ;;  %v3703_v35 = vpop.eup %3702  ;;  %v3158_v5 = vmul.f32 0.5, %v3701_v23 }
 0xc25   :  { %v3167_v20 = vadd.f32 %v3165_v15, %v3163_v1  ;;  %v3159_v28 = vmul.f32 0.5, %v3703_v35 }
 0xc26   :  { %3704 = vtanh.f32 %v3166_v34  ;;  %v3160_v19 = vadd.f32 0.5, %v3158_v5 }
 0xc27   :  { %3706 = vtanh.f32 %v3167_v20  ;;  %v3161_v8 = vadd.f32 0.5, %v3159_v28 }
 0xc30   :  { %v3705_v2 = vpop.eup %3704 }
 0xc31   :  { %v3707_v9 = vpop.eup %3706  ;;  %v3170_v38 = vmul.f32 %v3705_v2, %v3160_v19 }
 0xc32   :  { %v3171_v49 = vmul.f32 %v3707_v9, %v3161_v8 }
 0xc34   :  { %v3176_v47 = vpack.c.bf16 %v3171_v49, %v3171_v49 }
 0xc35   :  { %4004 = dma.done.wait [#allocation6 + $0x1], 2048 }
 0xc36   :  { %4005 = vsyncadd [#allocation6 + $0x1], 4294965248  ;;  %v7796_v55 = vld [vmem:[#allocation18_spill] sm:$0xff]  ;;  %3241 = vst [vmem:[%s6685_s10] sm:$0xff] %v3170_v38  ;;  %v7797_v63 = vld [vmem:[#allocation27_spill] sm:$0xff]  ;;  %3232 = vmatprep.mubr.bf16.mxu1 %v3176_v47  ;;  %v3175_v54 = vpack.c.bf16 %v3170_v38, %v3170_v38 }
 0xc37   :  { %3480 = vmatpush3.bf16.msra.mxu1 %v7796_v55  ;;  %3242 = vst [vmem:[%s6685_s10 + $0x8] sm:$0xff] %v3171_v49  ;;  %3243 = vst [vmem:[%s6686_s11] sm:$0xff] %v3166_v34  ;;  %v7798_v12 = vld [vmem:[#allocation19_spill] sm:$0xff]  ;;  %v7799_v14 = vld [vmem:[#allocation28_spill] sm:$0xff] }
 0xc38   :  { %3244 = vst [vmem:[%s6686_s11 + $0x8] sm:$0xff] %v3167_v20  ;;  %3481 = vmatprep.subr.bf16.mxu1 %v7797_v63  ;;  %v7800_v41 = vld [vmem:[#allocation20_spill] sm:$0xff]  ;;  %v7801_v42 = vld [vmem:[#allocation29_spill] sm:$0xff]  ;;  %v7803_v16 = vld [vmem:[#allocation30_spill] sm:$0xff] }
 0xc39   :  { %v7802_v52 = vld [vmem:[#allocation21_spill] sm:$0xff]  ;;  %v7804_v58 = vld [vmem:[#allocation22_spill] sm:$0xff]  ;;  %v7805_v27 = vld [vmem:[#allocation31_spill] sm:$0xff] }
 0xc3a   :  { %v7806_v31 = vld [vmem:[#allocation23_spill] sm:$0xff]  ;;  %v7807_v50 = vld [vmem:[#allocation32_spill] sm:$0xff]  ;;  %v7809_v51 = vld [vmem:[#allocation33_spill] sm:$0xff] }
 0xc3b   :  { %3482 = vmatpush3.bf16.msra.mxu1 %v7798_v12  ;;  %v7808_v18 = vld [vmem:[#allocation24_spill] sm:$0xff]  ;;  %v7810_v4 = vld [vmem:[#allocation25_spill] sm:$0xff]  ;;  %v3464_v22 = vld [vmem:[%s6681_s6] ss:$0 sm:$0xff] }
 0xc3c   :  { %3483 = vmatprep.subr.bf16.mxu1 %v7799_v14 }
 0xc3f   :  { %3484 = vmatpush3.bf16.msra.mxu1 %v7800_v41 }
 0xc40   :  { %3485 = vmatprep.subr.bf16.mxu1 %v7801_v42 }
 0xc43   :  { %3486 = vmatpush3.bf16.msra.mxu1 %v7802_v52 }
 0xc44   :  { %3487 = vmatprep.subr.bf16.mxu1 %v7803_v16 }
 0xc47   :  { %3488 = vmatpush3.bf16.msra.mxu1 %v7804_v58 }
 0xc48   :  { %3489 = vmatprep.subr.bf16.mxu1 %v7805_v27 }
 0xc4b   :  { %3490 = vmatpush3.bf16.msra.mxu1 %v7806_v31 }
 0xc4c   :  { %3491 = vmatprep.subr.bf16.mxu1 %v7807_v50 }
 0xc4f   :  { %3492 = vmatpush3.bf16.msra.mxu1 %v7808_v18 }
 0xc50   :  { %3493 = vmatprep.subr.bf16.mxu1 %v7809_v51 }
 0xc53   :  { %3494 = vmatpush3.bf16.msra.mxu1 %v7810_v4 }
 0xc56   :  { %3233 = vmatmul.mubr.bf16.vlgmr.msra.gmra.mrb[96].mxu1 %v3175_v54 }
 0xd29   :  { %v3495_v59 = vpop.f32.mrb[96].mxu1 }
 0xd2a   :  { %v3496_v53 = vpop.f32.mrb[97].mxu1 }
 0xd2b   :  { %v3497_v25 = vadd.f32 %v3496_v53, %v3495_v59  ;;  %v3498_v17 = vpop.f32.mrb[98].mxu1 }
 0xd2c   :  { %v3499_v45 = vpop.f32.mrb[99].mxu1 }
 0xd2d   :  { %v3235_v0 = vadd.f32 %v3497_v25, %v3464_v22 }
 0xd2f   :  { %3240 = vst [vmem:[%s6684_s9] sm:$0xff] %v3235_v0 }
 0xd30   :  { %3257 = vsyncpa [#allocation10], 1 }
 0xd31   :  { %3258 = vsyncmov [#allocation6] }
 0xd34   :  { %s3259_s15 = vpop.sfrf %3258 }
 0xd35   :  { %p3465_p13 = scmp.ne.s32.totalorder %s3259_s15, 0 }
 0xd37   :  { %3263 = shalt.err (%p3465_p13)  }
 0xd38   :  { %3265 = vsyncmov [#allocation6 + $0x1] }
 0xd3b   :  { %s3266_s1 = vpop.sfrf %3265 }
 0xd3c   :  { %p3466_p0 = scmp.ne.s32.totalorder %s3266_s1, 0 }
 0xd3e   :  { %3270 = shalt.err (%p3466_p0)  }

</bundles_post_ra>
